<compile_context>
chip_gen: v7x
topology: tpu7x:2x2x1
jax: 0.10.0
libtpu: 0.0.40
codegen_flags: <defaults>
</compile_context>

<pallas_src>
import jax
import jax.numpy as jnp
from jax import lax
from jax.experimental import pallas as pl
from jax.experimental.pallas import tpu as pltpu

KH, KW = 5, 5
PAD = 2


def _make_kernel(H, W, C, HB, WROW):
    """Builds the kernel for one H-half grid step.

    x_ref : (H, W, C)              full input activations (pre-ReLU), fetched once
    w_ref : (KH, KW, C)            depthwise weights
    o_ref : (HB, W, C)             output rows of this grid step
    xp_ref: (HB + 2*PAD, WROW, C)  f32 scratch: ReLU'd rows + zero halo rows;
                                   cols [W, WROW) are zero so sublane rolls wrap
                                   into zeros (no boundary masking needed)
    wb_ref: (KH*KW, WROW, C)       f32 scratch: per-tap weights broadcast along W
    """
    NPR = HB + 2 * PAD      # padded rows held per grid step
    NCOPY = HB + PAD        # real input rows copied per grid step (one-sided halo)

    def kernel(x_ref, w_ref, o_ref, xp_ref, wb_ref):
        f32 = jnp.float32
        step = pl.program_id(0)

        # ---- prologue (once per grid step) --------------------------------
        # Zero ONLY the out-of-image halo rows; real rows are rewritten every
        # step including their zero pad columns (xp persists across steps).
        zero_halo = jnp.zeros((PAD, WROW, C), f32)
        zero_cols = jnp.zeros((NCOPY, WROW - W, C), f32)

        @pl.when(step == 0)                       # top half: halo above row 0
        def _():
            xp_ref[0:PAD] = zero_halo
            rows = jnp.maximum(x_ref[0:NCOPY, :, :], 0.0).astype(f32)
            xp_ref[PAD:PAD + NCOPY, 0:W, :] = rows
            xp_ref[PAD:PAD + NCOPY, W:WROW, :] = zero_cols

        @pl.when(step != 0)                       # bottom half: halo below row H-1
        def _():
            xp_ref[NCOPY:NPR] = zero_halo
            rows = jnp.maximum(x_ref[H - NCOPY:H, :, :], 0.0).astype(f32)
            xp_ref[0:NCOPY, 0:W, :] = rows
            xp_ref[0:NCOPY, W:WROW, :] = zero_cols

        # Per-tap weights broadcast across the W (sublane) axis, hoisted out of
        # the row loop.  Filled every step (safe under megacore partitioning).
        # TODO(synk): replace with stride-0 sublane-broadcast loads
        # (w_ref[pl.ds(t, WROW, stride=0), :]) to drop wb_ref entirely once the
        # installed JAX supports stride=0 slices.
        w32 = w_ref[...].astype(f32)              # (KH, KW, C)
        for dh in range(KH):
            for dw in range(KW):
                wb_ref[dh * KW + dw] = jnp.broadcast_to(w32[dh, dw, :], (WROW, C))

        # ---- loop-interchanged accumulation --------------------------------
        # Iterate padded INPUT rows; each row is rolled once per horizontal tap
        # and accumulated into the <=KH live output-row register accumulators
        # it feeds.  Rolled wrap-around lands in the zero columns [W, WROW).
        accs = {}
        for r in range(NPR):
            xr = xp_ref[r]                        # (WROW, C) f32
            for dw in range(KW):
                s = dw - PAD                      # horizontal tap offset
                sh = xr if s == 0 else pltpu.roll(xr, shift=(-s) % WROW, axis=0)
                for dh in range(KH):
                    h_out = r - dh
                    if 0 <= h_out < HB:
                        contrib = sh * wb_ref[dh * KW + dw]
                        if h_out in accs:
                            accs[h_out] = accs[h_out] + contrib
                        else:                     # init from first tap (no zeros+add)
                            accs[h_out] = contrib
            h_done = r - (KH - 1)
            if 0 <= h_done < HB:                  # output row complete -> store & free
                o_ref[h_done] = accs.pop(h_done)[0:W, :].astype(o_ref.dtype)

    return kernel


def relu_depthwise_conv2d(x_nchw, weight_oihw):
    """x: (1, C, H, W) f32, weight: (C, 1, 5, 5) f32  ->  (1, C, H, W) f32."""
    N, C, H, W = x_nchw.shape
    assert N == 1 and weight_oihw.shape == (C, 1, KH, KW)
    assert C % 128 == 0, "lane-dense channel layout expects C % 128 == 0"
    assert H % 2 == 0, "2-way row split expects even H"

    # TODO(synk): in a multi-layer network keep activations channels-last (HWC)
    # across layers so these NCHW<->HWC layout ops drop out of the hot path.
    x_hwc = jnp.transpose(x_nchw[0], (1, 2, 0))             # (H, W, C)
    w_hwc = jnp.transpose(weight_oihw[:, 0], (1, 2, 0))     # (KH, KW, C)

    HB = H // 2                                             # output rows per grid step
    WROW = ((W + PAD + 7) // 8) * 8                         # 16 for W=14 (sublane-aligned)

    out_hwc = pl.pallas_call(
        _make_kernel(H, W, C, HB, WROW),
        out_shape=jax.ShapeDtypeStruct((H, W, C), x_nchw.dtype),
        grid=(2,),
        in_specs=[
            pl.BlockSpec((H, W, C), lambda i: (0, 0, 0)),       # full input, fetched once
            pl.BlockSpec((KH, KW, C), lambda i: (0, 0, 0)),     # full weights
        ],
        out_specs=pl.BlockSpec((HB, W, C), lambda i: (i, 0, 0)),
        scratch_shapes=[
            pltpu.VMEM((HB + 2 * PAD, WROW, C), jnp.float32),   # padded, ReLU'd rows
            pltpu.VMEM((KH * KW, WROW, C), jnp.float32),        # broadcast weights
        ],
        compiler_params=pltpu.CompilerParams(
            dimension_semantics=("parallel",)),
    )(x_hwc, w_hwc)

    return jnp.transpose(out_hwc, (2, 0, 1))[None]           # HWC -> NCHW


def reference(x_nchw, weight_oihw):
    C = x_nchw.shape[1]
    xr = jnp.maximum(x_nchw, 0.0)
    return lax.conv_general_dilated(
        xr, weight_oihw,
        window_strides=(1, 1),
        padding=((PAD, PAD), (PAD, PAD)),
        dimension_numbers=("NCHW", "OIHW", "NCHW"),
        feature_group_count=C,
    )


if __name__ == "__main__":
    key = jax.random.PRNGKey(0)
    kx, kw = jax.random.split(key)

    # Shape implied by the module's forward: (1, 384, 14, 14)
    N, C, H, W = 1, 384, 14, 14
    x = jax.random.normal(kx, (N, C, H, W), dtype=jnp.float32)
    # Depthwise weights, PyTorch Conv2d(groups=C) layout (C, 1, 5, 5)
    weight = jax.random.normal(kw, (C, 1, KH, KW), dtype=jnp.float32) * 0.1

    fwd = jax.jit(relu_depthwise_conv2d)
    out = jax.block_until_ready(fwd(x, weight))

    ref = jax.block_until_ready(reference(x, weight))
    assert out.shape == (N, C, H, W), out.shape
    assert jnp.allclose(out, ref, atol=1e-4, rtol=1e-4), float(jnp.max(jnp.abs(out - ref)))

    print("KERNEL_OK")
</pallas_src>

<mosaic_0001>
module attributes {stable_mosaic.version = 11 : i64} {
  func.func @kernel(%arg0: i32, %arg1: memref<14x14x384xf32, #tpu.memory_space<vmem>>, %arg2: memref<5x5x384xf32, #tpu.memory_space<vmem>>, %arg3: memref<7x14x384xf32, #tpu.memory_space<vmem>>, %arg4: memref<11x16x384xf32, #tpu.memory_space<vmem>>, %arg5: memref<25x16x384xf32, #tpu.memory_space<vmem>>) attributes {dimension_semantics = [#tpu.dimension_semantics<parallel>], iteration_bounds = array<i64: 2>, scalar_prefetch = 0 : i64, scratch_operands = 2 : i64, tpu.core_type = #tpu.core_type<tc>, window_params = [{pipeline_mode = #tpu.pipeline_mode<synchronous>, transform_indices = @transform_0, window_bounds = array<i64: 14, 14, 384>}, {pipeline_mode = #tpu.pipeline_mode<synchronous>, transform_indices = @transform_1, window_bounds = array<i64: 5, 5, 384>}, {transform_indices = @transform_2, window_bounds = array<i64: 7, 14, 384>}]} {
    %cst = arith.constant 0.000000e+00 : f32
    %0 = vector.broadcast %cst : f32 to vector<2x16x384xf32>
    %cst_0 = arith.constant 0.000000e+00 : f32
    %1 = vector.broadcast %cst_0 : f32 to vector<9x2x384xf32>
    %c0_i32 = arith.constant 0 : i32
    %2 = arith.cmpi eq, %arg0, %c0_i32 : i32
    %3 = arith.extui %2 : i1 to i32
    %c0_i32_1 = arith.constant 0 : i32
    %4 = arith.cmpi ne, %3, %c0_i32_1 : i32
    scf.if %4 {
      %c0_676 = arith.constant 0 : index
      %c0_677 = arith.constant 0 : index
      %c0_678 = arith.constant 0 : index
      %971 = vector.load %arg4[%c0_676, %c0_677, %c0_678] : memref<11x16x384xf32, #tpu.memory_space<vmem>>, vector<2x16x384xf32>
      tpu.vector_store %arg4[%c0_676, %c0_677, %c0_678], %0 {strides = array<i32>} : memref<11x16x384xf32, #tpu.memory_space<vmem>>, vector<2x16x384xf32>,
      %c0_679 = arith.constant 0 : index
      %c0_680 = arith.constant 0 : index
      %c0_681 = arith.constant 0 : index
      %972 = vector.load %arg1[%c0_679, %c0_680, %c0_681] : memref<14x14x384xf32, #tpu.memory_space<vmem>>, vector<9x14x384xf32>
      %cst_682 = arith.constant 0.000000e+00 : f32
      %973 = vector.broadcast %cst_682 : f32 to vector<9x14x384xf32>
      %974 = arith.maximumf %972, %973 : vector<9x14x384xf32>
      %c2_683 = arith.constant 2 : index
      %c0_684 = arith.constant 0 : index
      %c0_685 = arith.constant 0 : index
      %975 = vector.load %arg4[%c2_683, %c0_684, %c0_685] : memref<11x16x384xf32, #tpu.memory_space<vmem>>, vector<9x14x384xf32>
      tpu.vector_store %arg4[%c2_683, %c0_684, %c0_685], %974 {strides = array<i32>} : memref<11x16x384xf32, #tpu.memory_space<vmem>>, vector<9x14x384xf32>,
      %c2_686 = arith.constant 2 : index
      %c14_687 = arith.constant 14 : index
      %c0_688 = arith.constant 0 : index
      %976 = vector.load %arg4[%c2_686, %c14_687, %c0_688] : memref<11x16x384xf32, #tpu.memory_space<vmem>>, vector<9x2x384xf32>
      tpu.vector_store %arg4[%c2_686, %c14_687, %c0_688], %1 {strides = array<i32>} : memref<11x16x384xf32, #tpu.memory_space<vmem>>, vector<9x2x384xf32>,
    } else {
    }
    %c0_i32_2 = arith.constant 0 : i32
    %5 = arith.cmpi ne, %arg0, %c0_i32_2 : i32
    %6 = arith.extui %5 : i1 to i32
    %c0_i32_3 = arith.constant 0 : i32
    %7 = arith.cmpi ne, %6, %c0_i32_3 : i32
    scf.if %7 {
      %c9_676 = arith.constant 9 : index
      %c0_677 = arith.constant 0 : index
      %c0_678 = arith.constant 0 : index
      %971 = vector.load %arg4[%c9_676, %c0_677, %c0_678] : memref<11x16x384xf32, #tpu.memory_space<vmem>>, vector<2x16x384xf32>
      tpu.vector_store %arg4[%c9_676, %c0_677, %c0_678], %0 {strides = array<i32>} : memref<11x16x384xf32, #tpu.memory_space<vmem>>, vector<2x16x384xf32>,
      %c5_679 = arith.constant 5 : index
      %c0_680 = arith.constant 0 : index
      %c0_681 = arith.constant 0 : index
      %972 = vector.load %arg1[%c5_679, %c0_680, %c0_681] : memref<14x14x384xf32, #tpu.memory_space<vmem>>, vector<9x14x384xf32>
      %cst_682 = arith.constant 0.000000e+00 : f32
      %973 = vector.broadcast %cst_682 : f32 to vector<9x14x384xf32>
      %974 = arith.maximumf %972, %973 : vector<9x14x384xf32>
      %c0_683 = arith.constant 0 : index
      %c0_684 = arith.constant 0 : index
      %c0_685 = arith.constant 0 : index
      %975 = vector.load %arg4[%c0_683, %c0_684, %c0_685] : memref<11x16x384xf32, #tpu.memory_space<vmem>>, vector<9x14x384xf32>
      tpu.vector_store %arg4[%c0_683, %c0_684, %c0_685], %974 {strides = array<i32>} : memref<11x16x384xf32, #tpu.memory_space<vmem>>, vector<9x14x384xf32>,
      %c0_686 = arith.constant 0 : index
      %c14_687 = arith.constant 14 : index
      %c0_688 = arith.constant 0 : index
      %976 = vector.load %arg4[%c0_686, %c14_687, %c0_688] : memref<11x16x384xf32, #tpu.memory_space<vmem>>, vector<9x2x384xf32>
      tpu.vector_store %arg4[%c0_686, %c14_687, %c0_688], %1 {strides = array<i32>} : memref<11x16x384xf32, #tpu.memory_space<vmem>>, vector<9x2x384xf32>,
    } else {
    }
    %c0 = arith.constant 0 : index
    %c0_4 = arith.constant 0 : index
    %c0_5 = arith.constant 0 : index
    %8 = vector.load %arg2[%c0, %c0_4, %c0_5] : memref<5x5x384xf32, #tpu.memory_space<vmem>>, vector<5x5x384xf32>
    %9 = vector.extract_strided_slice %8 {offsets = [0, 0, 0], sizes = [1, 1, 384], strides = [1, 1, 1]} : vector<5x5x384xf32> to vector<1x1x384xf32>
    %10 = vector.shape_cast %9 : vector<1x1x384xf32> to vector<384xf32>
    %11 = vector.shape_cast %10 : vector<384xf32> to vector<1x384xf32>
    %12 = vector.broadcast %11 : vector<1x384xf32> to vector<16x384xf32>
    %c0_6 = arith.constant 0 : index
    %c0_7 = arith.constant 0 : index
    %c0_8 = arith.constant 0 : index
    %13 = vector.load %arg5[%c0_6, %c0_7, %c0_8] : memref<25x16x384xf32, #tpu.memory_space<vmem>>, vector<1x16x384xf32>
    %14 = vector.shape_cast %13 : vector<1x16x384xf32> to vector<16x384xf32>
    %15 = vector.shape_cast %12 : vector<16x384xf32> to vector<1x16x384xf32>
    tpu.vector_store %arg5[%c0_6, %c0_7, %c0_8], %15 {strides = array<i32>} : memref<25x16x384xf32, #tpu.memory_space<vmem>>, vector<1x16x384xf32>,
    %16 = vector.extract_strided_slice %8 {offsets = [0, 1, 0], sizes = [1, 1, 384], strides = [1, 1, 1]} : vector<5x5x384xf32> to vector<1x1x384xf32>
    %17 = vector.shape_cast %16 : vector<1x1x384xf32> to vector<384xf32>
    %18 = vector.shape_cast %17 : vector<384xf32> to vector<1x384xf32>
    %19 = vector.broadcast %18 : vector<1x384xf32> to vector<16x384xf32>
    %c1 = arith.constant 1 : index
    %c0_9 = arith.constant 0 : index
    %c0_10 = arith.constant 0 : index
    %20 = vector.load %arg5[%c1, %c0_9, %c0_10] : memref<25x16x384xf32, #tpu.memory_space<vmem>>, vector<1x16x384xf32>
    %21 = vector.shape_cast %20 : vector<1x16x384xf32> to vector<16x384xf32>
    %22 = vector.shape_cast %19 : vector<16x384xf32> to vector<1x16x384xf32>
    tpu.vector_store %arg5[%c1, %c0_9, %c0_10], %22 {strides = array<i32>} : memref<25x16x384xf32, #tpu.memory_space<vmem>>, vector<1x16x384xf32>,
    %23 = vector.extract_strided_slice %8 {offsets = [0, 2, 0], sizes = [1, 1, 384], strides = [1, 1, 1]} : vector<5x5x384xf32> to vector<1x1x384xf32>
    %24 = vector.shape_cast %23 : vector<1x1x384xf32> to vector<384xf32>
    %25 = vector.shape_cast %24 : vector<384xf32> to vector<1x384xf32>
    %26 = vector.broadcast %25 : vector<1x384xf32> to vector<16x384xf32>
    %c2 = arith.constant 2 : index
    %c0_11 = arith.constant 0 : index
    %c0_12 = arith.constant 0 : index
    %27 = vector.load %arg5[%c2, %c0_11, %c0_12] : memref<25x16x384xf32, #tpu.memory_space<vmem>>, vector<1x16x384xf32>
    %28 = vector.shape_cast %27 : vector<1x16x384xf32> to vector<16x384xf32>
    %29 = vector.shape_cast %26 : vector<16x384xf32> to vector<1x16x384xf32>
    tpu.vector_store %arg5[%c2, %c0_11, %c0_12], %29 {strides = array<i32>} : memref<25x16x384xf32, #tpu.memory_space<vmem>>, vector<1x16x384xf32>,
    %30 = vector.extract_strided_slice %8 {offsets = [0, 3, 0], sizes = [1, 1, 384], strides = [1, 1, 1]} : vector<5x5x384xf32> to vector<1x1x384xf32>
    %31 = vector.shape_cast %30 : vector<1x1x384xf32> to vector<384xf32>
    %32 = vector.shape_cast %31 : vector<384xf32> to vector<1x384xf32>
    %33 = vector.broadcast %32 : vector<1x384xf32> to vector<16x384xf32>
    %c3 = arith.constant 3 : index
    %c0_13 = arith.constant 0 : index
    %c0_14 = arith.constant 0 : index
    %34 = vector.load %arg5[%c3, %c0_13, %c0_14] : memref<25x16x384xf32, #tpu.memory_space<vmem>>, vector<1x16x384xf32>
    %35 = vector.shape_cast %34 : vector<1x16x384xf32> to vector<16x384xf32>
    %36 = vector.shape_cast %33 : vector<16x384xf32> to vector<1x16x384xf32>
    tpu.vector_store %arg5[%c3, %c0_13, %c0_14], %36 {strides = array<i32>} : memref<25x16x384xf32, #tpu.memory_space<vmem>>, vector<1x16x384xf32>,
    %37 = vector.extract_strided_slice %8 {offsets = [0, 4, 0], sizes = [1, 1, 384], strides = [1, 1, 1]} : vector<5x5x384xf32> to vector<1x1x384xf32>
    %38 = vector.shape_cast %37 : vector<1x1x384xf32> to vector<384xf32>
    %39 = vector.shape_cast %38 : vector<384xf32> to vector<1x384xf32>
    %40 = vector.broadcast %39 : vector<1x384xf32> to vector<16x384xf32>
    %c4 = arith.constant 4 : index
    %c0_15 = arith.constant 0 : index
    %c0_16 = arith.constant 0 : index
    %41 = vector.load %arg5[%c4, %c0_15, %c0_16] : memref<25x16x384xf32, #tpu.memory_space<vmem>>, vector<1x16x384xf32>
    %42 = vector.shape_cast %41 : vector<1x16x384xf32> to vector<16x384xf32>
    %43 = vector.shape_cast %40 : vector<16x384xf32> to vector<1x16x384xf32>
    tpu.vector_store %arg5[%c4, %c0_15, %c0_16], %43 {strides = array<i32>} : memref<25x16x384xf32, #tpu.memory_space<vmem>>, vector<1x16x384xf32>,
    %44 = vector.extract_strided_slice %8 {offsets = [1, 0, 0], sizes = [1, 1, 384], strides = [1, 1, 1]} : vector<5x5x384xf32> to vector<1x1x384xf32>
    %45 = vector.shape_cast %44 : vector<1x1x384xf32> to vector<384xf32>
    %46 = vector.shape_cast %45 : vector<384xf32> to vector<1x384xf32>
    %47 = vector.broadcast %46 : vector<1x384xf32> to vector<16x384xf32>
    %c5 = arith.constant 5 : index
    %c0_17 = arith.constant 0 : index
    %c0_18 = arith.constant 0 : index
    %48 = vector.load %arg5[%c5, %c0_17, %c0_18] : memref<25x16x384xf32, #tpu.memory_space<vmem>>, vector<1x16x384xf32>
    %49 = vector.shape_cast %48 : vector<1x16x384xf32> to vector<16x384xf32>
    %50 = vector.shape_cast %47 : vector<16x384xf32> to vector<1x16x384xf32>
    tpu.vector_store %arg5[%c5, %c0_17, %c0_18], %50 {strides = array<i32>} : memref<25x16x384xf32, #tpu.memory_space<vmem>>, vector<1x16x384xf32>,
    %51 = vector.extract_strided_slice %8 {offsets = [1, 1, 0], sizes = [1, 1, 384], strides = [1, 1, 1]} : vector<5x5x384xf32> to vector<1x1x384xf32>
    %52 = vector.shape_cast %51 : vector<1x1x384xf32> to vector<384xf32>
    %53 = vector.shape_cast %52 : vector<384xf32> to vector<1x384xf32>
    %54 = vector.broadcast %53 : vector<1x384xf32> to vector<16x384xf32>
    %c6 = arith.constant 6 : index
    %c0_19 = arith.constant 0 : index
    %c0_20 = arith.constant 0 : index
    %55 = vector.load %arg5[%c6, %c0_19, %c0_20] : memref<25x16x384xf32, #tpu.memory_space<vmem>>, vector<1x16x384xf32>
    %56 = vector.shape_cast %55 : vector<1x16x384xf32> to vector<16x384xf32>
    %57 = vector.shape_cast %54 : vector<16x384xf32> to vector<1x16x384xf32>
    tpu.vector_store %arg5[%c6, %c0_19, %c0_20], %57 {strides = array<i32>} : memref<25x16x384xf32, #tpu.memory_space<vmem>>, vector<1x16x384xf32>,
    %58 = vector.extract_strided_slice %8 {offsets = [1, 2, 0], sizes = [1, 1, 384], strides = [1, 1, 1]} : vector<5x5x384xf32> to vector<1x1x384xf32>
    %59 = vector.shape_cast %58 : vector<1x1x384xf32> to vector<384xf32>
    %60 = vector.shape_cast %59 : vector<384xf32> to vector<1x384xf32>
    %61 = vector.broadcast %60 : vector<1x384xf32> to vector<16x384xf32>
    %c7 = arith.constant 7 : index
    %c0_21 = arith.constant 0 : index
    %c0_22 = arith.constant 0 : index
    %62 = vector.load %arg5[%c7, %c0_21, %c0_22] : memref<25x16x384xf32, #tpu.memory_space<vmem>>, vector<1x16x384xf32>
    %63 = vector.shape_cast %62 : vector<1x16x384xf32> to vector<16x384xf32>
    %64 = vector.shape_cast %61 : vector<16x384xf32> to vector<1x16x384xf32>
    tpu.vector_store %arg5[%c7, %c0_21, %c0_22], %64 {strides = array<i32>} : memref<25x16x384xf32, #tpu.memory_space<vmem>>, vector<1x16x384xf32>,
    %65 = vector.extract_strided_slice %8 {offsets = [1, 3, 0], sizes = [1, 1, 384], strides = [1, 1, 1]} : vector<5x5x384xf32> to vector<1x1x384xf32>
    %66 = vector.shape_cast %65 : vector<1x1x384xf32> to vector<384xf32>
    %67 = vector.shape_cast %66 : vector<384xf32> to vector<1x384xf32>
    %68 = vector.broadcast %67 : vector<1x384xf32> to vector<16x384xf32>
    %c8 = arith.constant 8 : index
    %c0_23 = arith.constant 0 : index
    %c0_24 = arith.constant 0 : index
    %69 = vector.load %arg5[%c8, %c0_23, %c0_24] : memref<25x16x384xf32, #tpu.memory_space<vmem>>, vector<1x16x384xf32>
    %70 = vector.shape_cast %69 : vector<1x16x384xf32> to vector<16x384xf32>
    %71 = vector.shape_cast %68 : vector<16x384xf32> to vector<1x16x384xf32>
    tpu.vector_store %arg5[%c8, %c0_23, %c0_24], %71 {strides = array<i32>} : memref<25x16x384xf32, #tpu.memory_space<vmem>>, vector<1x16x384xf32>,
    %72 = vector.extract_strided_slice %8 {offsets = [1, 4, 0], sizes = [1, 1, 384], strides = [1, 1, 1]} : vector<5x5x384xf32> to vector<1x1x384xf32>
    %73 = vector.shape_cast %72 : vector<1x1x384xf32> to vector<384xf32>
    %74 = vector.shape_cast %73 : vector<384xf32> to vector<1x384xf32>
    %75 = vector.broadcast %74 : vector<1x384xf32> to vector<16x384xf32>
    %c9 = arith.constant 9 : index
    %c0_25 = arith.constant 0 : index
    %c0_26 = arith.constant 0 : index
    %76 = vector.load %arg5[%c9, %c0_25, %c0_26] : memref<25x16x384xf32, #tpu.memory_space<vmem>>, vector<1x16x384xf32>
    %77 = vector.shape_cast %76 : vector<1x16x384xf32> to vector<16x384xf32>
    %78 = vector.shape_cast %75 : vector<16x384xf32> to vector<1x16x384xf32>
    tpu.vector_store %arg5[%c9, %c0_25, %c0_26], %78 {strides = array<i32>} : memref<25x16x384xf32, #tpu.memory_space<vmem>>, vector<1x16x384xf32>,
    %79 = vector.extract_strided_slice %8 {offsets = [2, 0, 0], sizes = [1, 1, 384], strides = [1, 1, 1]} : vector<5x5x384xf32> to vector<1x1x384xf32>
    %80 = vector.shape_cast %79 : vector<1x1x384xf32> to vector<384xf32>
    %81 = vector.shape_cast %80 : vector<384xf32> to vector<1x384xf32>
    %82 = vector.broadcast %81 : vector<1x384xf32> to vector<16x384xf32>
    %c10 = arith.constant 10 : index
    %c0_27 = arith.constant 0 : index
    %c0_28 = arith.constant 0 : index
    %83 = vector.load %arg5[%c10, %c0_27, %c0_28] : memref<25x16x384xf32, #tpu.memory_space<vmem>>, vector<1x16x384xf32>
    %84 = vector.shape_cast %83 : vector<1x16x384xf32> to vector<16x384xf32>
    %85 = vector.shape_cast %82 : vector<16x384xf32> to vector<1x16x384xf32>
    tpu.vector_store %arg5[%c10, %c0_27, %c0_28], %85 {strides = array<i32>} : memref<25x16x384xf32, #tpu.memory_space<vmem>>, vector<1x16x384xf32>,
    %86 = vector.extract_strided_slice %8 {offsets = [2, 1, 0], sizes = [1, 1, 384], strides = [1, 1, 1]} : vector<5x5x384xf32> to vector<1x1x384xf32>
    %87 = vector.shape_cast %86 : vector<1x1x384xf32> to vector<384xf32>
    %88 = vector.shape_cast %87 : vector<384xf32> to vector<1x384xf32>
    %89 = vector.broadcast %88 : vector<1x384xf32> to vector<16x384xf32>
    %c11 = arith.constant 11 : index
    %c0_29 = arith.constant 0 : index
    %c0_30 = arith.constant 0 : index
    %90 = vector.load %arg5[%c11, %c0_29, %c0_30] : memref<25x16x384xf32, #tpu.memory_space<vmem>>, vector<1x16x384xf32>
    %91 = vector.shape_cast %90 : vector<1x16x384xf32> to vector<16x384xf32>
    %92 = vector.shape_cast %89 : vector<16x384xf32> to vector<1x16x384xf32>
    tpu.vector_store %arg5[%c11, %c0_29, %c0_30], %92 {strides = array<i32>} : memref<25x16x384xf32, #tpu.memory_space<vmem>>, vector<1x16x384xf32>,
    %93 = vector.extract_strided_slice %8 {offsets = [2, 2, 0], sizes = [1, 1, 384], strides = [1, 1, 1]} : vector<5x5x384xf32> to vector<1x1x384xf32>
    %94 = vector.shape_cast %93 : vector<1x1x384xf32> to vector<384xf32>
    %95 = vector.shape_cast %94 : vector<384xf32> to vector<1x384xf32>
    %96 = vector.broadcast %95 : vector<1x384xf32> to vector<16x384xf32>
    %c12 = arith.constant 12 : index
    %c0_31 = arith.constant 0 : index
    %c0_32 = arith.constant 0 : index
    %97 = vector.load %arg5[%c12, %c0_31, %c0_32] : memref<25x16x384xf32, #tpu.memory_space<vmem>>, vector<1x16x384xf32>
    %98 = vector.shape_cast %97 : vector<1x16x384xf32> to vector<16x384xf32>
    %99 = vector.shape_cast %96 : vector<16x384xf32> to vector<1x16x384xf32>
    tpu.vector_store %arg5[%c12, %c0_31, %c0_32], %99 {strides = array<i32>} : memref<25x16x384xf32, #tpu.memory_space<vmem>>, vector<1x16x384xf32>,
    %100 = vector.extract_strided_slice %8 {offsets = [2, 3, 0], sizes = [1, 1, 384], strides = [1, 1, 1]} : vector<5x5x384xf32> to vector<1x1x384xf32>
    %101 = vector.shape_cast %100 : vector<1x1x384xf32> to vector<384xf32>
    %102 = vector.shape_cast %101 : vector<384xf32> to vector<1x384xf32>
    %103 = vector.broadcast %102 : vector<1x384xf32> to vector<16x384xf32>
    %c13 = arith.constant 13 : index
    %c0_33 = arith.constant 0 : index
    %c0_34 = arith.constant 0 : index
    %104 = vector.load %arg5[%c13, %c0_33, %c0_34] : memref<25x16x384xf32, #tpu.memory_space<vmem>>, vector<1x16x384xf32>
    %105 = vector.shape_cast %104 : vector<1x16x384xf32> to vector<16x384xf32>
    %106 = vector.shape_cast %103 : vector<16x384xf32> to vector<1x16x384xf32>
    tpu.vector_store %arg5[%c13, %c0_33, %c0_34], %106 {strides = array<i32>} : memref<25x16x384xf32, #tpu.memory_space<vmem>>, vector<1x16x384xf32>,
    %107 = vector.extract_strided_slice %8 {offsets = [2, 4, 0], sizes = [1, 1, 384], strides = [1, 1, 1]} : vector<5x5x384xf32> to vector<1x1x384xf32>
    %108 = vector.shape_cast %107 : vector<1x1x384xf32> to vector<384xf32>
    %109 = vector.shape_cast %108 : vector<384xf32> to vector<1x384xf32>
    %110 = vector.broadcast %109 : vector<1x384xf32> to vector<16x384xf32>
    %c14 = arith.constant 14 : index
    %c0_35 = arith.constant 0 : index
    %c0_36 = arith.constant 0 : index
    %111 = vector.load %arg5[%c14, %c0_35, %c0_36] : memref<25x16x384xf32, #tpu.memory_space<vmem>>, vector<1x16x384xf32>
    %112 = vector.shape_cast %111 : vector<1x16x384xf32> to vector<16x384xf32>
    %113 = vector.shape_cast %110 : vector<16x384xf32> to vector<1x16x384xf32>
    tpu.vector_store %arg5[%c14, %c0_35, %c0_36], %113 {strides = array<i32>} : memref<25x16x384xf32, #tpu.memory_space<vmem>>, vector<1x16x384xf32>,
    %114 = vector.extract_strided_slice %8 {offsets = [3, 0, 0], sizes = [1, 1, 384], strides = [1, 1, 1]} : vector<5x5x384xf32> to vector<1x1x384xf32>
    %115 = vector.shape_cast %114 : vector<1x1x384xf32> to vector<384xf32>
    %116 = vector.shape_cast %115 : vector<384xf32> to vector<1x384xf32>
    %117 = vector.broadcast %116 : vector<1x384xf32> to vector<16x384xf32>
    %c15 = arith.constant 15 : index
    %c0_37 = arith.constant 0 : index
    %c0_38 = arith.constant 0 : index
    %118 = vector.load %arg5[%c15, %c0_37, %c0_38] : memref<25x16x384xf32, #tpu.memory_space<vmem>>, vector<1x16x384xf32>
    %119 = vector.shape_cast %118 : vector<1x16x384xf32> to vector<16x384xf32>
    %120 = vector.shape_cast %117 : vector<16x384xf32> to vector<1x16x384xf32>
    tpu.vector_store %arg5[%c15, %c0_37, %c0_38], %120 {strides = array<i32>} : memref<25x16x384xf32, #tpu.memory_space<vmem>>, vector<1x16x384xf32>,
    %121 = vector.extract_strided_slice %8 {offsets = [3, 1, 0], sizes = [1, 1, 384], strides = [1, 1, 1]} : vector<5x5x384xf32> to vector<1x1x384xf32>
    %122 = vector.shape_cast %121 : vector<1x1x384xf32> to vector<384xf32>
    %123 = vector.shape_cast %122 : vector<384xf32> to vector<1x384xf32>
    %124 = vector.broadcast %123 : vector<1x384xf32> to vector<16x384xf32>
    %c16 = arith.constant 16 : index
    %c0_39 = arith.constant 0 : index
    %c0_40 = arith.constant 0 : index
    %125 = vector.load %arg5[%c16, %c0_39, %c0_40] : memref<25x16x384xf32, #tpu.memory_space<vmem>>, vector<1x16x384xf32>
    %126 = vector.shape_cast %125 : vector<1x16x384xf32> to vector<16x384xf32>
    %127 = vector.shape_cast %124 : vector<16x384xf32> to vector<1x16x384xf32>
    tpu.vector_store %arg5[%c16, %c0_39, %c0_40], %127 {strides = array<i32>} : memref<25x16x384xf32, #tpu.memory_space<vmem>>, vector<1x16x384xf32>,
    %128 = vector.extract_strided_slice %8 {offsets = [3, 2, 0], sizes = [1, 1, 384], strides = [1, 1, 1]} : vector<5x5x384xf32> to vector<1x1x384xf32>
    %129 = vector.shape_cast %128 : vector<1x1x384xf32> to vector<384xf32>
    %130 = vector.shape_cast %129 : vector<384xf32> to vector<1x384xf32>
    %131 = vector.broadcast %130 : vector<1x384xf32> to vector<16x384xf32>
    %c17 = arith.constant 17 : index
    %c0_41 = arith.constant 0 : index
    %c0_42 = arith.constant 0 : index
    %132 = vector.load %arg5[%c17, %c0_41, %c0_42] : memref<25x16x384xf32, #tpu.memory_space<vmem>>, vector<1x16x384xf32>
    %133 = vector.shape_cast %132 : vector<1x16x384xf32> to vector<16x384xf32>
    %134 = vector.shape_cast %131 : vector<16x384xf32> to vector<1x16x384xf32>
    tpu.vector_store %arg5[%c17, %c0_41, %c0_42], %134 {strides = array<i32>} : memref<25x16x384xf32, #tpu.memory_space<vmem>>, vector<1x16x384xf32>,
    %135 = vector.extract_strided_slice %8 {offsets = [3, 3, 0], sizes = [1, 1, 384], strides = [1, 1, 1]} : vector<5x5x384xf32> to vector<1x1x384xf32>
    %136 = vector.shape_cast %135 : vector<1x1x384xf32> to vector<384xf32>
    %137 = vector.shape_cast %136 : vector<384xf32> to vector<1x384xf32>
    %138 = vector.broadcast %137 : vector<1x384xf32> to vector<16x384xf32>
    %c18 = arith.constant 18 : index
    %c0_43 = arith.constant 0 : index
    %c0_44 = arith.constant 0 : index
    %139 = vector.load %arg5[%c18, %c0_43, %c0_44] : memref<25x16x384xf32, #tpu.memory_space<vmem>>, vector<1x16x384xf32>
    %140 = vector.shape_cast %139 : vector<1x16x384xf32> to vector<16x384xf32>
    %141 = vector.shape_cast %138 : vector<16x384xf32> to vector<1x16x384xf32>
    tpu.vector_store %arg5[%c18, %c0_43, %c0_44], %141 {strides = array<i32>} : memref<25x16x384xf32, #tpu.memory_space<vmem>>, vector<1x16x384xf32>,
    %142 = vector.extract_strided_slice %8 {offsets = [3, 4, 0], sizes = [1, 1, 384], strides = [1, 1, 1]} : vector<5x5x384xf32> to vector<1x1x384xf32>
    %143 = vector.shape_cast %142 : vector<1x1x384xf32> to vector<384xf32>
    %144 = vector.shape_cast %143 : vector<384xf32> to vector<1x384xf32>
    %145 = vector.broadcast %144 : vector<1x384xf32> to vector<16x384xf32>
    %c19 = arith.constant 19 : index
    %c0_45 = arith.constant 0 : index
    %c0_46 = arith.constant 0 : index
    %146 = vector.load %arg5[%c19, %c0_45, %c0_46] : memref<25x16x384xf32, #tpu.memory_space<vmem>>, vector<1x16x384xf32>
    %147 = vector.shape_cast %146 : vector<1x16x384xf32> to vector<16x384xf32>
    %148 = vector.shape_cast %145 : vector<16x384xf32> to vector<1x16x384xf32>
    tpu.vector_store %arg5[%c19, %c0_45, %c0_46], %148 {strides = array<i32>} : memref<25x16x384xf32, #tpu.memory_space<vmem>>, vector<1x16x384xf32>,
    %149 = vector.extract_strided_slice %8 {offsets = [4, 0, 0], sizes = [1, 1, 384], strides = [1, 1, 1]} : vector<5x5x384xf32> to vector<1x1x384xf32>
    %150 = vector.shape_cast %149 : vector<1x1x384xf32> to vector<384xf32>
    %151 = vector.shape_cast %150 : vector<384xf32> to vector<1x384xf32>
    %152 = vector.broadcast %151 : vector<1x384xf32> to vector<16x384xf32>
    %c20 = arith.constant 20 : index
    %c0_47 = arith.constant 0 : index
    %c0_48 = arith.constant 0 : index
    %153 = vector.load %arg5[%c20, %c0_47, %c0_48] : memref<25x16x384xf32, #tpu.memory_space<vmem>>, vector<1x16x384xf32>
    %154 = vector.shape_cast %153 : vector<1x16x384xf32> to vector<16x384xf32>
    %155 = vector.shape_cast %152 : vector<16x384xf32> to vector<1x16x384xf32>
    tpu.vector_store %arg5[%c20, %c0_47, %c0_48], %155 {strides = array<i32>} : memref<25x16x384xf32, #tpu.memory_space<vmem>>, vector<1x16x384xf32>,
    %156 = vector.extract_strided_slice %8 {offsets = [4, 1, 0], sizes = [1, 1, 384], strides = [1, 1, 1]} : vector<5x5x384xf32> to vector<1x1x384xf32>
    %157 = vector.shape_cast %156 : vector<1x1x384xf32> to vector<384xf32>
    %158 = vector.shape_cast %157 : vector<384xf32> to vector<1x384xf32>
    %159 = vector.broadcast %158 : vector<1x384xf32> to vector<16x384xf32>
    %c21 = arith.constant 21 : index
    %c0_49 = arith.constant 0 : index
    %c0_50 = arith.constant 0 : index
    %160 = vector.load %arg5[%c21, %c0_49, %c0_50] : memref<25x16x384xf32, #tpu.memory_space<vmem>>, vector<1x16x384xf32>
    %161 = vector.shape_cast %160 : vector<1x16x384xf32> to vector<16x384xf32>
    %162 = vector.shape_cast %159 : vector<16x384xf32> to vector<1x16x384xf32>
    tpu.vector_store %arg5[%c21, %c0_49, %c0_50], %162 {strides = array<i32>} : memref<25x16x384xf32, #tpu.memory_space<vmem>>, vector<1x16x384xf32>,
    %163 = vector.extract_strided_slice %8 {offsets = [4, 2, 0], sizes = [1, 1, 384], strides = [1, 1, 1]} : vector<5x5x384xf32> to vector<1x1x384xf32>
    %164 = vector.shape_cast %163 : vector<1x1x384xf32> to vector<384xf32>
    %165 = vector.shape_cast %164 : vector<384xf32> to vector<1x384xf32>
    %166 = vector.broadcast %165 : vector<1x384xf32> to vector<16x384xf32>
    %c22 = arith.constant 22 : index
    %c0_51 = arith.constant 0 : index
    %c0_52 = arith.constant 0 : index
    %167 = vector.load %arg5[%c22, %c0_51, %c0_52] : memref<25x16x384xf32, #tpu.memory_space<vmem>>, vector<1x16x384xf32>
    %168 = vector.shape_cast %167 : vector<1x16x384xf32> to vector<16x384xf32>
    %169 = vector.shape_cast %166 : vector<16x384xf32> to vector<1x16x384xf32>
    tpu.vector_store %arg5[%c22, %c0_51, %c0_52], %169 {strides = array<i32>} : memref<25x16x384xf32, #tpu.memory_space<vmem>>, vector<1x16x384xf32>,
    %170 = vector.extract_strided_slice %8 {offsets = [4, 3, 0], sizes = [1, 1, 384], strides = [1, 1, 1]} : vector<5x5x384xf32> to vector<1x1x384xf32>
    %171 = vector.shape_cast %170 : vector<1x1x384xf32> to vector<384xf32>
    %172 = vector.shape_cast %171 : vector<384xf32> to vector<1x384xf32>
    %173 = vector.broadcast %172 : vector<1x384xf32> to vector<16x384xf32>
    %c23 = arith.constant 23 : index
    %c0_53 = arith.constant 0 : index
    %c0_54 = arith.constant 0 : index
    %174 = vector.load %arg5[%c23, %c0_53, %c0_54] : memref<25x16x384xf32, #tpu.memory_space<vmem>>, vector<1x16x384xf32>
    %175 = vector.shape_cast %174 : vector<1x16x384xf32> to vector<16x384xf32>
    %176 = vector.shape_cast %173 : vector<16x384xf32> to vector<1x16x384xf32>
    tpu.vector_store %arg5[%c23, %c0_53, %c0_54], %176 {strides = array<i32>} : memref<25x16x384xf32, #tpu.memory_space<vmem>>, vector<1x16x384xf32>,
    %177 = vector.extract_strided_slice %8 {offsets = [4, 4, 0], sizes = [1, 1, 384], strides = [1, 1, 1]} : vector<5x5x384xf32> to vector<1x1x384xf32>
    %178 = vector.shape_cast %177 : vector<1x1x384xf32> to vector<384xf32>
    %179 = vector.shape_cast %178 : vector<384xf32> to vector<1x384xf32>
    %180 = vector.broadcast %179 : vector<1x384xf32> to vector<16x384xf32>
    %c24 = arith.constant 24 : index
    %c0_55 = arith.constant 0 : index
    %c0_56 = arith.constant 0 : index
    %181 = vector.load %arg5[%c24, %c0_55, %c0_56] : memref<25x16x384xf32, #tpu.memory_space<vmem>>, vector<1x16x384xf32>
    %182 = vector.shape_cast %181 : vector<1x16x384xf32> to vector<16x384xf32>
    %183 = vector.shape_cast %180 : vector<16x384xf32> to vector<1x16x384xf32>
    tpu.vector_store %arg5[%c24, %c0_55, %c0_56], %183 {strides = array<i32>} : memref<25x16x384xf32, #tpu.memory_space<vmem>>, vector<1x16x384xf32>,
    %c0_57 = arith.constant 0 : index
    %c0_58 = arith.constant 0 : index
    %c0_59 = arith.constant 0 : index
    %184 = vector.load %arg4[%c0_57, %c0_58, %c0_59] : memref<11x16x384xf32, #tpu.memory_space<vmem>>, vector<1x16x384xf32>
    %185 = vector.shape_cast %184 : vector<1x16x384xf32> to vector<16x384xf32>
    %c2_i32 = arith.constant 2 : i32
    %186 = tpu.dynamic_rotate %185 by %c2_i32 dim 0 : vector<16x384xf32>, i32 -> vector<16x384xf32>
    %c0_60 = arith.constant 0 : index
    %c0_61 = arith.constant 0 : index
    %c0_62 = arith.constant 0 : index
    %187 = vector.load %arg5[%c0_60, %c0_61, %c0_62] : memref<25x16x384xf32, #tpu.memory_space<vmem>>, vector<1x16x384xf32>
    %188 = vector.shape_cast %187 : vector<1x16x384xf32> to vector<16x384xf32>
    %189 = arith.mulf %186, %188 : vector<16x384xf32>
    %c1_i32 = arith.constant 1 : i32
    %190 = tpu.dynamic_rotate %185 by %c1_i32 dim 0 : vector<16x384xf32>, i32 -> vector<16x384xf32>
    %c1_63 = arith.constant 1 : index
    %c0_64 = arith.constant 0 : index
    %c0_65 = arith.constant 0 : index
    %191 = vector.load %arg5[%c1_63, %c0_64, %c0_65] : memref<25x16x384xf32, #tpu.memory_space<vmem>>, vector<1x16x384xf32>
    %192 = vector.shape_cast %191 : vector<1x16x384xf32> to vector<16x384xf32>
    %193 = arith.mulf %190, %192 : vector<16x384xf32>
    %194 = arith.addf %189, %193 : vector<16x384xf32>
    %c2_66 = arith.constant 2 : index
    %c0_67 = arith.constant 0 : index
    %c0_68 = arith.constant 0 : index
    %195 = vector.load %arg5[%c2_66, %c0_67, %c0_68] : memref<25x16x384xf32, #tpu.memory_space<vmem>>, vector<1x16x384xf32>
    %196 = vector.shape_cast %195 : vector<1x16x384xf32> to vector<16x384xf32>
    %197 = arith.mulf %185, %196 : vector<16x384xf32>
    %198 = arith.addf %194, %197 : vector<16x384xf32>
    %c15_i32 = arith.constant 15 : i32
    %199 = tpu.dynamic_rotate %185 by %c15_i32 dim 0 : vector<16x384xf32>, i32 -> vector<16x384xf32>
    %c3_69 = arith.constant 3 : index
    %c0_70 = arith.constant 0 : index
    %c0_71 = arith.constant 0 : index
    %200 = vector.load %arg5[%c3_69, %c0_70, %c0_71] : memref<25x16x384xf32, #tpu.memory_space<vmem>>, vector<1x16x384xf32>
    %201 = vector.shape_cast %200 : vector<1x16x384xf32> to vector<16x384xf32>
    %202 = arith.mulf %199, %201 : vector<16x384xf32>
    %203 = arith.addf %198, %202 : vector<16x384xf32>
    %c14_i32 = arith.constant 14 : i32
    %204 = tpu.dynamic_rotate %185 by %c14_i32 dim 0 : vector<16x384xf32>, i32 -> vector<16x384xf32>
    %c4_72 = arith.constant 4 : index
    %c0_73 = arith.constant 0 : index
    %c0_74 = arith.constant 0 : index
    %205 = vector.load %arg5[%c4_72, %c0_73, %c0_74] : memref<25x16x384xf32, #tpu.memory_space<vmem>>, vector<1x16x384xf32>
    %206 = vector.shape_cast %205 : vector<1x16x384xf32> to vector<16x384xf32>
    %207 = arith.mulf %204, %206 : vector<16x384xf32>
    %208 = arith.addf %203, %207 : vector<16x384xf32>
    %c1_75 = arith.constant 1 : index
    %c0_76 = arith.constant 0 : index
    %c0_77 = arith.constant 0 : index
    %209 = vector.load %arg4[%c1_75, %c0_76, %c0_77] : memref<11x16x384xf32, #tpu.memory_space<vmem>>, vector<1x16x384xf32>
    %210 = vector.shape_cast %209 : vector<1x16x384xf32> to vector<16x384xf32>
    %c2_i32_78 = arith.constant 2 : i32
    %211 = tpu.dynamic_rotate %210 by %c2_i32_78 dim 0 : vector<16x384xf32>, i32 -> vector<16x384xf32>
    %c0_79 = arith.constant 0 : index
    %c0_80 = arith.constant 0 : index
    %c0_81 = arith.constant 0 : index
    %212 = vector.load %arg5[%c0_79, %c0_80, %c0_81] : memref<25x16x384xf32, #tpu.memory_space<vmem>>, vector<1x16x384xf32>
    %213 = vector.shape_cast %212 : vector<1x16x384xf32> to vector<16x384xf32>
    %214 = arith.mulf %211, %213 : vector<16x384xf32>
    %c5_82 = arith.constant 5 : index
    %c0_83 = arith.constant 0 : index
    %c0_84 = arith.constant 0 : index
    %215 = vector.load %arg5[%c5_82, %c0_83, %c0_84] : memref<25x16x384xf32, #tpu.memory_space<vmem>>, vector<1x16x384xf32>
    %216 = vector.shape_cast %215 : vector<1x16x384xf32> to vector<16x384xf32>
    %217 = arith.mulf %211, %216 : vector<16x384xf32>
    %218 = arith.addf %208, %217 : vector<16x384xf32>
    %c1_i32_85 = arith.constant 1 : i32
    %219 = tpu.dynamic_rotate %210 by %c1_i32_85 dim 0 : vector<16x384xf32>, i32 -> vector<16x384xf32>
    %c1_86 = arith.constant 1 : index
    %c0_87 = arith.constant 0 : index
    %c0_88 = arith.constant 0 : index
    %220 = vector.load %arg5[%c1_86, %c0_87, %c0_88] : memref<25x16x384xf32, #tpu.memory_space<vmem>>, vector<1x16x384xf32>
    %221 = vector.shape_cast %220 : vector<1x16x384xf32> to vector<16x384xf32>
    %222 = arith.mulf %219, %221 : vector<16x384xf32>
    %223 = arith.addf %214, %222 : vector<16x384xf32>
    %c6_89 = arith.constant 6 : index
    %c0_90 = arith.constant 0 : index
    %c0_91 = arith.constant 0 : index
    %224 = vector.load %arg5[%c6_89, %c0_90, %c0_91] : memref<25x16x384xf32, #tpu.memory_space<vmem>>, vector<1x16x384xf32>
    %225 = vector.shape_cast %224 : vector<1x16x384xf32> to vector<16x384xf32>
    %226 = arith.mulf %219, %225 : vector<16x384xf32>
    %227 = arith.addf %218, %226 : vector<16x384xf32>
    %c2_92 = arith.constant 2 : index
    %c0_93 = arith.constant 0 : index
    %c0_94 = arith.constant 0 : index
    %228 = vector.load %arg5[%c2_92, %c0_93, %c0_94] : memref<25x16x384xf32, #tpu.memory_space<vmem>>, vector<1x16x384xf32>
    %229 = vector.shape_cast %228 : vector<1x16x384xf32> to vector<16x384xf32>
    %230 = arith.mulf %210, %229 : vector<16x384xf32>
    %231 = arith.addf %223, %230 : vector<16x384xf32>
    %c7_95 = arith.constant 7 : index
    %c0_96 = arith.constant 0 : index
    %c0_97 = arith.constant 0 : index
    %232 = vector.load %arg5[%c7_95, %c0_96, %c0_97] : memref<25x16x384xf32, #tpu.memory_space<vmem>>, vector<1x16x384xf32>
    %233 = vector.shape_cast %232 : vector<1x16x384xf32> to vector<16x384xf32>
    %234 = arith.mulf %210, %233 : vector<16x384xf32>
    %235 = arith.addf %227, %234 : vector<16x384xf32>
    %c15_i32_98 = arith.constant 15 : i32
    %236 = tpu.dynamic_rotate %210 by %c15_i32_98 dim 0 : vector<16x384xf32>, i32 -> vector<16x384xf32>
    %c3_99 = arith.constant 3 : index
    %c0_100 = arith.constant 0 : index
    %c0_101 = arith.constant 0 : index
    %237 = vector.load %arg5[%c3_99, %c0_100, %c0_101] : memref<25x16x384xf32, #tpu.memory_space<vmem>>, vector<1x16x384xf32>
    %238 = vector.shape_cast %237 : vector<1x16x384xf32> to vector<16x384xf32>
    %239 = arith.mulf %236, %238 : vector<16x384xf32>
    %240 = arith.addf %231, %239 : vector<16x384xf32>
    %c8_102 = arith.constant 8 : index
    %c0_103 = arith.constant 0 : index
    %c0_104 = arith.constant 0 : index
    %241 = vector.load %arg5[%c8_102, %c0_103, %c0_104] : memref<25x16x384xf32, #tpu.memory_space<vmem>>, vector<1x16x384xf32>
    %242 = vector.shape_cast %241 : vector<1x16x384xf32> to vector<16x384xf32>
    %243 = arith.mulf %236, %242 : vector<16x384xf32>
    %244 = arith.addf %235, %243 : vector<16x384xf32>
    %c14_i32_105 = arith.constant 14 : i32
    %245 = tpu.dynamic_rotate %210 by %c14_i32_105 dim 0 : vector<16x384xf32>, i32 -> vector<16x384xf32>
    %c4_106 = arith.constant 4 : index
    %c0_107 = arith.constant 0 : index
    %c0_108 = arith.constant 0 : index
    %246 = vector.load %arg5[%c4_106, %c0_107, %c0_108] : memref<25x16x384xf32, #tpu.memory_space<vmem>>, vector<1x16x384xf32>
    %247 = vector.shape_cast %246 : vector<1x16x384xf32> to vector<16x384xf32>
    %248 = arith.mulf %245, %247 : vector<16x384xf32>
    %249 = arith.addf %240, %248 : vector<16x384xf32>
    %c9_109 = arith.constant 9 : index
    %c0_110 = arith.constant 0 : index
    %c0_111 = arith.constant 0 : index
    %250 = vector.load %arg5[%c9_109, %c0_110, %c0_111] : memref<25x16x384xf32, #tpu.memory_space<vmem>>, vector<1x16x384xf32>
    %251 = vector.shape_cast %250 : vector<1x16x384xf32> to vector<16x384xf32>
    %252 = arith.mulf %245, %251 : vector<16x384xf32>
    %253 = arith.addf %244, %252 : vector<16x384xf32>
    %c2_112 = arith.constant 2 : index
    %c0_113 = arith.constant 0 : index
    %c0_114 = arith.constant 0 : index
    %254 = vector.load %arg4[%c2_112, %c0_113, %c0_114] : memref<11x16x384xf32, #tpu.memory_space<vmem>>, vector<1x16x384xf32>
    %255 = vector.shape_cast %254 : vector<1x16x384xf32> to vector<16x384xf32>
    %c2_i32_115 = arith.constant 2 : i32
    %256 = tpu.dynamic_rotate %255 by %c2_i32_115 dim 0 : vector<16x384xf32>, i32 -> vector<16x384xf32>
    %c0_116 = arith.constant 0 : index
    %c0_117 = arith.constant 0 : index
    %c0_118 = arith.constant 0 : index
    %257 = vector.load %arg5[%c0_116, %c0_117, %c0_118] : memref<25x16x384xf32, #tpu.memory_space<vmem>>, vector<1x16x384xf32>
    %258 = vector.shape_cast %257 : vector<1x16x384xf32> to vector<16x384xf32>
    %259 = arith.mulf %256, %258 : vector<16x384xf32>
    %c5_119 = arith.constant 5 : index
    %c0_120 = arith.constant 0 : index
    %c0_121 = arith.constant 0 : index
    %260 = vector.load %arg5[%c5_119, %c0_120, %c0_121] : memref<25x16x384xf32, #tpu.memory_space<vmem>>, vector<1x16x384xf32>
    %261 = vector.shape_cast %260 : vector<1x16x384xf32> to vector<16x384xf32>
    %262 = arith.mulf %256, %261 : vector<16x384xf32>
    %263 = arith.addf %249, %262 : vector<16x384xf32>
    %c10_122 = arith.constant 10 : index
    %c0_123 = arith.constant 0 : index
    %c0_124 = arith.constant 0 : index
    %264 = vector.load %arg5[%c10_122, %c0_123, %c0_124] : memref<25x16x384xf32, #tpu.memory_space<vmem>>, vector<1x16x384xf32>
    %265 = vector.shape_cast %264 : vector<1x16x384xf32> to vector<16x384xf32>
    %266 = arith.mulf %256, %265 : vector<16x384xf32>
    %267 = arith.addf %253, %266 : vector<16x384xf32>
    %c1_i32_125 = arith.constant 1 : i32
    %268 = tpu.dynamic_rotate %255 by %c1_i32_125 dim 0 : vector<16x384xf32>, i32 -> vector<16x384xf32>
    %c1_126 = arith.constant 1 : index
    %c0_127 = arith.constant 0 : index
    %c0_128 = arith.constant 0 : index
    %269 = vector.load %arg5[%c1_126, %c0_127, %c0_128] : memref<25x16x384xf32, #tpu.memory_space<vmem>>, vector<1x16x384xf32>
    %270 = vector.shape_cast %269 : vector<1x16x384xf32> to vector<16x384xf32>
    %271 = arith.mulf %268, %270 : vector<16x384xf32>
    %272 = arith.addf %259, %271 : vector<16x384xf32>
    %c6_129 = arith.constant 6 : index
    %c0_130 = arith.constant 0 : index
    %c0_131 = arith.constant 0 : index
    %273 = vector.load %arg5[%c6_129, %c0_130, %c0_131] : memref<25x16x384xf32, #tpu.memory_space<vmem>>, vector<1x16x384xf32>
    %274 = vector.shape_cast %273 : vector<1x16x384xf32> to vector<16x384xf32>
    %275 = arith.mulf %268, %274 : vector<16x384xf32>
    %276 = arith.addf %263, %275 : vector<16x384xf32>
    %c11_132 = arith.constant 11 : index
    %c0_133 = arith.constant 0 : index
    %c0_134 = arith.constant 0 : index
    %277 = vector.load %arg5[%c11_132, %c0_133, %c0_134] : memref<25x16x384xf32, #tpu.memory_space<vmem>>, vector<1x16x384xf32>
    %278 = vector.shape_cast %277 : vector<1x16x384xf32> to vector<16x384xf32>
    %279 = arith.mulf %268, %278 : vector<16x384xf32>
    %280 = arith.addf %267, %279 : vector<16x384xf32>
    %c2_135 = arith.constant 2 : index
    %c0_136 = arith.constant 0 : index
    %c0_137 = arith.constant 0 : index
    %281 = vector.load %arg5[%c2_135, %c0_136, %c0_137] : memref<25x16x384xf32, #tpu.memory_space<vmem>>, vector<1x16x384xf32>
    %282 = vector.shape_cast %281 : vector<1x16x384xf32> to vector<16x384xf32>
    %283 = arith.mulf %255, %282 : vector<16x384xf32>
    %284 = arith.addf %272, %283 : vector<16x384xf32>
    %c7_138 = arith.constant 7 : index
    %c0_139 = arith.constant 0 : index
    %c0_140 = arith.constant 0 : index
    %285 = vector.load %arg5[%c7_138, %c0_139, %c0_140] : memref<25x16x384xf32, #tpu.memory_space<vmem>>, vector<1x16x384xf32>
    %286 = vector.shape_cast %285 : vector<1x16x384xf32> to vector<16x384xf32>
    %287 = arith.mulf %255, %286 : vector<16x384xf32>
    %288 = arith.addf %276, %287 : vector<16x384xf32>
    %c12_141 = arith.constant 12 : index
    %c0_142 = arith.constant 0 : index
    %c0_143 = arith.constant 0 : index
    %289 = vector.load %arg5[%c12_141, %c0_142, %c0_143] : memref<25x16x384xf32, #tpu.memory_space<vmem>>, vector<1x16x384xf32>
    %290 = vector.shape_cast %289 : vector<1x16x384xf32> to vector<16x384xf32>
    %291 = arith.mulf %255, %290 : vector<16x384xf32>
    %292 = arith.addf %280, %291 : vector<16x384xf32>
    %c15_i32_144 = arith.constant 15 : i32
    %293 = tpu.dynamic_rotate %255 by %c15_i32_144 dim 0 : vector<16x384xf32>, i32 -> vector<16x384xf32>
    %c3_145 = arith.constant 3 : index
    %c0_146 = arith.constant 0 : index
    %c0_147 = arith.constant 0 : index
    %294 = vector.load %arg5[%c3_145, %c0_146, %c0_147] : memref<25x16x384xf32, #tpu.memory_space<vmem>>, vector<1x16x384xf32>
    %295 = vector.shape_cast %294 : vector<1x16x384xf32> to vector<16x384xf32>
    %296 = arith.mulf %293, %295 : vector<16x384xf32>
    %297 = arith.addf %284, %296 : vector<16x384xf32>
    %c8_148 = arith.constant 8 : index
    %c0_149 = arith.constant 0 : index
    %c0_150 = arith.constant 0 : index
    %298 = vector.load %arg5[%c8_148, %c0_149, %c0_150] : memref<25x16x384xf32, #tpu.memory_space<vmem>>, vector<1x16x384xf32>
    %299 = vector.shape_cast %298 : vector<1x16x384xf32> to vector<16x384xf32>
    %300 = arith.mulf %293, %299 : vector<16x384xf32>
    %301 = arith.addf %288, %300 : vector<16x384xf32>
    %c13_151 = arith.constant 13 : index
    %c0_152 = arith.constant 0 : index
    %c0_153 = arith.constant 0 : index
    %302 = vector.load %arg5[%c13_151, %c0_152, %c0_153] : memref<25x16x384xf32, #tpu.memory_space<vmem>>, vector<1x16x384xf32>
    %303 = vector.shape_cast %302 : vector<1x16x384xf32> to vector<16x384xf32>
    %304 = arith.mulf %293, %303 : vector<16x384xf32>
    %305 = arith.addf %292, %304 : vector<16x384xf32>
    %c14_i32_154 = arith.constant 14 : i32
    %306 = tpu.dynamic_rotate %255 by %c14_i32_154 dim 0 : vector<16x384xf32>, i32 -> vector<16x384xf32>
    %c4_155 = arith.constant 4 : index
    %c0_156 = arith.constant 0 : index
    %c0_157 = arith.constant 0 : index
    %307 = vector.load %arg5[%c4_155, %c0_156, %c0_157] : memref<25x16x384xf32, #tpu.memory_space<vmem>>, vector<1x16x384xf32>
    %308 = vector.shape_cast %307 : vector<1x16x384xf32> to vector<16x384xf32>
    %309 = arith.mulf %306, %308 : vector<16x384xf32>
    %310 = arith.addf %297, %309 : vector<16x384xf32>
    %c9_158 = arith.constant 9 : index
    %c0_159 = arith.constant 0 : index
    %c0_160 = arith.constant 0 : index
    %311 = vector.load %arg5[%c9_158, %c0_159, %c0_160] : memref<25x16x384xf32, #tpu.memory_space<vmem>>, vector<1x16x384xf32>
    %312 = vector.shape_cast %311 : vector<1x16x384xf32> to vector<16x384xf32>
    %313 = arith.mulf %306, %312 : vector<16x384xf32>
    %314 = arith.addf %301, %313 : vector<16x384xf32>
    %c14_161 = arith.constant 14 : index
    %c0_162 = arith.constant 0 : index
    %c0_163 = arith.constant 0 : index
    %315 = vector.load %arg5[%c14_161, %c0_162, %c0_163] : memref<25x16x384xf32, #tpu.memory_space<vmem>>, vector<1x16x384xf32>
    %316 = vector.shape_cast %315 : vector<1x16x384xf32> to vector<16x384xf32>
    %317 = arith.mulf %306, %316 : vector<16x384xf32>
    %318 = arith.addf %305, %317 : vector<16x384xf32>
    %c3_164 = arith.constant 3 : index
    %c0_165 = arith.constant 0 : index
    %c0_166 = arith.constant 0 : index
    %319 = vector.load %arg4[%c3_164, %c0_165, %c0_166] : memref<11x16x384xf32, #tpu.memory_space<vmem>>, vector<1x16x384xf32>
    %320 = vector.shape_cast %319 : vector<1x16x384xf32> to vector<16x384xf32>
    %c2_i32_167 = arith.constant 2 : i32
    %321 = tpu.dynamic_rotate %320 by %c2_i32_167 dim 0 : vector<16x384xf32>, i32 -> vector<16x384xf32>
    %c0_168 = arith.constant 0 : index
    %c0_169 = arith.constant 0 : index
    %c0_170 = arith.constant 0 : index
    %322 = vector.load %arg5[%c0_168, %c0_169, %c0_170] : memref<25x16x384xf32, #tpu.memory_space<vmem>>, vector<1x16x384xf32>
    %323 = vector.shape_cast %322 : vector<1x16x384xf32> to vector<16x384xf32>
    %324 = arith.mulf %321, %323 : vector<16x384xf32>
    %c5_171 = arith.constant 5 : index
    %c0_172 = arith.constant 0 : index
    %c0_173 = arith.constant 0 : index
    %325 = vector.load %arg5[%c5_171, %c0_172, %c0_173] : memref<25x16x384xf32, #tpu.memory_space<vmem>>, vector<1x16x384xf32>
    %326 = vector.shape_cast %325 : vector<1x16x384xf32> to vector<16x384xf32>
    %327 = arith.mulf %321, %326 : vector<16x384xf32>
    %328 = arith.addf %310, %327 : vector<16x384xf32>
    %c10_174 = arith.constant 10 : index
    %c0_175 = arith.constant 0 : index
    %c0_176 = arith.constant 0 : index
    %329 = vector.load %arg5[%c10_174, %c0_175, %c0_176] : memref<25x16x384xf32, #tpu.memory_space<vmem>>, vector<1x16x384xf32>
    %330 = vector.shape_cast %329 : vector<1x16x384xf32> to vector<16x384xf32>
    %331 = arith.mulf %321, %330 : vector<16x384xf32>
    %332 = arith.addf %314, %331 : vector<16x384xf32>
    %c15_177 = arith.constant 15 : index
    %c0_178 = arith.constant 0 : index
    %c0_179 = arith.constant 0 : index
    %333 = vector.load %arg5[%c15_177, %c0_178, %c0_179] : memref<25x16x384xf32, #tpu.memory_space<vmem>>, vector<1x16x384xf32>
    %334 = vector.shape_cast %333 : vector<1x16x384xf32> to vector<16x384xf32>
    %335 = arith.mulf %321, %334 : vector<16x384xf32>
    %336 = arith.addf %318, %335 : vector<16x384xf32>
    %c1_i32_180 = arith.constant 1 : i32
    %337 = tpu.dynamic_rotate %320 by %c1_i32_180 dim 0 : vector<16x384xf32>, i32 -> vector<16x384xf32>
    %c1_181 = arith.constant 1 : index
    %c0_182 = arith.constant 0 : index
    %c0_183 = arith.constant 0 : index
    %338 = vector.load %arg5[%c1_181, %c0_182, %c0_183] : memref<25x16x384xf32, #tpu.memory_space<vmem>>, vector<1x16x384xf32>
    %339 = vector.shape_cast %338 : vector<1x16x384xf32> to vector<16x384xf32>
    %340 = arith.mulf %337, %339 : vector<16x384xf32>
    %341 = arith.addf %324, %340 : vector<16x384xf32>
    %c6_184 = arith.constant 6 : index
    %c0_185 = arith.constant 0 : index
    %c0_186 = arith.constant 0 : index
    %342 = vector.load %arg5[%c6_184, %c0_185, %c0_186] : memref<25x16x384xf32, #tpu.memory_space<vmem>>, vector<1x16x384xf32>
    %343 = vector.shape_cast %342 : vector<1x16x384xf32> to vector<16x384xf32>
    %344 = arith.mulf %337, %343 : vector<16x384xf32>
    %345 = arith.addf %328, %344 : vector<16x384xf32>
    %c11_187 = arith.constant 11 : index
    %c0_188 = arith.constant 0 : index
    %c0_189 = arith.constant 0 : index
    %346 = vector.load %arg5[%c11_187, %c0_188, %c0_189] : memref<25x16x384xf32, #tpu.memory_space<vmem>>, vector<1x16x384xf32>
    %347 = vector.shape_cast %346 : vector<1x16x384xf32> to vector<16x384xf32>
    %348 = arith.mulf %337, %347 : vector<16x384xf32>
    %349 = arith.addf %332, %348 : vector<16x384xf32>
    %c16_190 = arith.constant 16 : index
    %c0_191 = arith.constant 0 : index
    %c0_192 = arith.constant 0 : index
    %350 = vector.load %arg5[%c16_190, %c0_191, %c0_192] : memref<25x16x384xf32, #tpu.memory_space<vmem>>, vector<1x16x384xf32>
    %351 = vector.shape_cast %350 : vector<1x16x384xf32> to vector<16x384xf32>
    %352 = arith.mulf %337, %351 : vector<16x384xf32>
    %353 = arith.addf %336, %352 : vector<16x384xf32>
    %c2_193 = arith.constant 2 : index
    %c0_194 = arith.constant 0 : index
    %c0_195 = arith.constant 0 : index
    %354 = vector.load %arg5[%c2_193, %c0_194, %c0_195] : memref<25x16x384xf32, #tpu.memory_space<vmem>>, vector<1x16x384xf32>
    %355 = vector.shape_cast %354 : vector<1x16x384xf32> to vector<16x384xf32>
    %356 = arith.mulf %320, %355 : vector<16x384xf32>
    %357 = arith.addf %341, %356 : vector<16x384xf32>
    %c7_196 = arith.constant 7 : index
    %c0_197 = arith.constant 0 : index
    %c0_198 = arith.constant 0 : index
    %358 = vector.load %arg5[%c7_196, %c0_197, %c0_198] : memref<25x16x384xf32, #tpu.memory_space<vmem>>, vector<1x16x384xf32>
    %359 = vector.shape_cast %358 : vector<1x16x384xf32> to vector<16x384xf32>
    %360 = arith.mulf %320, %359 : vector<16x384xf32>
    %361 = arith.addf %345, %360 : vector<16x384xf32>
    %c12_199 = arith.constant 12 : index
    %c0_200 = arith.constant 0 : index
    %c0_201 = arith.constant 0 : index
    %362 = vector.load %arg5[%c12_199, %c0_200, %c0_201] : memref<25x16x384xf32, #tpu.memory_space<vmem>>, vector<1x16x384xf32>
    %363 = vector.shape_cast %362 : vector<1x16x384xf32> to vector<16x384xf32>
    %364 = arith.mulf %320, %363 : vector<16x384xf32>
    %365 = arith.addf %349, %364 : vector<16x384xf32>
    %c17_202 = arith.constant 17 : index
    %c0_203 = arith.constant 0 : index
    %c0_204 = arith.constant 0 : index
    %366 = vector.load %arg5[%c17_202, %c0_203, %c0_204] : memref<25x16x384xf32, #tpu.memory_space<vmem>>, vector<1x16x384xf32>
    %367 = vector.shape_cast %366 : vector<1x16x384xf32> to vector<16x384xf32>
    %368 = arith.mulf %320, %367 : vector<16x384xf32>
    %369 = arith.addf %353, %368 : vector<16x384xf32>
    %c15_i32_205 = arith.constant 15 : i32
    %370 = tpu.dynamic_rotate %320 by %c15_i32_205 dim 0 : vector<16x384xf32>, i32 -> vector<16x384xf32>
    %c3_206 = arith.constant 3 : index
    %c0_207 = arith.constant 0 : index
    %c0_208 = arith.constant 0 : index
    %371 = vector.load %arg5[%c3_206, %c0_207, %c0_208] : memref<25x16x384xf32, #tpu.memory_space<vmem>>, vector<1x16x384xf32>
    %372 = vector.shape_cast %371 : vector<1x16x384xf32> to vector<16x384xf32>
    %373 = arith.mulf %370, %372 : vector<16x384xf32>
    %374 = arith.addf %357, %373 : vector<16x384xf32>
    %c8_209 = arith.constant 8 : index
    %c0_210 = arith.constant 0 : index
    %c0_211 = arith.constant 0 : index
    %375 = vector.load %arg5[%c8_209, %c0_210, %c0_211] : memref<25x16x384xf32, #tpu.memory_space<vmem>>, vector<1x16x384xf32>
    %376 = vector.shape_cast %375 : vector<1x16x384xf32> to vector<16x384xf32>
    %377 = arith.mulf %370, %376 : vector<16x384xf32>
    %378 = arith.addf %361, %377 : vector<16x384xf32>
    %c13_212 = arith.constant 13 : index
    %c0_213 = arith.constant 0 : index
    %c0_214 = arith.constant 0 : index
    %379 = vector.load %arg5[%c13_212, %c0_213, %c0_214] : memref<25x16x384xf32, #tpu.memory_space<vmem>>, vector<1x16x384xf32>
    %380 = vector.shape_cast %379 : vector<1x16x384xf32> to vector<16x384xf32>
    %381 = arith.mulf %370, %380 : vector<16x384xf32>
    %382 = arith.addf %365, %381 : vector<16x384xf32>
    %c18_215 = arith.constant 18 : index
    %c0_216 = arith.constant 0 : index
    %c0_217 = arith.constant 0 : index
    %383 = vector.load %arg5[%c18_215, %c0_216, %c0_217] : memref<25x16x384xf32, #tpu.memory_space<vmem>>, vector<1x16x384xf32>
    %384 = vector.shape_cast %383 : vector<1x16x384xf32> to vector<16x384xf32>
    %385 = arith.mulf %370, %384 : vector<16x384xf32>
    %386 = arith.addf %369, %385 : vector<16x384xf32>
    %c14_i32_218 = arith.constant 14 : i32
    %387 = tpu.dynamic_rotate %320 by %c14_i32_218 dim 0 : vector<16x384xf32>, i32 -> vector<16x384xf32>
    %c4_219 = arith.constant 4 : index
    %c0_220 = arith.constant 0 : index
    %c0_221 = arith.constant 0 : index
    %388 = vector.load %arg5[%c4_219, %c0_220, %c0_221] : memref<25x16x384xf32, #tpu.memory_space<vmem>>, vector<1x16x384xf32>
    %389 = vector.shape_cast %388 : vector<1x16x384xf32> to vector<16x384xf32>
    %390 = arith.mulf %387, %389 : vector<16x384xf32>
    %391 = arith.addf %374, %390 : vector<16x384xf32>
    %c9_222 = arith.constant 9 : index
    %c0_223 = arith.constant 0 : index
    %c0_224 = arith.constant 0 : index
    %392 = vector.load %arg5[%c9_222, %c0_223, %c0_224] : memref<25x16x384xf32, #tpu.memory_space<vmem>>, vector<1x16x384xf32>
    %393 = vector.shape_cast %392 : vector<1x16x384xf32> to vector<16x384xf32>
    %394 = arith.mulf %387, %393 : vector<16x384xf32>
    %395 = arith.addf %378, %394 : vector<16x384xf32>
    %c14_225 = arith.constant 14 : index
    %c0_226 = arith.constant 0 : index
    %c0_227 = arith.constant 0 : index
    %396 = vector.load %arg5[%c14_225, %c0_226, %c0_227] : memref<25x16x384xf32, #tpu.memory_space<vmem>>, vector<1x16x384xf32>
    %397 = vector.shape_cast %396 : vector<1x16x384xf32> to vector<16x384xf32>
    %398 = arith.mulf %387, %397 : vector<16x384xf32>
    %399 = arith.addf %382, %398 : vector<16x384xf32>
    %c19_228 = arith.constant 19 : index
    %c0_229 = arith.constant 0 : index
    %c0_230 = arith.constant 0 : index
    %400 = vector.load %arg5[%c19_228, %c0_229, %c0_230] : memref<25x16x384xf32, #tpu.memory_space<vmem>>, vector<1x16x384xf32>
    %401 = vector.shape_cast %400 : vector<1x16x384xf32> to vector<16x384xf32>
    %402 = arith.mulf %387, %401 : vector<16x384xf32>
    %403 = arith.addf %386, %402 : vector<16x384xf32>
    %c4_231 = arith.constant 4 : index
    %c0_232 = arith.constant 0 : index
    %c0_233 = arith.constant 0 : index
    %404 = vector.load %arg4[%c4_231, %c0_232, %c0_233] : memref<11x16x384xf32, #tpu.memory_space<vmem>>, vector<1x16x384xf32>
    %405 = vector.shape_cast %404 : vector<1x16x384xf32> to vector<16x384xf32>
    %c2_i32_234 = arith.constant 2 : i32
    %406 = tpu.dynamic_rotate %405 by %c2_i32_234 dim 0 : vector<16x384xf32>, i32 -> vector<16x384xf32>
    %c0_235 = arith.constant 0 : index
    %c0_236 = arith.constant 0 : index
    %c0_237 = arith.constant 0 : index
    %407 = vector.load %arg5[%c0_235, %c0_236, %c0_237] : memref<25x16x384xf32, #tpu.memory_space<vmem>>, vector<1x16x384xf32>
    %408 = vector.shape_cast %407 : vector<1x16x384xf32> to vector<16x384xf32>
    %409 = arith.mulf %406, %408 : vector<16x384xf32>
    %c5_238 = arith.constant 5 : index
    %c0_239 = arith.constant 0 : index
    %c0_240 = arith.constant 0 : index
    %410 = vector.load %arg5[%c5_238, %c0_239, %c0_240] : memref<25x16x384xf32, #tpu.memory_space<vmem>>, vector<1x16x384xf32>
    %411 = vector.shape_cast %410 : vector<1x16x384xf32> to vector<16x384xf32>
    %412 = arith.mulf %406, %411 : vector<16x384xf32>
    %413 = arith.addf %391, %412 : vector<16x384xf32>
    %c10_241 = arith.constant 10 : index
    %c0_242 = arith.constant 0 : index
    %c0_243 = arith.constant 0 : index
    %414 = vector.load %arg5[%c10_241, %c0_242, %c0_243] : memref<25x16x384xf32, #tpu.memory_space<vmem>>, vector<1x16x384xf32>
    %415 = vector.shape_cast %414 : vector<1x16x384xf32> to vector<16x384xf32>
    %416 = arith.mulf %406, %415 : vector<16x384xf32>
    %417 = arith.addf %395, %416 : vector<16x384xf32>
    %c15_244 = arith.constant 15 : index
    %c0_245 = arith.constant 0 : index
    %c0_246 = arith.constant 0 : index
    %418 = vector.load %arg5[%c15_244, %c0_245, %c0_246] : memref<25x16x384xf32, #tpu.memory_space<vmem>>, vector<1x16x384xf32>
    %419 = vector.shape_cast %418 : vector<1x16x384xf32> to vector<16x384xf32>
    %420 = arith.mulf %406, %419 : vector<16x384xf32>
    %421 = arith.addf %399, %420 : vector<16x384xf32>
    %c20_247 = arith.constant 20 : index
    %c0_248 = arith.constant 0 : index
    %c0_249 = arith.constant 0 : index
    %422 = vector.load %arg5[%c20_247, %c0_248, %c0_249] : memref<25x16x384xf32, #tpu.memory_space<vmem>>, vector<1x16x384xf32>
    %423 = vector.shape_cast %422 : vector<1x16x384xf32> to vector<16x384xf32>
    %424 = arith.mulf %406, %423 : vector<16x384xf32>
    %425 = arith.addf %403, %424 : vector<16x384xf32>
    %c1_i32_250 = arith.constant 1 : i32
    %426 = tpu.dynamic_rotate %405 by %c1_i32_250 dim 0 : vector<16x384xf32>, i32 -> vector<16x384xf32>
    %c1_251 = arith.constant 1 : index
    %c0_252 = arith.constant 0 : index
    %c0_253 = arith.constant 0 : index
    %427 = vector.load %arg5[%c1_251, %c0_252, %c0_253] : memref<25x16x384xf32, #tpu.memory_space<vmem>>, vector<1x16x384xf32>
    %428 = vector.shape_cast %427 : vector<1x16x384xf32> to vector<16x384xf32>
    %429 = arith.mulf %426, %428 : vector<16x384xf32>
    %430 = arith.addf %409, %429 : vector<16x384xf32>
    %c6_254 = arith.constant 6 : index
    %c0_255 = arith.constant 0 : index
    %c0_256 = arith.constant 0 : index
    %431 = vector.load %arg5[%c6_254, %c0_255, %c0_256] : memref<25x16x384xf32, #tpu.memory_space<vmem>>, vector<1x16x384xf32>
    %432 = vector.shape_cast %431 : vector<1x16x384xf32> to vector<16x384xf32>
    %433 = arith.mulf %426, %432 : vector<16x384xf32>
    %434 = arith.addf %413, %433 : vector<16x384xf32>
    %c11_257 = arith.constant 11 : index
    %c0_258 = arith.constant 0 : index
    %c0_259 = arith.constant 0 : index
    %435 = vector.load %arg5[%c11_257, %c0_258, %c0_259] : memref<25x16x384xf32, #tpu.memory_space<vmem>>, vector<1x16x384xf32>
    %436 = vector.shape_cast %435 : vector<1x16x384xf32> to vector<16x384xf32>
    %437 = arith.mulf %426, %436 : vector<16x384xf32>
    %438 = arith.addf %417, %437 : vector<16x384xf32>
    %c16_260 = arith.constant 16 : index
    %c0_261 = arith.constant 0 : index
    %c0_262 = arith.constant 0 : index
    %439 = vector.load %arg5[%c16_260, %c0_261, %c0_262] : memref<25x16x384xf32, #tpu.memory_space<vmem>>, vector<1x16x384xf32>
    %440 = vector.shape_cast %439 : vector<1x16x384xf32> to vector<16x384xf32>
    %441 = arith.mulf %426, %440 : vector<16x384xf32>
    %442 = arith.addf %421, %441 : vector<16x384xf32>
    %c21_263 = arith.constant 21 : index
    %c0_264 = arith.constant 0 : index
    %c0_265 = arith.constant 0 : index
    %443 = vector.load %arg5[%c21_263, %c0_264, %c0_265] : memref<25x16x384xf32, #tpu.memory_space<vmem>>, vector<1x16x384xf32>
    %444 = vector.shape_cast %443 : vector<1x16x384xf32> to vector<16x384xf32>
    %445 = arith.mulf %426, %444 : vector<16x384xf32>
    %446 = arith.addf %425, %445 : vector<16x384xf32>
    %c2_266 = arith.constant 2 : index
    %c0_267 = arith.constant 0 : index
    %c0_268 = arith.constant 0 : index
    %447 = vector.load %arg5[%c2_266, %c0_267, %c0_268] : memref<25x16x384xf32, #tpu.memory_space<vmem>>, vector<1x16x384xf32>
    %448 = vector.shape_cast %447 : vector<1x16x384xf32> to vector<16x384xf32>
    %449 = arith.mulf %405, %448 : vector<16x384xf32>
    %450 = arith.addf %430, %449 : vector<16x384xf32>
    %c7_269 = arith.constant 7 : index
    %c0_270 = arith.constant 0 : index
    %c0_271 = arith.constant 0 : index
    %451 = vector.load %arg5[%c7_269, %c0_270, %c0_271] : memref<25x16x384xf32, #tpu.memory_space<vmem>>, vector<1x16x384xf32>
    %452 = vector.shape_cast %451 : vector<1x16x384xf32> to vector<16x384xf32>
    %453 = arith.mulf %405, %452 : vector<16x384xf32>
    %454 = arith.addf %434, %453 : vector<16x384xf32>
    %c12_272 = arith.constant 12 : index
    %c0_273 = arith.constant 0 : index
    %c0_274 = arith.constant 0 : index
    %455 = vector.load %arg5[%c12_272, %c0_273, %c0_274] : memref<25x16x384xf32, #tpu.memory_space<vmem>>, vector<1x16x384xf32>
    %456 = vector.shape_cast %455 : vector<1x16x384xf32> to vector<16x384xf32>
    %457 = arith.mulf %405, %456 : vector<16x384xf32>
    %458 = arith.addf %438, %457 : vector<16x384xf32>
    %c17_275 = arith.constant 17 : index
    %c0_276 = arith.constant 0 : index
    %c0_277 = arith.constant 0 : index
    %459 = vector.load %arg5[%c17_275, %c0_276, %c0_277] : memref<25x16x384xf32, #tpu.memory_space<vmem>>, vector<1x16x384xf32>
    %460 = vector.shape_cast %459 : vector<1x16x384xf32> to vector<16x384xf32>
    %461 = arith.mulf %405, %460 : vector<16x384xf32>
    %462 = arith.addf %442, %461 : vector<16x384xf32>
    %c22_278 = arith.constant 22 : index
    %c0_279 = arith.constant 0 : index
    %c0_280 = arith.constant 0 : index
    %463 = vector.load %arg5[%c22_278, %c0_279, %c0_280] : memref<25x16x384xf32, #tpu.memory_space<vmem>>, vector<1x16x384xf32>
    %464 = vector.shape_cast %463 : vector<1x16x384xf32> to vector<16x384xf32>
    %465 = arith.mulf %405, %464 : vector<16x384xf32>
    %466 = arith.addf %446, %465 : vector<16x384xf32>
    %c15_i32_281 = arith.constant 15 : i32
    %467 = tpu.dynamic_rotate %405 by %c15_i32_281 dim 0 : vector<16x384xf32>, i32 -> vector<16x384xf32>
    %c3_282 = arith.constant 3 : index
    %c0_283 = arith.constant 0 : index
    %c0_284 = arith.constant 0 : index
    %468 = vector.load %arg5[%c3_282, %c0_283, %c0_284] : memref<25x16x384xf32, #tpu.memory_space<vmem>>, vector<1x16x384xf32>
    %469 = vector.shape_cast %468 : vector<1x16x384xf32> to vector<16x384xf32>
    %470 = arith.mulf %467, %469 : vector<16x384xf32>
    %471 = arith.addf %450, %470 : vector<16x384xf32>
    %c8_285 = arith.constant 8 : index
    %c0_286 = arith.constant 0 : index
    %c0_287 = arith.constant 0 : index
    %472 = vector.load %arg5[%c8_285, %c0_286, %c0_287] : memref<25x16x384xf32, #tpu.memory_space<vmem>>, vector<1x16x384xf32>
    %473 = vector.shape_cast %472 : vector<1x16x384xf32> to vector<16x384xf32>
    %474 = arith.mulf %467, %473 : vector<16x384xf32>
    %475 = arith.addf %454, %474 : vector<16x384xf32>
    %c13_288 = arith.constant 13 : index
    %c0_289 = arith.constant 0 : index
    %c0_290 = arith.constant 0 : index
    %476 = vector.load %arg5[%c13_288, %c0_289, %c0_290] : memref<25x16x384xf32, #tpu.memory_space<vmem>>, vector<1x16x384xf32>
    %477 = vector.shape_cast %476 : vector<1x16x384xf32> to vector<16x384xf32>
    %478 = arith.mulf %467, %477 : vector<16x384xf32>
    %479 = arith.addf %458, %478 : vector<16x384xf32>
    %c18_291 = arith.constant 18 : index
    %c0_292 = arith.constant 0 : index
    %c0_293 = arith.constant 0 : index
    %480 = vector.load %arg5[%c18_291, %c0_292, %c0_293] : memref<25x16x384xf32, #tpu.memory_space<vmem>>, vector<1x16x384xf32>
    %481 = vector.shape_cast %480 : vector<1x16x384xf32> to vector<16x384xf32>
    %482 = arith.mulf %467, %481 : vector<16x384xf32>
    %483 = arith.addf %462, %482 : vector<16x384xf32>
    %c23_294 = arith.constant 23 : index
    %c0_295 = arith.constant 0 : index
    %c0_296 = arith.constant 0 : index
    %484 = vector.load %arg5[%c23_294, %c0_295, %c0_296] : memref<25x16x384xf32, #tpu.memory_space<vmem>>, vector<1x16x384xf32>
    %485 = vector.shape_cast %484 : vector<1x16x384xf32> to vector<16x384xf32>
    %486 = arith.mulf %467, %485 : vector<16x384xf32>
    %487 = arith.addf %466, %486 : vector<16x384xf32>
    %c14_i32_297 = arith.constant 14 : i32
    %488 = tpu.dynamic_rotate %405 by %c14_i32_297 dim 0 : vector<16x384xf32>, i32 -> vector<16x384xf32>
    %c4_298 = arith.constant 4 : index
    %c0_299 = arith.constant 0 : index
    %c0_300 = arith.constant 0 : index
    %489 = vector.load %arg5[%c4_298, %c0_299, %c0_300] : memref<25x16x384xf32, #tpu.memory_space<vmem>>, vector<1x16x384xf32>
    %490 = vector.shape_cast %489 : vector<1x16x384xf32> to vector<16x384xf32>
    %491 = arith.mulf %488, %490 : vector<16x384xf32>
    %492 = arith.addf %471, %491 : vector<16x384xf32>
    %c9_301 = arith.constant 9 : index
    %c0_302 = arith.constant 0 : index
    %c0_303 = arith.constant 0 : index
    %493 = vector.load %arg5[%c9_301, %c0_302, %c0_303] : memref<25x16x384xf32, #tpu.memory_space<vmem>>, vector<1x16x384xf32>
    %494 = vector.shape_cast %493 : vector<1x16x384xf32> to vector<16x384xf32>
    %495 = arith.mulf %488, %494 : vector<16x384xf32>
    %496 = arith.addf %475, %495 : vector<16x384xf32>
    %c14_304 = arith.constant 14 : index
    %c0_305 = arith.constant 0 : index
    %c0_306 = arith.constant 0 : index
    %497 = vector.load %arg5[%c14_304, %c0_305, %c0_306] : memref<25x16x384xf32, #tpu.memory_space<vmem>>, vector<1x16x384xf32>
    %498 = vector.shape_cast %497 : vector<1x16x384xf32> to vector<16x384xf32>
    %499 = arith.mulf %488, %498 : vector<16x384xf32>
    %500 = arith.addf %479, %499 : vector<16x384xf32>
    %c19_307 = arith.constant 19 : index
    %c0_308 = arith.constant 0 : index
    %c0_309 = arith.constant 0 : index
    %501 = vector.load %arg5[%c19_307, %c0_308, %c0_309] : memref<25x16x384xf32, #tpu.memory_space<vmem>>, vector<1x16x384xf32>
    %502 = vector.shape_cast %501 : vector<1x16x384xf32> to vector<16x384xf32>
    %503 = arith.mulf %488, %502 : vector<16x384xf32>
    %504 = arith.addf %483, %503 : vector<16x384xf32>
    %c24_310 = arith.constant 24 : index
    %c0_311 = arith.constant 0 : index
    %c0_312 = arith.constant 0 : index
    %505 = vector.load %arg5[%c24_310, %c0_311, %c0_312] : memref<25x16x384xf32, #tpu.memory_space<vmem>>, vector<1x16x384xf32>
    %506 = vector.shape_cast %505 : vector<1x16x384xf32> to vector<16x384xf32>
    %507 = arith.mulf %488, %506 : vector<16x384xf32>
    %508 = arith.addf %487, %507 : vector<16x384xf32>
    %509 = vector.extract_strided_slice %508 {offsets = [0, 0], sizes = [14, 384], strides = [1, 1]} : vector<16x384xf32> to vector<14x384xf32>
    %c0_313 = arith.constant 0 : index
    %c0_314 = arith.constant 0 : index
    %c0_315 = arith.constant 0 : index
    %510 = vector.load %arg3[%c0_313, %c0_314, %c0_315] : memref<7x14x384xf32, #tpu.memory_space<vmem>>, vector<1x14x384xf32>
    %511 = vector.shape_cast %510 : vector<1x14x384xf32> to vector<14x384xf32>
    %512 = vector.shape_cast %509 : vector<14x384xf32> to vector<1x14x384xf32>
    tpu.vector_store %arg3[%c0_313, %c0_314, %c0_315], %512 {strides = array<i32>} : memref<7x14x384xf32, #tpu.memory_space<vmem>>, vector<1x14x384xf32>,
    %c5_316 = arith.constant 5 : index
    %c0_317 = arith.constant 0 : index
    %c0_318 = arith.constant 0 : index
    %513 = vector.load %arg4[%c5_316, %c0_317, %c0_318] : memref<11x16x384xf32, #tpu.memory_space<vmem>>, vector<1x16x384xf32>
    %514 = vector.shape_cast %513 : vector<1x16x384xf32> to vector<16x384xf32>
    %c2_i32_319 = arith.constant 2 : i32
    %515 = tpu.dynamic_rotate %514 by %c2_i32_319 dim 0 : vector<16x384xf32>, i32 -> vector<16x384xf32>
    %c0_320 = arith.constant 0 : index
    %c0_321 = arith.constant 0 : index
    %c0_322 = arith.constant 0 : index
    %516 = vector.load %arg5[%c0_320, %c0_321, %c0_322] : memref<25x16x384xf32, #tpu.memory_space<vmem>>, vector<1x16x384xf32>
    %517 = vector.shape_cast %516 : vector<1x16x384xf32> to vector<16x384xf32>
    %518 = arith.mulf %515, %517 : vector<16x384xf32>
    %c5_323 = arith.constant 5 : index
    %c0_324 = arith.constant 0 : index
    %c0_325 = arith.constant 0 : index
    %519 = vector.load %arg5[%c5_323, %c0_324, %c0_325] : memref<25x16x384xf32, #tpu.memory_space<vmem>>, vector<1x16x384xf32>
    %520 = vector.shape_cast %519 : vector<1x16x384xf32> to vector<16x384xf32>
    %521 = arith.mulf %515, %520 : vector<16x384xf32>
    %522 = arith.addf %492, %521 : vector<16x384xf32>
    %c10_326 = arith.constant 10 : index
    %c0_327 = arith.constant 0 : index
    %c0_328 = arith.constant 0 : index
    %523 = vector.load %arg5[%c10_326, %c0_327, %c0_328] : memref<25x16x384xf32, #tpu.memory_space<vmem>>, vector<1x16x384xf32>
    %524 = vector.shape_cast %523 : vector<1x16x384xf32> to vector<16x384xf32>
    %525 = arith.mulf %515, %524 : vector<16x384xf32>
    %526 = arith.addf %496, %525 : vector<16x384xf32>
    %c15_329 = arith.constant 15 : index
    %c0_330 = arith.constant 0 : index
    %c0_331 = arith.constant 0 : index
    %527 = vector.load %arg5[%c15_329, %c0_330, %c0_331] : memref<25x16x384xf32, #tpu.memory_space<vmem>>, vector<1x16x384xf32>
    %528 = vector.shape_cast %527 : vector<1x16x384xf32> to vector<16x384xf32>
    %529 = arith.mulf %515, %528 : vector<16x384xf32>
    %530 = arith.addf %500, %529 : vector<16x384xf32>
    %c20_332 = arith.constant 20 : index
    %c0_333 = arith.constant 0 : index
    %c0_334 = arith.constant 0 : index
    %531 = vector.load %arg5[%c20_332, %c0_333, %c0_334] : memref<25x16x384xf32, #tpu.memory_space<vmem>>, vector<1x16x384xf32>
    %532 = vector.shape_cast %531 : vector<1x16x384xf32> to vector<16x384xf32>
    %533 = arith.mulf %515, %532 : vector<16x384xf32>
    %534 = arith.addf %504, %533 : vector<16x384xf32>
    %c1_i32_335 = arith.constant 1 : i32
    %535 = tpu.dynamic_rotate %514 by %c1_i32_335 dim 0 : vector<16x384xf32>, i32 -> vector<16x384xf32>
    %c1_336 = arith.constant 1 : index
    %c0_337 = arith.constant 0 : index
    %c0_338 = arith.constant 0 : index
    %536 = vector.load %arg5[%c1_336, %c0_337, %c0_338] : memref<25x16x384xf32, #tpu.memory_space<vmem>>, vector<1x16x384xf32>
    %537 = vector.shape_cast %536 : vector<1x16x384xf32> to vector<16x384xf32>
    %538 = arith.mulf %535, %537 : vector<16x384xf32>
    %539 = arith.addf %518, %538 : vector<16x384xf32>
    %c6_339 = arith.constant 6 : index
    %c0_340 = arith.constant 0 : index
    %c0_341 = arith.constant 0 : index
    %540 = vector.load %arg5[%c6_339, %c0_340, %c0_341] : memref<25x16x384xf32, #tpu.memory_space<vmem>>, vector<1x16x384xf32>
    %541 = vector.shape_cast %540 : vector<1x16x384xf32> to vector<16x384xf32>
    %542 = arith.mulf %535, %541 : vector<16x384xf32>
    %543 = arith.addf %522, %542 : vector<16x384xf32>
    %c11_342 = arith.constant 11 : index
    %c0_343 = arith.constant 0 : index
    %c0_344 = arith.constant 0 : index
    %544 = vector.load %arg5[%c11_342, %c0_343, %c0_344] : memref<25x16x384xf32, #tpu.memory_space<vmem>>, vector<1x16x384xf32>
    %545 = vector.shape_cast %544 : vector<1x16x384xf32> to vector<16x384xf32>
    %546 = arith.mulf %535, %545 : vector<16x384xf32>
    %547 = arith.addf %526, %546 : vector<16x384xf32>
    %c16_345 = arith.constant 16 : index
    %c0_346 = arith.constant 0 : index
    %c0_347 = arith.constant 0 : index
    %548 = vector.load %arg5[%c16_345, %c0_346, %c0_347] : memref<25x16x384xf32, #tpu.memory_space<vmem>>, vector<1x16x384xf32>
    %549 = vector.shape_cast %548 : vector<1x16x384xf32> to vector<16x384xf32>
    %550 = arith.mulf %535, %549 : vector<16x384xf32>
    %551 = arith.addf %530, %550 : vector<16x384xf32>
    %c21_348 = arith.constant 21 : index
    %c0_349 = arith.constant 0 : index
    %c0_350 = arith.constant 0 : index
    %552 = vector.load %arg5[%c21_348, %c0_349, %c0_350] : memref<25x16x384xf32, #tpu.memory_space<vmem>>, vector<1x16x384xf32>
    %553 = vector.shape_cast %552 : vector<1x16x384xf32> to vector<16x384xf32>
    %554 = arith.mulf %535, %553 : vector<16x384xf32>
    %555 = arith.addf %534, %554 : vector<16x384xf32>
    %c2_351 = arith.constant 2 : index
    %c0_352 = arith.constant 0 : index
    %c0_353 = arith.constant 0 : index
    %556 = vector.load %arg5[%c2_351, %c0_352, %c0_353] : memref<25x16x384xf32, #tpu.memory_space<vmem>>, vector<1x16x384xf32>
    %557 = vector.shape_cast %556 : vector<1x16x384xf32> to vector<16x384xf32>
    %558 = arith.mulf %514, %557 : vector<16x384xf32>
    %559 = arith.addf %539, %558 : vector<16x384xf32>
    %c7_354 = arith.constant 7 : index
    %c0_355 = arith.constant 0 : index
    %c0_356 = arith.constant 0 : index
    %560 = vector.load %arg5[%c7_354, %c0_355, %c0_356] : memref<25x16x384xf32, #tpu.memory_space<vmem>>, vector<1x16x384xf32>
    %561 = vector.shape_cast %560 : vector<1x16x384xf32> to vector<16x384xf32>
    %562 = arith.mulf %514, %561 : vector<16x384xf32>
    %563 = arith.addf %543, %562 : vector<16x384xf32>
    %c12_357 = arith.constant 12 : index
    %c0_358 = arith.constant 0 : index
    %c0_359 = arith.constant 0 : index
    %564 = vector.load %arg5[%c12_357, %c0_358, %c0_359] : memref<25x16x384xf32, #tpu.memory_space<vmem>>, vector<1x16x384xf32>
    %565 = vector.shape_cast %564 : vector<1x16x384xf32> to vector<16x384xf32>
    %566 = arith.mulf %514, %565 : vector<16x384xf32>
    %567 = arith.addf %547, %566 : vector<16x384xf32>
    %c17_360 = arith.constant 17 : index
    %c0_361 = arith.constant 0 : index
    %c0_362 = arith.constant 0 : index
    %568 = vector.load %arg5[%c17_360, %c0_361, %c0_362] : memref<25x16x384xf32, #tpu.memory_space<vmem>>, vector<1x16x384xf32>
    %569 = vector.shape_cast %568 : vector<1x16x384xf32> to vector<16x384xf32>
    %570 = arith.mulf %514, %569 : vector<16x384xf32>
    %571 = arith.addf %551, %570 : vector<16x384xf32>
    %c22_363 = arith.constant 22 : index
    %c0_364 = arith.constant 0 : index
    %c0_365 = arith.constant 0 : index
    %572 = vector.load %arg5[%c22_363, %c0_364, %c0_365] : memref<25x16x384xf32, #tpu.memory_space<vmem>>, vector<1x16x384xf32>
    %573 = vector.shape_cast %572 : vector<1x16x384xf32> to vector<16x384xf32>
    %574 = arith.mulf %514, %573 : vector<16x384xf32>
    %575 = arith.addf %555, %574 : vector<16x384xf32>
    %c15_i32_366 = arith.constant 15 : i32
    %576 = tpu.dynamic_rotate %514 by %c15_i32_366 dim 0 : vector<16x384xf32>, i32 -> vector<16x384xf32>
    %c3_367 = arith.constant 3 : index
    %c0_368 = arith.constant 0 : index
    %c0_369 = arith.constant 0 : index
    %577 = vector.load %arg5[%c3_367, %c0_368, %c0_369] : memref<25x16x384xf32, #tpu.memory_space<vmem>>, vector<1x16x384xf32>
    %578 = vector.shape_cast %577 : vector<1x16x384xf32> to vector<16x384xf32>
    %579 = arith.mulf %576, %578 : vector<16x384xf32>
    %580 = arith.addf %559, %579 : vector<16x384xf32>
    %c8_370 = arith.constant 8 : index
    %c0_371 = arith.constant 0 : index
    %c0_372 = arith.constant 0 : index
    %581 = vector.load %arg5[%c8_370, %c0_371, %c0_372] : memref<25x16x384xf32, #tpu.memory_space<vmem>>, vector<1x16x384xf32>
    %582 = vector.shape_cast %581 : vector<1x16x384xf32> to vector<16x384xf32>
    %583 = arith.mulf %576, %582 : vector<16x384xf32>
    %584 = arith.addf %563, %583 : vector<16x384xf32>
    %c13_373 = arith.constant 13 : index
    %c0_374 = arith.constant 0 : index
    %c0_375 = arith.constant 0 : index
    %585 = vector.load %arg5[%c13_373, %c0_374, %c0_375] : memref<25x16x384xf32, #tpu.memory_space<vmem>>, vector<1x16x384xf32>
    %586 = vector.shape_cast %585 : vector<1x16x384xf32> to vector<16x384xf32>
    %587 = arith.mulf %576, %586 : vector<16x384xf32>
    %588 = arith.addf %567, %587 : vector<16x384xf32>
    %c18_376 = arith.constant 18 : index
    %c0_377 = arith.constant 0 : index
    %c0_378 = arith.constant 0 : index
    %589 = vector.load %arg5[%c18_376, %c0_377, %c0_378] : memref<25x16x384xf32, #tpu.memory_space<vmem>>, vector<1x16x384xf32>
    %590 = vector.shape_cast %589 : vector<1x16x384xf32> to vector<16x384xf32>
    %591 = arith.mulf %576, %590 : vector<16x384xf32>
    %592 = arith.addf %571, %591 : vector<16x384xf32>
    %c23_379 = arith.constant 23 : index
    %c0_380 = arith.constant 0 : index
    %c0_381 = arith.constant 0 : index
    %593 = vector.load %arg5[%c23_379, %c0_380, %c0_381] : memref<25x16x384xf32, #tpu.memory_space<vmem>>, vector<1x16x384xf32>
    %594 = vector.shape_cast %593 : vector<1x16x384xf32> to vector<16x384xf32>
    %595 = arith.mulf %576, %594 : vector<16x384xf32>
    %596 = arith.addf %575, %595 : vector<16x384xf32>
    %c14_i32_382 = arith.constant 14 : i32
    %597 = tpu.dynamic_rotate %514 by %c14_i32_382 dim 0 : vector<16x384xf32>, i32 -> vector<16x384xf32>
    %c4_383 = arith.constant 4 : index
    %c0_384 = arith.constant 0 : index
    %c0_385 = arith.constant 0 : index
    %598 = vector.load %arg5[%c4_383, %c0_384, %c0_385] : memref<25x16x384xf32, #tpu.memory_space<vmem>>, vector<1x16x384xf32>
    %599 = vector.shape_cast %598 : vector<1x16x384xf32> to vector<16x384xf32>
    %600 = arith.mulf %597, %599 : vector<16x384xf32>
    %601 = arith.addf %580, %600 : vector<16x384xf32>
    %c9_386 = arith.constant 9 : index
    %c0_387 = arith.constant 0 : index
    %c0_388 = arith.constant 0 : index
    %602 = vector.load %arg5[%c9_386, %c0_387, %c0_388] : memref<25x16x384xf32, #tpu.memory_space<vmem>>, vector<1x16x384xf32>
    %603 = vector.shape_cast %602 : vector<1x16x384xf32> to vector<16x384xf32>
    %604 = arith.mulf %597, %603 : vector<16x384xf32>
    %605 = arith.addf %584, %604 : vector<16x384xf32>
    %c14_389 = arith.constant 14 : index
    %c0_390 = arith.constant 0 : index
    %c0_391 = arith.constant 0 : index
    %606 = vector.load %arg5[%c14_389, %c0_390, %c0_391] : memref<25x16x384xf32, #tpu.memory_space<vmem>>, vector<1x16x384xf32>
    %607 = vector.shape_cast %606 : vector<1x16x384xf32> to vector<16x384xf32>
    %608 = arith.mulf %597, %607 : vector<16x384xf32>
    %609 = arith.addf %588, %608 : vector<16x384xf32>
    %c19_392 = arith.constant 19 : index
    %c0_393 = arith.constant 0 : index
    %c0_394 = arith.constant 0 : index
    %610 = vector.load %arg5[%c19_392, %c0_393, %c0_394] : memref<25x16x384xf32, #tpu.memory_space<vmem>>, vector<1x16x384xf32>
    %611 = vector.shape_cast %610 : vector<1x16x384xf32> to vector<16x384xf32>
    %612 = arith.mulf %597, %611 : vector<16x384xf32>
    %613 = arith.addf %592, %612 : vector<16x384xf32>
    %c24_395 = arith.constant 24 : index
    %c0_396 = arith.constant 0 : index
    %c0_397 = arith.constant 0 : index
    %614 = vector.load %arg5[%c24_395, %c0_396, %c0_397] : memref<25x16x384xf32, #tpu.memory_space<vmem>>, vector<1x16x384xf32>
    %615 = vector.shape_cast %614 : vector<1x16x384xf32> to vector<16x384xf32>
    %616 = arith.mulf %597, %615 : vector<16x384xf32>
    %617 = arith.addf %596, %616 : vector<16x384xf32>
    %618 = vector.extract_strided_slice %617 {offsets = [0, 0], sizes = [14, 384], strides = [1, 1]} : vector<16x384xf32> to vector<14x384xf32>
    %c1_398 = arith.constant 1 : index
    %c0_399 = arith.constant 0 : index
    %c0_400 = arith.constant 0 : index
    %619 = vector.load %arg3[%c1_398, %c0_399, %c0_400] : memref<7x14x384xf32, #tpu.memory_space<vmem>>, vector<1x14x384xf32>
    %620 = vector.shape_cast %619 : vector<1x14x384xf32> to vector<14x384xf32>
    %621 = vector.shape_cast %618 : vector<14x384xf32> to vector<1x14x384xf32>
    tpu.vector_store %arg3[%c1_398, %c0_399, %c0_400], %621 {strides = array<i32>} : memref<7x14x384xf32, #tpu.memory_space<vmem>>, vector<1x14x384xf32>,
    %c6_401 = arith.constant 6 : index
    %c0_402 = arith.constant 0 : index
    %c0_403 = arith.constant 0 : index
    %622 = vector.load %arg4[%c6_401, %c0_402, %c0_403] : memref<11x16x384xf32, #tpu.memory_space<vmem>>, vector<1x16x384xf32>
    %623 = vector.shape_cast %622 : vector<1x16x384xf32> to vector<16x384xf32>
    %c2_i32_404 = arith.constant 2 : i32
    %624 = tpu.dynamic_rotate %623 by %c2_i32_404 dim 0 : vector<16x384xf32>, i32 -> vector<16x384xf32>
    %c0_405 = arith.constant 0 : index
    %c0_406 = arith.constant 0 : index
    %c0_407 = arith.constant 0 : index
    %625 = vector.load %arg5[%c0_405, %c0_406, %c0_407] : memref<25x16x384xf32, #tpu.memory_space<vmem>>, vector<1x16x384xf32>
    %626 = vector.shape_cast %625 : vector<1x16x384xf32> to vector<16x384xf32>
    %627 = arith.mulf %624, %626 : vector<16x384xf32>
    %c5_408 = arith.constant 5 : index
    %c0_409 = arith.constant 0 : index
    %c0_410 = arith.constant 0 : index
    %628 = vector.load %arg5[%c5_408, %c0_409, %c0_410] : memref<25x16x384xf32, #tpu.memory_space<vmem>>, vector<1x16x384xf32>
    %629 = vector.shape_cast %628 : vector<1x16x384xf32> to vector<16x384xf32>
    %630 = arith.mulf %624, %629 : vector<16x384xf32>
    %631 = arith.addf %601, %630 : vector<16x384xf32>
    %c10_411 = arith.constant 10 : index
    %c0_412 = arith.constant 0 : index
    %c0_413 = arith.constant 0 : index
    %632 = vector.load %arg5[%c10_411, %c0_412, %c0_413] : memref<25x16x384xf32, #tpu.memory_space<vmem>>, vector<1x16x384xf32>
    %633 = vector.shape_cast %632 : vector<1x16x384xf32> to vector<16x384xf32>
    %634 = arith.mulf %624, %633 : vector<16x384xf32>
    %635 = arith.addf %605, %634 : vector<16x384xf32>
    %c15_414 = arith.constant 15 : index
    %c0_415 = arith.constant 0 : index
    %c0_416 = arith.constant 0 : index
    %636 = vector.load %arg5[%c15_414, %c0_415, %c0_416] : memref<25x16x384xf32, #tpu.memory_space<vmem>>, vector<1x16x384xf32>
    %637 = vector.shape_cast %636 : vector<1x16x384xf32> to vector<16x384xf32>
    %638 = arith.mulf %624, %637 : vector<16x384xf32>
    %639 = arith.addf %609, %638 : vector<16x384xf32>
    %c20_417 = arith.constant 20 : index
    %c0_418 = arith.constant 0 : index
    %c0_419 = arith.constant 0 : index
    %640 = vector.load %arg5[%c20_417, %c0_418, %c0_419] : memref<25x16x384xf32, #tpu.memory_space<vmem>>, vector<1x16x384xf32>
    %641 = vector.shape_cast %640 : vector<1x16x384xf32> to vector<16x384xf32>
    %642 = arith.mulf %624, %641 : vector<16x384xf32>
    %643 = arith.addf %613, %642 : vector<16x384xf32>
    %c1_i32_420 = arith.constant 1 : i32
    %644 = tpu.dynamic_rotate %623 by %c1_i32_420 dim 0 : vector<16x384xf32>, i32 -> vector<16x384xf32>
    %c1_421 = arith.constant 1 : index
    %c0_422 = arith.constant 0 : index
    %c0_423 = arith.constant 0 : index
    %645 = vector.load %arg5[%c1_421, %c0_422, %c0_423] : memref<25x16x384xf32, #tpu.memory_space<vmem>>, vector<1x16x384xf32>
    %646 = vector.shape_cast %645 : vector<1x16x384xf32> to vector<16x384xf32>
    %647 = arith.mulf %644, %646 : vector<16x384xf32>
    %648 = arith.addf %627, %647 : vector<16x384xf32>
    %c6_424 = arith.constant 6 : index
    %c0_425 = arith.constant 0 : index
    %c0_426 = arith.constant 0 : index
    %649 = vector.load %arg5[%c6_424, %c0_425, %c0_426] : memref<25x16x384xf32, #tpu.memory_space<vmem>>, vector<1x16x384xf32>
    %650 = vector.shape_cast %649 : vector<1x16x384xf32> to vector<16x384xf32>
    %651 = arith.mulf %644, %650 : vector<16x384xf32>
    %652 = arith.addf %631, %651 : vector<16x384xf32>
    %c11_427 = arith.constant 11 : index
    %c0_428 = arith.constant 0 : index
    %c0_429 = arith.constant 0 : index
    %653 = vector.load %arg5[%c11_427, %c0_428, %c0_429] : memref<25x16x384xf32, #tpu.memory_space<vmem>>, vector<1x16x384xf32>
    %654 = vector.shape_cast %653 : vector<1x16x384xf32> to vector<16x384xf32>
    %655 = arith.mulf %644, %654 : vector<16x384xf32>
    %656 = arith.addf %635, %655 : vector<16x384xf32>
    %c16_430 = arith.constant 16 : index
    %c0_431 = arith.constant 0 : index
    %c0_432 = arith.constant 0 : index
    %657 = vector.load %arg5[%c16_430, %c0_431, %c0_432] : memref<25x16x384xf32, #tpu.memory_space<vmem>>, vector<1x16x384xf32>
    %658 = vector.shape_cast %657 : vector<1x16x384xf32> to vector<16x384xf32>
    %659 = arith.mulf %644, %658 : vector<16x384xf32>
    %660 = arith.addf %639, %659 : vector<16x384xf32>
    %c21_433 = arith.constant 21 : index
    %c0_434 = arith.constant 0 : index
    %c0_435 = arith.constant 0 : index
    %661 = vector.load %arg5[%c21_433, %c0_434, %c0_435] : memref<25x16x384xf32, #tpu.memory_space<vmem>>, vector<1x16x384xf32>
    %662 = vector.shape_cast %661 : vector<1x16x384xf32> to vector<16x384xf32>
    %663 = arith.mulf %644, %662 : vector<16x384xf32>
    %664 = arith.addf %643, %663 : vector<16x384xf32>
    %c2_436 = arith.constant 2 : index
    %c0_437 = arith.constant 0 : index
    %c0_438 = arith.constant 0 : index
    %665 = vector.load %arg5[%c2_436, %c0_437, %c0_438] : memref<25x16x384xf32, #tpu.memory_space<vmem>>, vector<1x16x384xf32>
    %666 = vector.shape_cast %665 : vector<1x16x384xf32> to vector<16x384xf32>
    %667 = arith.mulf %623, %666 : vector<16x384xf32>
    %668 = arith.addf %648, %667 : vector<16x384xf32>
    %c7_439 = arith.constant 7 : index
    %c0_440 = arith.constant 0 : index
    %c0_441 = arith.constant 0 : index
    %669 = vector.load %arg5[%c7_439, %c0_440, %c0_441] : memref<25x16x384xf32, #tpu.memory_space<vmem>>, vector<1x16x384xf32>
    %670 = vector.shape_cast %669 : vector<1x16x384xf32> to vector<16x384xf32>
    %671 = arith.mulf %623, %670 : vector<16x384xf32>
    %672 = arith.addf %652, %671 : vector<16x384xf32>
    %c12_442 = arith.constant 12 : index
    %c0_443 = arith.constant 0 : index
    %c0_444 = arith.constant 0 : index
    %673 = vector.load %arg5[%c12_442, %c0_443, %c0_444] : memref<25x16x384xf32, #tpu.memory_space<vmem>>, vector<1x16x384xf32>
    %674 = vector.shape_cast %673 : vector<1x16x384xf32> to vector<16x384xf32>
    %675 = arith.mulf %623, %674 : vector<16x384xf32>
    %676 = arith.addf %656, %675 : vector<16x384xf32>
    %c17_445 = arith.constant 17 : index
    %c0_446 = arith.constant 0 : index
    %c0_447 = arith.constant 0 : index
    %677 = vector.load %arg5[%c17_445, %c0_446, %c0_447] : memref<25x16x384xf32, #tpu.memory_space<vmem>>, vector<1x16x384xf32>
    %678 = vector.shape_cast %677 : vector<1x16x384xf32> to vector<16x384xf32>
    %679 = arith.mulf %623, %678 : vector<16x384xf32>
    %680 = arith.addf %660, %679 : vector<16x384xf32>
    %c22_448 = arith.constant 22 : index
    %c0_449 = arith.constant 0 : index
    %c0_450 = arith.constant 0 : index
    %681 = vector.load %arg5[%c22_448, %c0_449, %c0_450] : memref<25x16x384xf32, #tpu.memory_space<vmem>>, vector<1x16x384xf32>
    %682 = vector.shape_cast %681 : vector<1x16x384xf32> to vector<16x384xf32>
    %683 = arith.mulf %623, %682 : vector<16x384xf32>
    %684 = arith.addf %664, %683 : vector<16x384xf32>
    %c15_i32_451 = arith.constant 15 : i32
    %685 = tpu.dynamic_rotate %623 by %c15_i32_451 dim 0 : vector<16x384xf32>, i32 -> vector<16x384xf32>
    %c3_452 = arith.constant 3 : index
    %c0_453 = arith.constant 0 : index
    %c0_454 = arith.constant 0 : index
    %686 = vector.load %arg5[%c3_452, %c0_453, %c0_454] : memref<25x16x384xf32, #tpu.memory_space<vmem>>, vector<1x16x384xf32>
    %687 = vector.shape_cast %686 : vector<1x16x384xf32> to vector<16x384xf32>
    %688 = arith.mulf %685, %687 : vector<16x384xf32>
    %689 = arith.addf %668, %688 : vector<16x384xf32>
    %c8_455 = arith.constant 8 : index
    %c0_456 = arith.constant 0 : index
    %c0_457 = arith.constant 0 : index
    %690 = vector.load %arg5[%c8_455, %c0_456, %c0_457] : memref<25x16x384xf32, #tpu.memory_space<vmem>>, vector<1x16x384xf32>
    %691 = vector.shape_cast %690 : vector<1x16x384xf32> to vector<16x384xf32>
    %692 = arith.mulf %685, %691 : vector<16x384xf32>
    %693 = arith.addf %672, %692 : vector<16x384xf32>
    %c13_458 = arith.constant 13 : index
    %c0_459 = arith.constant 0 : index
    %c0_460 = arith.constant 0 : index
    %694 = vector.load %arg5[%c13_458, %c0_459, %c0_460] : memref<25x16x384xf32, #tpu.memory_space<vmem>>, vector<1x16x384xf32>
    %695 = vector.shape_cast %694 : vector<1x16x384xf32> to vector<16x384xf32>
    %696 = arith.mulf %685, %695 : vector<16x384xf32>
    %697 = arith.addf %676, %696 : vector<16x384xf32>
    %c18_461 = arith.constant 18 : index
    %c0_462 = arith.constant 0 : index
    %c0_463 = arith.constant 0 : index
    %698 = vector.load %arg5[%c18_461, %c0_462, %c0_463] : memref<25x16x384xf32, #tpu.memory_space<vmem>>, vector<1x16x384xf32>
    %699 = vector.shape_cast %698 : vector<1x16x384xf32> to vector<16x384xf32>
    %700 = arith.mulf %685, %699 : vector<16x384xf32>
    %701 = arith.addf %680, %700 : vector<16x384xf32>
    %c23_464 = arith.constant 23 : index
    %c0_465 = arith.constant 0 : index
    %c0_466 = arith.constant 0 : index
    %702 = vector.load %arg5[%c23_464, %c0_465, %c0_466] : memref<25x16x384xf32, #tpu.memory_space<vmem>>, vector<1x16x384xf32>
    %703 = vector.shape_cast %702 : vector<1x16x384xf32> to vector<16x384xf32>
    %704 = arith.mulf %685, %703 : vector<16x384xf32>
    %705 = arith.addf %684, %704 : vector<16x384xf32>
    %c14_i32_467 = arith.constant 14 : i32
    %706 = tpu.dynamic_rotate %623 by %c14_i32_467 dim 0 : vector<16x384xf32>, i32 -> vector<16x384xf32>
    %c4_468 = arith.constant 4 : index
    %c0_469 = arith.constant 0 : index
    %c0_470 = arith.constant 0 : index
    %707 = vector.load %arg5[%c4_468, %c0_469, %c0_470] : memref<25x16x384xf32, #tpu.memory_space<vmem>>, vector<1x16x384xf32>
    %708 = vector.shape_cast %707 : vector<1x16x384xf32> to vector<16x384xf32>
    %709 = arith.mulf %706, %708 : vector<16x384xf32>
    %710 = arith.addf %689, %709 : vector<16x384xf32>
    %c9_471 = arith.constant 9 : index
    %c0_472 = arith.constant 0 : index
    %c0_473 = arith.constant 0 : index
    %711 = vector.load %arg5[%c9_471, %c0_472, %c0_473] : memref<25x16x384xf32, #tpu.memory_space<vmem>>, vector<1x16x384xf32>
    %712 = vector.shape_cast %711 : vector<1x16x384xf32> to vector<16x384xf32>
    %713 = arith.mulf %706, %712 : vector<16x384xf32>
    %714 = arith.addf %693, %713 : vector<16x384xf32>
    %c14_474 = arith.constant 14 : index
    %c0_475 = arith.constant 0 : index
    %c0_476 = arith.constant 0 : index
    %715 = vector.load %arg5[%c14_474, %c0_475, %c0_476] : memref<25x16x384xf32, #tpu.memory_space<vmem>>, vector<1x16x384xf32>
    %716 = vector.shape_cast %715 : vector<1x16x384xf32> to vector<16x384xf32>
    %717 = arith.mulf %706, %716 : vector<16x384xf32>
    %718 = arith.addf %697, %717 : vector<16x384xf32>
    %c19_477 = arith.constant 19 : index
    %c0_478 = arith.constant 0 : index
    %c0_479 = arith.constant 0 : index
    %719 = vector.load %arg5[%c19_477, %c0_478, %c0_479] : memref<25x16x384xf32, #tpu.memory_space<vmem>>, vector<1x16x384xf32>
    %720 = vector.shape_cast %719 : vector<1x16x384xf32> to vector<16x384xf32>
    %721 = arith.mulf %706, %720 : vector<16x384xf32>
    %722 = arith.addf %701, %721 : vector<16x384xf32>
    %c24_480 = arith.constant 24 : index
    %c0_481 = arith.constant 0 : index
    %c0_482 = arith.constant 0 : index
    %723 = vector.load %arg5[%c24_480, %c0_481, %c0_482] : memref<25x16x384xf32, #tpu.memory_space<vmem>>, vector<1x16x384xf32>
    %724 = vector.shape_cast %723 : vector<1x16x384xf32> to vector<16x384xf32>
    %725 = arith.mulf %706, %724 : vector<16x384xf32>
    %726 = arith.addf %705, %725 : vector<16x384xf32>
    %727 = vector.extract_strided_slice %726 {offsets = [0, 0], sizes = [14, 384], strides = [1, 1]} : vector<16x384xf32> to vector<14x384xf32>
    %c2_483 = arith.constant 2 : index
    %c0_484 = arith.constant 0 : index
    %c0_485 = arith.constant 0 : index
    %728 = vector.load %arg3[%c2_483, %c0_484, %c0_485] : memref<7x14x384xf32, #tpu.memory_space<vmem>>, vector<1x14x384xf32>
    %729 = vector.shape_cast %728 : vector<1x14x384xf32> to vector<14x384xf32>
    %730 = vector.shape_cast %727 : vector<14x384xf32> to vector<1x14x384xf32>
    tpu.vector_store %arg3[%c2_483, %c0_484, %c0_485], %730 {strides = array<i32>} : memref<7x14x384xf32, #tpu.memory_space<vmem>>, vector<1x14x384xf32>,
    %c7_486 = arith.constant 7 : index
    %c0_487 = arith.constant 0 : index
    %c0_488 = arith.constant 0 : index
    %731 = vector.load %arg4[%c7_486, %c0_487, %c0_488] : memref<11x16x384xf32, #tpu.memory_space<vmem>>, vector<1x16x384xf32>
    %732 = vector.shape_cast %731 : vector<1x16x384xf32> to vector<16x384xf32>
    %c2_i32_489 = arith.constant 2 : i32
    %733 = tpu.dynamic_rotate %732 by %c2_i32_489 dim 0 : vector<16x384xf32>, i32 -> vector<16x384xf32>
    %c5_490 = arith.constant 5 : index
    %c0_491 = arith.constant 0 : index
    %c0_492 = arith.constant 0 : index
    %734 = vector.load %arg5[%c5_490, %c0_491, %c0_492] : memref<25x16x384xf32, #tpu.memory_space<vmem>>, vector<1x16x384xf32>
    %735 = vector.shape_cast %734 : vector<1x16x384xf32> to vector<16x384xf32>
    %736 = arith.mulf %733, %735 : vector<16x384xf32>
    %737 = arith.addf %710, %736 : vector<16x384xf32>
    %c10_493 = arith.constant 10 : index
    %c0_494 = arith.constant 0 : index
    %c0_495 = arith.constant 0 : index
    %738 = vector.load %arg5[%c10_493, %c0_494, %c0_495] : memref<25x16x384xf32, #tpu.memory_space<vmem>>, vector<1x16x384xf32>
    %739 = vector.shape_cast %738 : vector<1x16x384xf32> to vector<16x384xf32>
    %740 = arith.mulf %733, %739 : vector<16x384xf32>
    %741 = arith.addf %714, %740 : vector<16x384xf32>
    %c15_496 = arith.constant 15 : index
    %c0_497 = arith.constant 0 : index
    %c0_498 = arith.constant 0 : index
    %742 = vector.load %arg5[%c15_496, %c0_497, %c0_498] : memref<25x16x384xf32, #tpu.memory_space<vmem>>, vector<1x16x384xf32>
    %743 = vector.shape_cast %742 : vector<1x16x384xf32> to vector<16x384xf32>
    %744 = arith.mulf %733, %743 : vector<16x384xf32>
    %745 = arith.addf %718, %744 : vector<16x384xf32>
    %c20_499 = arith.constant 20 : index
    %c0_500 = arith.constant 0 : index
    %c0_501 = arith.constant 0 : index
    %746 = vector.load %arg5[%c20_499, %c0_500, %c0_501] : memref<25x16x384xf32, #tpu.memory_space<vmem>>, vector<1x16x384xf32>
    %747 = vector.shape_cast %746 : vector<1x16x384xf32> to vector<16x384xf32>
    %748 = arith.mulf %733, %747 : vector<16x384xf32>
    %749 = arith.addf %722, %748 : vector<16x384xf32>
    %c1_i32_502 = arith.constant 1 : i32
    %750 = tpu.dynamic_rotate %732 by %c1_i32_502 dim 0 : vector<16x384xf32>, i32 -> vector<16x384xf32>
    %c6_503 = arith.constant 6 : index
    %c0_504 = arith.constant 0 : index
    %c0_505 = arith.constant 0 : index
    %751 = vector.load %arg5[%c6_503, %c0_504, %c0_505] : memref<25x16x384xf32, #tpu.memory_space<vmem>>, vector<1x16x384xf32>
    %752 = vector.shape_cast %751 : vector<1x16x384xf32> to vector<16x384xf32>
    %753 = arith.mulf %750, %752 : vector<16x384xf32>
    %754 = arith.addf %737, %753 : vector<16x384xf32>
    %c11_506 = arith.constant 11 : index
    %c0_507 = arith.constant 0 : index
    %c0_508 = arith.constant 0 : index
    %755 = vector.load %arg5[%c11_506, %c0_507, %c0_508] : memref<25x16x384xf32, #tpu.memory_space<vmem>>, vector<1x16x384xf32>
    %756 = vector.shape_cast %755 : vector<1x16x384xf32> to vector<16x384xf32>
    %757 = arith.mulf %750, %756 : vector<16x384xf32>
    %758 = arith.addf %741, %757 : vector<16x384xf32>
    %c16_509 = arith.constant 16 : index
    %c0_510 = arith.constant 0 : index
    %c0_511 = arith.constant 0 : index
    %759 = vector.load %arg5[%c16_509, %c0_510, %c0_511] : memref<25x16x384xf32, #tpu.memory_space<vmem>>, vector<1x16x384xf32>
    %760 = vector.shape_cast %759 : vector<1x16x384xf32> to vector<16x384xf32>
    %761 = arith.mulf %750, %760 : vector<16x384xf32>
    %762 = arith.addf %745, %761 : vector<16x384xf32>
    %c21_512 = arith.constant 21 : index
    %c0_513 = arith.constant 0 : index
    %c0_514 = arith.constant 0 : index
    %763 = vector.load %arg5[%c21_512, %c0_513, %c0_514] : memref<25x16x384xf32, #tpu.memory_space<vmem>>, vector<1x16x384xf32>
    %764 = vector.shape_cast %763 : vector<1x16x384xf32> to vector<16x384xf32>
    %765 = arith.mulf %750, %764 : vector<16x384xf32>
    %766 = arith.addf %749, %765 : vector<16x384xf32>
    %c7_515 = arith.constant 7 : index
    %c0_516 = arith.constant 0 : index
    %c0_517 = arith.constant 0 : index
    %767 = vector.load %arg5[%c7_515, %c0_516, %c0_517] : memref<25x16x384xf32, #tpu.memory_space<vmem>>, vector<1x16x384xf32>
    %768 = vector.shape_cast %767 : vector<1x16x384xf32> to vector<16x384xf32>
    %769 = arith.mulf %732, %768 : vector<16x384xf32>
    %770 = arith.addf %754, %769 : vector<16x384xf32>
    %c12_518 = arith.constant 12 : index
    %c0_519 = arith.constant 0 : index
    %c0_520 = arith.constant 0 : index
    %771 = vector.load %arg5[%c12_518, %c0_519, %c0_520] : memref<25x16x384xf32, #tpu.memory_space<vmem>>, vector<1x16x384xf32>
    %772 = vector.shape_cast %771 : vector<1x16x384xf32> to vector<16x384xf32>
    %773 = arith.mulf %732, %772 : vector<16x384xf32>
    %774 = arith.addf %758, %773 : vector<16x384xf32>
    %c17_521 = arith.constant 17 : index
    %c0_522 = arith.constant 0 : index
    %c0_523 = arith.constant 0 : index
    %775 = vector.load %arg5[%c17_521, %c0_522, %c0_523] : memref<25x16x384xf32, #tpu.memory_space<vmem>>, vector<1x16x384xf32>
    %776 = vector.shape_cast %775 : vector<1x16x384xf32> to vector<16x384xf32>
    %777 = arith.mulf %732, %776 : vector<16x384xf32>
    %778 = arith.addf %762, %777 : vector<16x384xf32>
    %c22_524 = arith.constant 22 : index
    %c0_525 = arith.constant 0 : index
    %c0_526 = arith.constant 0 : index
    %779 = vector.load %arg5[%c22_524, %c0_525, %c0_526] : memref<25x16x384xf32, #tpu.memory_space<vmem>>, vector<1x16x384xf32>
    %780 = vector.shape_cast %779 : vector<1x16x384xf32> to vector<16x384xf32>
    %781 = arith.mulf %732, %780 : vector<16x384xf32>
    %782 = arith.addf %766, %781 : vector<16x384xf32>
    %c15_i32_527 = arith.constant 15 : i32
    %783 = tpu.dynamic_rotate %732 by %c15_i32_527 dim 0 : vector<16x384xf32>, i32 -> vector<16x384xf32>
    %c8_528 = arith.constant 8 : index
    %c0_529 = arith.constant 0 : index
    %c0_530 = arith.constant 0 : index
    %784 = vector.load %arg5[%c8_528, %c0_529, %c0_530] : memref<25x16x384xf32, #tpu.memory_space<vmem>>, vector<1x16x384xf32>
    %785 = vector.shape_cast %784 : vector<1x16x384xf32> to vector<16x384xf32>
    %786 = arith.mulf %783, %785 : vector<16x384xf32>
    %787 = arith.addf %770, %786 : vector<16x384xf32>
    %c13_531 = arith.constant 13 : index
    %c0_532 = arith.constant 0 : index
    %c0_533 = arith.constant 0 : index
    %788 = vector.load %arg5[%c13_531, %c0_532, %c0_533] : memref<25x16x384xf32, #tpu.memory_space<vmem>>, vector<1x16x384xf32>
    %789 = vector.shape_cast %788 : vector<1x16x384xf32> to vector<16x384xf32>
    %790 = arith.mulf %783, %789 : vector<16x384xf32>
    %791 = arith.addf %774, %790 : vector<16x384xf32>
    %c18_534 = arith.constant 18 : index
    %c0_535 = arith.constant 0 : index
    %c0_536 = arith.constant 0 : index
    %792 = vector.load %arg5[%c18_534, %c0_535, %c0_536] : memref<25x16x384xf32, #tpu.memory_space<vmem>>, vector<1x16x384xf32>
    %793 = vector.shape_cast %792 : vector<1x16x384xf32> to vector<16x384xf32>
    %794 = arith.mulf %783, %793 : vector<16x384xf32>
    %795 = arith.addf %778, %794 : vector<16x384xf32>
    %c23_537 = arith.constant 23 : index
    %c0_538 = arith.constant 0 : index
    %c0_539 = arith.constant 0 : index
    %796 = vector.load %arg5[%c23_537, %c0_538, %c0_539] : memref<25x16x384xf32, #tpu.memory_space<vmem>>, vector<1x16x384xf32>
    %797 = vector.shape_cast %796 : vector<1x16x384xf32> to vector<16x384xf32>
    %798 = arith.mulf %783, %797 : vector<16x384xf32>
    %799 = arith.addf %782, %798 : vector<16x384xf32>
    %c14_i32_540 = arith.constant 14 : i32
    %800 = tpu.dynamic_rotate %732 by %c14_i32_540 dim 0 : vector<16x384xf32>, i32 -> vector<16x384xf32>
    %c9_541 = arith.constant 9 : index
    %c0_542 = arith.constant 0 : index
    %c0_543 = arith.constant 0 : index
    %801 = vector.load %arg5[%c9_541, %c0_542, %c0_543] : memref<25x16x384xf32, #tpu.memory_space<vmem>>, vector<1x16x384xf32>
    %802 = vector.shape_cast %801 : vector<1x16x384xf32> to vector<16x384xf32>
    %803 = arith.mulf %800, %802 : vector<16x384xf32>
    %804 = arith.addf %787, %803 : vector<16x384xf32>
    %c14_544 = arith.constant 14 : index
    %c0_545 = arith.constant 0 : index
    %c0_546 = arith.constant 0 : index
    %805 = vector.load %arg5[%c14_544, %c0_545, %c0_546] : memref<25x16x384xf32, #tpu.memory_space<vmem>>, vector<1x16x384xf32>
    %806 = vector.shape_cast %805 : vector<1x16x384xf32> to vector<16x384xf32>
    %807 = arith.mulf %800, %806 : vector<16x384xf32>
    %808 = arith.addf %791, %807 : vector<16x384xf32>
    %c19_547 = arith.constant 19 : index
    %c0_548 = arith.constant 0 : index
    %c0_549 = arith.constant 0 : index
    %809 = vector.load %arg5[%c19_547, %c0_548, %c0_549] : memref<25x16x384xf32, #tpu.memory_space<vmem>>, vector<1x16x384xf32>
    %810 = vector.shape_cast %809 : vector<1x16x384xf32> to vector<16x384xf32>
    %811 = arith.mulf %800, %810 : vector<16x384xf32>
    %812 = arith.addf %795, %811 : vector<16x384xf32>
    %c24_550 = arith.constant 24 : index
    %c0_551 = arith.constant 0 : index
    %c0_552 = arith.constant 0 : index
    %813 = vector.load %arg5[%c24_550, %c0_551, %c0_552] : memref<25x16x384xf32, #tpu.memory_space<vmem>>, vector<1x16x384xf32>
    %814 = vector.shape_cast %813 : vector<1x16x384xf32> to vector<16x384xf32>
    %815 = arith.mulf %800, %814 : vector<16x384xf32>
    %816 = arith.addf %799, %815 : vector<16x384xf32>
    %817 = vector.extract_strided_slice %816 {offsets = [0, 0], sizes = [14, 384], strides = [1, 1]} : vector<16x384xf32> to vector<14x384xf32>
    %c3_553 = arith.constant 3 : index
    %c0_554 = arith.constant 0 : index
    %c0_555 = arith.constant 0 : index
    %818 = vector.load %arg3[%c3_553, %c0_554, %c0_555] : memref<7x14x384xf32, #tpu.memory_space<vmem>>, vector<1x14x384xf32>
    %819 = vector.shape_cast %818 : vector<1x14x384xf32> to vector<14x384xf32>
    %820 = vector.shape_cast %817 : vector<14x384xf32> to vector<1x14x384xf32>
    tpu.vector_store %arg3[%c3_553, %c0_554, %c0_555], %820 {strides = array<i32>} : memref<7x14x384xf32, #tpu.memory_space<vmem>>, vector<1x14x384xf32>,
    %c8_556 = arith.constant 8 : index
    %c0_557 = arith.constant 0 : index
    %c0_558 = arith.constant 0 : index
    %821 = vector.load %arg4[%c8_556, %c0_557, %c0_558] : memref<11x16x384xf32, #tpu.memory_space<vmem>>, vector<1x16x384xf32>
    %822 = vector.shape_cast %821 : vector<1x16x384xf32> to vector<16x384xf32>
    %c2_i32_559 = arith.constant 2 : i32
    %823 = tpu.dynamic_rotate %822 by %c2_i32_559 dim 0 : vector<16x384xf32>, i32 -> vector<16x384xf32>
    %c10_560 = arith.constant 10 : index
    %c0_561 = arith.constant 0 : index
    %c0_562 = arith.constant 0 : index
    %824 = vector.load %arg5[%c10_560, %c0_561, %c0_562] : memref<25x16x384xf32, #tpu.memory_space<vmem>>, vector<1x16x384xf32>
    %825 = vector.shape_cast %824 : vector<1x16x384xf32> to vector<16x384xf32>
    %826 = arith.mulf %823, %825 : vector<16x384xf32>
    %827 = arith.addf %804, %826 : vector<16x384xf32>
    %c15_563 = arith.constant 15 : index
    %c0_564 = arith.constant 0 : index
    %c0_565 = arith.constant 0 : index
    %828 = vector.load %arg5[%c15_563, %c0_564, %c0_565] : memref<25x16x384xf32, #tpu.memory_space<vmem>>, vector<1x16x384xf32>
    %829 = vector.shape_cast %828 : vector<1x16x384xf32> to vector<16x384xf32>
    %830 = arith.mulf %823, %829 : vector<16x384xf32>
    %831 = arith.addf %808, %830 : vector<16x384xf32>
    %c20_566 = arith.constant 20 : index
    %c0_567 = arith.constant 0 : index
    %c0_568 = arith.constant 0 : index
    %832 = vector.load %arg5[%c20_566, %c0_567, %c0_568] : memref<25x16x384xf32, #tpu.memory_space<vmem>>, vector<1x16x384xf32>
    %833 = vector.shape_cast %832 : vector<1x16x384xf32> to vector<16x384xf32>
    %834 = arith.mulf %823, %833 : vector<16x384xf32>
    %835 = arith.addf %812, %834 : vector<16x384xf32>
    %c1_i32_569 = arith.constant 1 : i32
    %836 = tpu.dynamic_rotate %822 by %c1_i32_569 dim 0 : vector<16x384xf32>, i32 -> vector<16x384xf32>
    %c11_570 = arith.constant 11 : index
    %c0_571 = arith.constant 0 : index
    %c0_572 = arith.constant 0 : index
    %837 = vector.load %arg5[%c11_570, %c0_571, %c0_572] : memref<25x16x384xf32, #tpu.memory_space<vmem>>, vector<1x16x384xf32>
    %838 = vector.shape_cast %837 : vector<1x16x384xf32> to vector<16x384xf32>
    %839 = arith.mulf %836, %838 : vector<16x384xf32>
    %840 = arith.addf %827, %839 : vector<16x384xf32>
    %c16_573 = arith.constant 16 : index
    %c0_574 = arith.constant 0 : index
    %c0_575 = arith.constant 0 : index
    %841 = vector.load %arg5[%c16_573, %c0_574, %c0_575] : memref<25x16x384xf32, #tpu.memory_space<vmem>>, vector<1x16x384xf32>
    %842 = vector.shape_cast %841 : vector<1x16x384xf32> to vector<16x384xf32>
    %843 = arith.mulf %836, %842 : vector<16x384xf32>
    %844 = arith.addf %831, %843 : vector<16x384xf32>
    %c21_576 = arith.constant 21 : index
    %c0_577 = arith.constant 0 : index
    %c0_578 = arith.constant 0 : index
    %845 = vector.load %arg5[%c21_576, %c0_577, %c0_578] : memref<25x16x384xf32, #tpu.memory_space<vmem>>, vector<1x16x384xf32>
    %846 = vector.shape_cast %845 : vector<1x16x384xf32> to vector<16x384xf32>
    %847 = arith.mulf %836, %846 : vector<16x384xf32>
    %848 = arith.addf %835, %847 : vector<16x384xf32>
    %c12_579 = arith.constant 12 : index
    %c0_580 = arith.constant 0 : index
    %c0_581 = arith.constant 0 : index
    %849 = vector.load %arg5[%c12_579, %c0_580, %c0_581] : memref<25x16x384xf32, #tpu.memory_space<vmem>>, vector<1x16x384xf32>
    %850 = vector.shape_cast %849 : vector<1x16x384xf32> to vector<16x384xf32>
    %851 = arith.mulf %822, %850 : vector<16x384xf32>
    %852 = arith.addf %840, %851 : vector<16x384xf32>
    %c17_582 = arith.constant 17 : index
    %c0_583 = arith.constant 0 : index
    %c0_584 = arith.constant 0 : index
    %853 = vector.load %arg5[%c17_582, %c0_583, %c0_584] : memref<25x16x384xf32, #tpu.memory_space<vmem>>, vector<1x16x384xf32>
    %854 = vector.shape_cast %853 : vector<1x16x384xf32> to vector<16x384xf32>
    %855 = arith.mulf %822, %854 : vector<16x384xf32>
    %856 = arith.addf %844, %855 : vector<16x384xf32>
    %c22_585 = arith.constant 22 : index
    %c0_586 = arith.constant 0 : index
    %c0_587 = arith.constant 0 : index
    %857 = vector.load %arg5[%c22_585, %c0_586, %c0_587] : memref<25x16x384xf32, #tpu.memory_space<vmem>>, vector<1x16x384xf32>
    %858 = vector.shape_cast %857 : vector<1x16x384xf32> to vector<16x384xf32>
    %859 = arith.mulf %822, %858 : vector<16x384xf32>
    %860 = arith.addf %848, %859 : vector<16x384xf32>
    %c15_i32_588 = arith.constant 15 : i32
    %861 = tpu.dynamic_rotate %822 by %c15_i32_588 dim 0 : vector<16x384xf32>, i32 -> vector<16x384xf32>
    %c13_589 = arith.constant 13 : index
    %c0_590 = arith.constant 0 : index
    %c0_591 = arith.constant 0 : index
    %862 = vector.load %arg5[%c13_589, %c0_590, %c0_591] : memref<25x16x384xf32, #tpu.memory_space<vmem>>, vector<1x16x384xf32>
    %863 = vector.shape_cast %862 : vector<1x16x384xf32> to vector<16x384xf32>
    %864 = arith.mulf %861, %863 : vector<16x384xf32>
    %865 = arith.addf %852, %864 : vector<16x384xf32>
    %c18_592 = arith.constant 18 : index
    %c0_593 = arith.constant 0 : index
    %c0_594 = arith.constant 0 : index
    %866 = vector.load %arg5[%c18_592, %c0_593, %c0_594] : memref<25x16x384xf32, #tpu.memory_space<vmem>>, vector<1x16x384xf32>
    %867 = vector.shape_cast %866 : vector<1x16x384xf32> to vector<16x384xf32>
    %868 = arith.mulf %861, %867 : vector<16x384xf32>
    %869 = arith.addf %856, %868 : vector<16x384xf32>
    %c23_595 = arith.constant 23 : index
    %c0_596 = arith.constant 0 : index
    %c0_597 = arith.constant 0 : index
    %870 = vector.load %arg5[%c23_595, %c0_596, %c0_597] : memref<25x16x384xf32, #tpu.memory_space<vmem>>, vector<1x16x384xf32>
    %871 = vector.shape_cast %870 : vector<1x16x384xf32> to vector<16x384xf32>
    %872 = arith.mulf %861, %871 : vector<16x384xf32>
    %873 = arith.addf %860, %872 : vector<16x384xf32>
    %c14_i32_598 = arith.constant 14 : i32
    %874 = tpu.dynamic_rotate %822 by %c14_i32_598 dim 0 : vector<16x384xf32>, i32 -> vector<16x384xf32>
    %c14_599 = arith.constant 14 : index
    %c0_600 = arith.constant 0 : index
    %c0_601 = arith.constant 0 : index
    %875 = vector.load %arg5[%c14_599, %c0_600, %c0_601] : memref<25x16x384xf32, #tpu.memory_space<vmem>>, vector<1x16x384xf32>
    %876 = vector.shape_cast %875 : vector<1x16x384xf32> to vector<16x384xf32>
    %877 = arith.mulf %874, %876 : vector<16x384xf32>
    %878 = arith.addf %865, %877 : vector<16x384xf32>
    %c19_602 = arith.constant 19 : index
    %c0_603 = arith.constant 0 : index
    %c0_604 = arith.constant 0 : index
    %879 = vector.load %arg5[%c19_602, %c0_603, %c0_604] : memref<25x16x384xf32, #tpu.memory_space<vmem>>, vector<1x16x384xf32>
    %880 = vector.shape_cast %879 : vector<1x16x384xf32> to vector<16x384xf32>
    %881 = arith.mulf %874, %880 : vector<16x384xf32>
    %882 = arith.addf %869, %881 : vector<16x384xf32>
    %c24_605 = arith.constant 24 : index
    %c0_606 = arith.constant 0 : index
    %c0_607 = arith.constant 0 : index
    %883 = vector.load %arg5[%c24_605, %c0_606, %c0_607] : memref<25x16x384xf32, #tpu.memory_space<vmem>>, vector<1x16x384xf32>
    %884 = vector.shape_cast %883 : vector<1x16x384xf32> to vector<16x384xf32>
    %885 = arith.mulf %874, %884 : vector<16x384xf32>
    %886 = arith.addf %873, %885 : vector<16x384xf32>
    %887 = vector.extract_strided_slice %886 {offsets = [0, 0], sizes = [14, 384], strides = [1, 1]} : vector<16x384xf32> to vector<14x384xf32>
    %c4_608 = arith.constant 4 : index
    %c0_609 = arith.constant 0 : index
    %c0_610 = arith.constant 0 : index
    %888 = vector.load %arg3[%c4_608, %c0_609, %c0_610] : memref<7x14x384xf32, #tpu.memory_space<vmem>>, vector<1x14x384xf32>
    %889 = vector.shape_cast %888 : vector<1x14x384xf32> to vector<14x384xf32>
    %890 = vector.shape_cast %887 : vector<14x384xf32> to vector<1x14x384xf32>
    tpu.vector_store %arg3[%c4_608, %c0_609, %c0_610], %890 {strides = array<i32>} : memref<7x14x384xf32, #tpu.memory_space<vmem>>, vector<1x14x384xf32>,
    %c9_611 = arith.constant 9 : index
    %c0_612 = arith.constant 0 : index
    %c0_613 = arith.constant 0 : index
    %891 = vector.load %arg4[%c9_611, %c0_612, %c0_613] : memref<11x16x384xf32, #tpu.memory_space<vmem>>, vector<1x16x384xf32>
    %892 = vector.shape_cast %891 : vector<1x16x384xf32> to vector<16x384xf32>
    %c2_i32_614 = arith.constant 2 : i32
    %893 = tpu.dynamic_rotate %892 by %c2_i32_614 dim 0 : vector<16x384xf32>, i32 -> vector<16x384xf32>
    %c15_615 = arith.constant 15 : index
    %c0_616 = arith.constant 0 : index
    %c0_617 = arith.constant 0 : index
    %894 = vector.load %arg5[%c15_615, %c0_616, %c0_617] : memref<25x16x384xf32, #tpu.memory_space<vmem>>, vector<1x16x384xf32>
    %895 = vector.shape_cast %894 : vector<1x16x384xf32> to vector<16x384xf32>
    %896 = arith.mulf %893, %895 : vector<16x384xf32>
    %897 = arith.addf %878, %896 : vector<16x384xf32>
    %c20_618 = arith.constant 20 : index
    %c0_619 = arith.constant 0 : index
    %c0_620 = arith.constant 0 : index
    %898 = vector.load %arg5[%c20_618, %c0_619, %c0_620] : memref<25x16x384xf32, #tpu.memory_space<vmem>>, vector<1x16x384xf32>
    %899 = vector.shape_cast %898 : vector<1x16x384xf32> to vector<16x384xf32>
    %900 = arith.mulf %893, %899 : vector<16x384xf32>
    %901 = arith.addf %882, %900 : vector<16x384xf32>
    %c1_i32_621 = arith.constant 1 : i32
    %902 = tpu.dynamic_rotate %892 by %c1_i32_621 dim 0 : vector<16x384xf32>, i32 -> vector<16x384xf32>
    %c16_622 = arith.constant 16 : index
    %c0_623 = arith.constant 0 : index
    %c0_624 = arith.constant 0 : index
    %903 = vector.load %arg5[%c16_622, %c0_623, %c0_624] : memref<25x16x384xf32, #tpu.memory_space<vmem>>, vector<1x16x384xf32>
    %904 = vector.shape_cast %903 : vector<1x16x384xf32> to vector<16x384xf32>
    %905 = arith.mulf %902, %904 : vector<16x384xf32>
    %906 = arith.addf %897, %905 : vector<16x384xf32>
    %c21_625 = arith.constant 21 : index
    %c0_626 = arith.constant 0 : index
    %c0_627 = arith.constant 0 : index
    %907 = vector.load %arg5[%c21_625, %c0_626, %c0_627] : memref<25x16x384xf32, #tpu.memory_space<vmem>>, vector<1x16x384xf32>
    %908 = vector.shape_cast %907 : vector<1x16x384xf32> to vector<16x384xf32>
    %909 = arith.mulf %902, %908 : vector<16x384xf32>
    %910 = arith.addf %901, %909 : vector<16x384xf32>
    %c17_628 = arith.constant 17 : index
    %c0_629 = arith.constant 0 : index
    %c0_630 = arith.constant 0 : index
    %911 = vector.load %arg5[%c17_628, %c0_629, %c0_630] : memref<25x16x384xf32, #tpu.memory_space<vmem>>, vector<1x16x384xf32>
    %912 = vector.shape_cast %911 : vector<1x16x384xf32> to vector<16x384xf32>
    %913 = arith.mulf %892, %912 : vector<16x384xf32>
    %914 = arith.addf %906, %913 : vector<16x384xf32>
    %c22_631 = arith.constant 22 : index
    %c0_632 = arith.constant 0 : index
    %c0_633 = arith.constant 0 : index
    %915 = vector.load %arg5[%c22_631, %c0_632, %c0_633] : memref<25x16x384xf32, #tpu.memory_space<vmem>>, vector<1x16x384xf32>
    %916 = vector.shape_cast %915 : vector<1x16x384xf32> to vector<16x384xf32>
    %917 = arith.mulf %892, %916 : vector<16x384xf32>
    %918 = arith.addf %910, %917 : vector<16x384xf32>
    %c15_i32_634 = arith.constant 15 : i32
    %919 = tpu.dynamic_rotate %892 by %c15_i32_634 dim 0 : vector<16x384xf32>, i32 -> vector<16x384xf32>
    %c18_635 = arith.constant 18 : index
    %c0_636 = arith.constant 0 : index
    %c0_637 = arith.constant 0 : index
    %920 = vector.load %arg5[%c18_635, %c0_636, %c0_637] : memref<25x16x384xf32, #tpu.memory_space<vmem>>, vector<1x16x384xf32>
    %921 = vector.shape_cast %920 : vector<1x16x384xf32> to vector<16x384xf32>
    %922 = arith.mulf %919, %921 : vector<16x384xf32>
    %923 = arith.addf %914, %922 : vector<16x384xf32>
    %c23_638 = arith.constant 23 : index
    %c0_639 = arith.constant 0 : index
    %c0_640 = arith.constant 0 : index
    %924 = vector.load %arg5[%c23_638, %c0_639, %c0_640] : memref<25x16x384xf32, #tpu.memory_space<vmem>>, vector<1x16x384xf32>
    %925 = vector.shape_cast %924 : vector<1x16x384xf32> to vector<16x384xf32>
    %926 = arith.mulf %919, %925 : vector<16x384xf32>
    %927 = arith.addf %918, %926 : vector<16x384xf32>
    %c14_i32_641 = arith.constant 14 : i32
    %928 = tpu.dynamic_rotate %892 by %c14_i32_641 dim 0 : vector<16x384xf32>, i32 -> vector<16x384xf32>
    %c19_642 = arith.constant 19 : index
    %c0_643 = arith.constant 0 : index
    %c0_644 = arith.constant 0 : index
    %929 = vector.load %arg5[%c19_642, %c0_643, %c0_644] : memref<25x16x384xf32, #tpu.memory_space<vmem>>, vector<1x16x384xf32>
    %930 = vector.shape_cast %929 : vector<1x16x384xf32> to vector<16x384xf32>
    %931 = arith.mulf %928, %930 : vector<16x384xf32>
    %932 = arith.addf %923, %931 : vector<16x384xf32>
    %c24_645 = arith.constant 24 : index
    %c0_646 = arith.constant 0 : index
    %c0_647 = arith.constant 0 : index
    %933 = vector.load %arg5[%c24_645, %c0_646, %c0_647] : memref<25x16x384xf32, #tpu.memory_space<vmem>>, vector<1x16x384xf32>
    %934 = vector.shape_cast %933 : vector<1x16x384xf32> to vector<16x384xf32>
    %935 = arith.mulf %928, %934 : vector<16x384xf32>
    %936 = arith.addf %927, %935 : vector<16x384xf32>
    %937 = vector.extract_strided_slice %936 {offsets = [0, 0], sizes = [14, 384], strides = [1, 1]} : vector<16x384xf32> to vector<14x384xf32>
    %c5_648 = arith.constant 5 : index
    %c0_649 = arith.constant 0 : index
    %c0_650 = arith.constant 0 : index
    %938 = vector.load %arg3[%c5_648, %c0_649, %c0_650] : memref<7x14x384xf32, #tpu.memory_space<vmem>>, vector<1x14x384xf32>
    %939 = vector.shape_cast %938 : vector<1x14x384xf32> to vector<14x384xf32>
    %940 = vector.shape_cast %937 : vector<14x384xf32> to vector<1x14x384xf32>
    tpu.vector_store %arg3[%c5_648, %c0_649, %c0_650], %940 {strides = array<i32>} : memref<7x14x384xf32, #tpu.memory_space<vmem>>, vector<1x14x384xf32>,
    %c10_651 = arith.constant 10 : index
    %c0_652 = arith.constant 0 : index
    %c0_653 = arith.constant 0 : index
    %941 = vector.load %arg4[%c10_651, %c0_652, %c0_653] : memref<11x16x384xf32, #tpu.memory_space<vmem>>, vector<1x16x384xf32>
    %942 = vector.shape_cast %941 : vector<1x16x384xf32> to vector<16x384xf32>
    %c2_i32_654 = arith.constant 2 : i32
    %943 = tpu.dynamic_rotate %942 by %c2_i32_654 dim 0 : vector<16x384xf32>, i32 -> vector<16x384xf32>
    %c20_655 = arith.constant 20 : index
    %c0_656 = arith.constant 0 : index
    %c0_657 = arith.constant 0 : index
    %944 = vector.load %arg5[%c20_655, %c0_656, %c0_657] : memref<25x16x384xf32, #tpu.memory_space<vmem>>, vector<1x16x384xf32>
    %945 = vector.shape_cast %944 : vector<1x16x384xf32> to vector<16x384xf32>
    %946 = arith.mulf %943, %945 : vector<16x384xf32>
    %947 = arith.addf %932, %946 : vector<16x384xf32>
    %c1_i32_658 = arith.constant 1 : i32
    %948 = tpu.dynamic_rotate %942 by %c1_i32_658 dim 0 : vector<16x384xf32>, i32 -> vector<16x384xf32>
    %c21_659 = arith.constant 21 : index
    %c0_660 = arith.constant 0 : index
    %c0_661 = arith.constant 0 : index
    %949 = vector.load %arg5[%c21_659, %c0_660, %c0_661] : memref<25x16x384xf32, #tpu.memory_space<vmem>>, vector<1x16x384xf32>
    %950 = vector.shape_cast %949 : vector<1x16x384xf32> to vector<16x384xf32>
    %951 = arith.mulf %948, %950 : vector<16x384xf32>
    %952 = arith.addf %947, %951 : vector<16x384xf32>
    %c22_662 = arith.constant 22 : index
    %c0_663 = arith.constant 0 : index
    %c0_664 = arith.constant 0 : index
    %953 = vector.load %arg5[%c22_662, %c0_663, %c0_664] : memref<25x16x384xf32, #tpu.memory_space<vmem>>, vector<1x16x384xf32>
    %954 = vector.shape_cast %953 : vector<1x16x384xf32> to vector<16x384xf32>
    %955 = arith.mulf %942, %954 : vector<16x384xf32>
    %956 = arith.addf %952, %955 : vector<16x384xf32>
    %c15_i32_665 = arith.constant 15 : i32
    %957 = tpu.dynamic_rotate %942 by %c15_i32_665 dim 0 : vector<16x384xf32>, i32 -> vector<16x384xf32>
    %c23_666 = arith.constant 23 : index
    %c0_667 = arith.constant 0 : index
    %c0_668 = arith.constant 0 : index
    %958 = vector.load %arg5[%c23_666, %c0_667, %c0_668] : memref<25x16x384xf32, #tpu.memory_space<vmem>>, vector<1x16x384xf32>
    %959 = vector.shape_cast %958 : vector<1x16x384xf32> to vector<16x384xf32>
    %960 = arith.mulf %957, %959 : vector<16x384xf32>
    %961 = arith.addf %956, %960 : vector<16x384xf32>
    %c14_i32_669 = arith.constant 14 : i32
    %962 = tpu.dynamic_rotate %942 by %c14_i32_669 dim 0 : vector<16x384xf32>, i32 -> vector<16x384xf32>
    %c24_670 = arith.constant 24 : index
    %c0_671 = arith.constant 0 : index
    %c0_672 = arith.constant 0 : index
    %963 = vector.load %arg5[%c24_670, %c0_671, %c0_672] : memref<25x16x384xf32, #tpu.memory_space<vmem>>, vector<1x16x384xf32>
    %964 = vector.shape_cast %963 : vector<1x16x384xf32> to vector<16x384xf32>
    %965 = arith.mulf %962, %964 : vector<16x384xf32>
    %966 = arith.addf %961, %965 : vector<16x384xf32>
    %967 = vector.extract_strided_slice %966 {offsets = [0, 0], sizes = [14, 384], strides = [1, 1]} : vector<16x384xf32> to vector<14x384xf32>
    %c6_673 = arith.constant 6 : index
    %c0_674 = arith.constant 0 : index
    %c0_675 = arith.constant 0 : index
    %968 = vector.load %arg3[%c6_673, %c0_674, %c0_675] : memref<7x14x384xf32, #tpu.memory_space<vmem>>, vector<1x14x384xf32>
    %969 = vector.shape_cast %968 : vector<1x14x384xf32> to vector<14x384xf32>
    %970 = vector.shape_cast %967 : vector<14x384xf32> to vector<1x14x384xf32>
    tpu.vector_store %arg3[%c6_673, %c0_674, %c0_675], %970 {strides = array<i32>} : memref<7x14x384xf32, #tpu.memory_space<vmem>>, vector<1x14x384xf32>,
    return
  }
  func.func @transform_0(%arg0: i32) -> (i32, i32, i32) {
    %c0_i32 = arith.constant 0 : i32
    %c0_i32_0 = arith.constant 0 : i32
    %c0_i32_1 = arith.constant 0 : i32
    %c0_i32_2 = arith.constant 0 : i32
    return %c0_i32, %c0_i32_0, %c0_i32_1 : i32, i32, i32
  }
  func.func @transform_1(%arg0: i32) -> (i32, i32, i32) {
    %c0_i32 = arith.constant 0 : i32
    %c0_i32_0 = arith.constant 0 : i32
    %c0_i32_1 = arith.constant 0 : i32
    %c0_i32_2 = arith.constant 0 : i32
    return %c0_i32, %c0_i32_0, %c0_i32_1 : i32, i32, i32
  }
  func.func @transform_2(%arg0: i32) -> (i32, i32, i32) {
    %c0_i32 = arith.constant 0 : i32
    %c0_i32_0 = arith.constant 0 : i32
    %c0_i32_1 = arith.constant 0 : i32
    return %arg0, %c0_i32, %c0_i32_0 : i32, i32, i32
  }
}

</mosaic_0001>

<bundles_post_ra>
// kernel: relu_depthwise_conv2d.1
= control target key start
LH: loop header
LB: loop body
LE: loop exit
PB: predicated region body
PF: predicated region fallthrough
CT: control target
= control target key end

     0   :  { %s4676_s9 = smov 0   ;;  %s9041_s0 = inlined_call_operand.vmem [shape: f32[14,14,384], index: 0, kind: input, shape index: {}]   ;;  %s9042_s1 = inlined_call_operand.vmem [shape: f32[5,5,384], index: 1, kind: input, shape index: {}]   ;;  %s9043_s2 = inlined_call_operand.vmem [shape: f32[14,14,384], index: 2, kind: output, shape index: {}]  }
   0x1 LB: > { %s4682_s10 = sadd.s32 4294967295, %s4657_s9   ;;  %p4544_p0 = scmp.ge.s32.totalorder %s4657_s9, 1  ;;  %s4657_s9 = sphi %s4676_s9, %s12_s9  }
   0x2   : > { %p102_p1 = scmp.lt.s32.totalorder %s4657_s9, 3 }
   0x4   : > { %p103_p2 = pnand %p4544_p0, %p102_p1 }
   0x6   : > { %106 = sbr.rel (%p103_p2) target bundleno = 833 (0x341), region = 28 }
   0xd   : > { %s120_s11 = smul.u32 7, %s4682_s10  ;;  %p4546_p4 = scmp.ne.s32.totalorder %s4682_s10, 0 }
   0xe   : > { %v143_v0 = vld [vmem:[%s9041_s0] sm:$0xff] (!%p4546_p4)  ;;  %v144_v1 = vld [vmem:[%s9041_s0 + $0x8] sm:$0xff] (!%p4546_p4)  ;;  %v145_v2 = vld [vmem:[%s9041_s0 + $0x10] sm:$0xff] (!%p4546_p4)  ;;  %v4659_v3 = vmov (!%p4546_p4), 0.0  }
   0xf   : > { %p121_p3 = scmp.lt.s32.totalorder %s120_s11, 13  ;;  %130 = sbr.rel (%p4546_p4) target bundleno = 64 (0x40), region = 32  ;;  %131 = vst [vmem:[#allocation2] sm:$0xff] (!%p4546_p4), %v4659_v3  ;;  %132 = vst [vmem:[#allocation2 + $0x8] sm:$0xff] (!%p4546_p4), %v4659_v3  ;;  %v197_v4 = vmax.f32 (!%p4546_p4), %v143_v0, 0.0  ;;  %v198_v5 = vmax.f32 (!%p4546_p4), %v144_v1, 0.0 }
  0x10   : > { %133 = vst [vmem:[#allocation2 + $0x10] sm:$0xff] (!%p4546_p4), %v4659_v3  ;;  %134 = vst [vmem:[#allocation2 + $0x18] sm:$0xff] (!%p4546_p4), %v4659_v3  ;;  %v199_v6 = vmax.f32 (!%p4546_p4), %v145_v2, 0.0  ;;  %v146_v7 = vld [vmem:[%s9041_s0 + $0x18] sm:$0x3f] (!%p4546_p4)  ;;  %v149_v8 = vld [vmem:[%s9041_s0 + $0x30] sm:$0xff] (!%p4546_p4) }
  0x11   : > { %s10081_s11 = smov (!%p121_p3, %s120_s11), 13  ;;  %135 = vst [vmem:[#allocation2 + $0x20] sm:$0xff] (!%p4546_p4), %v4659_v3  ;;  %136 = vst [vmem:[#allocation2 + $0x28] sm:$0xff] (!%p4546_p4), %v4659_v3  ;;  %v200_v9 = vmax.f32 (!%p4546_p4), %v146_v7, 0.0  ;;  %v147_v10 = vld [vmem:[%s9041_s0 + $0x20] sm:$0x3f] (!%p4546_p4) }
  0x12   : > { %s4640_s12 = smul.u32 48, %s10081_s11  ;;  %137 = vst [vmem:[#allocation2 + $0x30] sm:$0xff] (!%p4546_p4), %v4659_v3  ;;  %138 = vst [vmem:[#allocation2 + $0x38] sm:$0xff] (!%p4546_p4), %v4659_v3  ;;  %v148_v11 = vld [vmem:[%s9041_s0 + $0x28] sm:$0x3f] (!%p4546_p4)  ;;  %v203_v12 = vmax.f32 (!%p4546_p4), %v149_v8, 0.0 }
  0x13   : > { %139 = vst [vmem:[#allocation2 + $0x40] sm:$0xff] (!%p4546_p4), %v4659_v3  ;;  %140 = vst [vmem:[#allocation2 + $0x48] sm:$0xff] (!%p4546_p4), %v4659_v3  ;;  %v201_v13 = vmax.f32 (!%p4546_p4), %v147_v10, 0.0  ;;  %v202_v14 = vmax.f32 (!%p4546_p4), %v148_v11, 0.0  ;;  %v150_v15 = vld [vmem:[%s9041_s0 + $0x38] sm:$0xff] (!%p4546_p4)  ;;  %v151_v16 = vld [vmem:[%s9041_s0 + $0x40] sm:$0xff] (!%p4546_p4) }
  0x14   : > { %s4690_s15 = scalar_lea.vmem %s9043_s2, %s4640_s12  ;;  %141 = vst [vmem:[#allocation2 + $0x50] sm:$0xff] (!%p4546_p4), %v4659_v3  ;;  %142 = vst [vmem:[#allocation2 + $0x58] sm:$0xff] (!%p4546_p4), %v4659_v3  ;;  %v152_v17 = vld [vmem:[%s9041_s0 + $0x48] sm:$0x3f] (!%p4546_p4)  ;;  %v204_v18 = vmax.f32 (!%p4546_p4), %v150_v15, 0.0  ;;  %v205_v19 = vmax.f32 (!%p4546_p4), %v151_v16, 0.0 }
  0x15   : > { %306 = vst [vmem:[#allocation2 + $0x78] sm:$0xc0] (!%p4546_p4), %v4659_v3  ;;  %307 = vst [vmem:[#allocation2 + $0x80] sm:$0xc0] (!%p4546_p4), %v4659_v3  ;;  %v206_v20 = vmax.f32 (!%p4546_p4), %v152_v17, 0.0  ;;  %v155_v22 = vld [vmem:[%s9041_s0 + $0x60] sm:$0xff] (!%p4546_p4) }
  0x16   : > { %308 = vst [vmem:[#allocation2 + $0x88] sm:$0xc0] %v4659_v3  ;;  %309 = vst [vmem:[#allocation2 + $0xa8] sm:$0xc0] %v4659_v3  ;;  %v153_v21 = vld [vmem:[%s9041_s0 + $0x50] sm:$0x3f] }
  0x17   : > { %310 = vst [vmem:[#allocation2 + $0xb0] sm:$0xc0] %v4659_v3  ;;  %311 = vst [vmem:[#allocation2 + $0xb8] sm:$0xc0] %v4659_v3  ;;  %v207_v23 = vmax.f32 %v153_v21, 0.0  ;;  %v209_v25 = vmax.f32 %v155_v22, 0.0 }
  0x18   : > { %312 = vst [vmem:[#allocation2 + $0xd8] sm:$0xc0] %v4659_v3  ;;  %313 = vst [vmem:[#allocation2 + $0xe0] sm:$0xc0] %v4659_v3  ;;  %v154_v24 = vld [vmem:[%s9041_s0 + $0x58] sm:$0x3f] }
  0x19   : > { %314 = vst [vmem:[#allocation2 + $0xe8] sm:$0xc0] %v4659_v3  ;;  %315 = vst [vmem:[#allocation2 + $0x108] sm:$0xc0] %v4659_v3  ;;  %v156_v26 = vld [vmem:[%s9041_s0 + $0x68] sm:$0xff]  ;;  %v157_v27 = vld [vmem:[%s9041_s0 + $0x70] sm:$0xff] }
  0x1a   : > { %316 = vst [vmem:[#allocation2 + $0x110] sm:$0xc0] %v4659_v3  ;;  %317 = vst [vmem:[#allocation2 + $0x118] sm:$0xc0] %v4659_v3  ;;  %v208_v28 = vmax.f32 %v154_v24, 0.0  ;;  %v210_v29 = vmax.f32 %v156_v26, 0.0 }
  0x1b   : > { %318 = vst [vmem:[#allocation2 + $0x138] sm:$0xc0] %v4659_v3  ;;  %319 = vst [vmem:[#allocation2 + $0x140] sm:$0xc0] %v4659_v3  ;;  %v211_v30 = vmax.f32 %v157_v27, 0.0  ;;  %v161_v32 = vld [vmem:[%s9041_s0 + $0x90] sm:$0xff] }
  0x1c   : > { %320 = vst [vmem:[#allocation2 + $0x148] sm:$0xc0] %v4659_v3  ;;  %321 = vst [vmem:[#allocation2 + $0x168] sm:$0xc0] %v4659_v3  ;;  %v158_v31 = vld [vmem:[%s9041_s0 + $0x78] sm:$0x3f] }
  0x1d   : > { %322 = vst [vmem:[#allocation2 + $0x170] sm:$0xc0] %v4659_v3  ;;  %323 = vst [vmem:[#allocation2 + $0x178] sm:$0xc0] %v4659_v3  ;;  %v212_v33 = vmax.f32 %v158_v31, 0.0  ;;  %v215_v36 = vmax.f32 %v161_v32, 0.0 }
  0x1e   : > { %324 = vst [vmem:[#allocation2 + $0x198] sm:$0xc0] %v4659_v3  ;;  %325 = vst [vmem:[#allocation2 + $0x1a0] sm:$0xc0] %v4659_v3  ;;  %v159_v34 = vld [vmem:[%s9041_s0 + $0x80] sm:$0x3f] }
  0x1f   : > { %326 = vst [vmem:[#allocation2 + $0x1a8] sm:$0xc0] %v4659_v3  ;;  %327 = vst [vmem:[#allocation2 + $0x1c8] sm:$0xc0] %v4659_v3  ;;  %v160_v35 = vld [vmem:[%s9041_s0 + $0x88] sm:$0x3f] }
  0x20   : > { %328 = vst [vmem:[#allocation2 + $0x1d0] sm:$0xc0] %v4659_v3  ;;  %329 = vst [vmem:[#allocation2 + $0x1d8] sm:$0xc0] %v4659_v3  ;;  %v213_v37 = vmax.f32 %v159_v34, 0.0  ;;  %v214_v38 = vmax.f32 %v160_v35, 0.0 }
  0x21   : > { %330 = vst [vmem:[#allocation2 + $0x1f8] sm:$0xc0] %v4659_v3  ;;  %331 = vst [vmem:[#allocation2 + $0x200] sm:$0xc0] %v4659_v3  ;;  %v162_v39 = vld [vmem:[%s9041_s0 + $0x98] sm:$0xff]  ;;  %v163_v40 = vld [vmem:[%s9041_s0 + $0xa0] sm:$0xff] }
  0x22   : > { %332 = vst [vmem:[#allocation2 + $0x208] sm:$0xc0] %v4659_v3  ;;  %252 = vst [vmem:[#allocation2 + $0x60] sm:$0xff] %v197_v4  ;;  %v164_v41 = vld [vmem:[%s9041_s0 + $0xa8] sm:$0x3f]  ;;  %v216_v42 = vmax.f32 %v162_v39, 0.0 }
  0x23   : > { %253 = vst [vmem:[#allocation2 + $0x68] sm:$0xff] %v198_v5  ;;  %254 = vst [vmem:[#allocation2 + $0x70] sm:$0xff] %v199_v6  ;;  %v217_v43 = vmax.f32 %v163_v40, 0.0  ;;  %v218_v44 = vmax.f32 %v164_v41, 0.0  ;;  %v165_v45 = vld [vmem:[%s9041_s0 + $0xb0] sm:$0x3f] }
  0x24   : > { %255 = vst [vmem:[#allocation2 + $0x78] sm:$0x3f] %v200_v9  ;;  %258 = vst [vmem:[#allocation2 + $0x90] sm:$0xff] %v203_v12  ;;  %v167_v46 = vld [vmem:[%s9041_s0 + $0xc0] sm:$0xff]  ;;  %v219_v47 = vmax.f32 %v165_v45, 0.0  ;;  %v168_v50 = vld [vmem:[%s9041_s0 + $0xc8] sm:$0xff] }
  0x25   : > { %256 = vst [vmem:[#allocation2 + $0x80] sm:$0x3f] %v201_v13  ;;  %257 = vst [vmem:[#allocation2 + $0x88] sm:$0x3f] %v202_v14  ;;  %v166_v48 = vld [vmem:[%s9041_s0 + $0xb8] sm:$0x3f] }
  0x26   : > { %259 = vst [vmem:[#allocation2 + $0x98] sm:$0xff] %v204_v18  ;;  %260 = vst [vmem:[#allocation2 + $0xa0] sm:$0xff] %v205_v19  ;;  %v221_v49 = vmax.f32 %v167_v46, 0.0  ;;  %v169_v51 = vld [vmem:[%s9041_s0 + $0xd0] sm:$0xff]  ;;  %v220_v52 = vmax.f32 %v166_v48, 0.0  ;;  %v222_v53 = vmax.f32 %v168_v50, 0.0 }
  0x27   : > { %261 = vst [vmem:[#allocation2 + $0xa8] sm:$0x3f] %v206_v20  ;;  %262 = vst [vmem:[#allocation2 + $0xb0] sm:$0x3f] %v207_v23  ;;  %v223_v54 = vmax.f32 %v169_v51, 0.0  ;;  %v173_v56 = vld [vmem:[%s9041_s0 + $0xf0] sm:$0xff] }
  0x28   : > { %264 = vst [vmem:[#allocation2 + $0xc0] sm:$0xff] %v209_v25  ;;  %263 = vst [vmem:[#allocation2 + $0xb8] sm:$0x3f] %v208_v28  ;;  %v170_v55 = vld [vmem:[%s9041_s0 + $0xd8] sm:$0x3f]  ;;  %v227_v60 = vmax.f32 %v173_v56, 0.0 }
  0x29   : > { %265 = vst [vmem:[#allocation2 + $0xc8] sm:$0xff] %v210_v29  ;;  %266 = vst [vmem:[#allocation2 + $0xd0] sm:$0xff] %v211_v30  ;;  %v224_v57 = vmax.f32 %v170_v55, 0.0  ;;  %v171_v58 = vld [vmem:[%s9041_s0 + $0xe0] sm:$0x3f]  ;;  %v174_v63 = vld [vmem:[%s9041_s0 + $0xf8] sm:$0xff] }
  0x2a   : > { %267 = vst [vmem:[#allocation2 + $0xd8] sm:$0x3f] %v212_v33  ;;  %270 = vst [vmem:[#allocation2 + $0xf0] sm:$0xff] %v215_v36  ;;  %v172_v59 = vld [vmem:[%s9041_s0 + $0xe8] sm:$0x3f]  ;;  %v225_v61 = vmax.f32 %v171_v58, 0.0 }
  0x2b   : > { %268 = vst [vmem:[#allocation2 + $0xe0] sm:$0x3f] %v213_v37  ;;  %269 = vst [vmem:[#allocation2 + $0xe8] sm:$0x3f] %v214_v38  ;;  %v226_v62 = vmax.f32 %v172_v59, 0.0  ;;  %v175_v0 = vld [vmem:[%s9041_s0 + $0x100] sm:$0xff] }
  0x2c   : > { %271 = vst [vmem:[#allocation2 + $0xf8] sm:$0xff] %v216_v42  ;;  %272 = vst [vmem:[#allocation2 + $0x100] sm:$0xff] %v217_v43  ;;  %v176_v1 = vld [vmem:[%s9041_s0 + $0x108] sm:$0x3f]  ;;  %v228_v2 = vmax.f32 %v174_v63, 0.0  ;;  %v229_v3 = vmax.f32 %v175_v0, 0.0 }
  0x2d   : > { %273 = vst [vmem:[#allocation2 + $0x108] sm:$0x3f] %v218_v44  ;;  %274 = vst [vmem:[#allocation2 + $0x110] sm:$0x3f] %v219_v47  ;;  %v230_v4 = vmax.f32 %v176_v1, 0.0  ;;  %v179_v6 = vld [vmem:[%s9041_s0 + $0x120] sm:$0xff] }
  0x2e   : > { %276 = vst [vmem:[#allocation2 + $0x120] sm:$0xff] %v221_v49  ;;  %275 = vst [vmem:[#allocation2 + $0x118] sm:$0x3f] %v220_v52  ;;  %v177_v5 = vld [vmem:[%s9041_s0 + $0x110] sm:$0x3f]  ;;  %v233_v9 = vmax.f32 %v179_v6, 0.0 }
  0x2f   : > { %277 = vst [vmem:[#allocation2 + $0x128] sm:$0xff] %v222_v53  ;;  %278 = vst [vmem:[#allocation2 + $0x130] sm:$0xff] %v223_v54  ;;  %v231_v7 = vmax.f32 %v177_v5, 0.0  ;;  %v178_v8 = vld [vmem:[%s9041_s0 + $0x118] sm:$0x3f]  ;;  %v180_v10 = vld [vmem:[%s9041_s0 + $0x128] sm:$0xff] }
  0x30   : > { %279 = vst [vmem:[#allocation2 + $0x138] sm:$0x3f] %v224_v57  ;;  %282 = vst [vmem:[#allocation2 + $0x150] sm:$0xff] %v227_v60  ;;  %v181_v11 = vld [vmem:[%s9041_s0 + $0x130] sm:$0xff]  ;;  %v232_v12 = vmax.f32 %v178_v8, 0.0  ;;  %v234_v13 = vmax.f32 %v180_v10, 0.0 }
  0x31   : > { %280 = vst [vmem:[#allocation2 + $0x140] sm:$0x3f] %v225_v61  ;;  %281 = vst [vmem:[#allocation2 + $0x148] sm:$0x3f] %v226_v62  ;;  %v235_v14 = vmax.f32 %v181_v11, 0.0  ;;  %v185_v16 = vld [vmem:[%s9041_s0 + $0x150] sm:$0xff] }
  0x32   : > { %283 = vst [vmem:[#allocation2 + $0x158] sm:$0xff] %v228_v2  ;;  %284 = vst [vmem:[#allocation2 + $0x160] sm:$0xff] %v229_v3  ;;  %v182_v15 = vld [vmem:[%s9041_s0 + $0x138] sm:$0x3f]  ;;  %v183_v18 = vld [vmem:[%s9041_s0 + $0x140] sm:$0x3f] }
  0x33   : > { %285 = vst [vmem:[#allocation2 + $0x168] sm:$0x3f] %v230_v4  ;;  %286 = vst [vmem:[#allocation2 + $0x170] sm:$0x3f] %v231_v7  ;;  %v236_v17 = vmax.f32 %v182_v15, 0.0  ;;  %v239_v20 = vmax.f32 %v185_v16, 0.0 }
  0x34   : > { %288 = vst [vmem:[#allocation2 + $0x180] sm:$0xff] %v233_v9  ;;  %v184_v19 = vld [vmem:[%s9041_s0 + $0x148] sm:$0x3f]  ;;  %287 = vst [vmem:[#allocation2 + $0x178] sm:$0x3f] %v232_v12  ;;  %v237_v21 = vmax.f32 %v183_v18, 0.0 }
  0x35   : > { %289 = vst [vmem:[#allocation2 + $0x188] sm:$0xff] %v234_v13  ;;  %290 = vst [vmem:[#allocation2 + $0x190] sm:$0xff] %v235_v14  ;;  %v238_v22 = vmax.f32 %v184_v19, 0.0  ;;  %v186_v23 = vld [vmem:[%s9041_s0 + $0x158] sm:$0xff]  ;;  %v187_v24 = vld [vmem:[%s9041_s0 + $0x160] sm:$0xff] }
  0x36   : > { %v188_v25 = vld [vmem:[%s9041_s0 + $0x168] sm:$0x3f]  ;;  %291 = vst [vmem:[#allocation2 + $0x198] sm:$0x3f] %v236_v17  ;;  %294 = vst [vmem:[#allocation2 + $0x1b0] sm:$0xff] %v239_v20  ;;  %v240_v26 = vmax.f32 %v186_v23, 0.0 }
  0x37   : > { %v241_v27 = vmax.f32 %v187_v24, 0.0  ;;  %v242_v28 = vmax.f32 %v188_v25, 0.0  ;;  %v189_v29 = vld [vmem:[%s9041_s0 + $0x170] sm:$0x3f]  ;;  %v191_v30 = vld [vmem:[%s9041_s0 + $0x180] sm:$0xff]  ;;  %v192_v34 = vld [vmem:[%s9041_s0 + $0x188] sm:$0xff] }
  0x38   : > { %292 = vst [vmem:[#allocation2 + $0x1a0] sm:$0x3f] %v237_v21  ;;  %293 = vst [vmem:[#allocation2 + $0x1a8] sm:$0x3f] %v238_v22  ;;  %v243_v31 = vmax.f32 %v189_v29, 0.0  ;;  %v245_v33 = vmax.f32 %v191_v30, 0.0 }
  0x39   : > { %v190_v32 = vld [vmem:[%s9041_s0 + $0x178] sm:$0x3f]  ;;  %v193_v35 = vld [vmem:[%s9041_s0 + $0x190] sm:$0xff]  ;;  %295 = vst [vmem:[#allocation2 + $0x1b8] sm:$0xff] %v240_v26  ;;  %296 = vst [vmem:[#allocation2 + $0x1c0] sm:$0xff] %v241_v27  ;;  %v246_v37 = vmax.f32 %v192_v34, 0.0 }
  0x3a   : > { %297 = vst [vmem:[#allocation2 + $0x1c8] sm:$0x3f] %v242_v28  ;;  %v244_v36 = vmax.f32 %v190_v32, 0.0  ;;  %v247_v38 = vmax.f32 %v193_v35, 0.0  ;;  %v194_v39 = vld [vmem:[%s9041_s0 + $0x198] sm:$0x3f] }
  0x3b   : > { %298 = vst [vmem:[#allocation2 + $0x1d0] sm:$0x3f] %v243_v31  ;;  %300 = vst [vmem:[#allocation2 + $0x1e0] sm:$0xff] %v245_v33  ;;  %v248_v40 = vmax.f32 %v194_v39, 0.0  ;;  %v195_v41 = vld [vmem:[%s9041_s0 + $0x1a0] sm:$0x3f] }
  0x3c   : > { %v196_v42 = vld [vmem:[%s9041_s0 + $0x1a8] sm:$0x3f]  ;;  %299 = vst [vmem:[#allocation2 + $0x1d8] sm:$0x3f] %v244_v36  ;;  %301 = vst [vmem:[#allocation2 + $0x1e8] sm:$0xff] %v246_v37  ;;  %v249_v43 = vmax.f32 %v195_v41, 0.0 }
  0x3d   : > { %302 = vst [vmem:[#allocation2 + $0x1f0] sm:$0xff] %v247_v38  ;;  %v250_v44 = vmax.f32 %v196_v42, 0.0  ;;  %303 = vst [vmem:[#allocation2 + $0x1f8] sm:$0x3f] %v248_v40 }
  0x3e   : > { %304 = vst [vmem:[#allocation2 + $0x200] sm:$0x3f] %v249_v43 }
  0x3f   : > { %305 = vst [vmem:[#allocation2 + $0x208] sm:$0x3f] %v250_v44 }
  0x40 PF: > { %p4547_p5 = scmp.eq.s32.totalorder %s4682_s10, 0 }
  0x41   : > { %v4548_v45 = vld [vmem:[%s9041_s0 + $0xf0] sm:$0xff] (!%p4547_p5)  ;;  %v4549_v46 = vld [vmem:[%s9041_s0 + $0xf8] sm:$0xff] (!%p4547_p5)  ;;  %v4550_v47 = vld [vmem:[%s9041_s0 + $0x100] sm:$0xff] (!%p4547_p5)  ;;  %v4660_v48 = vmov (!%p4547_p5), 0.0  }
  0x42   : > { %336 = sbr.rel (%p4547_p5) target bundleno = 115 (0x73), region = 36  ;;  %338 = vst [vmem:[#allocation2 + $0x1b0] sm:$0xff] (!%p4547_p5), %v4660_v48  ;;  %339 = vst [vmem:[#allocation2 + $0x1b8] sm:$0xff] (!%p4547_p5), %v4660_v48  ;;  %v405_v49 = vmax.f32 (!%p4547_p5), %v4548_v45, 0.0  ;;  %v406_v50 = vmax.f32 (!%p4547_p5), %v4549_v46, 0.0  ;;  %v407_v51 = vmax.f32 (!%p4547_p5), %v4550_v47, 0.0 }
  0x43   : > { %340 = vst [vmem:[#allocation2 + $0x1c0] sm:$0xff] (!%p4547_p5), %v4660_v48  ;;  %341 = vst [vmem:[#allocation2 + $0x1c8] sm:$0xff] (!%p4547_p5), %v4660_v48  ;;  %v4551_v52 = vld [vmem:[%s9041_s0 + $0x108] sm:$0x3f] (!%p4547_p5)  ;;  %v4554_v53 = vld [vmem:[%s9041_s0 + $0x120] sm:$0xff] (!%p4547_p5) }
  0x44   : > { %342 = vst [vmem:[#allocation2 + $0x1d0] sm:$0xff] (!%p4547_p5), %v4660_v48  ;;  %343 = vst [vmem:[#allocation2 + $0x1d8] sm:$0xff] (!%p4547_p5), %v4660_v48  ;;  %v408_v54 = vmax.f32 (!%p4547_p5), %v4551_v52, 0.0  ;;  %v4552_v55 = vld [vmem:[%s9041_s0 + $0x110] sm:$0x3f] (!%p4547_p5)  ;;  %v411_v57 = vmax.f32 (!%p4547_p5), %v4554_v53, 0.0 }
  0x45   : > { %344 = vst [vmem:[#allocation2 + $0x1e0] sm:$0xff] (!%p4547_p5), %v4660_v48  ;;  %345 = vst [vmem:[#allocation2 + $0x1e8] sm:$0xff] (!%p4547_p5), %v4660_v48  ;;  %v4553_v56 = vld [vmem:[%s9041_s0 + $0x118] sm:$0x3f] (!%p4547_p5)  ;;  %v409_v58 = vmax.f32 (!%p4547_p5), %v4552_v55, 0.0  ;;  %v4555_v60 = vld [vmem:[%s9041_s0 + $0x128] sm:$0xff] (!%p4547_p5) }
  0x46   : > { %346 = vst [vmem:[#allocation2 + $0x1f0] sm:$0xff] (!%p4547_p5), %v4660_v48  ;;  %347 = vst [vmem:[#allocation2 + $0x1f8] sm:$0xff] (!%p4547_p5), %v4660_v48  ;;  %v410_v59 = vmax.f32 (!%p4547_p5), %v4553_v56, 0.0  ;;  %v4556_v61 = vld [vmem:[%s9041_s0 + $0x130] sm:$0xff] (!%p4547_p5)  ;;  %v4557_v62 = vld [vmem:[%s9041_s0 + $0x138] sm:$0x3f] (!%p4547_p5) }
  0x47   : > { %348 = vst [vmem:[#allocation2 + $0x200] sm:$0xff] (!%p4547_p5), %v4660_v48  ;;  %349 = vst [vmem:[#allocation2 + $0x208] sm:$0xff] (!%p4547_p5), %v4660_v48  ;;  %v412_v63 = vmax.f32 (!%p4547_p5), %v4555_v60, 0.0  ;;  %v413_v0 = vmax.f32 (!%p4547_p5), %v4556_v61, 0.0  ;;  %v414_v1 = vmax.f32 (!%p4547_p5), %v4557_v62, 0.0  ;;  %v4560_v3 = vld [vmem:[%s9041_s0 + $0x150] sm:$0xff] (!%p4547_p5) }
  0x48   : > { %513 = vst [vmem:[#allocation2 + $0x18] sm:$0xc0] (!%p4547_p5), %v4660_v48  ;;  %514 = vst [vmem:[#allocation2 + $0x20] sm:$0xc0] (!%p4547_p5), %v4660_v48  ;;  %v4558_v2 = vld [vmem:[%s9041_s0 + $0x140] sm:$0x3f] (!%p4547_p5) }
  0x49   : > { %515 = vst [vmem:[#allocation2 + $0x28] sm:$0xc0] %v4660_v48  ;;  %516 = vst [vmem:[#allocation2 + $0x48] sm:$0xc0] %v4660_v48  ;;  %v415_v4 = vmax.f32 %v4558_v2, 0.0  ;;  %v417_v6 = vmax.f32 %v4560_v3, 0.0 }
  0x4a   : > { %517 = vst [vmem:[#allocation2 + $0x50] sm:$0xc0] %v4660_v48  ;;  %518 = vst [vmem:[#allocation2 + $0x58] sm:$0xc0] %v4660_v48  ;;  %v4559_v5 = vld [vmem:[%s9041_s0 + $0x148] sm:$0x3f] }
  0x4b   : > { %519 = vst [vmem:[#allocation2 + $0x78] sm:$0xc0] %v4660_v48  ;;  %520 = vst [vmem:[#allocation2 + $0x80] sm:$0xc0] %v4660_v48  ;;  %v4561_v7 = vld [vmem:[%s9041_s0 + $0x158] sm:$0xff]  ;;  %v4562_v8 = vld [vmem:[%s9041_s0 + $0x160] sm:$0xff] }
  0x4c   : > { %521 = vst [vmem:[#allocation2 + $0x88] sm:$0xc0] %v4660_v48  ;;  %522 = vst [vmem:[#allocation2 + $0xa8] sm:$0xc0] %v4660_v48  ;;  %v416_v9 = vmax.f32 %v4559_v5, 0.0  ;;  %v418_v10 = vmax.f32 %v4561_v7, 0.0 }
  0x4d   : > { %523 = vst [vmem:[#allocation2 + $0xb0] sm:$0xc0] %v4660_v48  ;;  %524 = vst [vmem:[#allocation2 + $0xb8] sm:$0xc0] %v4660_v48  ;;  %v419_v11 = vmax.f32 %v4562_v8, 0.0  ;;  %v4566_v13 = vld [vmem:[%s9041_s0 + $0x180] sm:$0xff] }
  0x4e   : > { %525 = vst [vmem:[#allocation2 + $0xd8] sm:$0xc0] %v4660_v48  ;;  %526 = vst [vmem:[#allocation2 + $0xe0] sm:$0xc0] %v4660_v48  ;;  %v4563_v12 = vld [vmem:[%s9041_s0 + $0x168] sm:$0x3f] }
  0x4f   : > { %527 = vst [vmem:[#allocation2 + $0xe8] sm:$0xc0] %v4660_v48  ;;  %528 = vst [vmem:[#allocation2 + $0x108] sm:$0xc0] %v4660_v48  ;;  %v420_v14 = vmax.f32 %v4563_v12, 0.0  ;;  %v423_v17 = vmax.f32 %v4566_v13, 0.0 }
  0x50   : > { %529 = vst [vmem:[#allocation2 + $0x110] sm:$0xc0] %v4660_v48  ;;  %530 = vst [vmem:[#allocation2 + $0x118] sm:$0xc0] %v4660_v48  ;;  %v4564_v15 = vld [vmem:[%s9041_s0 + $0x170] sm:$0x3f] }
  0x51   : > { %531 = vst [vmem:[#allocation2 + $0x138] sm:$0xc0] %v4660_v48  ;;  %532 = vst [vmem:[#allocation2 + $0x140] sm:$0xc0] %v4660_v48  ;;  %v4565_v16 = vld [vmem:[%s9041_s0 + $0x178] sm:$0x3f] }
  0x52   : > { %533 = vst [vmem:[#allocation2 + $0x148] sm:$0xc0] %v4660_v48  ;;  %534 = vst [vmem:[#allocation2 + $0x168] sm:$0xc0] %v4660_v48  ;;  %v421_v18 = vmax.f32 %v4564_v15, 0.0  ;;  %v422_v19 = vmax.f32 %v4565_v16, 0.0 }
  0x53   : > { %535 = vst [vmem:[#allocation2 + $0x170] sm:$0xc0] %v4660_v48  ;;  %536 = vst [vmem:[#allocation2 + $0x178] sm:$0xc0] %v4660_v48  ;;  %v4567_v20 = vld [vmem:[%s9041_s0 + $0x188] sm:$0xff]  ;;  %v4568_v21 = vld [vmem:[%s9041_s0 + $0x190] sm:$0xff] }
  0x54   : > { %537 = vst [vmem:[#allocation2 + $0x198] sm:$0xc0] %v4660_v48  ;;  %538 = vst [vmem:[#allocation2 + $0x1a0] sm:$0xc0] %v4660_v48  ;;  %v4569_v22 = vld [vmem:[%s9041_s0 + $0x198] sm:$0x3f] }
  0x55   : > { %539 = vst [vmem:[#allocation2 + $0x1a8] sm:$0xc0] %v4660_v48  ;;  %459 = vst [vmem:[#allocation2] sm:$0xff] %v405_v49  ;;  %v424_v23 = vmax.f32 %v4567_v20, 0.0  ;;  %v425_v24 = vmax.f32 %v4568_v21, 0.0  ;;  %v426_v25 = vmax.f32 %v4569_v22, 0.0 }
  0x56   : > { %460 = vst [vmem:[#allocation2 + $0x8] sm:$0xff] %v406_v50  ;;  %461 = vst [vmem:[#allocation2 + $0x10] sm:$0xff] %v407_v51  ;;  %v4570_v26 = vld [vmem:[%s9041_s0 + $0x1a0] sm:$0x3f]  ;;  %v4572_v27 = vld [vmem:[%s9041_s0 + $0x1b0] sm:$0xff] }
  0x57   : > { %462 = vst [vmem:[#allocation2 + $0x18] sm:$0x3f] %v408_v54  ;;  %465 = vst [vmem:[#allocation2 + $0x30] sm:$0xff] %v411_v57  ;;  %v427_v28 = vmax.f32 %v4570_v26, 0.0  ;;  %v4571_v29 = vld [vmem:[%s9041_s0 + $0x1a8] sm:$0x3f] }
  0x58   : > { %463 = vst [vmem:[#allocation2 + $0x20] sm:$0x3f] %v409_v58  ;;  %464 = vst [vmem:[#allocation2 + $0x28] sm:$0x3f] %v410_v59  ;;  %v429_v30 = vmax.f32 %v4572_v27, 0.0  ;;  %v4573_v31 = vld [vmem:[%s9041_s0 + $0x1b8] sm:$0xff] }
  0x59   : > { %466 = vst [vmem:[#allocation2 + $0x38] sm:$0xff] %v412_v63  ;;  %467 = vst [vmem:[#allocation2 + $0x40] sm:$0xff] %v413_v0  ;;  %v4574_v32 = vld [vmem:[%s9041_s0 + $0x1c0] sm:$0xff]  ;;  %v428_v33 = vmax.f32 %v4571_v29, 0.0  ;;  %v430_v34 = vmax.f32 %v4573_v31, 0.0  ;;  %v4579_v44 = vld [vmem:[%s9041_s0 + $0x1e8] sm:$0xff] }
  0x5a   : > { %468 = vst [vmem:[#allocation2 + $0x48] sm:$0x3f] %v414_v1  ;;  %469 = vst [vmem:[#allocation2 + $0x50] sm:$0x3f] %v415_v4  ;;  %v431_v35 = vmax.f32 %v4574_v32, 0.0  ;;  %v4578_v37 = vld [vmem:[%s9041_s0 + $0x1e0] sm:$0xff] }
  0x5b   : > { %471 = vst [vmem:[#allocation2 + $0x60] sm:$0xff] %v417_v6  ;;  %470 = vst [vmem:[#allocation2 + $0x58] sm:$0x3f] %v416_v9  ;;  %v4575_v36 = vld [vmem:[%s9041_s0 + $0x1c8] sm:$0x3f]  ;;  %v435_v41 = vmax.f32 %v4578_v37, 0.0 }
  0x5c   : > { %472 = vst [vmem:[#allocation2 + $0x68] sm:$0xff] %v418_v10  ;;  %473 = vst [vmem:[#allocation2 + $0x70] sm:$0xff] %v419_v11  ;;  %v432_v38 = vmax.f32 %v4575_v36, 0.0  ;;  %v4576_v39 = vld [vmem:[%s9041_s0 + $0x1d0] sm:$0x3f]  ;;  %v436_v47 = vmax.f32 %v4579_v44, 0.0 }
  0x5d   : > { %474 = vst [vmem:[#allocation2 + $0x78] sm:$0x3f] %v420_v14  ;;  %477 = vst [vmem:[#allocation2 + $0x90] sm:$0xff] %v423_v17  ;;  %v4577_v40 = vld [vmem:[%s9041_s0 + $0x1d8] sm:$0x3f]  ;;  %v433_v42 = vmax.f32 %v4576_v39, 0.0 }
  0x5e   : > { %475 = vst [vmem:[#allocation2 + $0x80] sm:$0x3f] %v421_v18  ;;  %476 = vst [vmem:[#allocation2 + $0x88] sm:$0x3f] %v422_v19  ;;  %v434_v43 = vmax.f32 %v4577_v40, 0.0  ;;  %v4580_v45 = vld [vmem:[%s9041_s0 + $0x1f0] sm:$0xff] }
  0x5f   : > { %478 = vst [vmem:[#allocation2 + $0x98] sm:$0xff] %v424_v23  ;;  %479 = vst [vmem:[#allocation2 + $0xa0] sm:$0xff] %v425_v24  ;;  %v4581_v46 = vld [vmem:[%s9041_s0 + $0x1f8] sm:$0x3f]  ;;  %v437_v48 = vmax.f32 %v4580_v45, 0.0  ;;  %v4584_v51 = vld [vmem:[%s9041_s0 + $0x210] sm:$0xff] }
  0x60   : > { %480 = vst [vmem:[#allocation2 + $0xa8] sm:$0x3f] %v426_v25  ;;  %481 = vst [vmem:[#allocation2 + $0xb0] sm:$0x3f] %v427_v28  ;;  %v438_v49 = vmax.f32 %v4581_v46, 0.0  ;;  %v441_v54 = vmax.f32 %v4584_v51, 0.0 }
  0x61   : > { %483 = vst [vmem:[#allocation2 + $0xc0] sm:$0xff] %v429_v30  ;;  %482 = vst [vmem:[#allocation2 + $0xb8] sm:$0x3f] %v428_v33  ;;  %v4582_v50 = vld [vmem:[%s9041_s0 + $0x200] sm:$0x3f]  ;;  %v4585_v55 = vld [vmem:[%s9041_s0 + $0x218] sm:$0xff] }
  0x62   : > { %484 = vst [vmem:[#allocation2 + $0xc8] sm:$0xff] %v430_v34  ;;  %485 = vst [vmem:[#allocation2 + $0xd0] sm:$0xff] %v431_v35  ;;  %v439_v52 = vmax.f32 %v4582_v50, 0.0  ;;  %v4583_v53 = vld [vmem:[%s9041_s0 + $0x208] sm:$0x3f]  ;;  %v4586_v56 = vld [vmem:[%s9041_s0 + $0x220] sm:$0xff] }
  0x63   : > { %486 = vst [vmem:[#allocation2 + $0xd8] sm:$0x3f] %v432_v38  ;;  %489 = vst [vmem:[#allocation2 + $0xf0] sm:$0xff] %v435_v41  ;;  %v440_v57 = vmax.f32 %v4583_v53, 0.0  ;;  %v442_v58 = vmax.f32 %v4585_v55, 0.0  ;;  %v443_v59 = vmax.f32 %v4586_v56, 0.0 }
  0x64   : > { %487 = vst [vmem:[#allocation2 + $0xe0] sm:$0x3f] %v433_v42  ;;  %488 = vst [vmem:[#allocation2 + $0xe8] sm:$0x3f] %v434_v43  ;;  %v4587_v60 = vld [vmem:[%s9041_s0 + $0x228] sm:$0x3f] }
  0x65   : > { %490 = vst [vmem:[#allocation2 + $0xf8] sm:$0xff] %v436_v47  ;;  %491 = vst [vmem:[#allocation2 + $0x100] sm:$0xff] %v437_v48  ;;  %v4590_v61 = vld [vmem:[%s9041_s0 + $0x240] sm:$0xff]  ;;  %v444_v62 = vmax.f32 %v4587_v60, 0.0  ;;  %v4588_v63 = vld [vmem:[%s9041_s0 + $0x230] sm:$0x3f] }
  0x66   : > { %492 = vst [vmem:[#allocation2 + $0x108] sm:$0x3f] %v438_v49  ;;  %493 = vst [vmem:[#allocation2 + $0x110] sm:$0x3f] %v439_v52  ;;  %v4589_v0 = vld [vmem:[%s9041_s0 + $0x238] sm:$0x3f] }
  0x67   : > { %495 = vst [vmem:[#allocation2 + $0x120] sm:$0xff] %v441_v54  ;;  %v447_v1 = vmax.f32 %v4590_v61, 0.0  ;;  %494 = vst [vmem:[#allocation2 + $0x118] sm:$0x3f] %v440_v57  ;;  %v445_v2 = vmax.f32 %v4588_v63, 0.0  ;;  %v446_v3 = vmax.f32 %v4589_v0, 0.0 }
  0x68   : > { %496 = vst [vmem:[#allocation2 + $0x128] sm:$0xff] %v442_v58  ;;  %497 = vst [vmem:[#allocation2 + $0x130] sm:$0xff] %v443_v59  ;;  %v4591_v4 = vld [vmem:[%s9041_s0 + $0x248] sm:$0xff]  ;;  %v4592_v5 = vld [vmem:[%s9041_s0 + $0x250] sm:$0xff] }
  0x69   : > { %v4593_v6 = vld [vmem:[%s9041_s0 + $0x258] sm:$0x3f]  ;;  %498 = vst [vmem:[#allocation2 + $0x138] sm:$0x3f] %v444_v62  ;;  %501 = vst [vmem:[#allocation2 + $0x150] sm:$0xff] %v447_v1  ;;  %v448_v7 = vmax.f32 %v4591_v4, 0.0 }
  0x6a   : > { %v449_v8 = vmax.f32 %v4592_v5, 0.0  ;;  %v450_v9 = vmax.f32 %v4593_v6, 0.0  ;;  %v4594_v10 = vld [vmem:[%s9041_s0 + $0x260] sm:$0x3f]  ;;  %v4596_v11 = vld [vmem:[%s9041_s0 + $0x270] sm:$0xff]  ;;  %v4597_v15 = vld [vmem:[%s9041_s0 + $0x278] sm:$0xff] }
  0x6b   : > { %499 = vst [vmem:[#allocation2 + $0x140] sm:$0x3f] %v445_v2  ;;  %500 = vst [vmem:[#allocation2 + $0x148] sm:$0x3f] %v446_v3  ;;  %v451_v12 = vmax.f32 %v4594_v10, 0.0  ;;  %v453_v14 = vmax.f32 %v4596_v11, 0.0 }
  0x6c   : > { %v4595_v13 = vld [vmem:[%s9041_s0 + $0x268] sm:$0x3f]  ;;  %v4598_v16 = vld [vmem:[%s9041_s0 + $0x280] sm:$0xff]  ;;  %502 = vst [vmem:[#allocation2 + $0x158] sm:$0xff] %v448_v7  ;;  %503 = vst [vmem:[#allocation2 + $0x160] sm:$0xff] %v449_v8  ;;  %v454_v18 = vmax.f32 %v4597_v15, 0.0 }
  0x6d   : > { %504 = vst [vmem:[#allocation2 + $0x168] sm:$0x3f] %v450_v9  ;;  %v452_v17 = vmax.f32 %v4595_v13, 0.0  ;;  %v455_v19 = vmax.f32 %v4598_v16, 0.0  ;;  %v4599_v20 = vld [vmem:[%s9041_s0 + $0x288] sm:$0x3f] }
  0x6e   : > { %505 = vst [vmem:[#allocation2 + $0x170] sm:$0x3f] %v451_v12  ;;  %507 = vst [vmem:[#allocation2 + $0x180] sm:$0xff] %v453_v14  ;;  %v456_v21 = vmax.f32 %v4599_v20, 0.0  ;;  %v4600_v22 = vld [vmem:[%s9041_s0 + $0x290] sm:$0x3f] }
  0x6f   : > { %v4601_v23 = vld [vmem:[%s9041_s0 + $0x298] sm:$0x3f]  ;;  %506 = vst [vmem:[#allocation2 + $0x178] sm:$0x3f] %v452_v17  ;;  %508 = vst [vmem:[#allocation2 + $0x188] sm:$0xff] %v454_v18  ;;  %v457_v24 = vmax.f32 %v4600_v22, 0.0 }
  0x70   : > { %509 = vst [vmem:[#allocation2 + $0x190] sm:$0xff] %v455_v19  ;;  %v458_v25 = vmax.f32 %v4601_v23, 0.0  ;;  %510 = vst [vmem:[#allocation2 + $0x198] sm:$0x3f] %v456_v21 }
  0x71   : > { %511 = vst [vmem:[#allocation2 + $0x1a0] sm:$0x3f] %v457_v24 }
  0x72   : > { %512 = vst [vmem:[#allocation2 + $0x1a8] sm:$0x3f] %v458_v25 }
  0x73 PF: > { %v555_v26 = vlaneseq  ;;  %v540_v27 = vld [vmem:[%s9042_s1] sm:$0x1f]  ;;  %v541_v28 = vld [vmem:[%s9042_s1 + $0x8] sm:$0x1f]  ;;  %v542_v29 = vld [vmem:[%s9042_s1 + $0x10] sm:$0x1f] }
  0x74   : > { %v5029_v31 = vld [vmem:[#allocation2] sm:$0xff]  ;;  %v5031_v32 = vld [vmem:[#allocation2 + $0x8] sm:$0xff]  ;;  %v5033_v33 = vld [vmem:[#allocation2 + $0x10] sm:$0xff] }
  0x75   : > { %v5027_v30 = vshrl.u32 %v555_v26, 7  ;;  %v543_v48 = vld [vmem:[%s9042_s1 + $0x18] sm:$0x1f]  ;;  %v544_v53 = vld [vmem:[%s9042_s1 + $0x20] sm:$0x1f] }
  0x76   : > { %v545_v54 = vld [vmem:[%s9042_s1 + $0x28] sm:$0x1f]  ;;  %v546_v3 = vld [vmem:[%s9042_s1 + $0x30] sm:$0x1f]  ;;  %v547_v4 = vld [vmem:[%s9042_s1 + $0x38] sm:$0x1f] }
  0x77   : > { %9498 = vst [vmem:[#allocation4_spill] sm:$0xff] %v5027_v30  ;;  %v5045_v40 = vsub.s32 0, %v5027_v30  ;;  %v5048_v41 = vsub.s32 1, %v5027_v30  ;;  %v5051_v42 = vsub.s32 2, %v5027_v30  ;;  %v5054_v43 = vsub.s32 3, %v5027_v30 }
  0x78   : > { %v5057_v44 = vsub.s32 4, %v5027_v30  ;;  %v548_v9 = vld [vmem:[%s9042_s1 + $0x40] sm:$0x1f]  ;;  %v549_v22 = vld [vmem:[%s9042_s1 + $0x48] sm:$0x1f]  ;;  %vm1043_vm0 = vcmp.lt.s32.totalorder %v5027_v30, 2 }
  0x79   : > { %v5035_v34 = vld [vmem:[#allocation2 + $0x18] sm:$0xff]  ;;  %v5037_v35 = vld [vmem:[#allocation2 + $0x20] sm:$0xff]  ;;  %v5066_v49 = vrot.slane %v540_v27, %v5045_v40  ;;  %v5069_v50 = vrot.slane %v541_v28, %v5045_v40  ;;  %v5072_v51 = vrot.slane %v542_v29, %v5045_v40  ;;  %v5075_v52 = vrot.slane %v540_v27, %v5048_v41  ;;  %v550_v23 = vld [vmem:[%s9042_s1 + $0x50] sm:$0x1f] }
  0x7a   : > { %v5039_v36 = vld [vmem:[#allocation2 + $0x28] sm:$0xff]  ;;  %v5084_v55 = vrot.slane %v541_v28, %v5048_v41  ;;  %v5087_v56 = vrot.slane %v542_v29, %v5048_v41  ;;  %v5090_v57 = vrot.slane %v540_v27, %v5051_v42  ;;  %v5093_v58 = vrot.slane %v541_v28, %v5051_v42  ;;  %v551_v24 = vld [vmem:[%s9042_s1 + $0x58] sm:$0x1f] }
  0x7b   : > { %9499 = vst [vmem:[#allocation5_spill] sm:$0xff] %v5066_v49  ;;  %9500 = vst [vmem:[#allocation6_spill] sm:$0xff] %v5069_v50  ;;  %v5096_v59 = vrot.slane %v542_v29, %v5051_v42  ;;  %v5099_v60 = vrot.slane %v540_v27, %v5054_v43  ;;  %v5102_v61 = vrot.slane %v541_v28, %v5054_v43  ;;  %vm1068_vm1 = vcmp.lt.s32.totalorder %v5027_v30, 1 }
  0x7c   : > { %9501 = vst [vmem:[#allocation7_spill] sm:$0xff] %v5072_v51  ;;  %9502 = vst [vmem:[#allocation8_spill] sm:$0xff] %v5075_v52  ;;  %v5105_v62 = vrot.slane %v542_v29, %v5054_v43  ;;  %v5108_v63 = vrot.slane %v540_v27, %v5057_v44  ;;  %v5111_v0 = vrot.slane %v541_v28, %v5057_v44  ;;  %vm1117_vm2 = vcmp.lt.s32.totalorder %v5027_v30, 7 }
  0x7d   : > { %9503 = vst [vmem:[#allocation9_spill] sm:$0xff] %v5084_v55  ;;  %9504 = vst [vmem:[#allocation10_spill] sm:$0xff] %v5087_v56  ;;  %v5114_v1 = vrot.slane %v542_v29, %v5057_v44  ;;  %v5117_v2 = vrot.slane %v543_v48, %v5045_v40  ;;  %v5126_v5 = vrot.slane %v544_v53, %v5045_v40  ;;  %vm1148_vm3 = vcmp.lt.s32.totalorder %v5027_v30, 6 }
  0x7e   : > { %9505 = vst [vmem:[#allocation11_spill] sm:$0xff] %v5090_v57  ;;  %9506 = vst [vmem:[#allocation12_spill] sm:$0xff] %v5093_v58  ;;  %v5129_v6 = vrot.slane %v545_v54, %v5045_v40  ;;  %v5132_v7 = vrot.slane %v543_v48, %v5048_v41  ;;  %v5135_v8 = vrot.slane %v544_v53, %v5048_v41 }
  0x7f   : > { %9507 = vst [vmem:[#allocation13_spill] sm:$0xff] %v5096_v59  ;;  %9508 = vst [vmem:[#allocation14_spill] sm:$0xff] %v5099_v60  ;;  %v5141_v10 = vrot.slane %v545_v54, %v5048_v41  ;;  %v5144_v11 = vrot.slane %v543_v48, %v5051_v42  ;;  %v5147_v12 = vrot.slane %v544_v53, %v5051_v42 }
  0x80   : > { %9509 = vst [vmem:[#allocation15_spill] sm:$0xff] %v5102_v61  ;;  %9510 = vst [vmem:[#allocation16_spill] sm:$0xff] %v5105_v62  ;;  %v5150_v13 = vrot.slane %v545_v54, %v5051_v42  ;;  %v5153_v14 = vrot.slane %v543_v48, %v5054_v43  ;;  %v5156_v15 = vrot.slane %v544_v53, %v5054_v43 }
  0x81   : > { %9511 = vst [vmem:[#allocation17_spill] sm:$0xff] %v5108_v63  ;;  %9512 = vst [vmem:[#allocation18_spill] sm:$0xff] %v5111_v0  ;;  %v5159_v16 = vrot.slane %v545_v54, %v5054_v43  ;;  %v5162_v17 = vrot.slane %v543_v48, %v5057_v44  ;;  %v5165_v18 = vrot.slane %v544_v53, %v5057_v44 }
  0x82   : > { %9513 = vst [vmem:[#allocation19_spill] sm:$0xff] %v5114_v1  ;;  %9514 = vst [vmem:[#allocation20_spill] sm:$0xff] %v5117_v2  ;;  %v5168_v19 = vrot.slane %v545_v54, %v5057_v44  ;;  %v5171_v20 = vrot.slane %v546_v3, %v5045_v40  ;;  %v5174_v21 = vrot.slane %v547_v4, %v5045_v40 }
  0x83   : > { %9515 = vst [vmem:[#allocation21_spill] sm:$0xff] %v5126_v5  ;;  %9516 = vst [vmem:[#allocation22_spill] sm:$0xff] %v5129_v6  ;;  %v5186_v25 = vrot.slane %v548_v9, %v5045_v40  ;;  %v5189_v26 = vrot.slane %v546_v3, %v5048_v41  ;;  %v5192_v27 = vrot.slane %v547_v4, %v5048_v41 }
  0x84   : > { %9517 = vst [vmem:[#allocation23_spill] sm:$0xff] %v5132_v7  ;;  %9518 = vst [vmem:[#allocation24_spill] sm:$0xff] %v5135_v8  ;;  %v5195_v28 = vrot.slane %v548_v9, %v5048_v41  ;;  %v5198_v29 = vrot.slane %v546_v3, %v5051_v42  ;;  %v5201_v48 = vrot.slane %v547_v4, %v5051_v42 }
  0x85   : > { %9519 = vst [vmem:[#allocation25_spill] sm:$0xff] %v5141_v10  ;;  %9520 = vst [vmem:[#allocation26_spill] sm:$0xff] %v5144_v11  ;;  %v5204_v53 = vrot.slane %v548_v9, %v5051_v42  ;;  %v5207_v54 = vrot.slane %v546_v3, %v5054_v43  ;;  %v5210_v39 = vrot.slane %v547_v4, %v5054_v43 }
  0x86   : > { %9521 = vst [vmem:[#allocation27_spill] sm:$0xff] %v5147_v12  ;;  %9522 = vst [vmem:[#allocation28_spill] sm:$0xff] %v5150_v13  ;;  %v5213_v47 = vrot.slane %v548_v9, %v5054_v43  ;;  %v5216_v38 = vrot.slane %v546_v3, %v5057_v44  ;;  %v5219_v46 = vrot.slane %v547_v4, %v5057_v44  ;;  %v552_v3 = vld [vmem:[%s9042_s1 + $0x60] sm:$0x1f]  ;;  %v553_v4 = vld [vmem:[%s9042_s1 + $0x68] sm:$0x1f] }
  0x87   : > { %9523 = vst [vmem:[#allocation29_spill] sm:$0xff] %v5153_v14  ;;  %9524 = vst [vmem:[#allocation30_spill] sm:$0xff] %v5156_v15  ;;  %v5222_v37 = vrot.slane %v548_v9, %v5057_v44  ;;  %v5225_v45 = vrot.slane %v549_v22, %v5045_v40  ;;  %v554_v9 = vld [vmem:[%s9042_s1 + $0x70] sm:$0x1f]  ;;  %v1112_v15 = vrot.slane %v5031_v32, 1 }
  0x88   : > { %9525 = vst [vmem:[#allocation31_spill] sm:$0xff] %v5159_v16  ;;  %9526 = vst [vmem:[#allocation32_spill] sm:$0xff] %v5162_v17 }
  0x89   : > { %9527 = vst [vmem:[#allocation33_spill] sm:$0xff] %v5165_v18  ;;  %9528 = vst [vmem:[#allocation34_spill] sm:$0xff] %v5168_v19 }
  0x8a   : > { %9529 = vst [vmem:[#allocation35_spill] sm:$0xff] %v5171_v20  ;;  %9530 = vst [vmem:[#allocation36_spill] sm:$0xff] %v5174_v21  ;;  %v1102_v21 = vmul.f32 %v5035_v34, %v5090_v57 }
  0x8b   : > { %9531 = vst [vmem:[#allocation37_spill] sm:$0xff] %v5186_v25  ;;  %9532 = vst [vmem:[#allocation38_spill] sm:$0xff] %v5189_v26 }
  0x8c   : > { %9533 = vst [vmem:[#allocation39_spill] sm:$0xff] %v5192_v27  ;;  %9534 = vst [vmem:[#allocation40_spill] sm:$0xff] %v5195_v28  ;;  %v9724_v30 = vld [vmem:[#allocation25_spill] sm:$0xff] }
  0x8d   : > { %9535 = vst [vmem:[#allocation41_spill] sm:$0xff] %v5198_v29  ;;  %9536 = vst [vmem:[#allocation42_spill] sm:$0xff] %v5201_v48 }
  0x8e   : > { %9537 = vst [vmem:[#allocation43_spill] sm:$0xff] %v5204_v53  ;;  %9538 = vst [vmem:[#allocation44_spill] sm:$0xff] %v5207_v54  ;;  %v5228_v54 = vrot.slane %v550_v23, %v5045_v40 }
  0x8f   : > { %9539 = vst [vmem:[#allocation45_spill] sm:$0xff] %v5210_v39  ;;  %9540 = vst [vmem:[#allocation46_spill] sm:$0xff] %v5213_v47  ;;  %v5231_v39 = vrot.slane %v551_v24, %v5045_v40  ;;  %v5261_v47 = vrot.slane %v549_v22, %v5054_v43 }
  0x90   : > { %9541 = vst [vmem:[#allocation47_spill] sm:$0xff] %v5216_v38  ;;  %9542 = vst [vmem:[#allocation48_spill] sm:$0xff] %v5219_v46  ;;  %v5255_v46 = vrot.slane %v550_v23, %v5051_v42  ;;  %v5258_v38 = vrot.slane %v551_v24, %v5051_v42 }
  0x91   : > { %9543 = vst [vmem:[#allocation49_spill] sm:$0xff] %v5222_v37  ;;  %9544 = vst [vmem:[#allocation50_spill] sm:$0xff] %v5225_v45  ;;  %v5243_v45 = vrot.slane %v549_v22, %v5048_v41  ;;  %v5252_v37 = vrot.slane %v549_v22, %v5051_v42 }
  0x92   : > { %9545 = vst [vmem:[#allocation51_spill] sm:$0xff] %v5228_v54  ;;  %9546 = vst [vmem:[#allocation52_spill] sm:$0xff] %v5231_v39  ;;  %v5246_v54 = vrot.slane %v550_v23, %v5048_v41  ;;  %v5249_v39 = vrot.slane %v551_v24, %v5048_v41 }
  0x93   : > { %9547 = vst [vmem:[#allocation53_spill] sm:$0xff] %v5243_v45  ;;  %9550 = vst [vmem:[#allocation56_spill] sm:$0xff] %v5252_v37  ;;  %v5264_v45 = vrot.slane %v550_v23, %v5054_v43  ;;  %v5273_v37 = vrot.slane %v550_v23, %v5057_v44  ;;  %v5294_v23 = vrot.slane %v554_v9, %v5048_v41 }
  0x94   : > { %9548 = vst [vmem:[#allocation54_spill] sm:$0xff] %v5246_v54  ;;  %9549 = vst [vmem:[#allocation55_spill] sm:$0xff] %v5249_v39  ;;  %v5267_v54 = vrot.slane %v551_v24, %v5054_v43  ;;  %v5270_v39 = vrot.slane %v549_v22, %v5057_v44  ;;  %v5291_v22 = vrot.slane %v553_v4, %v5048_v41 }
  0x95   : > { %9551 = vst [vmem:[#allocation57_spill] sm:$0xff] %v5255_v46  ;;  %9552 = vst [vmem:[#allocation58_spill] sm:$0xff] %v5258_v38  ;;  %v5276_v46 = vrot.slane %v551_v24, %v5057_v44  ;;  %v5279_v38 = vrot.slane %v552_v3, %v5045_v40  ;;  %v5297_v24 = vrot.slane %v552_v3, %v5051_v42 }
  0x96   : > { %9553 = vst [vmem:[#allocation59_spill] sm:$0xff] %v5261_v47  ;;  %9554 = vst [vmem:[#allocation60_spill] sm:$0xff] %v5264_v45  ;;  %v5282_v47 = vrot.slane %v553_v4, %v5045_v40  ;;  %v5285_v45 = vrot.slane %v554_v9, %v5045_v40  ;;  %v5306_v40 = vrot.slane %v552_v3, %v5054_v43 }
  0x97   : > { %9555 = vst [vmem:[#allocation61_spill] sm:$0xff] %v5267_v54  ;;  %9556 = vst [vmem:[#allocation62_spill] sm:$0xff] %v5270_v39  ;;  %v5288_v54 = vrot.slane %v552_v3, %v5048_v41  ;;  %v5315_v41 = vrot.slane %v552_v3, %v5057_v44  ;;  %v9577_v3 = vrot.slane %v5031_v32, 6 }
  0x98   : > { %9557 = vst [vmem:[#allocation63_spill] sm:$0xff] %v5273_v37  ;;  %9558 = vst [vmem:[#allocation64_spill] sm:$0xff] %v5276_v46  ;;  %v1064_v37 = vrot.slane %v5033_v33, 7 }
  0x99   : > { %9559 = vst [vmem:[#allocation65_spill] sm:$0xff] %v5279_v38  ;;  %9560 = vst [vmem:[#allocation66_spill] sm:$0xff] %v5282_v47  ;;  %v5300_v38 = vrot.slane %v553_v4, %v5051_v42  ;;  %v5303_v47 = vrot.slane %v554_v9, %v5051_v42  ;;  %v9574_v42 = vrot.slane %v5035_v34, 6 }
  0x9a   : > { %9561 = vst [vmem:[#allocation67_spill] sm:$0xff] %v5285_v45  ;;  %9562 = vst [vmem:[#allocation68_spill] sm:$0xff] %v5288_v54  ;;  %v5309_v54 = vrot.slane %v553_v4, %v5054_v43 }
  0x9b   : > { %9563 = vst [vmem:[#allocation69_spill] sm:$0xff] %v5291_v22  ;;  %9564 = vst [vmem:[#allocation70_spill] sm:$0xff] %v5294_v23  ;;  %v5312_v22 = vrot.slane %v554_v9, %v5054_v43  ;;  %v9576_v43 = vrot.slane %v5037_v35, 6 }
  0x9c   : > { %9565 = vst [vmem:[#allocation71_spill] sm:$0xff] %v5297_v24  ;;  %9566 = vst [vmem:[#allocation72_spill] sm:$0xff] %v5300_v38  ;;  %v5318_v24 = vrot.slane %v553_v4, %v5057_v44  ;;  %v5321_v38 = vrot.slane %v554_v9, %v5057_v44  ;;  %v9579_v44 = vrot.slane %v5033_v33, 6 }
  0x9d   : > { %9567 = vst [vmem:[#allocation73_spill] sm:$0xff] %v5303_v47  ;;  %9568 = vst [vmem:[#allocation74_spill] sm:$0xff] %v5306_v40  ;;  %v9575_v40 = vrot.slane %v5029_v31, 6  ;;  %v1045_v4 = vsel %vm1043_vm0, %v9577_v3, %v9576_v43 }
  0x9e   : > { %9569 = vst [vmem:[#allocation75_spill] sm:$0xff] %v5309_v54  ;;  %9570 = vst [vmem:[#allocation76_spill] sm:$0xff] %v5312_v22  ;;  %v9583_v22 = vmov %v9576_v43  ;;  %v1060_v45 = vmul.f32 %v1045_v4, %v5069_v50 }
  0x9f   : > { %9571 = vst [vmem:[#allocation77_spill] sm:$0xff] %v5315_v41  ;;  %9572 = vst [vmem:[#allocation78_spill] sm:$0xff] %v5318_v24  ;;  %v1044_v54 = vsel %vm1043_vm0, %v9575_v40, %v9574_v42  ;;  %v9578_v24 = vrot.slane %v5039_v36, 6  ;;  %v9581_v41 = vmov %v9574_v42  ;;  %v9582_v42 = vmov %v9577_v3 }
  0xa0   : > { %9573 = vst [vmem:[#allocation79_spill] sm:$0xff] %v5321_v38  ;;  %v9580_v38 = vmov %v9575_v40  ;;  %v1048_v43 = vsel %vm1043_vm0, %v9583_v22, %v9582_v42  ;;  %v9584_v3 = vmov %v9579_v44  ;;  %v1059_v23 = vmul.f32 %v1044_v54, %v5066_v49 }
  0xa1   : > { %v1046_v9 = vsel %vm1043_vm0, %v9579_v44, %v9578_v24  ;;  %v1047_v40 = vsel %vm1043_vm0, %v9581_v41, %v9580_v38  ;;  %v9585_v47 = vmov %v9578_v24  ;;  %v1057_v38 = vmul.f32 %v1048_v43, %v5069_v50 }
  0xa2   : > { %v1049_v24 = vsel %vm1043_vm0, %v9585_v47, %v9584_v3  ;;  %v1056_v44 = vmul.f32 %v1047_v40, %v5066_v49  ;;  %v1061_v46 = vmul.f32 %v1046_v9, %v5072_v51  ;;  %v1062_v22 = vrot.slane %v5029_v31, 7 }
  0xa3   : > { %v1058_v41 = vmul.f32 %v1049_v24, %v5072_v51  ;;  %v1063_v42 = vrot.slane %v5031_v32, 7  ;;  %v1065_v47 = vrot.slane %v5035_v34, 7  ;;  %v1066_v40 = vrot.slane %v5037_v35, 7 }
  0xa4   : > { %v1067_v54 = vrot.slane %v5039_v36, 7  ;;  %v1099_v43 = vmul.f32 %v5029_v31, %v5090_v57  ;;  %v1100_v3 = vmul.f32 %v5031_v32, %v5093_v58  ;;  %v1101_v24 = vmul.f32 %v5033_v33, %v5096_v59 }
  0xa5   : > { %v1069_v4 = vsel %vm1068_vm1, %v1062_v22, %v1065_v47  ;;  %v1072_v9 = vsel %vm1068_vm1, %v1065_v47, %v1062_v22  ;;  %v1070_v39 = vsel %vm1068_vm1, %v1063_v42, %v1066_v40  ;;  %v1073_v48 = vsel %vm1068_vm1, %v1066_v40, %v1063_v42 }
  0xa6   : > { %v1071_v53 = vsel %vm1068_vm1, %v1064_v37, %v1067_v54  ;;  %v1074_v29 = vsel %vm1068_vm1, %v1067_v54, %v1064_v37  ;;  %v1081_v22 = vmul.f32 %v1072_v9, %v5075_v52  ;;  %v1082_v47 = vmul.f32 %v1073_v48, %v5084_v55 }
  0xa7   : > { %v1083_v28 = vmul.f32 %v1074_v29, %v5087_v56  ;;  %v1084_v27 = vmul.f32 %v1069_v4, %v5075_v52  ;;  %v1085_v26 = vmul.f32 %v1070_v39, %v5084_v55  ;;  %v1086_v25 = vmul.f32 %v1071_v53, %v5087_v56 }
  0xa8   : > { %v1103_v42 = vmul.f32 %v5037_v35, %v5093_v58  ;;  %v1087_v40 = vadd.f32 %v1081_v22, %v1056_v44  ;;  %v1088_v37 = vadd.f32 %v1082_v47, %v1057_v38  ;;  %v1104_v29 = vmul.f32 %v5039_v36, %v5096_v59  ;;  %v5432_v47 = vld [vmem:[#allocation2 + $0x30] sm:$0xff] }
  0xa9   : > { %v1089_v54 = vadd.f32 %v1083_v28, %v1058_v41  ;;  %v1090_v9 = vadd.f32 %v1084_v27, %v1059_v23  ;;  %v1091_v20 = vadd.f32 %v1085_v26, %v1060_v45  ;;  %v1092_v48 = vadd.f32 %v1086_v25, %v1061_v46 }
  0xaa   : > { %v1111_v4 = vrot.slane %v5029_v31, 1  ;;  %v1105_v39 = vadd.f32 %v1099_v43, %v1087_v40  ;;  %v1106_v19 = vadd.f32 %v1100_v3, %v1088_v37  ;;  %v1113_v44 = vrot.slane %v5033_v33, 1 }
  0xab   : > { %v1107_v53 = vadd.f32 %v1101_v24, %v1089_v54  ;;  %v1108_v18 = vadd.f32 %v1102_v21, %v1090_v9  ;;  %v1109_v17 = vadd.f32 %v1103_v42, %v1091_v20  ;;  %v1110_v16 = vadd.f32 %v1104_v29, %v1092_v48  ;;  %v5434_v42 = vld [vmem:[#allocation2 + $0x38] sm:$0xff] }
  0xac   : > { %v1114_v28 = vrot.slane %v5035_v34, 1  ;;  %v1115_v45 = vrot.slane %v5037_v35, 1  ;;  %v1116_v46 = vrot.slane %v5039_v36, 1  ;;  %v1142_v25 = vrot.slane %v5029_v31, 2 }
  0xad   : > { %v1143_v26 = vrot.slane %v5031_v32, 2  ;;  %v1144_v21 = vrot.slane %v5033_v33, 2  ;;  %v1145_v20 = vrot.slane %v5035_v34, 2  ;;  %v1146_v54 = vrot.slane %v5037_v35, 2 }
  0xae   : > { %v1118_v27 = vsel %vm1117_vm2, %v1111_v4, %v1114_v28  ;;  %v1119_v23 = vsel %vm1117_vm2, %v1112_v15, %v1115_v45  ;;  %v1120_v38 = vsel %vm1117_vm2, %v1113_v44, %v1116_v46  ;;  %v1121_v41 = vsel %vm1117_vm2, %v1114_v28, %v1111_v4 }
  0xaf   : > { %v1122_v31 = vsel %vm1117_vm2, %v1115_v45, %v1112_v15  ;;  %v1123_v32 = vsel %vm1117_vm2, %v1116_v46, %v1113_v44  ;;  %v1130_v33 = vmul.f32 %v1118_v27, %v5099_v60  ;;  %v1131_v34 = vmul.f32 %v1119_v23, %v5102_v61  ;;  %v5436_v15 = vld [vmem:[#allocation2 + $0x40] sm:$0xff] }
  0xb0   : > { %v1132_v43 = vmul.f32 %v1120_v38, %v5105_v62  ;;  %v1133_v3 = vmul.f32 %v1121_v41, %v5099_v60  ;;  %v1134_v24 = vmul.f32 %v1122_v31, %v5102_v61  ;;  %v1135_v22 = vmul.f32 %v1123_v32, %v5105_v62  ;;  %v5466_v31 = vld [vmem:[#allocation2 + $0x58] sm:$0xff] }
  0xb1   : > { %v1136_v40 = vadd.f32 %v1130_v33, %v1105_v39  ;;  %v1137_v37 = vadd.f32 %v1131_v34, %v1106_v19  ;;  %v1147_v9 = vrot.slane %v5039_v36, 2  ;;  %v1180_v28 = vrot.slane %v5432_v47, 6 }
  0xb2   : > { %v1138_v48 = vadd.f32 %v1132_v43, %v1107_v53  ;;  %v1139_v29 = vadd.f32 %v1133_v3, %v1108_v18  ;;  %v1140_v4 = vadd.f32 %v1134_v24, %v1109_v17  ;;  %v1141_v44 = vadd.f32 %v1135_v22, %v1110_v16  ;;  %v5452_v17 = vld [vmem:[#allocation2 + $0x48] sm:$0xff]  ;;  %v5454_v18 = vld [vmem:[#allocation2 + $0x50] sm:$0xff] }
  0xb3   : > { %v1181_v45 = vrot.slane %v5434_v42, 6  ;;  %v1182_v46 = vrot.slane %v5436_v15, 6  ;;  %v1149_v39 = vsel %vm1148_vm3, %v1142_v25, %v1145_v20  ;;  %v1150_v35 = vsel %vm1148_vm3, %v1143_v26, %v1146_v54 }
  0xb4   : > { %v1151_v36 = vsel %vm1148_vm3, %v1144_v21, %v1147_v9  ;;  %v1152_v16 = vsel %vm1148_vm3, %v1145_v20, %v1142_v25  ;;  %v1153_v19 = vsel %vm1148_vm3, %v1146_v54, %v1143_v26  ;;  %v1154_v53 = vsel %vm1148_vm3, %v1147_v9, %v1144_v21 }
  0xb5   : > { %v1161_v27 = vmul.f32 %v1149_v39, %v5108_v63  ;;  %v1162_v23 = vmul.f32 %v1150_v35, %v5111_v0  ;;  %v1163_v38 = vmul.f32 %v1151_v36, %v5114_v1  ;;  %v1164_v41 = vmul.f32 %v1152_v16, %v5108_v63 }
  0xb6   : > { %v1165_v25 = vmul.f32 %v1153_v19, %v5111_v0  ;;  %v1166_v20 = vmul.f32 %v1154_v53, %v5114_v1  ;;  %v1183_v26 = vrot.slane %v5452_v17, 6  ;;  %v1184_v21 = vrot.slane %v5454_v18, 6 }
  0xb7   : > { %v1167_v32 = vadd.f32 %v1161_v27, %v1136_v40  ;;  %v1168_v33 = vadd.f32 %v1162_v23, %v1137_v37  ;;  %v1169_v34 = vadd.f32 %v1163_v38, %v1138_v48  ;;  %v1170_v43 = vadd.f32 %v1164_v41, %v1139_v29 }
  0xb8   : > { %v1171_v3 = vadd.f32 %v1165_v25, %v1140_v4  ;;  %v1172_v24 = vadd.f32 %v1166_v20, %v1141_v44  ;;  %v1185_v22 = vrot.slane %v5466_v31, 6  ;;  %v1186_v54 = vsel %vm1043_vm0, %v1180_v28, %v1183_v26 }
  0xb9   : > { %v1187_v9 = vsel %vm1043_vm0, %v1181_v45, %v1184_v21  ;;  %v1189_v40 = vsel %vm1043_vm0, %v1183_v26, %v1180_v28  ;;  %v1190_v37 = vsel %vm1043_vm0, %v1184_v21, %v1181_v45  ;;  %v1195_v48 = vmul.f32 %v1186_v54, %v5066_v49 }
  0xba   : > { %v1192_v39 = vmul.f32 %v1189_v40, %v5066_v49  ;;  %v1196_v29 = vmul.f32 %v1187_v9, %v5069_v50  ;;  %v1188_v4 = vsel %vm1043_vm0, %v1182_v46, %v1185_v22  ;;  %v1191_v44 = vsel %vm1043_vm0, %v1185_v22, %v1182_v46 }
  0xbb   : > { %v1193_v35 = vmul.f32 %v1190_v37, %v5069_v50  ;;  %v1204_v36 = vmul.f32 %v1189_v40, %v5117_v2  ;;  %v1194_v28 = vmul.f32 %v1191_v44, %v5072_v51  ;;  %v1197_v45 = vmul.f32 %v1188_v4, %v5072_v51 }
  0xbc   : > { %v1205_v16 = vmul.f32 %v1190_v37, %v5126_v5  ;;  %v1206_v19 = vmul.f32 %v1191_v44, %v5129_v6  ;;  %v1207_v53 = vmul.f32 %v1186_v54, %v5117_v2  ;;  %v1208_v27 = vmul.f32 %v1187_v9, %v5126_v5 }
  0xbd   : > { %v1209_v23 = vmul.f32 %v1188_v4, %v5129_v6  ;;  %v1210_v38 = vadd.f32 %v1204_v36, %v1167_v32  ;;  %v1216_v25 = vrot.slane %v5432_v47, 7  ;;  %v1217_v20 = vrot.slane %v5434_v42, 7 }
  0xbe   : > { %v1211_v46 = vadd.f32 %v1205_v16, %v1168_v33  ;;  %v1212_v41 = vadd.f32 %v1206_v19, %v1169_v34  ;;  %v1213_v26 = vadd.f32 %v1207_v53, %v1170_v43  ;;  %v1214_v21 = vadd.f32 %v1208_v27, %v1171_v3 }
  0xbf   : > { %v1215_v22 = vadd.f32 %v1209_v23, %v1172_v24  ;;  %v1218_v40 = vrot.slane %v5436_v15, 7  ;;  %v1219_v37 = vrot.slane %v5452_v17, 7  ;;  %v1220_v54 = vrot.slane %v5454_v18, 7 }
  0xc0   : > { %v1221_v9 = vrot.slane %v5466_v31, 7  ;;  %v1258_v32 = vmul.f32 %v5432_v47, %v5090_v57  ;;  %v1259_v33 = vmul.f32 %v5434_v42, %v5093_v58  ;;  %v1260_v34 = vmul.f32 %v5436_v15, %v5096_v59 }
  0xc1   : > { %v1261_v43 = vmul.f32 %v5452_v17, %v5090_v57  ;;  %v1262_v3 = vmul.f32 %v5454_v18, %v5093_v58  ;;  %v1222_v24 = vsel %vm1068_vm1, %v1216_v25, %v1219_v37  ;;  %v1223_v4 = vsel %vm1068_vm1, %v1217_v20, %v1220_v54 }
  0xc2   : > { %v1224_v44 = vsel %vm1068_vm1, %v1218_v40, %v1221_v9  ;;  %v1225_v36 = vsel %vm1068_vm1, %v1219_v37, %v1216_v25  ;;  %v1226_v16 = vsel %vm1068_vm1, %v1220_v54, %v1217_v20  ;;  %v1227_v19 = vsel %vm1068_vm1, %v1221_v9, %v1218_v40 }
  0xc3   : > { %v1228_v53 = vmul.f32 %v1225_v36, %v5075_v52  ;;  %v1231_v27 = vmul.f32 %v1222_v24, %v5075_v52  ;;  %v1229_v23 = vmul.f32 %v1226_v16, %v5084_v55  ;;  %v1230_v58 = vmul.f32 %v1227_v19, %v5087_v56 }
  0xc4   : > { %v1232_v57 = vmul.f32 %v1223_v4, %v5084_v55  ;;  %v1233_v6 = vmul.f32 %v1224_v44, %v5087_v56  ;;  %v1246_v37 = vmul.f32 %v1225_v36, %v5132_v7  ;;  %v1247_v20 = vmul.f32 %v1226_v16, %v5135_v8 }
  0xc5   : > { %v1234_v5 = vadd.f32 %v1228_v53, %v1192_v39  ;;  %v1237_v25 = vadd.f32 %v1231_v27, %v1195_v48  ;;  %v1235_v54 = vadd.f32 %v1229_v23, %v1193_v35  ;;  %v1236_v40 = vadd.f32 %v1230_v58, %v1194_v28 }
  0xc6   : > { %v1238_v9 = vadd.f32 %v1232_v57, %v1196_v29  ;;  %v1239_v2 = vadd.f32 %v1233_v6, %v1197_v45  ;;  %v1248_v52 = vmul.f32 %v1227_v19, %v5141_v10  ;;  %v1249_v51 = vmul.f32 %v1222_v24, %v5132_v7 }
  0xc7   : > { %v1250_v50 = vmul.f32 %v1223_v4, %v5135_v8  ;;  %v1251_v55 = vmul.f32 %v1224_v44, %v5141_v10  ;;  %v1252_v49 = vadd.f32 %v1246_v37, %v1210_v38  ;;  %v1253_v56 = vadd.f32 %v1247_v20, %v1211_v46 }
  0xc8   : > { %v1263_v39 = vmul.f32 %v5466_v31, %v5096_v59  ;;  %v1264_v48 = vadd.f32 %v1258_v32, %v1234_v5  ;;  %v1254_v36 = vadd.f32 %v1248_v52, %v1212_v41  ;;  %v1255_v16 = vadd.f32 %v1249_v51, %v1213_v26 }
  0xc9   : > { %v1256_v35 = vadd.f32 %v1250_v50, %v1214_v21  ;;  %v1257_v58 = vadd.f32 %v1251_v55, %v1215_v22  ;;  %v1265_v57 = vadd.f32 %v1259_v33, %v1235_v54  ;;  %v1266_v6 = vadd.f32 %v1260_v34, %v1236_v40 }
  0xca   : > { %v1267_v29 = vadd.f32 %v1261_v43, %v1237_v25  ;;  %v1268_v28 = vadd.f32 %v1262_v3, %v1238_v9  ;;  %v1269_v45 = vadd.f32 %v1263_v39, %v1239_v2  ;;  %v1276_v24 = vmul.f32 %v5432_v47, %v5144_v11 }
  0xcb   : > { %v1277_v38 = vmul.f32 %v5434_v42, %v5147_v12  ;;  %v1278_v46 = vmul.f32 %v5436_v15, %v5150_v13  ;;  %v1279_v52 = vmul.f32 %v5452_v17, %v5144_v11  ;;  %v1280_v50 = vmul.f32 %v5454_v18, %v5147_v12 }
  0xcc   : > { %v1281_v51 = vmul.f32 %v5466_v31, %v5150_v13  ;;  %v1288_v55 = vrot.slane %v5432_v47, 1  ;;  %v1282_v2 = vadd.f32 %v1276_v24, %v1252_v49  ;;  %v1289_v26 = vrot.slane %v5434_v42, 1 }
  0xcd   : > { %v1283_v5 = vadd.f32 %v1277_v38, %v1253_v56  ;;  %v1284_v41 = vadd.f32 %v1278_v46, %v1254_v36  ;;  %v1285_v21 = vadd.f32 %v1279_v52, %v1255_v16  ;;  %v1286_v22 = vadd.f32 %v1280_v50, %v1256_v35  ;;  %v9586_v36 = vld [vmem:[#allocation30_spill] sm:$0xff]  ;;  %v9587_v46 = vld [vmem:[#allocation31_spill] sm:$0xff] }
  0xce   : > { %v1287_v32 = vadd.f32 %v1281_v51, %v1257_v58  ;;  %v1290_v33 = vrot.slane %v5436_v15, 1  ;;  %v1291_v34 = vrot.slane %v5452_v17, 1  ;;  %v1292_v43 = vrot.slane %v5454_v18, 1 }
  0xcf   : > { %v1293_v3 = vrot.slane %v5466_v31, 1  ;;  %v1330_v4 = vrot.slane %v5432_v47, 2  ;;  %v1331_v44 = vrot.slane %v5434_v42, 2  ;;  %v1332_v49 = vrot.slane %v5436_v15, 2 }
  0xd0   : > { %v1333_v56 = vrot.slane %v5452_v17, 2  ;;  %v1334_v19 = vrot.slane %v5454_v18, 2  ;;  %v1294_v53 = vsel %vm1117_vm2, %v1288_v55, %v1291_v34  ;;  %v1295_v27 = vsel %vm1117_vm2, %v1289_v26, %v1292_v43 }
  0xd1   : > { %v1296_v23 = vsel %vm1117_vm2, %v1290_v33, %v1293_v3  ;;  %v1297_v47 = vsel %vm1117_vm2, %v1291_v34, %v1288_v55  ;;  %v1298_v42 = vsel %vm1117_vm2, %v1292_v43, %v1289_v26  ;;  %v1299_v15 = vsel %vm1117_vm2, %v1293_v3, %v1290_v33 }
  0xd2   : > { %v1300_v17 = vmul.f32 %v1294_v53, %v5099_v60  ;;  %v1301_v18 = vmul.f32 %v1295_v27, %v5102_v61  ;;  %v1302_v25 = vmul.f32 %v1296_v23, %v5105_v62  ;;  %v1303_v37 = vmul.f32 %v1297_v47, %v5099_v60 }
  0xd3   : > { %v1304_v20 = vmul.f32 %v1298_v42, %v5102_v61  ;;  %v1305_v54 = vmul.f32 %v1299_v15, %v5105_v62  ;;  %v1318_v39 = vmul.f32 %v1294_v53, %v5153_v14  ;;  %v1319_v16 = vmul.f32 %v1295_v27, %v9586_v36  ;;  %v9588_v27 = vld [vmem:[#allocation32_spill] sm:$0xff]  ;;  %v9599_v61 = vld [vmem:[#allocation37_spill] sm:$0xff] }
  0xd4   : > { %v1306_v40 = vadd.f32 %v1300_v17, %v1264_v48  ;;  %v1307_v9 = vadd.f32 %v1301_v18, %v1265_v57  ;;  %v1308_v35 = vadd.f32 %v1302_v25, %v1266_v6  ;;  %v1309_v58 = vadd.f32 %v1303_v37, %v1267_v29  ;;  %v9590_v25 = vld [vmem:[#allocation34_spill] sm:$0xff] }
  0xd5   : > { %v1310_v24 = vadd.f32 %v1304_v20, %v1268_v28  ;;  %v1311_v38 = vadd.f32 %v1305_v54, %v1269_v45  ;;  %v1320_v52 = vmul.f32 %v1296_v23, %v9587_v46  ;;  %v1321_v50 = vmul.f32 %v1297_v47, %v5153_v14  ;;  %v5610_v20 = vld [vmem:[#allocation2 + $0x70] sm:$0xff] }
  0xd6   : > { %v1322_v51 = vmul.f32 %v1298_v42, %v9586_v36  ;;  %v1323_v55 = vmul.f32 %v1299_v15, %v9587_v46  ;;  %v1324_v26 = vadd.f32 %v1318_v39, %v1282_v2  ;;  %v1325_v33 = vadd.f32 %v1319_v16, %v1283_v5  ;;  %v5607_v42 = vld [vmem:[#allocation2 + $0x68] sm:$0xff]  ;;  %v5615_v16 = vld [vmem:[#allocation2 + $0x78] sm:$0xff] }
  0xd7   : > { %v1335_v48 = vrot.slane %v5466_v31, 2  ;;  %v1336_v57 = vsel %vm1148_vm3, %v1330_v4, %v1333_v56  ;;  %v1326_v34 = vadd.f32 %v1320_v52, %v1284_v41  ;;  %v1327_v6 = vadd.f32 %v1321_v50, %v1285_v21  ;;  %v5619_v52 = vld [vmem:[#allocation2 + $0x88] sm:$0xff] }
  0xd8   : > { %v1328_v29 = vadd.f32 %v1322_v51, %v1286_v22  ;;  %v1329_v28 = vadd.f32 %v1323_v55, %v1287_v32  ;;  %v1337_v45 = vsel %vm1148_vm3, %v1331_v44, %v1334_v19  ;;  %v1339_v3 = vsel %vm1148_vm3, %v1333_v56, %v1330_v4 }
  0xd9   : > { %v1338_v43 = vsel %vm1148_vm3, %v1332_v49, %v1335_v48  ;;  %v1340_v2 = vsel %vm1148_vm3, %v1334_v19, %v1331_v44  ;;  %v1341_v31 = vsel %vm1148_vm3, %v1335_v48, %v1332_v49  ;;  %v1342_v5 = vmul.f32 %v1336_v57, %v5108_v63  ;;  %v9589_v19 = vld [vmem:[#allocation33_spill] sm:$0xff]  ;;  %v5605_v49 = vld [vmem:[#allocation2 + $0x60] sm:$0xff] }
  0xda   : > { %v1343_v41 = vmul.f32 %v1337_v45, %v5111_v0  ;;  %v1344_v21 = vmul.f32 %v1338_v43, %v5114_v1  ;;  %v1345_v22 = vmul.f32 %v1339_v3, %v5108_v63  ;;  %v1346_v32 = vmul.f32 %v1340_v2, %v5111_v0  ;;  %v9598_v0 = vld [vmem:[#allocation36_spill] sm:$0xff] }
  0xdb   : > { %v1347_v53 = vmul.f32 %v1341_v31, %v5114_v1  ;;  %v1360_v4 = vmul.f32 %v1336_v57, %v9588_v27  ;;  %v1348_v56 = vadd.f32 %v1342_v5, %v1306_v40  ;;  %v1361_v47 = vmul.f32 %v1337_v45, %v9589_v19  ;;  %v9597_v1 = vld [vmem:[#allocation35_spill] sm:$0xff] }
  0xdc   : > { %v1349_v23 = vadd.f32 %v1343_v41, %v1307_v9  ;;  %v1350_v44 = vadd.f32 %v1344_v21, %v1308_v35  ;;  %v1351_v15 = vadd.f32 %v1345_v22, %v1309_v58  ;;  %v1352_v17 = vadd.f32 %v1346_v32, %v1310_v24  ;;  %v5617_v35 = vld [vmem:[#allocation2 + $0x80] sm:$0xff]  ;;  %v9591_v22 = vld [vmem:[#allocation5_spill] sm:$0xff] }
  0xdd   : > { %v1353_v18 = vadd.f32 %v1347_v53, %v1311_v38  ;;  %v1362_v37 = vmul.f32 %v1338_v43, %v9590_v25  ;;  %v1363_v54 = vmul.f32 %v1339_v3, %v9588_v27  ;;  %v1364_v39 = vmul.f32 %v1340_v2, %v9589_v19 }
  0xde   : > { %v1365_v40 = vmul.f32 %v1341_v31, %v9590_v25  ;;  %v1366_v9 = vadd.f32 %v1360_v4, %v1324_v26  ;;  %v1367_v58 = vadd.f32 %v1361_v47, %v1325_v33  ;;  %v1379_v38 = vrot.slane %v5605_v49, 6  ;;  %v9592_v4 = vld [vmem:[#allocation6_spill] sm:$0xff]  ;;  %v9594_v25 = vld [vmem:[#allocation20_spill] sm:$0xff] }
  0xdf   : > { %v1368_v24 = vadd.f32 %v1362_v37, %v1326_v34  ;;  %v1380_v50 = vrot.slane %v5607_v42, 6  ;;  %v1369_v51 = vadd.f32 %v1363_v54, %v1327_v6  ;;  %v1370_v55 = vadd.f32 %v1364_v39, %v1328_v29  ;;  %v9593_v37 = vld [vmem:[#allocation7_spill] sm:$0xff] }
  0xe0   : > { %v1371_v48 = vadd.f32 %v1365_v40, %v1329_v28  ;;  %v1381_v57 = vrot.slane %v5610_v20, 6  ;;  %v1382_v45 = vrot.slane %v5615_v16, 6  ;;  %v1383_v26 = vrot.slane %v5617_v35, 6 }
  0xe1   : > { %v1384_v43 = vrot.slane %v5619_v52, 6  ;;  %v1427_v3 = vrot.slane %v5605_v49, 7  ;;  %v1428_v33 = vrot.slane %v5607_v42, 7  ;;  %v1429_v34 = vrot.slane %v5610_v20, 7 }
  0xe2   : > { %v1430_v2 = vrot.slane %v5615_v16, 7  ;;  %v1431_v6 = vrot.slane %v5617_v35, 7  ;;  %v1385_v29 = vsel %vm1043_vm0, %v1379_v38, %v1382_v45  ;;  %v1386_v28 = vsel %vm1043_vm0, %v1380_v50, %v1383_v26 }
  0xe3   : > { %v1387_v31 = vsel %vm1043_vm0, %v1381_v57, %v1384_v43  ;;  %v1388_v5 = vsel %vm1043_vm0, %v1382_v45, %v1379_v38  ;;  %v1389_v41 = vsel %vm1043_vm0, %v1383_v26, %v1380_v50  ;;  %v1390_v21 = vsel %vm1043_vm0, %v1384_v43, %v1381_v57  ;;  %v9595_v45 = vld [vmem:[#allocation21_spill] sm:$0xff]  ;;  %v9596_v50 = vld [vmem:[#allocation22_spill] sm:$0xff] }
  0xe4   : > { %v1391_v32 = vmul.f32 %v1388_v5, %v9591_v22  ;;  %v1394_v53 = vmul.f32 %v1385_v29, %v9591_v22  ;;  %v1392_v47 = vmul.f32 %v1389_v41, %v9592_v4  ;;  %v1393_v54 = vmul.f32 %v1390_v21, %v9593_v37 }
  0xe5   : > { %v1395_v39 = vmul.f32 %v1386_v28, %v9592_v4  ;;  %v1396_v40 = vmul.f32 %v1387_v31, %v9593_v37  ;;  %v1397_v38 = vmul.f32 %v1388_v5, %v9594_v25  ;;  %v1398_v19 = vmul.f32 %v1389_v41, %v9595_v45 }
  0xe6   : > { %v1399_v26 = vmul.f32 %v1390_v21, %v9596_v50  ;;  %v1400_v57 = vmul.f32 %v1385_v29, %v9594_v25  ;;  %v1401_v43 = vmul.f32 %v1386_v28, %v9595_v45  ;;  %v1402_v22 = vmul.f32 %v1387_v31, %v9596_v50 }
  0xe7   : > { %v1415_v27 = vmul.f32 %v1388_v5, %v9597_v1  ;;  %v1416_v63 = vmul.f32 %v1389_v41, %v9598_v0  ;;  %v1403_v46 = vadd.f32 %v1397_v38, %v1348_v56  ;;  %v1404_v4 = vadd.f32 %v1398_v19, %v1349_v23 }
  0xe8   : > { %v1405_v36 = vadd.f32 %v1399_v26, %v1350_v44  ;;  %v1406_v37 = vadd.f32 %v1400_v57, %v1351_v15  ;;  %v1407_v14 = vadd.f32 %v1401_v43, %v1352_v17  ;;  %v1408_v62 = vadd.f32 %v1402_v22, %v1353_v18  ;;  %v9601_v18 = vld [vmem:[#allocation9_spill] sm:$0xff] }
  0xe9   : > { %v1417_v60 = vmul.f32 %v1390_v21, %v9599_v61  ;;  %v1418_v13 = vmul.f32 %v1385_v29, %v9597_v1  ;;  %v1419_v25 = vmul.f32 %v1386_v28, %v9598_v0  ;;  %v1420_v45 = vmul.f32 %v1387_v31, %v9599_v61 }
  0xea   : > { %v1421_v12 = vadd.f32 %v1415_v27, %v1366_v9  ;;  %v1422_v50 = vadd.f32 %v1416_v63, %v1367_v58  ;;  %v1432_v41 = vrot.slane %v5619_v52, 7  ;;  %v1433_v56 = vsel %vm1068_vm1, %v1427_v3, %v1430_v2  ;;  %v9602_v9 = vld [vmem:[#allocation10_spill] sm:$0xff] }
  0xeb   : > { %v1423_v11 = vadd.f32 %v1417_v60, %v1368_v24  ;;  %v1424_v5 = vadd.f32 %v1418_v13, %v1369_v51  ;;  %v1425_v23 = vadd.f32 %v1419_v25, %v1370_v55  ;;  %v1426_v44 = vadd.f32 %v1420_v45, %v1371_v48  ;;  %v9600_v13 = vld [vmem:[#allocation8_spill] sm:$0xff] }
  0xec   : > { %v1434_v19 = vsel %vm1068_vm1, %v1428_v33, %v1431_v6  ;;  %v1436_v15 = vsel %vm1068_vm1, %v1430_v2, %v1427_v3  ;;  %v1435_v17 = vsel %vm1068_vm1, %v1429_v34, %v1432_v41  ;;  %v1437_v60 = vsel %vm1068_vm1, %v1431_v6, %v1428_v33 }
  0xed   : > { %v1438_v63 = vsel %vm1068_vm1, %v1432_v41, %v1429_v34  ;;  %v1439_v27 = vmul.f32 %v1436_v15, %v9600_v13  ;;  %v1440_v25 = vmul.f32 %v1437_v60, %v9601_v18  ;;  %v1442_v24 = vmul.f32 %v1433_v56, %v9600_v13 }
  0xee   : > { %v1441_v58 = vmul.f32 %v1438_v63, %v9602_v9  ;;  %v1443_v51 = vmul.f32 %v1434_v19, %v9601_v18  ;;  %v1444_v55 = vmul.f32 %v1435_v17, %v9602_v9  ;;  %v1451_v3 = vmul.f32 %v1436_v15, %v5132_v7 }
  0xef   : > { %v1445_v48 = vadd.f32 %v1439_v27, %v1391_v32  ;;  %v1452_v33 = vmul.f32 %v1437_v60, %v5135_v8  ;;  %v1446_v2 = vadd.f32 %v1440_v25, %v1392_v47  ;;  %v1448_v34 = vadd.f32 %v1442_v24, %v1394_v53  ;;  %v9603_v32 = vld [vmem:[#allocation38_spill] sm:$0xff]  ;;  %v9604_v47 = vld [vmem:[#allocation39_spill] sm:$0xff] }
  0xf0   : > { %v1447_v6 = vadd.f32 %v1441_v58, %v1393_v54  ;;  %v1449_v29 = vadd.f32 %v1443_v51, %v1395_v39  ;;  %v1450_v28 = vadd.f32 %v1444_v55, %v1396_v40  ;;  %v1453_v31 = vmul.f32 %v1438_v63, %v5141_v10  ;;  %v9605_v39 = vld [vmem:[#allocation40_spill] sm:$0xff] }
  0xf1   : > { %v1454_v21 = vmul.f32 %v1433_v56, %v5132_v7  ;;  %v1455_v22 = vmul.f32 %v1434_v19, %v5135_v8  ;;  %v1456_v38 = vmul.f32 %v1435_v17, %v5141_v10  ;;  %v1457_v45 = vadd.f32 %v1451_v3, %v1403_v46  ;;  %v9606_v46 = vld [vmem:[#allocation11_spill] sm:$0xff] }
  0xf2   : > { %v1458_v26 = vadd.f32 %v1452_v33, %v1404_v4  ;;  %v1469_v57 = vmul.f32 %v1436_v15, %v9603_v32  ;;  %v1459_v43 = vadd.f32 %v1453_v31, %v1405_v36  ;;  %v1470_v54 = vmul.f32 %v1437_v60, %v9604_v47  ;;  %v9609_v33 = vld [vmem:[#allocation27_spill] sm:$0xff] }
  0xf3   : > { %v1460_v41 = vadd.f32 %v1454_v21, %v1406_v37  ;;  %v1461_v27 = vadd.f32 %v1455_v22, %v1407_v14  ;;  %v1462_v53 = vadd.f32 %v1456_v38, %v1408_v62  ;;  %v1471_v40 = vmul.f32 %v1438_v63, %v9605_v39  ;;  %v9607_v14 = vld [vmem:[#allocation12_spill] sm:$0xff] }
  0xf4   : > { %v1472_v25 = vmul.f32 %v1433_v56, %v9603_v32  ;;  %v1473_v58 = vmul.f32 %v1434_v19, %v9604_v47  ;;  %v1474_v24 = vmul.f32 %v1435_v17, %v9605_v39  ;;  %v1475_v51 = vadd.f32 %v1469_v57, %v1421_v12  ;;  %v9610_v22 = vld [vmem:[#allocation28_spill] sm:$0xff] }
  0xf5   : > { %v1476_v55 = vadd.f32 %v1470_v54, %v1422_v50  ;;  %v1481_v4 = vmul.f32 %v5605_v49, %v9606_v46  ;;  %v1477_v15 = vadd.f32 %v1471_v40, %v1423_v11  ;;  %v1482_v60 = vmul.f32 %v5607_v42, %v9607_v14 }
  0xf6   : > { %v1478_v36 = vadd.f32 %v1472_v25, %v1424_v5  ;;  %v1479_v37 = vadd.f32 %v1473_v58, %v1425_v23  ;;  %v1480_v62 = vadd.f32 %v1474_v24, %v1426_v44  ;;  %v1483_v63 = vmul.f32 %v5610_v20, %v5096_v59  ;;  %v9608_v5 = vld [vmem:[#allocation26_spill] sm:$0xff] }
  0xf7   : > { %v1484_v56 = vmul.f32 %v5615_v16, %v9606_v46  ;;  %v1485_v12 = vmul.f32 %v5617_v35, %v9607_v14  ;;  %v1486_v50 = vmul.f32 %v5619_v52, %v5096_v59  ;;  %v1487_v19 = vadd.f32 %v1481_v4, %v1445_v48  ;;  %v9612_v58 = vld [vmem:[#allocation42_spill] sm:$0xff]  ;;  %v9619_v14 = vld [vmem:[#allocation31_spill] sm:$0xff] }
  0xf8   : > { %v1488_v11 = vadd.f32 %v1482_v60, %v1446_v2  ;;  %v1493_v23 = vmul.f32 %v5605_v49, %v9608_v5  ;;  %v1489_v17 = vadd.f32 %v1483_v63, %v1447_v6  ;;  %v1494_v31 = vmul.f32 %v5607_v42, %v9609_v33  ;;  %v9613_v60 = vld [vmem:[#allocation43_spill] sm:$0xff] }
  0xf9   : > { %v1490_v3 = vadd.f32 %v1484_v56, %v1448_v34  ;;  %v1491_v44 = vadd.f32 %v1485_v12, %v1449_v29  ;;  %v1492_v21 = vadd.f32 %v1486_v50, %v1450_v28  ;;  %v1495_v38 = vmul.f32 %v5610_v20, %v9610_v22  ;;  %v9611_v34 = vld [vmem:[#allocation41_spill] sm:$0xff] }
  0xfa   : > { %v1496_v57 = vmul.f32 %v5615_v16, %v9608_v5  ;;  %v1497_v48 = vmul.f32 %v5617_v35, %v9609_v33  ;;  %v1498_v2 = vmul.f32 %v5619_v52, %v9610_v22  ;;  %v1499_v54 = vadd.f32 %v1493_v23, %v1457_v45  ;;  %v9618_v22 = vld [vmem:[#allocation30_spill] sm:$0xff] }
  0xfb   : > { %v1500_v6 = vadd.f32 %v1494_v31, %v1458_v26  ;;  %v1511_v29 = vmul.f32 %v5605_v49, %v9611_v34  ;;  %v1501_v40 = vadd.f32 %v1495_v38, %v1459_v43  ;;  %v1512_v24 = vmul.f32 %v5607_v42, %v9612_v58 }
  0xfc   : > { %v1502_v25 = vadd.f32 %v1496_v57, %v1460_v41  ;;  %v1503_v28 = vadd.f32 %v1497_v48, %v1461_v27  ;;  %v1504_v4 = vadd.f32 %v1498_v2, %v1462_v53  ;;  %v1513_v63 = vmul.f32 %v5610_v20, %v9613_v60 }
  0xfd   : > { %v1514_v56 = vmul.f32 %v5615_v16, %v9611_v34  ;;  %v1515_v45 = vmul.f32 %v5617_v35, %v9612_v58  ;;  %v1516_v26 = vmul.f32 %v5619_v52, %v9613_v60  ;;  %v1517_v12 = vadd.f32 %v1511_v29, %v1475_v51 }
  0xfe   : > { %v1518_v43 = vadd.f32 %v1512_v24, %v1476_v55  ;;  %v1523_v41 = vrot.slane %v5605_v49, 1  ;;  %v1519_v27 = vadd.f32 %v1513_v63, %v1477_v15  ;;  %v1524_v53 = vrot.slane %v5607_v42, 1  ;;  %v9615_v24 = vld [vmem:[#allocation15_spill] sm:$0xff] }
  0xff   : > { %v1520_v50 = vadd.f32 %v1514_v56, %v1478_v36  ;;  %v1521_v23 = vadd.f32 %v1515_v45, %v1479_v37  ;;  %v1522_v31 = vadd.f32 %v1516_v26, %v1480_v62  ;;  %v1525_v38 = vrot.slane %v5610_v20, 1  ;;  %v9616_v56 = vld [vmem:[#allocation16_spill] sm:$0xff] }
 0x100   : > { %v1526_v57 = vrot.slane %v5615_v16, 1  ;;  %v1527_v48 = vrot.slane %v5617_v35, 1  ;;  %v1528_v2 = vrot.slane %v5619_v52, 1  ;;  %v1577_v60 = vrot.slane %v5605_v49, 2 }
 0x101   : > { %v1578_v51 = vrot.slane %v5607_v42, 2  ;;  %v1579_v55 = vrot.slane %v5610_v20, 2  ;;  %v9614_v42 = vld [vmem:[#allocation14_spill] sm:$0xff] }
 0x102   : > { %v1529_v15 = vsel %vm1117_vm2, %v1523_v41, %v1526_v57  ;;  %v1530_v36 = vsel %vm1117_vm2, %v1524_v53, %v1527_v48  ;;  %v1532_v37 = vsel %vm1117_vm2, %v1526_v57, %v1523_v41  ;;  %v1533_v62 = vsel %vm1117_vm2, %v1527_v48, %v1524_v53  ;;  %v9617_v48 = vld [vmem:[#allocation29_spill] sm:$0xff] }
 0x103   : > { %v1531_v29 = vsel %vm1117_vm2, %v1525_v38, %v1528_v2  ;;  %v1534_v49 = vsel %vm1117_vm2, %v1528_v2, %v1525_v38  ;;  %v1535_v20 = vmul.f32 %v1529_v15, %v9614_v42  ;;  %v1536_v63 = vmul.f32 %v1530_v36, %v9615_v24 }
 0x104   : > { %v1537_v45 = vmul.f32 %v1531_v29, %v9616_v56  ;;  %v1538_v26 = vmul.f32 %v1532_v37, %v9614_v42  ;;  %v1539_v58 = vmul.f32 %v1533_v62, %v9615_v24  ;;  %v1540_v41 = vmul.f32 %v1534_v49, %v9616_v56 }
 0x105   : > { %v1541_v57 = vadd.f32 %v1535_v20, %v1487_v19  ;;  %v1542_v53 = vadd.f32 %v1536_v63, %v1488_v11  ;;  %v1547_v34 = vmul.f32 %v1529_v15, %v9617_v48  ;;  %v1548_v33 = vmul.f32 %v1530_v36, %v9618_v22  ;;  %v9620_v19 = vld [vmem:[#allocation44_spill] sm:$0xff]  ;;  %v9621_v20 = vld [vmem:[#allocation45_spill] sm:$0xff] }
 0x106   : > { %v1543_v5 = vadd.f32 %v1537_v45, %v1489_v17  ;;  %v1544_v38 = vadd.f32 %v1538_v26, %v1490_v3  ;;  %v1545_v2 = vadd.f32 %v1539_v58, %v1491_v44  ;;  %v1546_v59 = vadd.f32 %v1540_v41, %v1492_v21  ;;  %v9622_v44 = vld [vmem:[#allocation46_spill] sm:$0xff] }
 0x107   : > { %v1549_v39 = vmul.f32 %v1531_v29, %v9619_v14  ;;  %v1550_v47 = vmul.f32 %v1532_v37, %v9617_v48  ;;  %v1551_v42 = vmul.f32 %v1533_v62, %v9618_v22  ;;  %v1552_v24 = vmul.f32 %v1534_v49, %v9619_v14 }
 0x108   : > { %v1553_v32 = vadd.f32 %v1547_v34, %v1499_v54  ;;  %v1554_v56 = vadd.f32 %v1548_v33, %v1500_v6  ;;  %v1565_v11 = vmul.f32 %v1529_v15, %v9620_v19  ;;  %v1566_v63 = vmul.f32 %v1530_v36, %v9621_v20  ;;  %v9625_v15 = vld [vmem:[#allocation32_spill] sm:$0xff] }
 0x109   : > { %v1555_v10 = vadd.f32 %v1549_v39, %v1501_v40  ;;  %v1556_v8 = vadd.f32 %v1550_v47, %v1502_v25  ;;  %v1557_v17 = vadd.f32 %v1551_v42, %v1503_v28  ;;  %v1558_v3 = vadd.f32 %v1552_v24, %v1504_v4  ;;  %v9627_v24 = vld [vmem:[#allocation33_spill] sm:$0xff] }
 0x10a   : > { %v1567_v21 = vmul.f32 %v1531_v29, %v9622_v44  ;;  %v1568_v58 = vmul.f32 %v1532_v37, %v9620_v19  ;;  %v1569_v45 = vmul.f32 %v1533_v62, %v9621_v20  ;;  %v1570_v26 = vmul.f32 %v1534_v49, %v9622_v44 }
 0x10b   : > { %v1571_v41 = vadd.f32 %v1565_v11, %v1517_v12  ;;  %v1572_v14 = vadd.f32 %v1566_v63, %v1518_v43  ;;  %v1580_v33 = vrot.slane %v5615_v16, 2  ;;  %v1581_v54 = vrot.slane %v5617_v35, 2  ;;  %v9623_v12 = vld [vmem:[#allocation17_spill] sm:$0xff]  ;;  %v9624_v43 = vld [vmem:[#allocation18_spill] sm:$0xff] }
 0x10c   : > { %v1573_v6 = vadd.f32 %v1567_v21, %v1519_v27  ;;  %v1574_v34 = vadd.f32 %v1568_v58, %v1520_v50  ;;  %v1575_v39 = vadd.f32 %v1569_v45, %v1521_v23  ;;  %v1576_v47 = vadd.f32 %v1570_v26, %v1522_v31  ;;  %v9628_v63 = vld [vmem:[#allocation34_spill] sm:$0xff] }
 0x10d   : > { %v1582_v40 = vrot.slane %v5619_v52, 2  ;;  %v1583_v25 = vsel %vm1148_vm3, %v1577_v60, %v1580_v33  ;;  %v1584_v28 = vsel %vm1148_vm3, %v1578_v51, %v1581_v54  ;;  %v1586_v4 = vsel %vm1148_vm3, %v1580_v33, %v1577_v60  ;;  %v9626_v60 = vld [vmem:[#allocation19_spill] sm:$0xff] }
 0x10e   : > { %v1587_v16 = vsel %vm1148_vm3, %v1581_v54, %v1578_v51  ;;  %v1589_v35 = vmul.f32 %v1583_v25, %v9623_v12  ;;  %v1590_v27 = vmul.f32 %v1584_v28, %v9624_v43  ;;  %v1592_v50 = vmul.f32 %v1586_v4, %v9623_v12 }
 0x10f   : > { %v1585_v52 = vsel %vm1148_vm3, %v1579_v55, %v1582_v40  ;;  %v1588_v23 = vsel %vm1148_vm3, %v1582_v40, %v1579_v55  ;;  %v1593_v31 = vmul.f32 %v1587_v16, %v9624_v43  ;;  %v1601_v36 = vmul.f32 %v1583_v25, %v9625_v15  ;;  %v9639_v43 = vld [vmem:[#allocation22_spill] sm:$0xff] }
 0x110   : > { %v1591_v37 = vmul.f32 %v1585_v52, %v9626_v60  ;;  %v1594_v51 = vmul.f32 %v1588_v23, %v9626_v60  ;;  %v5790_v62 = vadd.f32 %v1589_v35, %v1541_v57  ;;  %v5792_v29 = vadd.f32 %v1590_v27, %v1542_v53  ;;  %v9629_v35 = vld [vmem:[#allocation47_spill] sm:$0xff] }
 0x111   : > { %v5794_v49 = vadd.f32 %v1592_v50, %v1544_v38  ;;  %v5796_v42 = vadd.f32 %v1593_v31, %v1545_v2  ;;  %v1602_v11 = vmul.f32 %v1584_v28, %v9627_v24  ;;  %v1603_v55 = vmul.f32 %v1585_v52, %v9628_v63  ;;  %v5809_v2 = vld [vmem:[#allocation2 + $0x90] sm:$0xff]  ;;  %v5815_v50 = vld [vmem:[#allocation2 + $0x98] sm:$0xff] }
 0x112   : > { %v1597_v21 = vadd.f32 %v1591_v37, %v1543_v5  ;;  %v1600_v58 = vadd.f32 %v1594_v51, %v1546_v59  ;;  %v1604_v45 = vmul.f32 %v1586_v4, %v9625_v15  ;;  %v1605_v26 = vmul.f32 %v1587_v16, %v9627_v24  ;;  %v9630_v59 = vld [vmem:[#allocation48_spill] sm:$0xff]  ;;  %9631 = vst [vmem:[#allocation80_spill] sm:$0xff] %v5815_v50  ;;  %v9632_v37 = vld [vmem:[#allocation49_spill] sm:$0xff] }
 0x113   : > { %v1606_v33 = vmul.f32 %v1588_v23, %v9628_v63  ;;  %v5803_v57 = vadd.f32 %v1601_v36, %v1553_v32  ;;  %v5805_v53 = vadd.f32 %v1602_v11, %v1554_v56  ;;  %v5807_v38 = vadd.f32 %v1603_v55, %v1555_v10  ;;  %v5820_v10 = vld [vmem:[#allocation2 + $0xa0] sm:$0xff]  ;;  %v5822_v36 = vld [vmem:[#allocation2 + $0xa8] sm:$0xff] }
 0x114   : > { %v1610_v54 = vadd.f32 %v1604_v45, %v1556_v8  ;;  %v5811_v40 = vadd.f32 %v1605_v26, %v1557_v17  ;;  %v1619_v5 = vmul.f32 %v1583_v25, %v9629_v35  ;;  %v1620_v27 = vmul.f32 %v1584_v28, %v9630_v59  ;;  %9633 = vst [vmem:[#allocation81_spill] sm:$0xff] %v5820_v10  ;;  %v5824_v8 = vld [vmem:[#allocation2 + $0xb0] sm:$0xff]  ;;  %v5827_v28 = vld [vmem:[#allocation2 + $0xb8] sm:$0xff] }
 0x115   : > { %v1612_v31 = vadd.f32 %v1606_v33, %v1558_v3  ;;  %v1621_v51 = vmul.f32 %v1585_v52, %v9632_v37  ;;  %v1622_v32 = vmul.f32 %v1586_v4, %v9629_v35  ;;  %v1623_v56 = vmul.f32 %v1587_v16, %v9630_v59  ;;  %v9636_v35 = vld [vmem:[#allocation7_spill] sm:$0xff] }
 0x116   : > { %v1624_v17 = vmul.f32 %v1588_v23, %v9632_v37  ;;  %v1625_v25 = vadd.f32 %v1619_v5, %v1571_v41  ;;  %v1626_v11 = vadd.f32 %v1620_v27, %v1572_v14  ;;  %v1638_v3 = vrot.slane %v5809_v2, 6 }
 0x117   : > { %v1627_v55 = vadd.f32 %v1621_v51, %v1573_v6  ;;  %v1628_v52 = vadd.f32 %v1622_v32, %v1574_v34  ;;  %v1629_v45 = vadd.f32 %v1623_v56, %v1575_v39  ;;  %v1639_v4 = vrot.slane %v5815_v50, 6  ;;  %v9634_v32 = vld [vmem:[#allocation5_spill] sm:$0xff] }
 0x118   : > { %v1630_v16 = vadd.f32 %v1624_v17, %v1576_v47  ;;  %v1640_v26 = vrot.slane %v5820_v10, 6  ;;  %v1641_v33 = vrot.slane %v5822_v36, 6  ;;  %v1642_v59 = vrot.slane %v5824_v8, 6  ;;  %v9635_v17 = vld [vmem:[#allocation6_spill] sm:$0xff] }
 0x119   : > { %v1643_v23 = vrot.slane %v5827_v28, 6  ;;  %v1698_v14 = vrot.slane %v5809_v2, 7  ;;  %v1699_v41 = vrot.slane %v5815_v50, 7  ;;  %v1700_v5 = vrot.slane %v5820_v10, 7 }
 0x11a   : > { %v1644_v6 = vsel %vm1043_vm0, %v1638_v3, %v1641_v33  ;;  %v1645_v34 = vsel %vm1043_vm0, %v1639_v4, %v1642_v59  ;;  %v1647_v39 = vsel %vm1043_vm0, %v1641_v33, %v1638_v3  ;;  %v1648_v47 = vsel %vm1043_vm0, %v1642_v59, %v1639_v4  ;;  %v9637_v33 = vld [vmem:[#allocation20_spill] sm:$0xff]  ;;  %v9638_v4 = vld [vmem:[#allocation21_spill] sm:$0xff] }
 0x11b   : > { %v1646_v27 = vsel %vm1043_vm0, %v1640_v26, %v1643_v23  ;;  %v1649_v51 = vsel %vm1043_vm0, %v1643_v23, %v1640_v26  ;;  %v1650_v56 = vmul.f32 %v1647_v39, %v9634_v32  ;;  %v1651_v37 = vmul.f32 %v1648_v47, %v9635_v17 }
 0x11c   : > { %v1652_v63 = vmul.f32 %v1649_v51, %v9636_v35  ;;  %v1653_v24 = vmul.f32 %v1644_v6, %v9634_v32  ;;  %v1654_v15 = vmul.f32 %v1645_v34, %v9635_v17  ;;  %v1655_v3 = vmul.f32 %v1646_v27, %v9636_v35 }
 0x11d   : > { %v1656_v59 = vmul.f32 %v1647_v39, %v9637_v33  ;;  %v1657_v60 = vmul.f32 %v1648_v47, %v9638_v4  ;;  %v1658_v12 = vmul.f32 %v1649_v51, %v9639_v43  ;;  %v1659_v26 = vmul.f32 %v1644_v6, %v9637_v33 }
 0x11e   : > { %v1660_v23 = vmul.f32 %v1645_v34, %v9638_v4  ;;  %v1661_v44 = vmul.f32 %v1646_v27, %v9639_v43  ;;  %v1668_v20 = vmul.f32 %v1647_v39, %v9597_v1  ;;  %v1669_v32 = vmul.f32 %v1648_v47, %v9598_v0 }
 0x11f   : > { %v1662_v17 = vadd.f32 %v1656_v59, %v5790_v62  ;;  %v1663_v35 = vadd.f32 %v1657_v60, %v5792_v29  ;;  %v1664_v19 = vadd.f32 %v1658_v12, %v1597_v21  ;;  %v1665_v22 = vadd.f32 %v1659_v26, %v5794_v49  ;;  %v9640_v29 = vld [vmem:[#allocation50_spill] sm:$0xff]  ;;  %v9641_v21 = vld [vmem:[#allocation51_spill] sm:$0xff]  ;;  %v9642_v59 = vld [vmem:[#allocation52_spill] sm:$0xff] }
 0x120   : > { %v1666_v48 = vadd.f32 %v1660_v23, %v5796_v42  ;;  %v1667_v10 = vadd.f32 %v1661_v44, %v1600_v58  ;;  %v1670_v33 = vmul.f32 %v1649_v51, %v9599_v61  ;;  %v1671_v4 = vmul.f32 %v1644_v6, %v9597_v1 }
 0x121   : > { %v1672_v43 = vmul.f32 %v1645_v34, %v9598_v0  ;;  %v1673_v50 = vmul.f32 %v1646_v27, %v9599_v61  ;;  %v1674_v7 = vadd.f32 %v1668_v20, %v5803_v57  ;;  %v1675_v62 = vadd.f32 %v1669_v32, %v5805_v53 }
 0x122   : > { %v1676_v60 = vadd.f32 %v1670_v33, %v5807_v38  ;;  %v1677_v12 = vadd.f32 %v1671_v4, %v1610_v54  ;;  %v1686_v49 = vmul.f32 %v1647_v39, %v9640_v29  ;;  %v1687_v42 = vmul.f32 %v1648_v47, %v9641_v21 }
 0x123   : > { %v1678_v44 = vadd.f32 %v1672_v43, %v5811_v40  ;;  %v1679_v58 = vadd.f32 %v1673_v50, %v1612_v31  ;;  %v1688_v26 = vmul.f32 %v1649_v51, %v9642_v59  ;;  %v1689_v23 = vmul.f32 %v1644_v6, %v9640_v29  ;;  %v9643_v51 = vld [vmem:[#allocation23_spill] sm:$0xff] }
 0x124   : > { %v1690_v61 = vmul.f32 %v1645_v34, %v9641_v21  ;;  %v1691_v20 = vmul.f32 %v1646_v27, %v9642_v59  ;;  %v1692_v57 = vadd.f32 %v1686_v49, %v1625_v25  ;;  %v1693_v53 = vadd.f32 %v1687_v42, %v1626_v11  ;;  %v9644_v49 = vld [vmem:[#allocation24_spill] sm:$0xff] }
 0x125   : > { %v1694_v32 = vadd.f32 %v1688_v26, %v1627_v55  ;;  %v1695_v38 = vadd.f32 %v1689_v23, %v1628_v52  ;;  %v1701_v54 = vrot.slane %v5822_v36, 7  ;;  %v1702_v39 = vrot.slane %v5824_v8, 7 }
 0x126   : > { %v1696_v47 = vadd.f32 %v1690_v61, %v1629_v45  ;;  %v1697_v33 = vadd.f32 %v1691_v20, %v1630_v16  ;;  %v1703_v43 = vrot.slane %v5827_v28, 7  ;;  %v1764_v40 = vmul.f32 %v5809_v2, %v9606_v46 }
 0x127   : > { %v1704_v50 = vsel %vm1068_vm1, %v1698_v14, %v1701_v54  ;;  %v1705_v31 = vsel %vm1068_vm1, %v1699_v41, %v1702_v39  ;;  %v1707_v25 = vsel %vm1068_vm1, %v1701_v54, %v1698_v14  ;;  %v1708_v11 = vsel %vm1068_vm1, %v1702_v39, %v1699_v41  ;;  %v9645_v54 = vld [vmem:[#allocation25_spill] sm:$0xff] }
 0x128   : > { %v1706_v61 = vsel %vm1068_vm1, %v1700_v5, %v1703_v43  ;;  %v1709_v55 = vsel %vm1068_vm1, %v1703_v43, %v1700_v5  ;;  %v1710_v52 = vmul.f32 %v1707_v25, %v9600_v13  ;;  %v1711_v45 = vmul.f32 %v1708_v11, %v9601_v18 }
 0x129   : > { %v1712_v16 = vmul.f32 %v1709_v55, %v9602_v9  ;;  %v1713_v6 = vmul.f32 %v1704_v50, %v9600_v13  ;;  %v1714_v34 = vmul.f32 %v1705_v31, %v9601_v18  ;;  %v1715_v14 = vmul.f32 %v1706_v61, %v9602_v9 }
 0x12a   : > { %v1716_v27 = vadd.f32 %v1710_v52, %v1650_v56  ;;  %v1717_v41 = vadd.f32 %v1711_v45, %v1651_v37  ;;  %v1722_v4 = vmul.f32 %v1707_v25, %v9643_v51  ;;  %v1723_v42 = vmul.f32 %v1708_v11, %v9644_v49  ;;  %v9646_v56 = vld [vmem:[#allocation38_spill] sm:$0xff]  ;;  %v9647_v52 = vld [vmem:[#allocation39_spill] sm:$0xff] }
 0x12b   : > { %v1718_v26 = vadd.f32 %v1712_v16, %v1652_v63  ;;  %v1719_v5 = vadd.f32 %v1713_v6, %v1653_v24  ;;  %v1720_v23 = vadd.f32 %v1714_v34, %v1654_v15  ;;  %v1721_v20 = vadd.f32 %v1715_v14, %v1655_v3  ;;  %v9648_v15 = vld [vmem:[#allocation40_spill] sm:$0xff] }
 0x12c   : > { %v1724_v39 = vmul.f32 %v1709_v55, %v9645_v54  ;;  %v1725_v43 = vmul.f32 %v1704_v50, %v9643_v51  ;;  %v1726_v13 = vmul.f32 %v1705_v31, %v9644_v49  ;;  %v1727_v18 = vmul.f32 %v1706_v61, %v9645_v54 }
 0x12d   : > { %v1728_v59 = vadd.f32 %v1722_v4, %v1662_v17  ;;  %v1729_v9 = vadd.f32 %v1723_v42, %v1663_v35  ;;  %v1734_v37 = vmul.f32 %v1707_v25, %v9646_v56  ;;  %v1735_v45 = vmul.f32 %v1708_v11, %v9647_v52  ;;  %v9649_v17 = vld [vmem:[#allocation53_spill] sm:$0xff]  ;;  %v9650_v4 = vld [vmem:[#allocation54_spill] sm:$0xff] }
 0x12e   : > { %v1730_v21 = vadd.f32 %v1724_v39, %v1664_v19  ;;  %v1731_v29 = vadd.f32 %v1725_v43, %v1665_v22  ;;  %v1732_v63 = vadd.f32 %v1726_v13, %v1666_v48  ;;  %v1733_v24 = vadd.f32 %v1727_v18, %v1667_v10  ;;  %v9651_v13 = vld [vmem:[#allocation55_spill] sm:$0xff] }
 0x12f   : > { %v1736_v3 = vmul.f32 %v1709_v55, %v9648_v15  ;;  %v1737_v16 = vmul.f32 %v1704_v50, %v9646_v56  ;;  %v1738_v6 = vmul.f32 %v1705_v31, %v9647_v52  ;;  %v1739_v34 = vmul.f32 %v1706_v61, %v9648_v15 }
 0x130   : > { %v1740_v14 = vadd.f32 %v1734_v37, %v1674_v7  ;;  %v1741_v54 = vadd.f32 %v1735_v45, %v1675_v62  ;;  %v1752_v35 = vmul.f32 %v1707_v25, %v9649_v17  ;;  %v1753_v42 = vmul.f32 %v1708_v11, %v9650_v4  ;;  %v9652_v7 = vld [vmem:[#allocation12_spill] sm:$0xff]  ;;  %v9654_v25 = vld [vmem:[#allocation13_spill] sm:$0xff] }
 0x131   : > { %v1742_v49 = vadd.f32 %v1736_v3, %v1676_v60  ;;  %v1743_v51 = vadd.f32 %v1737_v16, %v1677_v12  ;;  %v1744_v19 = vadd.f32 %v1738_v6, %v1678_v44  ;;  %v1745_v22 = vadd.f32 %v1739_v34, %v1679_v58  ;;  %v9653_v62 = vld [vmem:[#allocation80_spill] sm:$0xff]  ;;  %v9655_v45 = vld [vmem:[#allocation81_spill] sm:$0xff]  ;;  %v9656_v3 = vld [vmem:[#allocation26_spill] sm:$0xff] }
 0x132   : > { %v1754_v18 = vmul.f32 %v1709_v55, %v9651_v13  ;;  %v1755_v48 = vmul.f32 %v1704_v50, %v9649_v17  ;;  %v1756_v10 = vmul.f32 %v1705_v31, %v9650_v4  ;;  %v1757_v39 = vmul.f32 %v1706_v61, %v9651_v13  ;;  %v9658_v34 = vld [vmem:[#allocation28_spill] sm:$0xff] }
 0x133   : > { %v1758_v43 = vadd.f32 %v1752_v35, %v1692_v57  ;;  %v1759_v15 = vadd.f32 %v1753_v42, %v1693_v53  ;;  %v1765_v37 = vmul.f32 %v9653_v62, %v9652_v7  ;;  %v1766_v11 = vmul.f32 %v9655_v45, %v9654_v25 }
 0x134   : > { %v1760_v60 = vadd.f32 %v1754_v18, %v1694_v32  ;;  %v1761_v12 = vadd.f32 %v1755_v48, %v1695_v38  ;;  %v1762_v44 = vadd.f32 %v1756_v10, %v1696_v47  ;;  %v1763_v58 = vadd.f32 %v1757_v39, %v1697_v33  ;;  %v9657_v38 = vld [vmem:[#allocation27_spill] sm:$0xff]  ;;  %v9660_v18 = vld [vmem:[#allocation42_spill] sm:$0xff] }
 0x135   : > { %v1767_v55 = vmul.f32 %v5822_v36, %v9606_v46  ;;  %v1768_v50 = vmul.f32 %v5824_v8, %v9652_v7  ;;  %v1769_v57 = vmul.f32 %v5827_v28, %v9654_v25  ;;  %v5933_v53 = vadd.f32 %v1764_v40, %v1716_v27  ;;  %v9670_v7 = vld [vmem:[#allocation31_spill] sm:$0xff]  ;;  %v9671_v46 = vld [vmem:[#allocation44_spill] sm:$0xff] }
 0x136   : > { %v5935_v31 = vadd.f32 %v1765_v37, %v1717_v41  ;;  %v5937_v61 = vadd.f32 %v1766_v11, %v1718_v26  ;;  %v1776_v32 = vmul.f32 %v5809_v2, %v9656_v3  ;;  %v1777_v47 = vmul.f32 %v9653_v62, %v9657_v38  ;;  %v9661_v11 = vld [vmem:[#allocation43_spill] sm:$0xff] }
 0x137   : > { %v5943_v33 = vadd.f32 %v1767_v55, %v1719_v5  ;;  %v5945_v16 = vadd.f32 %v1768_v50, %v1720_v23  ;;  %v5947_v6 = vadd.f32 %v1769_v57, %v1721_v20  ;;  %v1778_v40 = vmul.f32 %v9655_v45, %v9658_v34  ;;  %v9659_v20 = vld [vmem:[#allocation41_spill] sm:$0xff] }
 0x138   : > { %v1779_v27 = vmul.f32 %v5822_v36, %v9656_v3  ;;  %v1780_v41 = vmul.f32 %v5824_v8, %v9657_v38  ;;  %v1781_v26 = vmul.f32 %v5827_v28, %v9658_v34  ;;  %v5957_v35 = vadd.f32 %v1776_v32, %v1728_v59  ;;  %v9663_v32 = vld [vmem:[#allocation57_spill] sm:$0xff]  ;;  %v9669_v38 = vld [vmem:[#allocation30_spill] sm:$0xff] }
 0x139   : > { %v5959_v5 = vadd.f32 %v1777_v47, %v1729_v9  ;;  %v5961_v23 = vadd.f32 %v1778_v40, %v1730_v21  ;;  %v1788_v42 = vmul.f32 %v5809_v2, %v9659_v20  ;;  %v1789_v48 = vmul.f32 %v9653_v62, %v9660_v18 }
 0x13a   : > { %v5967_v10 = vadd.f32 %v1779_v27, %v1731_v29  ;;  %v5969_v39 = vadd.f32 %v1780_v41, %v1732_v63  ;;  %v5971_v37 = vadd.f32 %v1781_v26, %v1733_v24  ;;  %v1790_v59 = vmul.f32 %v9655_v45, %v9661_v11  ;;  %v9662_v24 = vld [vmem:[#allocation56_spill] sm:$0xff]  ;;  %v9664_v26 = vld [vmem:[#allocation58_spill] sm:$0xff] }
 0x13b   : > { %v1791_v9 = vmul.f32 %v5822_v36, %v9659_v20  ;;  %v1792_v21 = vmul.f32 %v5824_v8, %v9660_v18  ;;  %v1793_v55 = vmul.f32 %v5827_v28, %v9661_v11  ;;  %v5981_v50 = vadd.f32 %v1788_v42, %v1740_v14 }
 0x13c   : > { %v5983_v29 = vadd.f32 %v1789_v48, %v1741_v54  ;;  %v5985_v63 = vadd.f32 %v1790_v59, %v1742_v49  ;;  %v1806_v57 = vmul.f32 %v5809_v2, %v9662_v24  ;;  %v1807_v47 = vmul.f32 %v9653_v62, %v9663_v32 }
 0x13d   : > { %v5991_v40 = vadd.f32 %v1791_v9, %v1743_v51  ;;  %v5993_v27 = vadd.f32 %v1792_v21, %v1744_v19  ;;  %v5995_v41 = vadd.f32 %v1793_v55, %v1745_v22  ;;  %v1808_v14 = vmul.f32 %v9655_v45, %v9664_v26 }
 0x13e   : > { %v1809_v54 = vmul.f32 %v5822_v36, %v9662_v24  ;;  %v1810_v49 = vmul.f32 %v5824_v8, %v9663_v32  ;;  %v1811_v42 = vmul.f32 %v5827_v28, %v9664_v26  ;;  %v6005_v48 = vadd.f32 %v1806_v57, %v1758_v43  ;;  %v9666_v57 = vld [vmem:[#allocation15_spill] sm:$0xff]  ;;  %v9667_v24 = vld [vmem:[#allocation16_spill] sm:$0xff] }
 0x13f   : > { %v6007_v51 = vadd.f32 %v1807_v47, %v1759_v15  ;;  %v6009_v19 = vadd.f32 %v1808_v14, %v1760_v60  ;;  %v1818_v22 = vrot.slane %v5809_v2, 1  ;;  %v1819_v59 = vrot.slane %v9653_v62, 1  ;;  %v9665_v47 = vld [vmem:[#allocation14_spill] sm:$0xff] }
 0x140   : > { %v6013_v9 = vadd.f32 %v1809_v54, %v1761_v12  ;;  %v6015_v21 = vadd.f32 %v1810_v49, %v1762_v44  ;;  %v6017_v55 = vadd.f32 %v1811_v42, %v1763_v58  ;;  %v1820_v32 = vrot.slane %v9655_v45, 1 }
 0x141   : > { %v1821_v26 = vrot.slane %v5822_v36, 1  ;;  %v1822_v43 = vrot.slane %v5824_v8, 1  ;;  %v1823_v15 = vrot.slane %v5827_v28, 1  ;;  %v1887_v12 = vrot.slane %v5822_v36, 2 }
 0x142   : > { %v1888_v44 = vrot.slane %v5824_v8, 2 }
 0x143   : > { %v1824_v58 = vsel %vm1117_vm2, %v1818_v22, %v1821_v26  ;;  %v1825_v14 = vsel %vm1117_vm2, %v1819_v59, %v1822_v43  ;;  %v1826_v54 = vsel %vm1117_vm2, %v1820_v32, %v1823_v15  ;;  %v1827_v49 = vsel %vm1117_vm2, %v1821_v26, %v1818_v22 }
 0x144   : > { %v1828_v42 = vsel %vm1117_vm2, %v1822_v43, %v1819_v59  ;;  %v1829_v36 = vsel %vm1117_vm2, %v1823_v15, %v1820_v32  ;;  %v1830_v8 = vmul.f32 %v1824_v58, %v9665_v47  ;;  %v1831_v60 = vmul.f32 %v1825_v14, %v9666_v57  ;;  %v9668_v59 = vld [vmem:[#allocation29_spill] sm:$0xff] }
 0x145   : > { %v1832_v11 = vmul.f32 %v1826_v54, %v9667_v24  ;;  %v1833_v18 = vmul.f32 %v1827_v49, %v9665_v47  ;;  %v1834_v20 = vmul.f32 %v1828_v42, %v9666_v57  ;;  %v1835_v34 = vmul.f32 %v1829_v36, %v9667_v24 }
 0x146   : > { %v1836_v26 = vadd.f32 %v1830_v8, %v5933_v53  ;;  %v1837_v22 = vadd.f32 %v1831_v60, %v5935_v31  ;;  %v1842_v43 = vmul.f32 %v1824_v58, %v9668_v59  ;;  %v1843_v32 = vmul.f32 %v1825_v14, %v9669_v38 }
 0x147   : > { %v1838_v15 = vadd.f32 %v1832_v11, %v5937_v61  ;;  %v1839_v3 = vadd.f32 %v1833_v18, %v5943_v33  ;;  %v1840_v25 = vadd.f32 %v1834_v20, %v5945_v16  ;;  %v1841_v47 = vadd.f32 %v1835_v34, %v5947_v6  ;;  %v9672_v11 = vld [vmem:[#allocation45_spill] sm:$0xff]  ;;  %v9673_v18 = vld [vmem:[#allocation46_spill] sm:$0xff] }
 0x148   : > { %v1844_v57 = vmul.f32 %v1826_v54, %v9670_v7  ;;  %v1845_v24 = vmul.f32 %v1827_v49, %v9668_v59  ;;  %v1846_v53 = vmul.f32 %v1828_v42, %v9669_v38  ;;  %v1847_v31 = vmul.f32 %v1829_v36, %v9670_v7  ;;  %v9674_v59 = vld [vmem:[#allocation59_spill] sm:$0xff] }
 0x149   : > { %v1848_v60 = vadd.f32 %v1842_v43, %v5957_v35  ;;  %v1849_v8 = vadd.f32 %v1843_v32, %v5959_v5  ;;  %v1854_v61 = vmul.f32 %v1824_v58, %v9671_v46  ;;  %v1855_v33 = vmul.f32 %v1825_v14, %v9672_v11 }
 0x14a   : > { %v1850_v16 = vadd.f32 %v1844_v57, %v5961_v23  ;;  %v1851_v6 = vadd.f32 %v1845_v24, %v5967_v10  ;;  %v1852_v34 = vadd.f32 %v1846_v53, %v5969_v39  ;;  %v1853_v20 = vadd.f32 %v1847_v31, %v5971_v37  ;;  %v9675_v57 = vld [vmem:[#allocation60_spill] sm:$0xff]  ;;  %v9676_v31 = vld [vmem:[#allocation61_spill] sm:$0xff] }
 0x14b   : > { %v1856_v38 = vmul.f32 %v1826_v54, %v9673_v18  ;;  %v1857_v7 = vmul.f32 %v1827_v49, %v9671_v46  ;;  %v1858_v35 = vmul.f32 %v1828_v42, %v9672_v11  ;;  %v1859_v5 = vmul.f32 %v1829_v36, %v9673_v18 }
 0x14c   : > { %v1860_v43 = vadd.f32 %v1854_v61, %v5981_v50  ;;  %v1861_v32 = vadd.f32 %v1855_v33, %v5983_v29  ;;  %v1872_v23 = vmul.f32 %v1824_v58, %v9674_v59  ;;  %v1873_v10 = vmul.f32 %v1825_v14, %v9675_v57  ;;  %v9683_v61 = vld [vmem:[#allocation17_spill] sm:$0xff]  ;;  %v9684_v33 = vld [vmem:[#allocation18_spill] sm:$0xff] }
 0x14d   : > { %v1862_v39 = vadd.f32 %v1856_v38, %v5985_v63  ;;  %v1863_v37 = vadd.f32 %v1857_v7, %v5991_v40  ;;  %v1864_v24 = vadd.f32 %v1858_v35, %v5993_v27  ;;  %v1865_v53 = vadd.f32 %v1859_v5, %v5995_v41  ;;  %v9685_v35 = vld [vmem:[#allocation19_spill] sm:$0xff] }
 0x14e   : > { %v1874_v11 = vmul.f32 %v1826_v54, %v9676_v31  ;;  %v1875_v18 = vmul.f32 %v1827_v49, %v9674_v59  ;;  %v1876_v50 = vmul.f32 %v1828_v42, %v9675_v57  ;;  %v1877_v29 = vmul.f32 %v1829_v36, %v9676_v31 }
 0x14f   : > { %v1878_v58 = vadd.f32 %v1872_v23, %v6005_v48  ;;  %v1879_v14 = vadd.f32 %v1873_v10, %v6007_v51  ;;  %v1889_v38 = vrot.slane %v5827_v28, 2  ;;  %v9677_v7 = vrot.slane %v5809_v2, 2  ;;  %v9686_v23 = vld [vmem:[#allocation32_spill] sm:$0xff] }
 0x150   : > { %v1880_v40 = vadd.f32 %v1874_v11, %v6009_v19  ;;  %v1881_v27 = vadd.f32 %v1875_v18, %v6013_v9  ;;  %v1882_v41 = vadd.f32 %v1876_v50, %v6015_v21  ;;  %v1883_v54 = vadd.f32 %v1877_v29, %v6017_v55  ;;  %v9687_v29 = vld [vmem:[#allocation33_spill] sm:$0xff] }
 0x151   : > { %v1890_v63 = vsel %vm1148_vm3, %v9677_v7, %v1887_v12  ;;  %v9678_v49 = vrot.slane %v9653_v62, 2  ;;  %v9679_v28 = vrot.slane %v9655_v45, 2  ;;  %v9680_v42 = vmov %v9677_v7 }
 0x152   : > { %v1893_v19 = vsel %vm1148_vm3, %v1887_v12, %v9680_v42  ;;  %v1896_v11 = vmul.f32 %v1890_v63, %v9683_v61  ;;  %v1908_v10 = vmul.f32 %v1890_v63, %v9686_v23  ;;  %v9688_v42 = vld [vmem:[#allocation34_spill] sm:$0xff] }
 0x153   : > { %v1891_v48 = vsel %vm1148_vm3, %v9678_v49, %v1888_v44  ;;  %v1892_v51 = vsel %vm1148_vm3, %v9679_v28, %v1889_v38  ;;  %v9681_v9 = vmov %v9678_v49  ;;  %v9682_v55 = vmov %v9679_v28 }
 0x154   : > { %v1894_v21 = vsel %vm1148_vm3, %v1888_v44, %v9681_v9  ;;  %v1895_v36 = vsel %vm1148_vm3, %v1889_v38, %v9682_v55  ;;  %v1897_v18 = vmul.f32 %v1891_v48, %v9684_v33  ;;  %v1898_v5 = vmul.f32 %v1892_v51, %v9685_v35 }
 0x155   : > { %v1899_v2 = vmul.f32 %v1893_v19, %v9683_v61  ;;  %v1900_v12 = vmul.f32 %v1894_v21, %v9684_v33  ;;  %v1901_v62 = vmul.f32 %v1895_v36, %v9685_v35  ;;  %v6120_v44 = vadd.f32 %v1896_v11, %v1836_v26 }
 0x156   : > { %v6122_v45 = vadd.f32 %v1897_v18, %v1837_v22  ;;  %v6124_v50 = vadd.f32 %v1898_v5, %v1838_v15  ;;  %v1909_v38 = vmul.f32 %v1891_v48, %v9687_v29  ;;  %v1910_v9 = vmul.f32 %v1892_v51, %v9688_v42 }
 0x157   : > { %v6127_v7 = vadd.f32 %v1899_v2, %v1839_v3  ;;  %v6129_v49 = vadd.f32 %v1900_v12, %v1840_v25  ;;  %v6131_v28 = vadd.f32 %v1901_v62, %v1841_v47  ;;  %v1911_v55 = vmul.f32 %v1893_v19, %v9686_v23  ;;  %v9689_v3 = vld [vmem:[#allocation47_spill] sm:$0xff]  ;;  %v9690_v25 = vld [vmem:[#allocation48_spill] sm:$0xff]  ;;  %v9691_v62 = vld [vmem:[#allocation49_spill] sm:$0xff] }
 0x158   : > { %v1912_v35 = vmul.f32 %v1894_v21, %v9687_v29  ;;  %v1913_v26 = vmul.f32 %v1895_v36, %v9688_v42  ;;  %v6137_v22 = vadd.f32 %v1908_v10, %v1848_v60  ;;  %v6139_v15 = vadd.f32 %v1909_v38, %v1849_v8  ;;  %v9701_v23 = vld [vmem:[#allocation22_spill] sm:$0xff] }
 0x159   : > { %v6141_v11 = vadd.f32 %v1910_v9, %v1850_v16  ;;  %v1920_v18 = vmul.f32 %v1890_v63, %v9689_v3  ;;  %v1921_v5 = vmul.f32 %v1891_v48, %v9690_v25  ;;  %v6145_v47 = vadd.f32 %v1911_v55, %v1851_v6  ;;  %v9692_v6 = vld [vmem:[#allocation62_spill] sm:$0xff]  ;;  %v6165_v55 = vld [vmem:[#allocation2 + $0xc8] sm:$0xff] }
 0x15a   : > { %v6147_v2 = vadd.f32 %v1912_v35, %v1852_v34  ;;  %v6149_v12 = vadd.f32 %v1913_v26, %v1853_v20  ;;  %v1922_v29 = vmul.f32 %v1892_v51, %v9691_v62  ;;  %v1923_v42 = vmul.f32 %v1893_v19, %v9689_v3  ;;  %v9693_v34 = vld [vmem:[#allocation63_spill] sm:$0xff]  ;;  %v6163_v20 = vld [vmem:[#allocation2 + $0xc0] sm:$0xff] }
 0x15b   : > { %v1924_v60 = vmul.f32 %v1894_v21, %v9690_v25  ;;  %v1925_v8 = vmul.f32 %v1895_v36, %v9691_v62  ;;  %v6155_v16 = vadd.f32 %v1920_v18, %v1860_v43  ;;  %v6157_v10 = vadd.f32 %v1921_v5, %v1861_v32  ;;  %v9694_v43 = vld [vmem:[#allocation64_spill] sm:$0xff]  ;;  %v6181_v5 = vld [vmem:[#allocation2 + $0xd8] sm:$0xff] }
 0x15c   : > { %v6159_v38 = vadd.f32 %v1922_v29, %v1862_v39  ;;  %v1938_v9 = vmul.f32 %v1890_v63, %v9692_v6  ;;  %v1939_v35 = vmul.f32 %v1891_v48, %v9693_v34  ;;  %v6167_v26 = vadd.f32 %v1923_v42, %v1863_v37  ;;  %v6174_v32 = vld [vmem:[#allocation2 + $0xd0] sm:$0xff]  ;;  %v6183_v37 = vld [vmem:[#allocation2 + $0xe0] sm:$0xff] }
 0x15d   : > { %v6169_v3 = vadd.f32 %v1924_v60, %v1864_v24  ;;  %v6171_v25 = vadd.f32 %v1925_v8, %v1865_v53  ;;  %v1940_v18 = vmul.f32 %v1892_v51, %v9694_v43  ;;  %v1941_v39 = vmul.f32 %v1893_v19, %v9692_v6  ;;  %v6185_v24 = vld [vmem:[#allocation2 + $0xe8] sm:$0xff] }
 0x15e   : > { %v1942_v63 = vmul.f32 %v1894_v21, %v9693_v34  ;;  %v1943_v48 = vmul.f32 %v1895_v36, %v9694_v43  ;;  %v6179_v29 = vadd.f32 %v1938_v9, %v1878_v58  ;;  %9695 = vst [vmem:[#allocation80_spill] sm:$0xff] %v6185_v24  ;;  %v6187_v53 = vadd.f32 %v1939_v35, %v1879_v14  ;;  %v9697_v43 = vld [vmem:[#allocation6_spill] sm:$0xff]  ;;  %v9698_v6 = vld [vmem:[#allocation7_spill] sm:$0xff] }
 0x15f   : > { %v6189_v42 = vadd.f32 %v1940_v18, %v1880_v40  ;;  %v1957_v51 = vrot.slane %v6163_v20, 6  ;;  %v1958_v19 = vrot.slane %v6165_v55, 6  ;;  %v6193_v60 = vadd.f32 %v1941_v39, %v1881_v27  ;;  %v9696_v40 = vld [vmem:[#allocation5_spill] sm:$0xff] }
 0x160   : > { %v6195_v21 = vadd.f32 %v1942_v63, %v1882_v41  ;;  %v6197_v58 = vadd.f32 %v1943_v48, %v1883_v54  ;;  %v1959_v36 = vrot.slane %v6174_v32, 6  ;;  %v1960_v8 = vrot.slane %v6181_v5, 6 }
 0x161   : > { %v1961_v9 = vrot.slane %v6183_v37, 6  ;;  %v1962_v14 = vrot.slane %v6185_v24, 6 }
 0x162   : > { %v1963_v54 = vsel %vm1043_vm0, %v1957_v51, %v1960_v8  ;;  %v1966_v48 = vsel %vm1043_vm0, %v1960_v8, %v1957_v51  ;;  %v9699_v8 = vld [vmem:[#allocation20_spill] sm:$0xff] }
 0x163   : > { %v1964_v39 = vsel %vm1043_vm0, %v1958_v19, %v1961_v9  ;;  %v1965_v63 = vsel %vm1043_vm0, %v1959_v36, %v1962_v14  ;;  %v1967_v35 = vsel %vm1043_vm0, %v1961_v9, %v1958_v19  ;;  %v1968_v18 = vsel %vm1043_vm0, %v1962_v14, %v1959_v36  ;;  %v9700_v9 = vld [vmem:[#allocation21_spill] sm:$0xff] }
 0x164   : > { %v6221_v41 = vmul.f32 %v1966_v48, %v9696_v40  ;;  %v6224_v27 = vmul.f32 %v1963_v54, %v9696_v40  ;;  %v6227_v34 = vmul.f32 %v1967_v35, %v9697_v43  ;;  %v6230_v62 = vmul.f32 %v1968_v18, %v9698_v6 }
 0x165   : > { %v6233_v51 = vmul.f32 %v1964_v39, %v9697_v43  ;;  %v6236_v19 = vmul.f32 %v1965_v63, %v9698_v6  ;;  %v1975_v36 = vmul.f32 %v1966_v48, %v9699_v8  ;;  %v1976_v14 = vmul.f32 %v1967_v35, %v9700_v9 }
 0x166   : > { %v1977_v33 = vmul.f32 %v1968_v18, %v9701_v23  ;;  %v1978_v40 = vmul.f32 %v1963_v54, %v9699_v8  ;;  %v1979_v61 = vmul.f32 %v1964_v39, %v9700_v9  ;;  %v1980_v31 = vmul.f32 %v1965_v63, %v9701_v23  ;;  %v9702_v8 = vld [vmem:[#allocation37_spill] sm:$0xff] }
 0x167   : > { %v1987_v57 = vmul.f32 %v1966_v48, %v9597_v1  ;;  %v1988_v43 = vmul.f32 %v1967_v35, %v9598_v0  ;;  %v6247_v59 = vadd.f32 %v1975_v36, %v6120_v44  ;;  %v6250_v6 = vadd.f32 %v1976_v14, %v6122_v45 }
 0x168   : > { %v6253_v46 = vadd.f32 %v1977_v33, %v6124_v50  ;;  %v6256_v13 = vadd.f32 %v1978_v40, %v6127_v7  ;;  %v6259_v9 = vadd.f32 %v1979_v61, %v6129_v49  ;;  %v6262_v23 = vadd.f32 %v1980_v31, %v6131_v28  ;;  %v9703_v7 = vld [vmem:[#allocation50_spill] sm:$0xff]  ;;  %v9704_v28 = vld [vmem:[#allocation51_spill] sm:$0xff] }
 0x169   : > { %v1989_v4 = vmul.f32 %v1968_v18, %v9702_v8  ;;  %v1990_v44 = vmul.f32 %v1963_v54, %v9597_v1  ;;  %v1991_v36 = vmul.f32 %v1964_v39, %v9598_v0  ;;  %v1992_v45 = vmul.f32 %v1965_v63, %v9702_v8 }
 0x16a   : > { %v6269_v33 = vadd.f32 %v1987_v57, %v6137_v22  ;;  %v6272_v50 = vadd.f32 %v1988_v43, %v6139_v15  ;;  %v1999_v49 = vmul.f32 %v1966_v48, %v9703_v7  ;;  %v2000_v40 = vmul.f32 %v1967_v35, %v9704_v28  ;;  %v9705_v57 = vld [vmem:[#allocation52_spill] sm:$0xff] }
 0x16b   : > { %v6275_v61 = vadd.f32 %v1989_v4, %v6141_v11  ;;  %v6278_v31 = vadd.f32 %v1990_v44, %v6145_v47  ;;  %v6283_v14 = vadd.f32 %v1991_v36, %v6147_v2  ;;  %v6286_v8 = vadd.f32 %v1992_v45, %v6149_v12  ;;  %v9706_v44 = vld [vmem:[#allocation65_spill] sm:$0xff]  ;;  %v9707_v45 = vld [vmem:[#allocation66_spill] sm:$0xff] }
 0x16c   : > { %v2001_v22 = vmul.f32 %v1968_v18, %v9705_v57  ;;  %v2002_v15 = vmul.f32 %v1963_v54, %v9703_v7  ;;  %v2003_v4 = vmul.f32 %v1964_v39, %v9704_v28  ;;  %v2004_v11 = vmul.f32 %v1965_v63, %v9705_v57 }
 0x16d   : > { %v6293_v47 = vadd.f32 %v1999_v49, %v6155_v16  ;;  %v6296_v43 = vadd.f32 %v2000_v40, %v6157_v10  ;;  %v2017_v36 = vmul.f32 %v1966_v48, %v9706_v44  ;;  %v2018_v7 = vmul.f32 %v1967_v35, %v9707_v45  ;;  %v9708_v16 = vld [vmem:[#allocation67_spill] sm:$0xff] }
 0x16e   : > { %v6299_v2 = vadd.f32 %v2001_v22, %v6159_v38  ;;  %v6302_v12 = vadd.f32 %v2002_v15, %v6167_v26  ;;  %v6307_v28 = vadd.f32 %v2003_v4, %v6169_v3  ;;  %v6310_v57 = vadd.f32 %v2004_v11, %v6171_v25 }
 0x16f   : > { %v2019_v49 = vmul.f32 %v1968_v18, %v9708_v16  ;;  %v2020_v10 = vmul.f32 %v1963_v54, %v9706_v44  ;;  %v2021_v38 = vmul.f32 %v1964_v39, %v9707_v45  ;;  %v2022_v40 = vmul.f32 %v1965_v63, %v9708_v16  ;;  %v9723_v45 = vld [vmem:[#allocation24_spill] sm:$0xff] }
 0x170   : > { %v6317_v26 = vadd.f32 %v2017_v36, %v6179_v29  ;;  %v6320_v48 = vadd.f32 %v2018_v7, %v6187_v53  ;;  %v2034_v35 = vrot.slane %v6185_v24, 7  ;;  %v9709_v18 = vrot.slane %v6181_v5, 7 }
 0x171   : > { %v6323_v3 = vadd.f32 %v2019_v49, %v6189_v42  ;;  %v6326_v25 = vadd.f32 %v2020_v10, %v6193_v60  ;;  %v9710_v54 = vrot.slane %v6163_v20, 7  ;;  %v6336_v29 = vadd.f32 %v2021_v38, %v6195_v21  ;;  %v9719_v38 = vld [vmem:[#allocation8_spill] sm:$0xff] }
 0x172   : > { %v6339_v53 = vadd.f32 %v2022_v40, %v6197_v58  ;;  %v9711_v42 = vrot.slane %v6183_v37, 7  ;;  %v9712_v60 = vrot.slane %v6165_v55, 7  ;;  %v9714_v22 = vmov %v9709_v18 }
 0x173   : > { %v2035_v39 = vsel %vm1068_vm1, %v9710_v54, %v9709_v18  ;;  %v9713_v7 = vmov %v9710_v54  ;;  %v9715_v21 = vrot.slane %v6174_v32, 7  ;;  %v9720_v18 = vld [vmem:[#allocation9_spill] sm:$0xff] }
 0x174   : > { %v2036_v63 = vsel %vm1068_vm1, %v9712_v60, %v9711_v42  ;;  %v2038_v15 = vsel %vm1068_vm1, %v9714_v22, %v9713_v7  ;;  %v9716_v4 = vmov %v9712_v60  ;;  %v9717_v11 = vmov %v9711_v42  ;;  %v9721_v42 = vld [vmem:[#allocation10_spill] sm:$0xff] }
 0x175   : > { %v2037_v58 = vsel %vm1068_vm1, %v9715_v21, %v2034_v35  ;;  %v2039_v36 = vsel %vm1068_vm1, %v9717_v11, %v9716_v4  ;;  %v9718_v49 = vmov %v9715_v21  ;;  %v2041_v40 = vmul.f32 %v2038_v15, %v9719_v38  ;;  %v9722_v4 = vld [vmem:[#allocation23_spill] sm:$0xff] }
 0x176   : > { %v2040_v10 = vsel %vm1068_vm1, %v2034_v35, %v9718_v49  ;;  %v2042_v54 = vmul.f32 %v2039_v36, %v9720_v18  ;;  %v2044_v7 = vmul.f32 %v2035_v39, %v9719_v38  ;;  %v2045_v22 = vmul.f32 %v2036_v63, %v9720_v18 }
 0x177   : > { %v2043_v60 = vmul.f32 %v2040_v10, %v9721_v42  ;;  %v2046_v21 = vmul.f32 %v2037_v58, %v9721_v42  ;;  %v2047_v16 = vadd.f32 %v2041_v40, %v6221_v41  ;;  %v2053_v11 = vmul.f32 %v2038_v15, %v9722_v4 }
 0x178   : > { %v2054_v44 = vmul.f32 %v2039_v36, %v9723_v45  ;;  %v2048_v35 = vadd.f32 %v2042_v54, %v6227_v34  ;;  %v2050_v0 = vadd.f32 %v2044_v7, %v6224_v27  ;;  %v2051_v1 = vadd.f32 %v2045_v22, %v6233_v51  ;;  %v9725_v7 = vld [vmem:[#allocation40_spill] sm:$0xff] }
 0x179   : > { %v2049_v49 = vadd.f32 %v2043_v60, %v6230_v62  ;;  %v2052_v38 = vadd.f32 %v2046_v21, %v6236_v19  ;;  %v2055_v18 = vmul.f32 %v2040_v10, %v9724_v30  ;;  %v2056_v42 = vmul.f32 %v2035_v39, %v9722_v4 }
 0x17a   : > { %v2057_v41 = vmul.f32 %v2036_v63, %v9723_v45  ;;  %v2058_v40 = vmul.f32 %v2037_v58, %v9724_v30  ;;  %v2059_v24 = vadd.f32 %v2053_v11, %v6247_v59  ;;  %v2060_v34 = vadd.f32 %v2054_v44, %v6250_v6 }
 0x17b   : > { %v2065_v62 = vmul.f32 %v2038_v15, %v9646_v56  ;;  %v2061_v27 = vadd.f32 %v2055_v18, %v6253_v46  ;;  %v2062_v51 = vadd.f32 %v2056_v42, %v6256_v13  ;;  %v2066_v54 = vmul.f32 %v2039_v36, %v9647_v52  ;;  %v9726_v42 = vld [vmem:[#allocation54_spill] sm:$0xff] }
 0x17c   : > { %v2063_v19 = vadd.f32 %v2057_v41, %v6259_v9  ;;  %v2064_v60 = vadd.f32 %v2058_v40, %v6262_v23  ;;  %v2067_v22 = vmul.f32 %v2040_v10, %v9725_v7  ;;  %v2068_v21 = vmul.f32 %v2035_v39, %v9646_v56  ;;  %v9727_v40 = vld [vmem:[#allocation55_spill] sm:$0xff] }
 0x17d   : > { %v2069_v59 = vmul.f32 %v2036_v63, %v9647_v52  ;;  %v2070_v6 = vmul.f32 %v2037_v58, %v9725_v7  ;;  %v2071_v44 = vadd.f32 %v2065_v62, %v6269_v33  ;;  %v2072_v46 = vadd.f32 %v2066_v54, %v6272_v50  ;;  %v9728_v54 = vld [vmem:[#allocation68_spill] sm:$0xff] }
 0x17e   : > { %v2077_v13 = vmul.f32 %v2038_v15, %v9649_v17  ;;  %v2073_v9 = vadd.f32 %v2067_v22, %v6275_v61  ;;  %v2074_v18 = vadd.f32 %v2068_v21, %v6278_v31  ;;  %v2078_v11 = vmul.f32 %v2039_v36, %v9726_v42  ;;  %v9729_v21 = vld [vmem:[#allocation69_spill] sm:$0xff] }
 0x17f   : > { %v2075_v23 = vadd.f32 %v2069_v59, %v6283_v14  ;;  %v2076_v41 = vadd.f32 %v2070_v6, %v6286_v8  ;;  %v2079_v52 = vmul.f32 %v2040_v10, %v9727_v40  ;;  %v2080_v7 = vmul.f32 %v2035_v39, %v9649_v17  ;;  %v9730_v17 = vld [vmem:[#allocation70_spill] sm:$0xff] }
 0x180   : > { %v2081_v33 = vmul.f32 %v2036_v63, %v9726_v42  ;;  %v2082_v50 = vmul.f32 %v2037_v58, %v9727_v40  ;;  %v2083_v62 = vadd.f32 %v2077_v13, %v6293_v47  ;;  %v2084_v61 = vadd.f32 %v2078_v11, %v6296_v43 }
 0x181   : > { %v2095_v31 = vmul.f32 %v2038_v15, %v9728_v54  ;;  %v2085_v14 = vadd.f32 %v2079_v52, %v6299_v2  ;;  %v2086_v22 = vadd.f32 %v2080_v7, %v6302_v12  ;;  %v2096_v59 = vmul.f32 %v2039_v36, %v9729_v21  ;;  %v9731_v2 = vld [vmem:[#allocation11_spill] sm:$0xff]  ;;  %v9733_v7 = vld [vmem:[#allocation13_spill] sm:$0xff] }
 0x182   : > { %v2087_v8 = vadd.f32 %v2081_v33, %v6307_v28  ;;  %v2088_v6 = vadd.f32 %v2082_v50, %v6310_v57  ;;  %v2097_v42 = vmul.f32 %v2040_v10, %v9730_v17  ;;  %v2098_v40 = vmul.f32 %v2035_v39, %v9728_v54  ;;  %v9732_v10 = vld [vmem:[#allocation12_spill] sm:$0xff]  ;;  %v9736_v50 = vld [vmem:[#allocation27_spill] sm:$0xff] }
 0x183   : > { %v2099_v47 = vmul.f32 %v2036_v63, %v9729_v21  ;;  %v2100_v43 = vmul.f32 %v2037_v58, %v9730_v17  ;;  %v2101_v15 = vadd.f32 %v2095_v31, %v6317_v26  ;;  %v2102_v52 = vadd.f32 %v2096_v59, %v6320_v48 }
 0x184   : > { %v2107_v12 = vmul.f32 %v6163_v20, %v9731_v2  ;;  %v2103_v28 = vadd.f32 %v2097_v42, %v6323_v3  ;;  %v2104_v36 = vadd.f32 %v2098_v40, %v6326_v25  ;;  %v2108_v39 = vmul.f32 %v6165_v55, %v9732_v10  ;;  %v9734_v3 = vld [vmem:[#allocation80_spill] sm:$0xff]  ;;  %v9735_v42 = vld [vmem:[#allocation26_spill] sm:$0xff] }
 0x185   : > { %v2105_v57 = vadd.f32 %v2099_v47, %v6336_v29  ;;  %v2106_v63 = vadd.f32 %v2100_v43, %v6339_v53  ;;  %v2109_v58 = vmul.f32 %v6174_v32, %v9733_v7  ;;  %v2110_v26 = vmul.f32 %v6181_v5, %v9731_v2  ;;  %v9737_v47 = vld [vmem:[#allocation28_spill] sm:$0xff] }
 0x186   : > { %v2111_v48 = vmul.f32 %v6183_v37, %v9732_v10  ;;  %v2112_v13 = vmul.f32 %v9734_v3, %v9733_v7  ;;  %v6439_v25 = vadd.f32 %v2107_v12, %v2047_v16  ;;  %v6441_v29 = vadd.f32 %v2108_v39, %v2048_v35  ;;  %v9738_v12 = vld [vmem:[#allocation41_spill] sm:$0xff] }
 0x187   : > { %v2119_v11 = vmul.f32 %v6163_v20, %v9735_v42  ;;  %v6445_v53 = vadd.f32 %v2109_v58, %v2049_v49  ;;  %v6447_v40 = vadd.f32 %v2110_v26, %v2050_v0  ;;  %v2120_v31 = vmul.f32 %v6165_v55, %v9736_v50 }
 0x188   : > { %v6449_v33 = vadd.f32 %v2111_v48, %v2051_v1  ;;  %v6453_v59 = vadd.f32 %v2112_v13, %v2052_v38  ;;  %v2121_v16 = vmul.f32 %v6174_v32, %v9737_v47  ;;  %v2122_v35 = vmul.f32 %v6181_v5, %v9735_v42  ;;  %v9739_v48 = vld [vmem:[#allocation42_spill] sm:$0xff]  ;;  %v9740_v42 = vld [vmem:[#allocation43_spill] sm:$0xff] }
 0x189   : > { %v2123_v43 = vmul.f32 %v6183_v37, %v9736_v50  ;;  %v2124_v0 = vmul.f32 %v9734_v3, %v9737_v47  ;;  %v6463_v49 = vadd.f32 %v2119_v11, %v2059_v24  ;;  %v6465_v1 = vadd.f32 %v2120_v31, %v2060_v34  ;;  %v9741_v31 = vld [vmem:[#allocation56_spill] sm:$0xff]  ;;  %v9743_v47 = vld [vmem:[#allocation58_spill] sm:$0xff] }
 0x18a   : > { %v2131_v38 = vmul.f32 %v6163_v20, %v9738_v12  ;;  %v6469_v39 = vadd.f32 %v2121_v16, %v2061_v27  ;;  %v6471_v58 = vadd.f32 %v2122_v35, %v2062_v51  ;;  %v2132_v13 = vmul.f32 %v6165_v55, %v9739_v48 }
 0x18b   : > { %v6473_v26 = vadd.f32 %v2123_v43, %v2063_v19  ;;  %v6477_v50 = vadd.f32 %v2124_v0, %v2064_v60  ;;  %v2133_v24 = vmul.f32 %v6174_v32, %v9740_v42  ;;  %v2134_v34 = vmul.f32 %v6181_v5, %v9738_v12  ;;  %v9742_v0 = vld [vmem:[#allocation57_spill] sm:$0xff] }
 0x18c   : > { %v2135_v11 = vmul.f32 %v6183_v37, %v9739_v48  ;;  %v2136_v27 = vmul.f32 %v9734_v3, %v9740_v42  ;;  %v6487_v51 = vadd.f32 %v2131_v38, %v2071_v44  ;;  %v6489_v19 = vadd.f32 %v2132_v13, %v2072_v46  ;;  %v9744_v13 = vld [vmem:[#allocation71_spill] sm:$0xff]  ;;  %v9746_v42 = vld [vmem:[#allocation73_spill] sm:$0xff] }
 0x18d   : > { %v2143_v60 = vmul.f32 %v6163_v20, %v9741_v31  ;;  %v6493_v16 = vadd.f32 %v2133_v24, %v2073_v9  ;;  %v6495_v35 = vadd.f32 %v2134_v34, %v2074_v18  ;;  %v2144_v12 = vmul.f32 %v6165_v55, %v9742_v0 }
 0x18e   : > { %v6497_v43 = vadd.f32 %v2135_v11, %v2075_v23  ;;  %v6501_v48 = vadd.f32 %v2136_v27, %v2076_v41  ;;  %v2145_v44 = vmul.f32 %v6174_v32, %v9743_v47  ;;  %v2146_v46 = vmul.f32 %v6181_v5, %v9741_v31  ;;  %v9745_v27 = vld [vmem:[#allocation72_spill] sm:$0xff] }
 0x18f   : > { %v2147_v38 = vmul.f32 %v6183_v37, %v9742_v0  ;;  %v2148_v9 = vmul.f32 %v9734_v3, %v9743_v47  ;;  %v6511_v18 = vadd.f32 %v2143_v60, %v2083_v62  ;;  %v6513_v23 = vadd.f32 %v2144_v12, %v2084_v61  ;;  %v9750_v47 = vld [vmem:[#allocation16_spill] sm:$0xff] }
 0x190   : > { %v2161_v41 = vmul.f32 %v6163_v20, %v9744_v13  ;;  %v6517_v24 = vadd.f32 %v2145_v44, %v2085_v14  ;;  %v6519_v34 = vadd.f32 %v2146_v46, %v2086_v22  ;;  %v2162_v31 = vmul.f32 %v6165_v55, %v9745_v27 }
 0x191   : > { %v6521_v11 = vadd.f32 %v2147_v38, %v2087_v8  ;;  %v6525_v0 = vadd.f32 %v2148_v9, %v2088_v6  ;;  %v2163_v62 = vmul.f32 %v6174_v32, %v9746_v42  ;;  %v2164_v61 = vmul.f32 %v6181_v5, %v9744_v13 }
 0x192   : > { %v2165_v12 = vmul.f32 %v6183_v37, %v9745_v27  ;;  %v2166_v14 = vmul.f32 %v9734_v3, %v9746_v42  ;;  %v6535_v22 = vadd.f32 %v2161_v41, %v2101_v15  ;;  %v6537_v8 = vadd.f32 %v2162_v31, %v2102_v52  ;;  %v9749_v31 = vld [vmem:[#allocation15_spill] sm:$0xff] }
 0x193   : > { %v2173_v60 = vrot.slane %v6163_v20, 1  ;;  %v6540_v6 = vadd.f32 %v2163_v62, %v2103_v28  ;;  %v6542_v44 = vadd.f32 %v2164_v61, %v2104_v36  ;;  %v2174_v38 = vrot.slane %v6165_v55, 1  ;;  %v9748_v28 = vld [vmem:[#allocation14_spill] sm:$0xff] }
 0x194   : > { %v6544_v46 = vadd.f32 %v2165_v12, %v2105_v57  ;;  %v6547_v9 = vadd.f32 %v2166_v14, %v2106_v63  ;;  %v2175_v27 = vrot.slane %v6174_v32, 1  ;;  %v2176_v42 = vrot.slane %v6181_v5, 1  ;;  %v9809_v57 = vld [vmem:[#allocation38_spill] sm:$0xff] }
 0x195   : > { %v2177_v15 = vrot.slane %v6183_v37, 1  ;;  %v2178_v52 = vrot.slane %v9734_v3, 1 }
 0x196   : > { %v2179_v41 = vsel %vm1117_vm2, %v2173_v60, %v2176_v42  ;;  %v2182_v62 = vsel %vm1117_vm2, %v2176_v42, %v2173_v60 }
 0x197   : > { %v2180_v63 = vsel %vm1117_vm2, %v2174_v38, %v2177_v15  ;;  %v2183_v61 = vsel %vm1117_vm2, %v2177_v15, %v2174_v38  ;;  %v2181_v12 = vsel %vm1117_vm2, %v2175_v27, %v2178_v52  ;;  %v2184_v14 = vsel %vm1117_vm2, %v2178_v52, %v2175_v27  ;;  %v9751_v15 = vld [vmem:[#allocation29_spill] sm:$0xff]  ;;  %v9752_v52 = vld [vmem:[#allocation30_spill] sm:$0xff] }
 0x198   : > { %v2185_v36 = vmul.f32 %v2179_v41, %v9748_v28  ;;  %v2186_v13 = vmul.f32 %v2180_v63, %v9749_v31  ;;  %v2187_v7 = vmul.f32 %v2181_v12, %v9750_v47  ;;  %v2188_v10 = vmul.f32 %v2182_v62, %v9748_v28 }
 0x199   : > { %v2189_v17 = vmul.f32 %v2183_v61, %v9749_v31  ;;  %v2190_v42 = vmul.f32 %v2184_v14, %v9750_v47  ;;  %v2197_v27 = vmul.f32 %v2179_v41, %v9751_v15  ;;  %v2198_v21 = vmul.f32 %v2180_v63, %v9752_v52 }
 0x19a   : > { %v6575_v60 = vadd.f32 %v2185_v36, %v6439_v25  ;;  %v6578_v38 = vadd.f32 %v2186_v13, %v6441_v29  ;;  %v6583_v54 = vadd.f32 %v2187_v7, %v6445_v53  ;;  %v6586_v56 = vadd.f32 %v2188_v10, %v6447_v40  ;;  %v9753_v25 = vld [vmem:[#allocation31_spill] sm:$0xff]  ;;  %v9754_v53 = vld [vmem:[#allocation44_spill] sm:$0xff]  ;;  %v9755_v40 = vld [vmem:[#allocation45_spill] sm:$0xff] }
 0x19b   : > { %v6589_v31 = vadd.f32 %v2189_v17, %v6449_v33  ;;  %v6592_v47 = vadd.f32 %v2190_v42, %v6453_v59  ;;  %v2199_v36 = vmul.f32 %v2181_v12, %v9753_v25  ;;  %v2200_v29 = vmul.f32 %v2182_v62, %v9751_v15 }
 0x19c   : > { %v2201_v13 = vmul.f32 %v2183_v61, %v9752_v52  ;;  %v2202_v28 = vmul.f32 %v2184_v14, %v9753_v25  ;;  %v6599_v7 = vadd.f32 %v2197_v27, %v6463_v49  ;;  %v6602_v10 = vadd.f32 %v2198_v21, %v6465_v1  ;;  %v9756_v49 = vld [vmem:[#allocation46_spill] sm:$0xff] }
 0x19d   : > { %v2209_v17 = vmul.f32 %v2179_v41, %v9754_v53  ;;  %v2210_v33 = vmul.f32 %v2180_v63, %v9755_v40  ;;  %v6607_v59 = vadd.f32 %v2199_v36, %v6469_v39  ;;  %v6610_v42 = vadd.f32 %v2200_v29, %v6471_v58  ;;  %v9757_v36 = vld [vmem:[#allocation59_spill] sm:$0xff]  ;;  %v9758_v29 = vld [vmem:[#allocation60_spill] sm:$0xff] }
 0x19e   : > { %v6613_v52 = vadd.f32 %v2201_v13, %v6473_v26  ;;  %v6616_v25 = vadd.f32 %v2202_v28, %v6477_v50  ;;  %v2211_v27 = vmul.f32 %v2181_v12, %v9756_v49  ;;  %v2212_v21 = vmul.f32 %v2182_v62, %v9754_v53 }
 0x19f   : > { %v2213_v1 = vmul.f32 %v2183_v61, %v9755_v40  ;;  %v2214_v15 = vmul.f32 %v2184_v14, %v9756_v49  ;;  %v6623_v39 = vadd.f32 %v2209_v17, %v6487_v51  ;;  %v6626_v58 = vadd.f32 %v2210_v33, %v6489_v19  ;;  %v9759_v51 = vld [vmem:[#allocation61_spill] sm:$0xff] }
 0x1a0   : > { %v2221_v26 = vmul.f32 %v2179_v41, %v9757_v36  ;;  %v2222_v13 = vmul.f32 %v2180_v63, %v9758_v29  ;;  %v6631_v50 = vadd.f32 %v2211_v27, %v6493_v16  ;;  %v6634_v28 = vadd.f32 %v2212_v21, %v6495_v35  ;;  %v9760_v27 = vld [vmem:[#allocation74_spill] sm:$0xff]  ;;  %v9761_v21 = vld [vmem:[#allocation75_spill] sm:$0xff] }
 0x1a1   : > { %v6637_v40 = vadd.f32 %v2213_v1, %v6497_v43  ;;  %v6640_v49 = vadd.f32 %v2214_v15, %v6501_v48  ;;  %v2223_v17 = vmul.f32 %v2181_v12, %v9759_v51  ;;  %v2224_v19 = vmul.f32 %v2182_v62, %v9757_v36 }
 0x1a2   : > { %v2225_v33 = vmul.f32 %v2183_v61, %v9758_v29  ;;  %v2226_v53 = vmul.f32 %v2184_v14, %v9759_v51  ;;  %v6647_v16 = vadd.f32 %v2221_v26, %v6511_v18  ;;  %v6650_v35 = vadd.f32 %v2222_v13, %v6513_v23  ;;  %v9762_v18 = vld [vmem:[#allocation76_spill] sm:$0xff] }
 0x1a3   : > { %v2239_v43 = vmul.f32 %v2179_v41, %v9760_v27  ;;  %v2240_v1 = vmul.f32 %v2180_v63, %v9761_v21  ;;  %v6655_v48 = vadd.f32 %v2223_v17, %v6517_v24  ;;  %v6658_v15 = vadd.f32 %v2224_v19, %v6519_v34  ;;  %v9768_v17 = vld [vmem:[#allocation18_spill] sm:$0xff] }
 0x1a4   : > { %v6661_v29 = vadd.f32 %v2225_v33, %v6521_v11  ;;  %v6664_v51 = vadd.f32 %v2226_v53, %v6525_v0  ;;  %v2241_v26 = vmul.f32 %v2181_v12, %v9762_v18  ;;  %v2242_v23 = vmul.f32 %v2182_v62, %v9760_v27 }
 0x1a5   : > { %v2243_v41 = vmul.f32 %v2183_v61, %v9761_v21  ;;  %v2244_v63 = vmul.f32 %v2184_v14, %v9762_v18  ;;  %v6671_v24 = vadd.f32 %v2239_v43, %v6535_v22  ;;  %v6674_v34 = vadd.f32 %v2240_v1, %v6537_v8  ;;  %v9767_v14 = vld [vmem:[#allocation17_spill] sm:$0xff]  ;;  %v9791_v18 = vld [vmem:[#allocation36_spill] sm:$0xff] }
 0x1a6   : > { %v2254_v11 = vrot.slane %v6181_v5, 2  ;;  %v2255_v13 = vrot.slane %v6183_v37, 2  ;;  %v6679_v0 = vadd.f32 %v2241_v26, %v6540_v6  ;;  %v6682_v12 = vadd.f32 %v2242_v23, %v6542_v44  ;;  %v9771_v23 = vld [vmem:[#allocation32_spill] sm:$0xff] }
 0x1a7   : > { %v6685_v62 = vadd.f32 %v2243_v41, %v6544_v46  ;;  %v6688_v61 = vadd.f32 %v2244_v63, %v6547_v9  ;;  %v2256_v22 = vrot.slane %v9734_v3, 2  ;;  %v9763_v8 = vrot.slane %v6163_v20, 2  ;;  %v9772_v63 = vld [vmem:[#allocation19_spill] sm:$0xff] }
 0x1a8   : > { %v9764_v37 = vrot.slane %v6165_v55, 2  ;;  %v9769_v43 = vrot.slane %v6174_v32, 2 }
 0x1a9   : > { %v2257_v5 = vsel %vm1148_vm3, %v9763_v8, %v2254_v11  ;;  %v9765_v44 = vmov %v9763_v8 }
 0x1aa   : > { %v2258_v6 = vsel %vm1148_vm3, %v9764_v37, %v2255_v13  ;;  %v2260_v46 = vsel %vm1148_vm3, %v2254_v11, %v9765_v44  ;;  %v9766_v9 = vmov %v9764_v37  ;;  %v2263_v53 = vmul.f32 %v2257_v5, %v9767_v14 }
 0x1ab   : > { %v2261_v3 = vsel %vm1148_vm3, %v2255_v13, %v9766_v9  ;;  %v2264_v19 = vmul.f32 %v2258_v6, %v9768_v17  ;;  %v2266_v33 = vmul.f32 %v2260_v46, %v9767_v14  ;;  %v2259_v1 = vsel %vm1148_vm3, %v9769_v43, %v2256_v22 }
 0x1ac   : > { %v9770_v20 = vmov %v9769_v43  ;;  %v2267_v55 = vmul.f32 %v2261_v3, %v9768_v17  ;;  %v2275_v41 = vmul.f32 %v2257_v5, %v9771_v23  ;;  %v2265_v11 = vmul.f32 %v2259_v1, %v9772_v63  ;;  %v9774_v43 = vld [vmem:[#allocation34_spill] sm:$0xff] }
 0x1ad   : > { %v2262_v26 = vsel %vm1148_vm3, %v2256_v22, %v9770_v20  ;;  %v6723_v8 = vadd.f32 %v2263_v53, %v6575_v60  ;;  %v6726_v37 = vadd.f32 %v2264_v19, %v6578_v38  ;;  %v6729_v44 = vadd.f32 %v2266_v33, %v6586_v56  ;;  %v9773_v22 = vld [vmem:[#allocation33_spill] sm:$0xff]  ;;  %v9775_v33 = vld [vmem:[#allocation47_spill] sm:$0xff] }
 0x1ae   : > { %v2268_v13 = vmul.f32 %v2262_v26, %v9772_v63  ;;  %v6732_v32 = vadd.f32 %v2267_v55, %v6589_v31  ;;  %v2276_v9 = vmul.f32 %v2258_v6, %v9773_v22  ;;  %v2277_v20 = vmul.f32 %v2259_v1, %v9774_v43 }
 0x1af   : > { %v6737_v17 = vadd.f32 %v2265_v11, %v6583_v54  ;;  %v2278_v60 = vmul.f32 %v2260_v46, %v9771_v23  ;;  %v2279_v38 = vmul.f32 %v2261_v3, %v9773_v22  ;;  %v2280_v56 = vmul.f32 %v2262_v26, %v9774_v43  ;;  %v9776_v11 = vld [vmem:[#allocation48_spill] sm:$0xff] }
 0x1b0   : > { %v6740_v63 = vadd.f32 %v2268_v13, %v6592_v47  ;;  %v6746_v53 = vadd.f32 %v2275_v41, %v6599_v7  ;;  %v6749_v31 = vadd.f32 %v2276_v9, %v6602_v10  ;;  %v6752_v19 = vadd.f32 %v2277_v20, %v6607_v59  ;;  %v9777_v7 = vld [vmem:[#allocation49_spill] sm:$0xff]  ;;  %v9778_v20 = vld [vmem:[#allocation62_spill] sm:$0xff] }
 0x1b1   : > { %v6755_v54 = vadd.f32 %v2278_v60, %v6610_v42  ;;  %v6758_v47 = vadd.f32 %v2279_v38, %v6613_v52  ;;  %v2287_v55 = vmul.f32 %v2257_v5, %v9775_v33  ;;  %v2288_v13 = vmul.f32 %v2258_v6, %v9776_v11 }
 0x1b2   : > { %v6763_v43 = vadd.f32 %v2280_v56, %v6616_v25  ;;  %v2289_v41 = vmul.f32 %v2259_v1, %v9777_v7  ;;  %v2290_v10 = vmul.f32 %v2260_v46, %v9775_v33  ;;  %v2291_v59 = vmul.f32 %v2261_v3, %v9776_v11  ;;  %v9779_v11 = vld [vmem:[#allocation63_spill] sm:$0xff] }
 0x1b3   : > { %v2292_v9 = vmul.f32 %v2262_v26, %v9777_v7  ;;  %v6770_v42 = vadd.f32 %v2287_v55, %v6623_v39  ;;  %v6773_v52 = vadd.f32 %v2288_v13, %v6626_v58  ;;  %v2299_v60 = vmul.f32 %v2257_v5, %v9778_v20  ;;  %v9780_v39 = vld [vmem:[#allocation64_spill] sm:$0xff] }
 0x1b4   : > { %v6777_v38 = vadd.f32 %v2289_v41, %v6631_v50  ;;  %v6780_v25 = vadd.f32 %v2290_v10, %v6634_v28  ;;  %v6783_v56 = vadd.f32 %v2291_v59, %v6637_v40  ;;  %v2300_v33 = vmul.f32 %v2258_v6, %v9779_v11  ;;  %v9781_v40 = vld [vmem:[#allocation77_spill] sm:$0xff]  ;;  %v6800_v59 = vld [vmem:[#allocation2 + $0xf0] sm:$0xff] }
 0x1b5   : > { %v6787_v7 = vadd.f32 %v2292_v9, %v6640_v49  ;;  %v2301_v55 = vmul.f32 %v2259_v1, %v9780_v39  ;;  %v2302_v58 = vmul.f32 %v2260_v46, %v9778_v20  ;;  %v2303_v13 = vmul.f32 %v2261_v3, %v9779_v11 }
 0x1b6   : > { %v2304_v50 = vmul.f32 %v2262_v26, %v9780_v39  ;;  %v6794_v41 = vadd.f32 %v2299_v60, %v6647_v16  ;;  %v6797_v28 = vadd.f32 %v2300_v33, %v6650_v35  ;;  %v2317_v10 = vmul.f32 %v2257_v5, %v9781_v40  ;;  %v9782_v39 = vld [vmem:[#allocation78_spill] sm:$0xff]  ;;  %v6812_v16 = vld [vmem:[#allocation2 + $0xf8] sm:$0xff]  ;;  %v9783_v33 = vld [vmem:[#allocation79_spill] sm:$0xff] }
 0x1b7   : > { %v6803_v49 = vadd.f32 %v2301_v55, %v6655_v48  ;;  %v6806_v9 = vadd.f32 %v2302_v58, %v6658_v15  ;;  %v6809_v11 = vadd.f32 %v2303_v13, %v6661_v29  ;;  %v2318_v20 = vmul.f32 %v2258_v6, %v9782_v39  ;;  %v6820_v15 = vld [vmem:[#allocation2 + $0x100] sm:$0xff]  ;;  %v6822_v55 = vld [vmem:[#allocation2 + $0x108] sm:$0xff]  ;;  %v6824_v29 = vld [vmem:[#allocation2 + $0x110] sm:$0xff] }
 0x1b8   : > { %v6815_v35 = vadd.f32 %v2304_v50, %v6664_v51  ;;  %v2319_v5 = vmul.f32 %v2259_v1, %v9783_v33  ;;  %v2320_v60 = vmul.f32 %v2260_v46, %v9781_v40  ;;  %v2321_v48 = vmul.f32 %v2261_v3, %v9782_v39  ;;  %v6829_v58 = vld [vmem:[#allocation2 + $0x118] sm:$0xff] }
 0x1b9   : > { %v2322_v6 = vmul.f32 %v2262_v26, %v9783_v33  ;;  %v2323_v51 = vadd.f32 %v2317_v10, %v6671_v24  ;;  %v2324_v1 = vadd.f32 %v2318_v20, %v6674_v34  ;;  %v2342_v46 = vrot.slane %v6800_v59, 6 }
 0x1ba   : > { %v2325_v3 = vadd.f32 %v2319_v5, %v6679_v0  ;;  %v2326_v13 = vadd.f32 %v2320_v60, %v6682_v12  ;;  %v2327_v50 = vadd.f32 %v2321_v48, %v6685_v62  ;;  %v2343_v39 = vrot.slane %v6812_v16, 6  ;;  %v9789_v12 = vld [vmem:[#allocation22_spill] sm:$0xff] }
 0x1bb   : > { %v2328_v26 = vadd.f32 %v2322_v6, %v6688_v61  ;;  %2329 = vst [vmem:[%s4690_s15] sm:$0xff] %v2323_v51  ;;  %2330 = vst [vmem:[%s4690_s15 + $0x8] sm:$0xff] %v2324_v1  ;;  %v2344_v24 = vrot.slane %v6820_v15, 6  ;;  %v2345_v34 = vrot.slane %v6822_v55, 6  ;;  %v2346_v20 = vrot.slane %v6824_v29, 6  ;;  %v9784_v1 = vld [vmem:[#allocation5_spill] sm:$0xff] }
 0x1bc   : > { %2331 = vst [vmem:[%s4690_s15 + $0x10] sm:$0xff] %v2325_v3  ;;  %2332 = vst [vmem:[%s4690_s15 + $0x18] sm:$0x3f] %v2326_v13  ;;  %v2347_v0 = vrot.slane %v6829_v58, 6  ;;  %v9785_v13 = vld [vmem:[#allocation6_spill] sm:$0xff] }
 0x1bd   : > { %2333 = vst [vmem:[%s4690_s15 + $0x20] sm:$0x3f] %v2327_v50  ;;  %2334 = vst [vmem:[%s4690_s15 + $0x28] sm:$0x3f] %v2328_v26  ;;  %v2348_v61 = vsel %vm1043_vm0, %v2342_v46, %v2345_v34  ;;  %v2349_v5 = vsel %vm1043_vm0, %v2343_v39, %v2346_v20  ;;  %v2351_v60 = vsel %vm1043_vm0, %v2345_v34, %v2342_v46  ;;  %v9786_v26 = vld [vmem:[#allocation7_spill] sm:$0xff] }
 0x1be   : > { %v2352_v48 = vsel %vm1043_vm0, %v2346_v20, %v2343_v39  ;;  %v2350_v6 = vsel %vm1043_vm0, %v2344_v24, %v2347_v0  ;;  %v2353_v51 = vsel %vm1043_vm0, %v2347_v0, %v2344_v24  ;;  %v6863_v3 = vmul.f32 %v2351_v60, %v9784_v1  ;;  %v9787_v20 = vld [vmem:[#allocation20_spill] sm:$0xff]  ;;  %v9788_v0 = vld [vmem:[#allocation21_spill] sm:$0xff] }
 0x1bf   : > { %v6866_v50 = vmul.f32 %v2352_v48, %v9785_v13  ;;  %v6869_v10 = vmul.f32 %v2353_v51, %v9786_v26  ;;  %v6872_v46 = vmul.f32 %v2348_v61, %v9784_v1  ;;  %v6875_v39 = vmul.f32 %v2349_v5, %v9785_v13  ;;  %v9790_v1 = vld [vmem:[#allocation35_spill] sm:$0xff] }
 0x1c0   : > { %v6878_v34 = vmul.f32 %v2350_v6, %v9786_v26  ;;  %v2372_v24 = vmul.f32 %v2351_v60, %v9787_v20  ;;  %v2373_v62 = vmul.f32 %v2352_v48, %v9788_v0  ;;  %v2374_v33 = vmul.f32 %v2353_v51, %v9789_v12 }
 0x1c1   : > { %v2375_v40 = vmul.f32 %v2348_v61, %v9787_v20  ;;  %v2376_v22 = vmul.f32 %v2349_v5, %v9788_v0  ;;  %v2377_v23 = vmul.f32 %v2350_v6, %v9789_v12  ;;  %v2390_v14 = vmul.f32 %v2351_v60, %v9790_v1  ;;  %v9792_v20 = vld [vmem:[#allocation37_spill] sm:$0xff] }
 0x1c2   : > { %v2391_v13 = vmul.f32 %v2352_v48, %v9791_v18  ;;  %v6889_v21 = vadd.f32 %v2372_v24, %v6723_v8  ;;  %v6892_v26 = vadd.f32 %v2373_v62, %v6726_v37  ;;  %v6895_v27 = vadd.f32 %v2374_v33, %v6737_v17 }
 0x1c3   : > { %v6898_v36 = vadd.f32 %v2375_v40, %v6729_v44  ;;  %v6901_v0 = vadd.f32 %v2376_v22, %v6732_v32  ;;  %v6904_v12 = vadd.f32 %v2377_v23, %v6740_v63  ;;  %v2392_v30 = vmul.f32 %v2353_v51, %v9792_v20  ;;  %v9793_v63 = vld [vmem:[#allocation50_spill] sm:$0xff]  ;;  %v9794_v40 = vld [vmem:[#allocation51_spill] sm:$0xff] }
 0x1c4   : > { %v2393_v8 = vmul.f32 %v2348_v61, %v9790_v1  ;;  %v2394_v24 = vmul.f32 %v2349_v5, %v9791_v18  ;;  %v2395_v37 = vmul.f32 %v2350_v6, %v9792_v20  ;;  %v6911_v17 = vadd.f32 %v2390_v14, %v6746_v53  ;;  %v9795_v14 = vld [vmem:[#allocation52_spill] sm:$0xff]  ;;  %v9808_v1 = vld [vmem:[#allocation25_spill] sm:$0xff] }
 0x1c5   : > { %v6914_v44 = vadd.f32 %v2391_v13, %v6749_v31  ;;  %v6917_v32 = vadd.f32 %v2392_v30, %v6752_v19  ;;  %v2408_v22 = vmul.f32 %v2351_v60, %v9793_v63  ;;  %v2409_v33 = vmul.f32 %v2352_v48, %v9794_v40 }
 0x1c6   : > { %v6920_v23 = vadd.f32 %v2393_v8, %v6755_v54  ;;  %v6925_v62 = vadd.f32 %v2394_v24, %v6758_v47  ;;  %v6928_v20 = vadd.f32 %v2395_v37, %v6763_v43  ;;  %v2410_v53 = vmul.f32 %v2353_v51, %v9795_v14  ;;  %v9796_v8 = vld [vmem:[#allocation65_spill] sm:$0xff]  ;;  %v9797_v37 = vld [vmem:[#allocation66_spill] sm:$0xff] }
 0x1c7   : > { %v2411_v31 = vmul.f32 %v2348_v61, %v9793_v63  ;;  %v2412_v30 = vmul.f32 %v2349_v5, %v9794_v40  ;;  %v2413_v19 = vmul.f32 %v2350_v6, %v9795_v14  ;;  %v6935_v54 = vadd.f32 %v2408_v22, %v6770_v42  ;;  %v9798_v42 = vld [vmem:[#allocation67_spill] sm:$0xff] }
 0x1c8   : > { %v6938_v13 = vadd.f32 %v2409_v33, %v6773_v52  ;;  %v6941_v47 = vadd.f32 %v2410_v53, %v6777_v38  ;;  %v2426_v24 = vmul.f32 %v2351_v60, %v9796_v8  ;;  %v2427_v63 = vmul.f32 %v2352_v48, %v9797_v37 }
 0x1c9   : > { %v6944_v43 = vadd.f32 %v2411_v31, %v6780_v25  ;;  %v6949_v40 = vadd.f32 %v2412_v30, %v6783_v56  ;;  %v6952_v14 = vadd.f32 %v2413_v19, %v6787_v7  ;;  %v2428_v22 = vmul.f32 %v2353_v51, %v9798_v42 }
 0x1ca   : > { %v2429_v52 = vmul.f32 %v2348_v61, %v9796_v8  ;;  %v2430_v38 = vmul.f32 %v2349_v5, %v9797_v37  ;;  %v2431_v33 = vmul.f32 %v2350_v6, %v9798_v42  ;;  %v6959_v25 = vadd.f32 %v2426_v24, %v6794_v41 }
 0x1cb   : > { %v6962_v60 = vadd.f32 %v2427_v63, %v6797_v28  ;;  %v6965_v56 = vadd.f32 %v2428_v22, %v6803_v49  ;;  %v2441_v48 = vrot.slane %v6822_v55, 7  ;;  %v2442_v61 = vrot.slane %v6824_v29, 7 }
 0x1cc   : > { %v6968_v7 = vadd.f32 %v2429_v52, %v6806_v9  ;;  %v6973_v5 = vadd.f32 %v2430_v38, %v6809_v11  ;;  %v6976_v6 = vadd.f32 %v2431_v33, %v6815_v35  ;;  %v2443_v41 = vrot.slane %v6829_v58, 7  ;;  %v9805_v52 = vld [vmem:[#allocation8_spill] sm:$0xff]  ;;  %v9806_v33 = vld [vmem:[#allocation9_spill] sm:$0xff] }
 0x1cd   : > { %v6981_v28 = vmul.f32 %v6800_v59, %v9731_v2  ;;  %v9799_v49 = vrot.slane %v6800_v59, 7  ;;  %v9800_v51 = vrot.slane %v6812_v16, 7  ;;  %v9803_v30 = vrot.slane %v6820_v15, 7 }
 0x1cf   : > { %v2444_v9 = vsel %vm1068_vm1, %v9799_v49, %v2441_v48  ;;  %v2445_v11 = vsel %vm1068_vm1, %v9800_v51, %v2442_v61  ;;  %v9801_v63 = vmov %v9799_v49  ;;  %v9802_v53 = vmov %v9800_v51 }
 0x1d0   : > { %v2447_v35 = vsel %vm1068_vm1, %v2441_v48, %v9801_v63  ;;  %v2448_v31 = vsel %vm1068_vm1, %v2442_v61, %v9802_v53  ;;  %v2446_v19 = vsel %vm1068_vm1, %v9803_v30, %v2443_v41  ;;  %v9804_v24 = vmov %v9803_v30  ;;  %v9807_v48 = vld [vmem:[#allocation10_spill] sm:$0xff] }
 0x1d1   : > { %v2449_v22 = vsel %vm1068_vm1, %v2443_v41, %v9804_v24  ;;  %v2456_v38 = vmul.f32 %v2447_v35, %v9805_v52  ;;  %v2457_v49 = vmul.f32 %v2448_v31, %v9806_v33  ;;  %v2459_v63 = vmul.f32 %v2444_v9, %v9805_v52 }
 0x1d2   : > { %v2458_v51 = vmul.f32 %v2449_v22, %v9807_v48  ;;  %v2460_v61 = vmul.f32 %v2445_v11, %v9806_v33  ;;  %v2461_v53 = vmul.f32 %v2446_v19, %v9807_v48  ;;  %v2474_v37 = vmul.f32 %v2447_v35, %v9722_v4 }
 0x1d3   : > { %v2462_v42 = vadd.f32 %v2456_v38, %v6863_v3  ;;  %v2463_v30 = vadd.f32 %v2457_v49, %v6866_v50  ;;  %v2475_v41 = vmul.f32 %v2448_v31, %v9723_v45  ;;  %v2465_v8 = vadd.f32 %v2459_v63, %v6872_v46 }
 0x1d4   : > { %v2464_v24 = vadd.f32 %v2458_v51, %v6869_v10  ;;  %v2466_v18 = vadd.f32 %v2460_v61, %v6875_v39  ;;  %v2467_v52 = vadd.f32 %v2461_v53, %v6878_v34  ;;  %v2476_v33 = vmul.f32 %v2449_v22, %v9808_v1  ;;  %v9810_v51 = vld [vmem:[#allocation39_spill] sm:$0xff]  ;;  %v9811_v53 = vld [vmem:[#allocation40_spill] sm:$0xff] }
 0x1d5   : > { %v2477_v48 = vmul.f32 %v2444_v9, %v9722_v4  ;;  %v2478_v3 = vmul.f32 %v2445_v11, %v9723_v45  ;;  %v2479_v50 = vmul.f32 %v2446_v19, %v9808_v1  ;;  %v2480_v38 = vadd.f32 %v2474_v37, %v6889_v21  ;;  %v9812_v4 = vld [vmem:[#allocation53_spill] sm:$0xff] }
 0x1d6   : > { %v2481_v49 = vadd.f32 %v2475_v41, %v6892_v26  ;;  %v2492_v10 = vmul.f32 %v2447_v35, %v9809_v57  ;;  %v2493_v46 = vmul.f32 %v2448_v31, %v9810_v51  ;;  %v2482_v39 = vadd.f32 %v2476_v33, %v6895_v27  ;;  %v9813_v33 = vld [vmem:[#allocation54_spill] sm:$0xff] }
 0x1d7   : > { %v2483_v34 = vadd.f32 %v2477_v48, %v6898_v36  ;;  %v2484_v63 = vadd.f32 %v2478_v3, %v6901_v0  ;;  %v2485_v61 = vadd.f32 %v2479_v50, %v6904_v12  ;;  %v2494_v45 = vmul.f32 %v2449_v22, %v9811_v53  ;;  %v9814_v50 = vld [vmem:[#allocation55_spill] sm:$0xff] }
 0x1d8   : > { %v2495_v1 = vmul.f32 %v2444_v9, %v9809_v57  ;;  %v2496_v21 = vmul.f32 %v2445_v11, %v9810_v51  ;;  %v2497_v26 = vmul.f32 %v2446_v19, %v9811_v53  ;;  %v2498_v37 = vadd.f32 %v2492_v10, %v6911_v17  ;;  %v9815_v57 = vld [vmem:[#allocation68_spill] sm:$0xff] }
 0x1d9   : > { %v2499_v41 = vadd.f32 %v2493_v46, %v6914_v44  ;;  %v2510_v27 = vmul.f32 %v2447_v35, %v9812_v4  ;;  %v2511_v36 = vmul.f32 %v2448_v31, %v9813_v33  ;;  %v2500_v0 = vadd.f32 %v2494_v45, %v6917_v32  ;;  %v9816_v32 = vld [vmem:[#allocation69_spill] sm:$0xff] }
 0x1da   : > { %v2501_v12 = vadd.f32 %v2495_v1, %v6920_v23  ;;  %v2502_v48 = vadd.f32 %v2496_v21, %v6925_v62  ;;  %v2503_v3 = vadd.f32 %v2497_v26, %v6928_v20  ;;  %v2512_v51 = vmul.f32 %v2449_v22, %v9814_v50  ;;  %v9817_v26 = vld [vmem:[#allocation70_spill] sm:$0xff] }
 0x1db   : > { %v2513_v53 = vmul.f32 %v2444_v9, %v9812_v4  ;;  %v2514_v17 = vmul.f32 %v2445_v11, %v9813_v33  ;;  %v2515_v44 = vmul.f32 %v2446_v19, %v9814_v50  ;;  %v2516_v10 = vadd.f32 %v2510_v27, %v6935_v54  ;;  %v9818_v27 = vld [vmem:[#allocation12_spill] sm:$0xff] }
 0x1dc   : > { %v2517_v46 = vadd.f32 %v2511_v36, %v6938_v13  ;;  %v2528_v45 = vmul.f32 %v2447_v35, %v9815_v57  ;;  %v2529_v1 = vmul.f32 %v2448_v31, %v9816_v32  ;;  %v2518_v23 = vadd.f32 %v2512_v51, %v6941_v47 }
 0x1dd   : > { %v2519_v20 = vadd.f32 %v2513_v53, %v6944_v43  ;;  %v2520_v62 = vadd.f32 %v2514_v17, %v6949_v40  ;;  %v2521_v21 = vadd.f32 %v2515_v44, %v6952_v14  ;;  %v2530_v33 = vmul.f32 %v2449_v22, %v9817_v26  ;;  %v9819_v43 = vld [vmem:[#allocation13_spill] sm:$0xff]  ;;  %v9822_v44 = vld [vmem:[#allocation28_spill] sm:$0xff] }
 0x1de   : > { %v2531_v50 = vmul.f32 %v2444_v9, %v9815_v57  ;;  %v2532_v54 = vmul.f32 %v2445_v11, %v9816_v32  ;;  %v2533_v13 = vmul.f32 %v2446_v19, %v9817_v26  ;;  %v2534_v35 = vadd.f32 %v2528_v45, %v6959_v25 }
 0x1df   : > { %v2535_v31 = vadd.f32 %v2529_v1, %v6962_v60  ;;  %v2547_v47 = vmul.f32 %v6812_v16, %v9818_v27  ;;  %v2548_v40 = vmul.f32 %v6820_v15, %v9819_v43  ;;  %v2536_v14 = vadd.f32 %v2530_v33, %v6965_v56 }
 0x1e0   : > { %v2537_v22 = vadd.f32 %v2531_v50, %v6968_v7  ;;  %v2538_v9 = vadd.f32 %v2532_v54, %v6973_v5  ;;  %v2539_v11 = vadd.f32 %v2533_v13, %v6976_v6  ;;  %v2549_v19 = vmul.f32 %v6822_v55, %v9731_v2  ;;  %v9820_v7 = vld [vmem:[#allocation26_spill] sm:$0xff]  ;;  %v9821_v6 = vld [vmem:[#allocation27_spill] sm:$0xff] }
 0x1e1   : > { %v2550_v25 = vmul.f32 %v6824_v29, %v9818_v27  ;;  %v2551_v60 = vmul.f32 %v6829_v58, %v9819_v43  ;;  %v7078_v51 = vadd.f32 %v6981_v28, %v2462_v42  ;;  %v7080_v53 = vadd.f32 %v2547_v47, %v2463_v30  ;;  %v9824_v54 = vld [vmem:[#allocation42_spill] sm:$0xff] }
 0x1e2   : > { %v7082_v56 = vadd.f32 %v2548_v40, %v2464_v24  ;;  %v2564_v5 = vmul.f32 %v6800_v59, %v9820_v7  ;;  %v2565_v33 = vmul.f32 %v6812_v16, %v9821_v6  ;;  %v7088_v36 = vadd.f32 %v2549_v19, %v2465_v8 }
 0x1e3   : > { %v7090_v50 = vadd.f32 %v2550_v25, %v2466_v18  ;;  %v7092_v17 = vadd.f32 %v2551_v60, %v2467_v52  ;;  %v2566_v42 = vmul.f32 %v6820_v15, %v9822_v44  ;;  %v2567_v28 = vmul.f32 %v6822_v55, %v9820_v7  ;;  %v9823_v52 = vld [vmem:[#allocation41_spill] sm:$0xff]  ;;  %v9825_v25 = vld [vmem:[#allocation43_spill] sm:$0xff] }
 0x1e4   : > { %v2568_v30 = vmul.f32 %v6824_v29, %v9821_v6  ;;  %v2569_v24 = vmul.f32 %v6829_v58, %v9822_v44  ;;  %v7102_v45 = vadd.f32 %v2564_v5, %v2480_v38  ;;  %v7104_v8 = vadd.f32 %v2565_v33, %v2481_v49 }
 0x1e5   : > { %v7106_v18 = vadd.f32 %v2566_v42, %v2482_v39  ;;  %v2582_v1 = vmul.f32 %v6800_v59, %v9823_v52  ;;  %v2583_v13 = vmul.f32 %v6812_v16, %v9824_v54  ;;  %v7112_v47 = vadd.f32 %v2567_v28, %v2483_v34  ;;  %v9827_v42 = vld [vmem:[#allocation57_spill] sm:$0xff] }
 0x1e6   : > { %v7114_v40 = vadd.f32 %v2568_v30, %v2484_v63  ;;  %v7116_v19 = vadd.f32 %v2569_v24, %v2485_v61  ;;  %v2584_v38 = vmul.f32 %v6820_v15, %v9825_v25  ;;  %v2585_v49 = vmul.f32 %v6822_v55, %v9823_v52  ;;  %v9826_v61 = vld [vmem:[#allocation56_spill] sm:$0xff]  ;;  %v9828_v52 = vld [vmem:[#allocation58_spill] sm:$0xff] }
 0x1e7   : > { %v2586_v39 = vmul.f32 %v6824_v29, %v9824_v54  ;;  %v2587_v60 = vmul.f32 %v6829_v58, %v9825_v25  ;;  %v7126_v5 = vadd.f32 %v2582_v1, %v2498_v37  ;;  %v7128_v34 = vadd.f32 %v2583_v13, %v2499_v41  ;;  %v9831_v25 = vld [vmem:[#allocation73_spill] sm:$0xff] }
 0x1e8   : > { %v7130_v63 = vadd.f32 %v2584_v38, %v2500_v0  ;;  %v2600_v33 = vmul.f32 %v6800_v59, %v9826_v61  ;;  %v2601_v28 = vmul.f32 %v6812_v16, %v9827_v42  ;;  %v7136_v30 = vadd.f32 %v2585_v49, %v2501_v12  ;;  %v9830_v49 = vld [vmem:[#allocation72_spill] sm:$0xff] }
 0x1e9   : > { %v7138_v24 = vadd.f32 %v2586_v39, %v2502_v48  ;;  %v7140_v54 = vadd.f32 %v2587_v60, %v2503_v3  ;;  %v2602_v37 = vmul.f32 %v6820_v15, %v9828_v52  ;;  %v2603_v41 = vmul.f32 %v6822_v55, %v9826_v61  ;;  %v9829_v3 = vld [vmem:[#allocation71_spill] sm:$0xff] }
 0x1ea   : > { %v2604_v0 = vmul.f32 %v6824_v29, %v9827_v42  ;;  %v2605_v1 = vmul.f32 %v6829_v58, %v9828_v52  ;;  %v7150_v13 = vadd.f32 %v2600_v33, %v2516_v10  ;;  %v7152_v12 = vadd.f32 %v2601_v28, %v2517_v46  ;;  %v9835_v52 = vld [vmem:[#allocation16_spill] sm:$0xff] }
 0x1eb   : > { %v7154_v48 = vadd.f32 %v2602_v37, %v2518_v23  ;;  %v2618_v38 = vmul.f32 %v6800_v59, %v9829_v3  ;;  %v2619_v39 = vmul.f32 %v6812_v16, %v9830_v49  ;;  %v7160_v60 = vadd.f32 %v2603_v41, %v2519_v20 }
 0x1ec   : > { %v7162_v61 = vadd.f32 %v2604_v0, %v2520_v62  ;;  %v7164_v42 = vadd.f32 %v2605_v1, %v2521_v21  ;;  %v2620_v10 = vmul.f32 %v6820_v15, %v9831_v25  ;;  %v2621_v46 = vmul.f32 %v6822_v55, %v9829_v3 }
 0x1ed   : > { %v2622_v23 = vmul.f32 %v6824_v29, %v9830_v49  ;;  %v2623_v33 = vmul.f32 %v6829_v58, %v9831_v25  ;;  %v7174_v28 = vadd.f32 %v2618_v38, %v2534_v35  ;;  %v7176_v20 = vadd.f32 %v2619_v39, %v2535_v31 }
 0x1ee   : > { %v7178_v62 = vadd.f32 %v2620_v10, %v2536_v14  ;;  %v2630_v21 = vrot.slane %v6800_v59, 1  ;;  %v2631_v37 = vrot.slane %v6812_v16, 1  ;;  %v7182_v41 = vadd.f32 %v2621_v46, %v2537_v22  ;;  %v9833_v14 = vld [vmem:[#allocation14_spill] sm:$0xff]  ;;  %v9834_v22 = vld [vmem:[#allocation15_spill] sm:$0xff] }
 0x1ef   : > { %v7184_v0 = vadd.f32 %v2622_v23, %v2538_v9  ;;  %v7186_v1 = vadd.f32 %v2623_v33, %v2539_v11  ;;  %v2632_v49 = vrot.slane %v6820_v15, 1  ;;  %v2633_v25 = vrot.slane %v6822_v55, 1  ;;  %v9904_v11 = vld [vmem:[#allocation25_spill] sm:$0xff] }
 0x1f0   : > { %v2634_v35 = vrot.slane %v6824_v29, 1  ;;  %v2635_v31 = vrot.slane %v6829_v58, 1 }
 0x1f1   : > { %v2636_v10 = vsel %vm1117_vm2, %v2630_v21, %v2633_v25  ;;  %v2639_v33 = vsel %vm1117_vm2, %v2633_v25, %v2630_v21 }
 0x1f2   : > { %v2637_v46 = vsel %vm1117_vm2, %v2631_v37, %v2634_v35  ;;  %v2638_v23 = vsel %vm1117_vm2, %v2632_v49, %v2635_v31  ;;  %v2640_v38 = vsel %vm1117_vm2, %v2634_v35, %v2631_v37  ;;  %v2641_v39 = vsel %vm1117_vm2, %v2635_v31, %v2632_v49  ;;  %v9836_v37 = vld [vmem:[#allocation29_spill] sm:$0xff]  ;;  %v9837_v35 = vld [vmem:[#allocation30_spill] sm:$0xff] }
 0x1f3   : > { %v2648_v9 = vmul.f32 %v2636_v10, %v9833_v14  ;;  %v2649_v3 = vmul.f32 %v2637_v46, %v9834_v22  ;;  %v2650_v44 = vmul.f32 %v2638_v23, %v9835_v52  ;;  %v2651_v6 = vmul.f32 %v2639_v33, %v9833_v14 }
 0x1f4   : > { %v2652_v7 = vmul.f32 %v2640_v38, %v9834_v22  ;;  %v2653_v43 = vmul.f32 %v2641_v39, %v9835_v52  ;;  %v2666_v49 = vmul.f32 %v2636_v10, %v9836_v37  ;;  %v2667_v31 = vmul.f32 %v2637_v46, %v9837_v35 }
 0x1f5   : > { %v7216_v25 = vadd.f32 %v2648_v9, %v7078_v51  ;;  %v7219_v21 = vadd.f32 %v2649_v3, %v7080_v53  ;;  %v7224_v27 = vadd.f32 %v2650_v44, %v7082_v56  ;;  %v7227_v2 = vadd.f32 %v2651_v6, %v7088_v36  ;;  %v9838_v51 = vld [vmem:[#allocation31_spill] sm:$0xff]  ;;  %v9839_v36 = vld [vmem:[#allocation44_spill] sm:$0xff] }
 0x1f6   : > { %v7230_v22 = vadd.f32 %v2652_v7, %v7090_v50  ;;  %v7233_v52 = vadd.f32 %v2653_v43, %v7092_v17  ;;  %v2668_v9 = vmul.f32 %v2638_v23, %v9838_v51  ;;  %v2669_v53 = vmul.f32 %v2639_v33, %v9836_v37  ;;  %v9840_v50 = vld [vmem:[#allocation45_spill] sm:$0xff] }
 0x1f7   : > { %v2670_v3 = vmul.f32 %v2640_v38, %v9837_v35  ;;  %v2671_v14 = vmul.f32 %v2641_v39, %v9838_v51  ;;  %v7240_v56 = vadd.f32 %v2666_v49, %v7102_v45  ;;  %v7243_v6 = vadd.f32 %v2667_v31, %v7104_v8  ;;  %v9841_v45 = vld [vmem:[#allocation46_spill] sm:$0xff] }
 0x1f8   : > { %v2684_v7 = vmul.f32 %v2636_v10, %v9839_v36  ;;  %v2685_v44 = vmul.f32 %v2637_v46, %v9840_v50  ;;  %v7248_v43 = vadd.f32 %v2668_v9, %v7106_v18  ;;  %v7251_v17 = vadd.f32 %v2669_v53, %v7112_v47  ;;  %v9842_v9 = vld [vmem:[#allocation59_spill] sm:$0xff]  ;;  %v9843_v53 = vld [vmem:[#allocation60_spill] sm:$0xff] }
 0x1f9   : > { %v7254_v35 = vadd.f32 %v2670_v3, %v7114_v40  ;;  %v7257_v51 = vadd.f32 %v2671_v14, %v7116_v19  ;;  %v2686_v49 = vmul.f32 %v2638_v23, %v9841_v45  ;;  %v2687_v8 = vmul.f32 %v2639_v33, %v9839_v36 }
 0x1fa   : > { %v2688_v31 = vmul.f32 %v2640_v38, %v9840_v50  ;;  %v2689_v37 = vmul.f32 %v2641_v39, %v9841_v45  ;;  %v7264_v18 = vadd.f32 %v2684_v7, %v7126_v5  ;;  %v7267_v47 = vadd.f32 %v2685_v44, %v7128_v34  ;;  %v9844_v5 = vld [vmem:[#allocation61_spill] sm:$0xff] }
 0x1fb   : > { %v2702_v40 = vmul.f32 %v2636_v10, %v9842_v9  ;;  %v2703_v3 = vmul.f32 %v2637_v46, %v9843_v53  ;;  %v7272_v19 = vadd.f32 %v2686_v49, %v7130_v63  ;;  %v7275_v14 = vadd.f32 %v2687_v8, %v7136_v30  ;;  %v9845_v49 = vld [vmem:[#allocation74_spill] sm:$0xff]  ;;  %v9846_v8 = vld [vmem:[#allocation75_spill] sm:$0xff] }
 0x1fc   : > { %v7278_v50 = vadd.f32 %v2688_v31, %v7138_v24  ;;  %v7281_v45 = vadd.f32 %v2689_v37, %v7140_v54  ;;  %v2704_v7 = vmul.f32 %v2638_v23, %v9844_v5  ;;  %v2705_v34 = vmul.f32 %v2639_v33, %v9842_v9 }
 0x1fd   : > { %v2706_v44 = vmul.f32 %v2640_v38, %v9843_v53  ;;  %v2707_v36 = vmul.f32 %v2641_v39, %v9844_v5  ;;  %v7288_v63 = vadd.f32 %v2702_v40, %v7150_v13  ;;  %v7291_v30 = vadd.f32 %v2703_v3, %v7152_v12  ;;  %v9847_v13 = vld [vmem:[#allocation76_spill] sm:$0xff] }
 0x1fe   : > { %v2720_v24 = vmul.f32 %v2636_v10, %v9845_v49  ;;  %v2721_v31 = vmul.f32 %v2637_v46, %v9846_v8  ;;  %v7296_v54 = vadd.f32 %v2704_v7, %v7154_v48  ;;  %v7299_v37 = vadd.f32 %v2705_v34, %v7160_v60 }
 0x1ff   : > { %v7302_v53 = vadd.f32 %v2706_v44, %v7162_v61  ;;  %v7305_v5 = vadd.f32 %v2707_v36, %v7164_v42  ;;  %v2722_v40 = vmul.f32 %v2638_v23, %v9847_v13  ;;  %v2723_v12 = vmul.f32 %v2639_v33, %v9845_v49 }
 0x200   : > { %v2724_v10 = vmul.f32 %v2640_v38, %v9846_v8  ;;  %v2725_v46 = vmul.f32 %v2641_v39, %v9847_v13  ;;  %v7312_v48 = vadd.f32 %v2720_v24, %v7174_v28  ;;  %v7315_v60 = vadd.f32 %v2721_v31, %v7176_v20  ;;  %v9881_v13 = vld [vmem:[#allocation36_spill] sm:$0xff] }
 0x201   : > { %v2737_v61 = vrot.slane %v6829_v58, 2  ;;  %v9848_v3 = vrot.slane %v6822_v55, 2  ;;  %v9849_v42 = vrot.slane %v6800_v59, 2  ;;  %v7325_v33 = vadd.f32 %v2722_v40, %v7178_v62  ;;  %v9859_v59 = vld [vmem:[#allocation18_spill] sm:$0xff]  ;;  %v9860_v55 = vld [vmem:[#allocation19_spill] sm:$0xff] }
 0x202   : > { %v7328_v38 = vadd.f32 %v2723_v12, %v7182_v41  ;;  %v7331_v28 = vadd.f32 %v2724_v10, %v7184_v0  ;;  %v7334_v20 = vadd.f32 %v2725_v46, %v7186_v1  ;;  %v9850_v58 = vrot.slane %v6824_v29, 2  ;;  %v9858_v12 = vld [vmem:[#allocation17_spill] sm:$0xff] }
 0x203   : > { %v2738_v23 = vsel %vm1148_vm3, %v9849_v42, %v9848_v3  ;;  %v9851_v39 = vrot.slane %v6812_v16, 2  ;;  %v9852_v7 = vrot.slane %v6820_v15, 2  ;;  %v9853_v41 = vmov %v9849_v42 }
 0x204   : > { %v9854_v0 = vmov %v9848_v3  ;;  %v9856_v44 = vmov %v9850_v58  ;;  %v2750_v10 = vmul.f32 %v2738_v23, %v9858_v12 }
 0x205   : > { %v2739_v36 = vsel %vm1148_vm3, %v9851_v39, %v9850_v58  ;;  %v2740_v62 = vsel %vm1148_vm3, %v9852_v7, %v2737_v61  ;;  %v2741_v1 = vsel %vm1148_vm3, %v9854_v0, %v9853_v41  ;;  %v9855_v34 = vmov %v9851_v39  ;;  %v9861_v58 = vld [vmem:[#allocation32_spill] sm:$0xff]  ;;  %v9862_v41 = vld [vmem:[#allocation33_spill] sm:$0xff] }
 0x206   : > { %v2742_v24 = vsel %vm1148_vm3, %v9856_v44, %v9855_v34  ;;  %v9857_v31 = vmov %v9852_v7  ;;  %v2751_v46 = vmul.f32 %v2739_v36, %v9859_v59  ;;  %v2752_v3 = vmul.f32 %v2740_v62, %v9860_v55 }
 0x207   : > { %v2743_v40 = vsel %vm1148_vm3, %v2737_v61, %v9857_v31  ;;  %v2753_v42 = vmul.f32 %v2741_v1, %v9858_v12  ;;  %v2754_v16 = vmul.f32 %v2742_v24, %v9859_v59  ;;  %v2768_v39 = vmul.f32 %v2738_v23, %v9861_v58  ;;  %v9880_v59 = vld [vmem:[#allocation35_spill] sm:$0xff] }
 0x208   : > { %v2755_v29 = vmul.f32 %v2743_v40, %v9860_v55  ;;  %v7370_v7 = vadd.f32 %v2750_v10, %v7216_v25  ;;  %v7373_v15 = vadd.f32 %v2751_v46, %v7219_v21  ;;  %v7376_v61 = vadd.f32 %v2752_v3, %v7224_v27  ;;  %v9863_v55 = vld [vmem:[#allocation34_spill] sm:$0xff]  ;;  %v9864_v3 = vld [vmem:[#allocation47_spill] sm:$0xff] }
 0x209   : > { %v2769_v0 = vmul.f32 %v2739_v36, %v9862_v41  ;;  %v7380_v34 = vadd.f32 %v2753_v42, %v7227_v2  ;;  %v7383_v44 = vadd.f32 %v2754_v16, %v7230_v22  ;;  %v2770_v25 = vmul.f32 %v2740_v62, %v9863_v55  ;;  %v9865_v42 = vld [vmem:[#allocation48_spill] sm:$0xff] }
 0x20a   : > { %v7386_v31 = vadd.f32 %v2755_v29, %v7233_v52  ;;  %v2771_v10 = vmul.f32 %v2741_v1, %v9861_v58  ;;  %v2772_v21 = vmul.f32 %v2742_v24, %v9862_v41  ;;  %v2773_v27 = vmul.f32 %v2743_v40, %v9863_v55 }
 0x20b   : > { %v7393_v46 = vadd.f32 %v2768_v39, %v7240_v56  ;;  %v7396_v2 = vadd.f32 %v2769_v0, %v7243_v6  ;;  %v7399_v22 = vadd.f32 %v2770_v25, %v7248_v43  ;;  %v2786_v52 = vmul.f32 %v2738_v23, %v9864_v3  ;;  %v9866_v56 = vld [vmem:[#allocation49_spill] sm:$0xff] }
 0x20c   : > { %v2787_v16 = vmul.f32 %v2739_v36, %v9865_v42  ;;  %v7404_v29 = vadd.f32 %v2771_v10, %v7251_v17  ;;  %v7407_v41 = vadd.f32 %v2772_v21, %v7254_v35  ;;  %v7410_v55 = vadd.f32 %v2773_v27, %v7257_v51  ;;  %v9867_v10 = vld [vmem:[#allocation62_spill] sm:$0xff]  ;;  %v9868_v21 = vld [vmem:[#allocation63_spill] sm:$0xff] }
 0x20d   : > { %v2788_v39 = vmul.f32 %v2740_v62, %v9866_v56  ;;  %v2789_v6 = vmul.f32 %v2741_v1, %v9864_v3  ;;  %v2790_v43 = vmul.f32 %v2742_v24, %v9865_v42  ;;  %v2791_v0 = vmul.f32 %v2743_v40, %v9866_v56  ;;  %v7451_v3 = vld [vmem:[#allocation2 + $0x120] sm:$0xff] }
 0x20e   : > { %v7417_v25 = vadd.f32 %v2786_v52, %v7264_v18  ;;  %v7420_v17 = vadd.f32 %v2787_v16, %v7267_v47  ;;  %v2804_v51 = vmul.f32 %v2738_v23, %v9867_v10  ;;  %v2805_v27 = vmul.f32 %v2739_v36, %v9868_v21  ;;  %v9869_v18 = vld [vmem:[#allocation64_spill] sm:$0xff] }
 0x20f   : > { %v7423_v35 = vadd.f32 %v2788_v39, %v7272_v19  ;;  %v7428_v58 = vadd.f32 %v2789_v6, %v7275_v14  ;;  %v7431_v42 = vadd.f32 %v2790_v43, %v7278_v50  ;;  %v7434_v56 = vadd.f32 %v2791_v0, %v7281_v45  ;;  %v9870_v6 = vld [vmem:[#allocation77_spill] sm:$0xff]  ;;  %v9871_v43 = vld [vmem:[#allocation78_spill] sm:$0xff] }
 0x210   : > { %v2806_v52 = vmul.f32 %v2740_v62, %v9869_v18  ;;  %v2807_v47 = vmul.f32 %v2741_v1, %v9867_v10  ;;  %v2808_v19 = vmul.f32 %v2742_v24, %v9868_v21  ;;  %v2809_v16 = vmul.f32 %v2743_v40, %v9869_v18  ;;  %v7453_v10 = vld [vmem:[#allocation2 + $0x128] sm:$0xff] }
 0x211   : > { %v7441_v39 = vadd.f32 %v2804_v51, %v7288_v63  ;;  %v7444_v14 = vadd.f32 %v2805_v27, %v7291_v30  ;;  %v2822_v45 = vmul.f32 %v2738_v23, %v9870_v6  ;;  %v2823_v0 = vmul.f32 %v2739_v36, %v9871_v43  ;;  %v9872_v51 = vld [vmem:[#allocation79_spill] sm:$0xff]  ;;  %v7465_v27 = vld [vmem:[#allocation2 + $0x130] sm:$0xff] }
 0x212   : > { %v7447_v50 = vadd.f32 %v2806_v52, %v7296_v54  ;;  %v7456_v21 = vadd.f32 %v2807_v47, %v7299_v37  ;;  %v7459_v63 = vadd.f32 %v2808_v19, %v7302_v53  ;;  %v7462_v30 = vadd.f32 %v2809_v16, %v7305_v5  ;;  %v7471_v53 = vld [vmem:[#allocation2 + $0x138] sm:$0xff]  ;;  %v7473_v47 = vld [vmem:[#allocation2 + $0x140] sm:$0xff]  ;;  %v7475_v5 = vld [vmem:[#allocation2 + $0x148] sm:$0xff] }
 0x213   : > { %v2824_v54 = vmul.f32 %v2740_v62, %v9872_v51  ;;  %v2825_v23 = vmul.f32 %v2741_v1, %v9870_v6  ;;  %v2826_v36 = vmul.f32 %v2742_v24, %v9871_v43  ;;  %v2827_v37 = vmul.f32 %v2743_v40, %v9872_v51  ;;  %9873 = vst [vmem:[#allocation81_spill] sm:$0xff] %v7475_v5  ;;  %v9879_v51 = vld [vmem:[#allocation22_spill] sm:$0xff] }
 0x214   : > { %v2828_v52 = vadd.f32 %v2822_v45, %v7312_v48  ;;  %v2829_v62 = vadd.f32 %v2823_v0, %v7315_v60  ;;  %v2848_v24 = vrot.slane %v7451_v3, 6  ;;  %v2849_v19 = vrot.slane %v7453_v10, 6 }
 0x215   : > { %v2830_v1 = vadd.f32 %v2824_v54, %v7325_v33  ;;  %v2831_v40 = vadd.f32 %v2825_v23, %v7328_v38  ;;  %v2832_v48 = vadd.f32 %v2826_v36, %v7331_v28  ;;  %v2833_v16 = vadd.f32 %v2827_v37, %v7334_v20  ;;  %v9875_v38 = vld [vmem:[#allocation6_spill] sm:$0xff]  ;;  %v9876_v54 = vld [vmem:[#allocation7_spill] sm:$0xff] }
 0x216   : > { %4602 = vst [vmem:[%s4690_s15 + $0x30] sm:$0xff] %v2828_v52  ;;  %v2850_v45 = vrot.slane %v7465_v27, 6  ;;  %4603 = vst [vmem:[%s4690_s15 + $0x38] sm:$0xff] %v2829_v62  ;;  %v2851_v60 = vrot.slane %v7471_v53, 6  ;;  %v2852_v33 = vrot.slane %v7473_v47, 6  ;;  %v2853_v0 = vrot.slane %v7475_v5, 6 }
 0x217   : > { %4604 = vst [vmem:[%s4690_s15 + $0x40] sm:$0xff] %v2830_v1  ;;  %4605 = vst [vmem:[%s4690_s15 + $0x48] sm:$0x3f] %v2831_v40 }
 0x218   : > { %4606 = vst [vmem:[%s4690_s15 + $0x50] sm:$0x3f] %v2832_v48  ;;  %4607 = vst [vmem:[%s4690_s15 + $0x58] sm:$0x3f] %v2833_v16  ;;  %v2854_v36 = vsel %vm1043_vm0, %v2848_v24, %v2851_v60  ;;  %v2855_v37 = vsel %vm1043_vm0, %v2849_v19, %v2852_v33  ;;  %v2856_v52 = vsel %vm1043_vm0, %v2850_v45, %v2853_v0  ;;  %v9874_v48 = vld [vmem:[#allocation5_spill] sm:$0xff] }
 0x219   : > { %v2857_v62 = vsel %vm1043_vm0, %v2851_v60, %v2848_v24  ;;  %v2858_v1 = vsel %vm1043_vm0, %v2852_v33, %v2849_v19  ;;  %v2859_v40 = vsel %vm1043_vm0, %v2853_v0, %v2850_v45  ;;  %v7515_v28 = vmul.f32 %v2854_v36, %v9874_v48  ;;  %v9877_v60 = vld [vmem:[#allocation20_spill] sm:$0xff]  ;;  %v9878_v33 = vld [vmem:[#allocation21_spill] sm:$0xff] }
 0x21a   : > { %v7512_v16 = vmul.f32 %v2857_v62, %v9874_v48  ;;  %v7518_v23 = vmul.f32 %v2858_v1, %v9875_v38  ;;  %v7521_v20 = vmul.f32 %v2859_v40, %v9876_v54  ;;  %v7524_v24 = vmul.f32 %v2855_v37, %v9875_v38 }
 0x21b   : > { %v7527_v19 = vmul.f32 %v2856_v52, %v9876_v54  ;;  %v2878_v45 = vmul.f32 %v2857_v62, %v9877_v60  ;;  %v2879_v0 = vmul.f32 %v2858_v1, %v9878_v33  ;;  %v2880_v43 = vmul.f32 %v2859_v40, %v9879_v51 }
 0x21c   : > { %v2881_v48 = vmul.f32 %v2854_v36, %v9877_v60  ;;  %v2882_v6 = vmul.f32 %v2855_v37, %v9878_v33  ;;  %v2883_v18 = vmul.f32 %v2856_v52, %v9879_v51  ;;  %v2896_v12 = vmul.f32 %v2857_v62, %v9880_v59  ;;  %v9882_v60 = vld [vmem:[#allocation37_spill] sm:$0xff] }
 0x21d   : > { %v2897_v38 = vmul.f32 %v2858_v1, %v9881_v13  ;;  %v7538_v8 = vadd.f32 %v2878_v45, %v7370_v7  ;;  %v7541_v54 = vadd.f32 %v2879_v0, %v7373_v15  ;;  %v7544_v49 = vadd.f32 %v2880_v43, %v7376_v61  ;;  %v9884_v43 = vld [vmem:[#allocation51_spill] sm:$0xff] }
 0x21e   : > { %v7547_v9 = vadd.f32 %v2881_v48, %v7380_v34  ;;  %v7550_v33 = vadd.f32 %v2882_v6, %v7383_v44  ;;  %v7553_v51 = vadd.f32 %v2883_v18, %v7386_v31  ;;  %v2898_v26 = vmul.f32 %v2859_v40, %v9882_v60  ;;  %v9883_v18 = vld [vmem:[#allocation50_spill] sm:$0xff] }
 0x21f   : > { %v2899_v7 = vmul.f32 %v2854_v36, %v9880_v59  ;;  %v2900_v45 = vmul.f32 %v2855_v37, %v9881_v13  ;;  %v2901_v15 = vmul.f32 %v2856_v52, %v9882_v60  ;;  %v7560_v61 = vadd.f32 %v2896_v12, %v7393_v46  ;;  %v9885_v12 = vld [vmem:[#allocation52_spill] sm:$0xff] }
 0x220   : > { %v7563_v34 = vadd.f32 %v2897_v38, %v7396_v2  ;;  %v7566_v44 = vadd.f32 %v2898_v26, %v7399_v22  ;;  %v2914_v6 = vmul.f32 %v2857_v62, %v9883_v18  ;;  %v2915_v0 = vmul.f32 %v2858_v1, %v9884_v43 }
 0x221   : > { %v7569_v31 = vadd.f32 %v2899_v7, %v7404_v29  ;;  %v7574_v48 = vadd.f32 %v2900_v45, %v7407_v41  ;;  %v7577_v60 = vadd.f32 %v2901_v15, %v7410_v55  ;;  %v2916_v46 = vmul.f32 %v2859_v40, %v9885_v12  ;;  %v9886_v7 = vld [vmem:[#allocation65_spill] sm:$0xff]  ;;  %v9887_v15 = vld [vmem:[#allocation66_spill] sm:$0xff] }
 0x222   : > { %v2917_v2 = vmul.f32 %v2854_v36, %v9883_v18  ;;  %v2918_v26 = vmul.f32 %v2855_v37, %v9884_v43  ;;  %v2919_v22 = vmul.f32 %v2856_v52, %v9885_v12  ;;  %v7584_v29 = vadd.f32 %v2914_v6, %v7417_v25  ;;  %v9888_v25 = vld [vmem:[#allocation67_spill] sm:$0xff] }
 0x223   : > { %v7587_v38 = vadd.f32 %v2915_v0, %v7420_v17  ;;  %v7590_v41 = vadd.f32 %v2916_v46, %v7423_v35  ;;  %v2932_v45 = vmul.f32 %v2857_v62, %v9886_v7  ;;  %v2933_v18 = vmul.f32 %v2858_v1, %v9887_v15 }
 0x224   : > { %v7593_v55 = vadd.f32 %v2917_v2, %v7428_v58  ;;  %v7598_v43 = vadd.f32 %v2918_v26, %v7431_v42  ;;  %v7601_v12 = vadd.f32 %v2919_v22, %v7434_v56  ;;  %v2934_v6 = vmul.f32 %v2859_v40, %v9888_v25 }
 0x225   : > { %v2935_v17 = vmul.f32 %v2854_v36, %v9886_v7  ;;  %v2936_v35 = vmul.f32 %v2855_v37, %v9887_v15  ;;  %v2937_v0 = vmul.f32 %v2856_v52, %v9888_v25  ;;  %v7608_v58 = vadd.f32 %v2932_v45, %v7441_v39  ;;  %v9903_v15 = vld [vmem:[#allocation24_spill] sm:$0xff] }
 0x226   : > { %v7611_v62 = vadd.f32 %v2933_v18, %v7444_v14  ;;  %v7614_v42 = vadd.f32 %v2934_v6, %v7447_v50  ;;  %v2949_v1 = vrot.slane %v7475_v5, 7  ;;  %v9889_v36 = vrot.slane %v7471_v53, 7 }
 0x227   : > { %v7617_v56 = vadd.f32 %v2935_v17, %v7456_v21  ;;  %v9890_v37 = vrot.slane %v7451_v3, 7  ;;  %v7627_v39 = vadd.f32 %v2936_v35, %v7459_v63  ;;  %v7630_v14 = vadd.f32 %v2937_v0, %v7462_v30  ;;  %v9899_v35 = vld [vmem:[#allocation8_spill] sm:$0xff] }
 0x228   : > { %v9891_v50 = vrot.slane %v7473_v47, 7  ;;  %v9892_v21 = vrot.slane %v7453_v10, 7  ;;  %v9894_v46 = vmov %v9889_v36  ;;  %v9895_v63 = vrot.slane %v7465_v27, 7 }
 0x229   : > { %v2950_v52 = vsel %vm1068_vm1, %v9890_v37, %v9889_v36  ;;  %v9893_v18 = vmov %v9890_v37  ;;  %v9900_v36 = vld [vmem:[#allocation9_spill] sm:$0xff] }
 0x22a   : > { %v2951_v40 = vsel %vm1068_vm1, %v9892_v21, %v9891_v50  ;;  %v2953_v2 = vsel %vm1068_vm1, %v9894_v46, %v9893_v18  ;;  %v2952_v30 = vsel %vm1068_vm1, %v9895_v63, %v2949_v1  ;;  %v9896_v26 = vmov %v9892_v21 }
 0x22b   : > { %v9897_v22 = vmov %v9891_v50  ;;  %v9898_v6 = vmov %v9895_v63  ;;  %v2962_v0 = vmul.f32 %v2953_v2, %v9899_v35  ;;  %v9901_v50 = vld [vmem:[#allocation10_spill] sm:$0xff]  ;;  %v2965_v18 = vmul.f32 %v2950_v52, %v9899_v35 }
 0x22c   : > { %v2954_v45 = vsel %vm1068_vm1, %v9897_v22, %v9896_v26  ;;  %v2955_v17 = vsel %vm1068_vm1, %v2949_v1, %v9898_v6  ;;  %v2966_v46 = vmul.f32 %v2951_v40, %v9900_v36  ;;  %v2967_v63 = vmul.f32 %v2952_v30, %v9901_v50  ;;  %v9902_v26 = vld [vmem:[#allocation23_spill] sm:$0xff] }
 0x22d   : > { %v2963_v37 = vmul.f32 %v2954_v45, %v9900_v36  ;;  %v2964_v21 = vmul.f32 %v2955_v17, %v9901_v50  ;;  %v2968_v25 = vadd.f32 %v2962_v0, %v7512_v16  ;;  %v2980_v22 = vmul.f32 %v2953_v2, %v9902_v26 }
 0x22e   : > { %v2981_v7 = vmul.f32 %v2954_v45, %v9903_v15  ;;  %v2971_v13 = vadd.f32 %v2965_v18, %v7515_v28  ;;  %v2972_v59 = vadd.f32 %v2966_v46, %v7524_v24  ;;  %v2973_v35 = vadd.f32 %v2967_v63, %v7527_v19  ;;  %v9907_v63 = vld [vmem:[#allocation40_spill] sm:$0xff] }
 0x22f   : > { %v2969_v1 = vadd.f32 %v2963_v37, %v7518_v23  ;;  %v2970_v6 = vadd.f32 %v2964_v21, %v7521_v20  ;;  %v2982_v36 = vmul.f32 %v2955_v17, %v9904_v11  ;;  %v2983_v50 = vmul.f32 %v2950_v52, %v9902_v26  ;;  %v9905_v37 = vld [vmem:[#allocation38_spill] sm:$0xff]  ;;  %v9906_v21 = vld [vmem:[#allocation39_spill] sm:$0xff] }
 0x230   : > { %v2984_v16 = vmul.f32 %v2951_v40, %v9903_v15  ;;  %v2985_v0 = vmul.f32 %v2952_v30, %v9904_v11  ;;  %v2986_v5 = vadd.f32 %v2980_v22, %v7538_v8  ;;  %v2987_v23 = vadd.f32 %v2981_v7, %v7541_v54 }
 0x231   : > { %v2998_v20 = vmul.f32 %v2953_v2, %v9905_v37  ;;  %v2988_v28 = vadd.f32 %v2982_v36, %v7544_v49  ;;  %v2989_v24 = vadd.f32 %v2983_v50, %v7547_v9  ;;  %v2999_v18 = vmul.f32 %v2954_v45, %v9906_v21  ;;  %v9908_v36 = vld [vmem:[#allocation54_spill] sm:$0xff] }
 0x232   : > { %v2990_v19 = vadd.f32 %v2984_v16, %v7550_v33  ;;  %v2991_v46 = vadd.f32 %v2985_v0, %v7553_v51  ;;  %v3000_v15 = vmul.f32 %v2955_v17, %v9907_v63  ;;  %v3001_v11 = vmul.f32 %v2950_v52, %v9905_v37  ;;  %v9909_v0 = vld [vmem:[#allocation55_spill] sm:$0xff] }
 0x233   : > { %v3002_v8 = vmul.f32 %v2951_v40, %v9906_v21  ;;  %v3003_v54 = vmul.f32 %v2952_v30, %v9907_v63  ;;  %v3004_v7 = vadd.f32 %v2998_v20, %v7560_v61  ;;  %v3005_v49 = vadd.f32 %v2999_v18, %v7563_v34 }
 0x234   : > { %v3016_v9 = vmul.f32 %v2953_v2, %v9812_v4  ;;  %v3006_v33 = vadd.f32 %v3000_v15, %v7566_v44  ;;  %v3007_v22 = vadd.f32 %v3001_v11, %v7569_v31  ;;  %v3017_v50 = vmul.f32 %v2954_v45, %v9908_v36 }
 0x235   : > { %v3008_v51 = vadd.f32 %v3002_v8, %v7574_v48  ;;  %v3009_v16 = vadd.f32 %v3003_v54, %v7577_v60  ;;  %v3018_v21 = vmul.f32 %v2955_v17, %v9909_v0  ;;  %v3019_v63 = vmul.f32 %v2950_v52, %v9812_v4  ;;  %v9910_v8 = vld [vmem:[#allocation70_spill] sm:$0xff] }
 0x236   : > { %v3020_v61 = vmul.f32 %v2951_v40, %v9908_v36  ;;  %v3021_v34 = vmul.f32 %v2952_v30, %v9909_v0  ;;  %v3022_v20 = vadd.f32 %v3016_v9, %v7584_v29  ;;  %v3023_v44 = vadd.f32 %v3017_v50, %v7587_v38  ;;  %v9915_v50 = vld [vmem:[#allocation26_spill] sm:$0xff] }
 0x237   : > { %v3034_v11 = vmul.f32 %v2953_v2, %v9815_v57  ;;  %v3024_v31 = vadd.f32 %v3018_v21, %v7590_v41  ;;  %v3025_v48 = vadd.f32 %v3019_v63, %v7593_v55  ;;  %v3035_v15 = vmul.f32 %v2954_v45, %v9816_v32  ;;  %v9911_v21 = vld [vmem:[#allocation11_spill] sm:$0xff]  ;;  %v9913_v63 = vld [vmem:[#allocation13_spill] sm:$0xff] }
 0x238   : > { %v3026_v60 = vadd.f32 %v3020_v61, %v7598_v43  ;;  %v3027_v18 = vadd.f32 %v3021_v34, %v7601_v12  ;;  %v3036_v54 = vmul.f32 %v2955_v17, %v9910_v8  ;;  %v3037_v0 = vmul.f32 %v2950_v52, %v9815_v57  ;;  %v9912_v17 = vld [vmem:[#allocation12_spill] sm:$0xff] }
 0x239   : > { %v3038_v29 = vmul.f32 %v2951_v40, %v9816_v32  ;;  %v3039_v38 = vmul.f32 %v2952_v30, %v9910_v8  ;;  %v3040_v2 = vadd.f32 %v3034_v11, %v7608_v58  ;;  %v3041_v41 = vadd.f32 %v3035_v15, %v7611_v62  ;;  %v9916_v11 = vld [vmem:[#allocation27_spill] sm:$0xff] }
 0x23a   : > { %v3052_v55 = vmul.f32 %v7451_v3, %v9911_v21  ;;  %v3042_v43 = vadd.f32 %v3036_v54, %v7614_v42  ;;  %v3043_v45 = vadd.f32 %v3037_v0, %v7617_v56  ;;  %v3053_v52 = vmul.f32 %v7453_v10, %v9912_v17  ;;  %v9914_v42 = vld [vmem:[#allocation81_spill] sm:$0xff] }
 0x23b   : > { %v3044_v12 = vadd.f32 %v3038_v29, %v7627_v39  ;;  %v3045_v40 = vadd.f32 %v3039_v38, %v7630_v14  ;;  %v3054_v30 = vmul.f32 %v7465_v27, %v9913_v63  ;;  %v3055_v58 = vmul.f32 %v7471_v53, %v9911_v21  ;;  %v9917_v29 = vld [vmem:[#allocation28_spill] sm:$0xff]  ;;  %v9918_v21 = vld [vmem:[#allocation41_spill] sm:$0xff] }
 0x23c   : > { %v3056_v62 = vmul.f32 %v7473_v47, %v9912_v17  ;;  %v3057_v9 = vmul.f32 %v9914_v42, %v9913_v63  ;;  %v7730_v56 = vadd.f32 %v3052_v55, %v2968_v25  ;;  %v7732_v39 = vadd.f32 %v3053_v52, %v2969_v1  ;;  %v9919_v63 = vld [vmem:[#allocation42_spill] sm:$0xff] }
 0x23d   : > { %v3070_v0 = vmul.f32 %v7451_v3, %v9915_v50  ;;  %v7736_v14 = vadd.f32 %v3054_v30, %v2970_v6  ;;  %v7738_v61 = vadd.f32 %v3055_v58, %v2971_v13  ;;  %v3071_v15 = vmul.f32 %v7453_v10, %v9916_v11 }
 0x23e   : > { %v7740_v34 = vadd.f32 %v3056_v62, %v2972_v59  ;;  %v7744_v54 = vadd.f32 %v3057_v9, %v2973_v35  ;;  %v3072_v25 = vmul.f32 %v7465_v27, %v9917_v29  ;;  %v3073_v1 = vmul.f32 %v7471_v53, %v9915_v50  ;;  %v9920_v62 = vld [vmem:[#allocation43_spill] sm:$0xff] }
 0x23f   : > { %v3074_v38 = vmul.f32 %v7473_v47, %v9916_v11  ;;  %v3075_v13 = vmul.f32 %v9914_v42, %v9917_v29  ;;  %v7754_v6 = vadd.f32 %v3070_v0, %v2986_v5  ;;  %v7756_v59 = vadd.f32 %v3071_v15, %v2987_v23  ;;  %v9921_v0 = vld [vmem:[#allocation56_spill] sm:$0xff] }
 0x240   : > { %v3088_v35 = vmul.f32 %v7451_v3, %v9918_v21  ;;  %v7760_v55 = vadd.f32 %v3072_v25, %v2988_v28  ;;  %v7762_v17 = vadd.f32 %v3073_v1, %v2989_v24  ;;  %v3089_v30 = vmul.f32 %v7453_v10, %v9919_v63 }
 0x241   : > { %v7764_v52 = vadd.f32 %v3074_v38, %v2990_v19  ;;  %v7768_v58 = vadd.f32 %v3075_v13, %v2991_v46  ;;  %v3090_v5 = vmul.f32 %v7465_v27, %v9920_v62  ;;  %v3091_v23 = vmul.f32 %v7471_v53, %v9918_v21  ;;  %v9922_v38 = vld [vmem:[#allocation57_spill] sm:$0xff]  ;;  %v9923_v21 = vld [vmem:[#allocation58_spill] sm:$0xff] }
 0x242   : > { %v3092_v9 = vmul.f32 %v7473_v47, %v9919_v63  ;;  %v3093_v28 = vmul.f32 %v9914_v42, %v9920_v62  ;;  %v7778_v24 = vadd.f32 %v3088_v35, %v3004_v7  ;;  %v7780_v19 = vadd.f32 %v3089_v30, %v3005_v49  ;;  %v9924_v30 = vld [vmem:[#allocation71_spill] sm:$0xff]  ;;  %v9926_v62 = vld [vmem:[#allocation73_spill] sm:$0xff] }
 0x243   : > { %v3106_v46 = vmul.f32 %v7451_v3, %v9921_v0  ;;  %v7784_v15 = vadd.f32 %v3090_v5, %v3006_v33  ;;  %v7786_v25 = vadd.f32 %v3091_v23, %v3007_v22  ;;  %v3107_v13 = vmul.f32 %v7453_v10, %v9922_v38 }
 0x244   : > { %v7788_v1 = vadd.f32 %v3092_v9, %v3008_v51  ;;  %v7792_v63 = vadd.f32 %v3093_v28, %v3009_v16  ;;  %v3108_v7 = vmul.f32 %v7465_v27, %v9923_v21  ;;  %v3109_v49 = vmul.f32 %v7471_v53, %v9921_v0  ;;  %v9925_v28 = vld [vmem:[#allocation72_spill] sm:$0xff] }
 0x245   : > { %v3110_v35 = vmul.f32 %v7473_v47, %v9922_v38  ;;  %v3111_v33 = vmul.f32 %v9914_v42, %v9923_v21  ;;  %v7802_v22 = vadd.f32 %v3106_v46, %v3022_v20  ;;  %v7804_v51 = vadd.f32 %v3107_v13, %v3023_v44  ;;  %v9930_v21 = vld [vmem:[#allocation16_spill] sm:$0xff] }
 0x246   : > { %v3124_v16 = vmul.f32 %v7451_v3, %v9924_v30  ;;  %v7808_v5 = vadd.f32 %v3108_v7, %v3024_v31  ;;  %v7810_v23 = vadd.f32 %v3109_v49, %v3025_v48  ;;  %v3125_v0 = vmul.f32 %v7453_v10, %v9925_v28 }
 0x247   : > { %v7812_v9 = vadd.f32 %v3110_v35, %v3026_v60  ;;  %v7816_v38 = vadd.f32 %v3111_v33, %v3027_v18  ;;  %v3126_v20 = vmul.f32 %v7465_v27, %v9926_v62  ;;  %v3127_v44 = vmul.f32 %v7471_v53, %v9924_v30 }
 0x248   : > { %v3128_v46 = vmul.f32 %v7473_v47, %v9925_v28  ;;  %v3129_v31 = vmul.f32 %v9914_v42, %v9926_v62  ;;  %v7826_v48 = vadd.f32 %v3124_v16, %v3040_v2  ;;  %v7828_v60 = vadd.f32 %v3125_v0, %v3041_v41  ;;  %v9929_v0 = vld [vmem:[#allocation15_spill] sm:$0xff] }
 0x249   : > { %v3136_v13 = vrot.slane %v7451_v3, 1  ;;  %v7831_v18 = vadd.f32 %v3126_v20, %v3042_v43  ;;  %v7833_v7 = vadd.f32 %v3127_v44, %v3043_v45  ;;  %v3137_v35 = vrot.slane %v7453_v10, 1  ;;  %v9928_v43 = vld [vmem:[#allocation14_spill] sm:$0xff] }
 0x24a   : > { %v7835_v49 = vadd.f32 %v3128_v46, %v3044_v12  ;;  %v7838_v33 = vadd.f32 %v3129_v31, %v3045_v40  ;;  %v3138_v28 = vrot.slane %v7465_v27, 1  ;;  %v3139_v62 = vrot.slane %v7471_v53, 1 }
 0x24b   : > { %v3140_v2 = vrot.slane %v7473_v47, 1  ;;  %v3141_v41 = vrot.slane %v9914_v42, 1 }
 0x24c   : > { %v3142_v16 = vsel %vm1117_vm2, %v3136_v13, %v3139_v62  ;;  %v3145_v20 = vsel %vm1117_vm2, %v3139_v62, %v3136_v13 }
 0x24d   : > { %v3143_v40 = vsel %vm1117_vm2, %v3137_v35, %v3140_v2  ;;  %v3146_v44 = vsel %vm1117_vm2, %v3140_v2, %v3137_v35  ;;  %v3144_v46 = vsel %vm1117_vm2, %v3138_v28, %v3141_v41  ;;  %v3147_v31 = vsel %vm1117_vm2, %v3141_v41, %v3138_v28  ;;  %v9931_v2 = vld [vmem:[#allocation29_spill] sm:$0xff]  ;;  %v9932_v41 = vld [vmem:[#allocation30_spill] sm:$0xff] }
 0x24e   : > { %v3154_v45 = vmul.f32 %v3142_v16, %v9928_v43  ;;  %v3155_v30 = vmul.f32 %v3143_v40, %v9929_v0  ;;  %v3156_v29 = vmul.f32 %v3144_v46, %v9930_v21  ;;  %v3157_v11 = vmul.f32 %v3145_v20, %v9928_v43 }
 0x24f   : > { %v3158_v50 = vmul.f32 %v3146_v44, %v9929_v0  ;;  %v3159_v62 = vmul.f32 %v3147_v31, %v9930_v21  ;;  %v3172_v28 = vmul.f32 %v3142_v16, %v9931_v2  ;;  %v3173_v8 = vmul.f32 %v3143_v40, %v9932_v41 }
 0x250   : > { %v7866_v13 = vadd.f32 %v3154_v45, %v7730_v56  ;;  %v7869_v35 = vadd.f32 %v3155_v30, %v7732_v39  ;;  %v7874_v32 = vadd.f32 %v3156_v29, %v7736_v14  ;;  %v7877_v57 = vadd.f32 %v3157_v11, %v7738_v61  ;;  %v9933_v56 = vld [vmem:[#allocation31_spill] sm:$0xff]  ;;  %v9934_v11 = vld [vmem:[#allocation44_spill] sm:$0xff] }
 0x251   : > { %v7880_v0 = vadd.f32 %v3158_v50, %v7740_v34  ;;  %v7883_v21 = vadd.f32 %v3159_v62, %v7744_v54  ;;  %v3174_v43 = vmul.f32 %v3144_v46, %v9933_v56  ;;  %v3175_v39 = vmul.f32 %v3145_v20, %v9931_v2  ;;  %v9935_v34 = vld [vmem:[#allocation45_spill] sm:$0xff] }
 0x252   : > { %v3176_v30 = vmul.f32 %v3146_v44, %v9932_v41  ;;  %v3177_v45 = vmul.f32 %v3147_v31, %v9933_v56  ;;  %v7890_v14 = vadd.f32 %v3172_v28, %v7754_v6  ;;  %v7893_v61 = vadd.f32 %v3173_v8, %v7756_v59  ;;  %v9936_v6 = vld [vmem:[#allocation46_spill] sm:$0xff] }
 0x253   : > { %v3190_v50 = vmul.f32 %v3142_v16, %v9934_v11  ;;  %v3191_v29 = vmul.f32 %v3143_v40, %v9935_v34  ;;  %v7898_v54 = vadd.f32 %v3174_v43, %v7760_v55  ;;  %v7901_v62 = vadd.f32 %v3175_v39, %v7762_v17  ;;  %v9937_v43 = vld [vmem:[#allocation59_spill] sm:$0xff]  ;;  %v9938_v39 = vld [vmem:[#allocation60_spill] sm:$0xff] }
 0x254   : > { %v7904_v41 = vadd.f32 %v3176_v30, %v7764_v52  ;;  %v7907_v56 = vadd.f32 %v3177_v45, %v7768_v58  ;;  %v3192_v28 = vmul.f32 %v3144_v46, %v9936_v6  ;;  %v3193_v8 = vmul.f32 %v3145_v20, %v9934_v11 }
 0x255   : > { %v3194_v59 = vmul.f32 %v3146_v44, %v9935_v34  ;;  %v3195_v2 = vmul.f32 %v3147_v31, %v9936_v6  ;;  %v7914_v55 = vadd.f32 %v3190_v50, %v7778_v24  ;;  %v7917_v17 = vadd.f32 %v3191_v29, %v7780_v19  ;;  %v9939_v24 = vld [vmem:[#allocation61_spill] sm:$0xff] }
 0x256   : > { %v3208_v52 = vmul.f32 %v3142_v16, %v9937_v43  ;;  %v3209_v30 = vmul.f32 %v3143_v40, %v9938_v39  ;;  %v7922_v58 = vadd.f32 %v3192_v28, %v7784_v15  ;;  %v7925_v45 = vadd.f32 %v3193_v8, %v7786_v25  ;;  %v9940_v28 = vld [vmem:[#allocation74_spill] sm:$0xff]  ;;  %v9941_v8 = vld [vmem:[#allocation75_spill] sm:$0xff] }
 0x257   : > { %v7928_v34 = vadd.f32 %v3194_v59, %v7788_v1  ;;  %v7931_v6 = vadd.f32 %v3195_v2, %v7792_v63  ;;  %v3210_v50 = vmul.f32 %v3144_v46, %v9939_v24  ;;  %v3211_v19 = vmul.f32 %v3145_v20, %v9937_v43 }
 0x258   : > { %v3212_v29 = vmul.f32 %v3146_v44, %v9938_v39  ;;  %v3213_v11 = vmul.f32 %v3147_v31, %v9939_v24  ;;  %v7938_v15 = vadd.f32 %v3208_v52, %v7802_v22  ;;  %v7941_v25 = vadd.f32 %v3209_v30, %v7804_v51  ;;  %v9942_v22 = vld [vmem:[#allocation76_spill] sm:$0xff] }
 0x259   : > { %v3226_v1 = vmul.f32 %v3142_v16, %v9940_v28  ;;  %v3227_v59 = vmul.f32 %v3143_v40, %v9941_v8  ;;  %v7946_v63 = vadd.f32 %v3210_v50, %v7808_v5  ;;  %v7949_v2 = vadd.f32 %v3211_v19, %v7810_v23  ;;  %v9948_v50 = vld [vmem:[#allocation18_spill] sm:$0xff] }
 0x25a   : > { %v7952_v39 = vadd.f32 %v3212_v29, %v7812_v9  ;;  %v7955_v24 = vadd.f32 %v3213_v11, %v7816_v38  ;;  %v3228_v52 = vmul.f32 %v3144_v46, %v9942_v22  ;;  %v3229_v51 = vmul.f32 %v3145_v20, %v9940_v28 }
 0x25b   : > { %v3230_v16 = vmul.f32 %v3146_v44, %v9941_v8  ;;  %v3231_v40 = vmul.f32 %v3147_v31, %v9942_v22  ;;  %v7962_v5 = vadd.f32 %v3226_v1, %v7826_v48  ;;  %v7965_v23 = vadd.f32 %v3227_v59, %v7828_v60  ;;  %v9947_v31 = vld [vmem:[#allocation17_spill] sm:$0xff]  ;;  %v9970_v22 = vld [vmem:[#allocation50_spill] sm:$0xff] }
 0x25c   : > { %v3241_v9 = vrot.slane %v7471_v53, 2  ;;  %v3242_v30 = vrot.slane %v7473_v47, 2  ;;  %v7970_v38 = vadd.f32 %v3228_v52, %v7831_v18  ;;  %v7973_v46 = vadd.f32 %v3229_v51, %v7833_v7  ;;  %v9951_v51 = vld [vmem:[#allocation32_spill] sm:$0xff] }
 0x25d   : > { %v7976_v20 = vadd.f32 %v3230_v16, %v7835_v49  ;;  %v7979_v44 = vadd.f32 %v3231_v40, %v7838_v33  ;;  %v3243_v48 = vrot.slane %v9914_v42, 2  ;;  %v9943_v60 = vrot.slane %v7451_v3, 2  ;;  %v9952_v40 = vld [vmem:[#allocation19_spill] sm:$0xff] }
 0x25e   : > { %v9944_v47 = vrot.slane %v7453_v10, 2  ;;  %v9949_v1 = vrot.slane %v7465_v27, 2 }
 0x25f   : > { %v3244_v53 = vsel %vm1148_vm3, %v9943_v60, %v3241_v9  ;;  %v9945_v7 = vmov %v9943_v60 }
 0x260   : > { %v3245_v18 = vsel %vm1148_vm3, %v9944_v47, %v3242_v30  ;;  %v3247_v49 = vsel %vm1148_vm3, %v3241_v9, %v9945_v7  ;;  %v9946_v33 = vmov %v9944_v47  ;;  %v3256_v11 = vmul.f32 %v3244_v53, %v9947_v31 }
 0x261   : > { %v3248_v42 = vsel %vm1148_vm3, %v3242_v30, %v9946_v33  ;;  %v3257_v19 = vmul.f32 %v3245_v18, %v9948_v50  ;;  %v3259_v29 = vmul.f32 %v3247_v49, %v9947_v31  ;;  %v3246_v59 = vsel %vm1148_vm3, %v9949_v1, %v3243_v48  ;;  %v9954_v31 = vld [vmem:[#allocation34_spill] sm:$0xff] }
 0x262   : > { %v9950_v3 = vmov %v9949_v1  ;;  %v3260_v10 = vmul.f32 %v3248_v42, %v9948_v50  ;;  %v3274_v16 = vmul.f32 %v3244_v53, %v9951_v51  ;;  %v3258_v9 = vmul.f32 %v3246_v59, %v9952_v40 }
 0x263   : > { %v3249_v52 = vsel %vm1148_vm3, %v3243_v48, %v9950_v3  ;;  %v8014_v60 = vadd.f32 %v3256_v11, %v7866_v13  ;;  %v8017_v47 = vadd.f32 %v3257_v19, %v7869_v35  ;;  %v8020_v7 = vadd.f32 %v3259_v29, %v7877_v57  ;;  %v9953_v48 = vld [vmem:[#allocation33_spill] sm:$0xff]  ;;  %v9955_v29 = vld [vmem:[#allocation47_spill] sm:$0xff] }
 0x264   : > { %v3261_v30 = vmul.f32 %v3249_v52, %v9952_v40  ;;  %v8023_v27 = vadd.f32 %v3260_v10, %v7880_v0  ;;  %v3275_v33 = vmul.f32 %v3245_v18, %v9953_v48  ;;  %v3276_v50 = vmul.f32 %v3246_v59, %v9954_v31  ;;  %v9956_v40 = vld [vmem:[#allocation48_spill] sm:$0xff] }
 0x265   : > { %v8028_v1 = vadd.f32 %v3258_v9, %v7874_v32  ;;  %v3277_v13 = vmul.f32 %v3247_v49, %v9951_v51  ;;  %v3278_v35 = vmul.f32 %v3248_v42, %v9953_v48  ;;  %v3279_v57 = vmul.f32 %v3249_v52, %v9954_v31  ;;  %v9969_v51 = vld [vmem:[#allocation37_spill] sm:$0xff] }
 0x266   : > { %v8031_v3 = vadd.f32 %v3261_v30, %v7883_v21  ;;  %v8037_v11 = vadd.f32 %v3274_v16, %v7890_v14  ;;  %v8040_v0 = vadd.f32 %v3275_v33, %v7893_v61  ;;  %v8043_v19 = vadd.f32 %v3276_v50, %v7898_v54  ;;  %v9957_v14 = vld [vmem:[#allocation49_spill] sm:$0xff]  ;;  %v9958_v50 = vld [vmem:[#allocation62_spill] sm:$0xff] }
 0x267   : > { %v8046_v32 = vadd.f32 %v3277_v13, %v7901_v62  ;;  %v8049_v21 = vadd.f32 %v3278_v35, %v7904_v41  ;;  %v3292_v10 = vmul.f32 %v3244_v53, %v9955_v29  ;;  %v3293_v9 = vmul.f32 %v3245_v18, %v9956_v40 }
 0x268   : > { %v8054_v30 = vadd.f32 %v3279_v57, %v7907_v56  ;;  %v3294_v16 = vmul.f32 %v3246_v59, %v9957_v14  ;;  %v3295_v61 = vmul.f32 %v3247_v49, %v9955_v29  ;;  %v3296_v54 = vmul.f32 %v3248_v42, %v9956_v40  ;;  %v9959_v40 = vld [vmem:[#allocation63_spill] sm:$0xff] }
 0x269   : > { %v3297_v33 = vmul.f32 %v3249_v52, %v9957_v14  ;;  %v8061_v62 = vadd.f32 %v3292_v10, %v7914_v55  ;;  %v8064_v41 = vadd.f32 %v3293_v9, %v7917_v17  ;;  %v3310_v13 = vmul.f32 %v3244_v53, %v9958_v50  ;;  %v9960_v55 = vld [vmem:[#allocation64_spill] sm:$0xff] }
 0x26a   : > { %v8068_v35 = vadd.f32 %v3294_v16, %v7922_v58  ;;  %v8071_v56 = vadd.f32 %v3295_v61, %v7925_v45  ;;  %v8074_v57 = vadd.f32 %v3296_v54, %v7928_v34  ;;  %v3311_v31 = vmul.f32 %v3245_v18, %v9959_v40  ;;  %v9961_v34 = vld [vmem:[#allocation77_spill] sm:$0xff]  ;;  %v8091_v54 = vld [vmem:[#allocation2 + $0x150] sm:$0xff] }
 0x26b   : > { %v8078_v14 = vadd.f32 %v3297_v33, %v7931_v6  ;;  %v3312_v10 = vmul.f32 %v3246_v59, %v9960_v55  ;;  %v3313_v17 = vmul.f32 %v3247_v49, %v9958_v50  ;;  %v3314_v9 = vmul.f32 %v3248_v42, %v9959_v40 }
 0x26c   : > { %v3315_v58 = vmul.f32 %v3249_v52, %v9960_v55  ;;  %v8085_v16 = vadd.f32 %v3310_v13, %v7938_v15  ;;  %v8088_v45 = vadd.f32 %v3311_v31, %v7941_v25  ;;  %v3328_v61 = vmul.f32 %v3244_v53, %v9961_v34  ;;  %v9962_v55 = vld [vmem:[#allocation78_spill] sm:$0xff]  ;;  %v8103_v15 = vld [vmem:[#allocation2 + $0x158] sm:$0xff]  ;;  %v9963_v31 = vld [vmem:[#allocation79_spill] sm:$0xff] }
 0x26d   : > { %v8094_v6 = vadd.f32 %v3312_v10, %v7946_v63  ;;  %v8097_v33 = vadd.f32 %v3313_v17, %v7949_v2  ;;  %v8100_v40 = vadd.f32 %v3314_v9, %v7952_v39  ;;  %v3329_v50 = vmul.f32 %v3245_v18, %v9962_v55  ;;  %v8111_v2 = vld [vmem:[#allocation2 + $0x160] sm:$0xff]  ;;  %v8113_v10 = vld [vmem:[#allocation2 + $0x168] sm:$0xff]  ;;  %v8115_v39 = vld [vmem:[#allocation2 + $0x170] sm:$0xff] }
 0x26e   : > { %v8106_v25 = vadd.f32 %v3315_v58, %v7955_v24  ;;  %v3330_v53 = vmul.f32 %v3246_v59, %v9963_v31  ;;  %v3331_v13 = vmul.f32 %v3247_v49, %v9961_v34  ;;  %v3332_v63 = vmul.f32 %v3248_v42, %v9962_v55  ;;  %v8120_v17 = vld [vmem:[#allocation2 + $0x178] sm:$0xff]  ;;  %v9968_v34 = vld [vmem:[#allocation36_spill] sm:$0xff] }
 0x26f   : > { %v3333_v18 = vmul.f32 %v3249_v52, %v9963_v31  ;;  %v3334_v24 = vadd.f32 %v3328_v61, %v7962_v5  ;;  %v3335_v59 = vadd.f32 %v3329_v50, %v7965_v23  ;;  %v3354_v49 = vrot.slane %v8091_v54, 6 }
 0x270   : > { %v3336_v42 = vadd.f32 %v3330_v53, %v7970_v38  ;;  %v3337_v9 = vadd.f32 %v3331_v13, %v7973_v46  ;;  %v3338_v58 = vadd.f32 %v3332_v63, %v7976_v20  ;;  %v3355_v55 = vrot.slane %v8103_v15, 6 }
 0x271   : > { %v3339_v52 = vadd.f32 %v3333_v18, %v7979_v44  ;;  %4608 = vst [vmem:[%s4690_s15 + $0x60] sm:$0xff] %v3334_v24  ;;  %4609 = vst [vmem:[%s4690_s15 + $0x68] sm:$0xff] %v3335_v59  ;;  %v3356_v5 = vrot.slane %v8111_v2, 6  ;;  %v3357_v23 = vrot.slane %v8113_v10, 6  ;;  %v3358_v50 = vrot.slane %v8115_v39, 6  ;;  %v9964_v59 = vld [vmem:[#allocation20_spill] sm:$0xff] }
 0x272   : > { %4610 = vst [vmem:[%s4690_s15 + $0x70] sm:$0xff] %v3336_v42  ;;  %4611 = vst [vmem:[%s4690_s15 + $0x78] sm:$0x3f] %v3337_v9  ;;  %v3359_v38 = vrot.slane %v8120_v17, 6  ;;  %v9965_v9 = vld [vmem:[#allocation21_spill] sm:$0xff] }
 0x273   : > { %4612 = vst [vmem:[%s4690_s15 + $0x80] sm:$0x3f] %v3338_v58  ;;  %4613 = vst [vmem:[%s4690_s15 + $0x88] sm:$0x3f] %v3339_v52  ;;  %v3360_v44 = vsel %vm1043_vm0, %v3354_v49, %v3357_v23  ;;  %v3361_v53 = vsel %vm1043_vm0, %v3355_v55, %v3358_v50  ;;  %v3363_v13 = vsel %vm1043_vm0, %v3357_v23, %v3354_v49  ;;  %v9966_v52 = vld [vmem:[#allocation22_spill] sm:$0xff] }
 0x274   : > { %v3364_v63 = vsel %vm1043_vm0, %v3358_v50, %v3355_v55  ;;  %v3362_v18 = vsel %vm1043_vm0, %v3356_v5, %v3359_v38  ;;  %v3365_v24 = vsel %vm1043_vm0, %v3359_v38, %v3356_v5  ;;  %v3372_v42 = vmul.f32 %v3363_v13, %v9964_v59  ;;  %v9967_v50 = vld [vmem:[#allocation35_spill] sm:$0xff] }
 0x275   : > { %v3373_v58 = vmul.f32 %v3364_v63, %v9965_v9  ;;  %v3374_v61 = vmul.f32 %v3365_v24, %v9966_v52  ;;  %v3375_v20 = vmul.f32 %v3360_v44, %v9964_v59  ;;  %v3376_v46 = vmul.f32 %v3361_v53, %v9965_v9 }
 0x276   : > { %v3377_v49 = vmul.f32 %v3362_v18, %v9966_v52  ;;  %v3378_v55 = vadd.f32 %v3372_v42, %v8014_v60  ;;  %v3390_v31 = vmul.f32 %v3363_v13, %v9967_v50  ;;  %v3391_v5 = vmul.f32 %v3364_v63, %v9968_v34 }
 0x277   : > { %v3379_v23 = vadd.f32 %v3373_v58, %v8017_v47  ;;  %v3380_v38 = vadd.f32 %v3374_v61, %v8028_v1  ;;  %v3381_v29 = vadd.f32 %v3375_v20, %v8020_v7  ;;  %v3382_v48 = vadd.f32 %v3376_v46, %v8023_v27  ;;  %v9971_v61 = vld [vmem:[#allocation51_spill] sm:$0xff] }
 0x278   : > { %v3383_v59 = vadd.f32 %v3377_v49, %v8031_v3  ;;  %v3392_v9 = vmul.f32 %v3365_v24, %v9969_v51  ;;  %v3393_v52 = vmul.f32 %v3360_v44, %v9967_v50  ;;  %v3394_v60 = vmul.f32 %v3361_v53, %v9968_v34  ;;  %v9972_v49 = vld [vmem:[#allocation52_spill] sm:$0xff]  ;;  %v9973_v50 = vld [vmem:[#allocation65_spill] sm:$0xff] }
 0x279   : > { %v3395_v47 = vmul.f32 %v3362_v18, %v9969_v51  ;;  %v3396_v42 = vadd.f32 %v3390_v31, %v8037_v11  ;;  %v3397_v58 = vadd.f32 %v3391_v5, %v8040_v0  ;;  %v3408_v1 = vmul.f32 %v3363_v13, %v9970_v22 }
 0x27a   : > { %v3409_v7 = vmul.f32 %v3364_v63, %v9971_v61  ;;  %v3398_v27 = vadd.f32 %v3392_v9, %v8043_v19  ;;  %v3399_v3 = vadd.f32 %v3393_v52, %v8046_v32  ;;  %v3400_v46 = vadd.f32 %v3394_v60, %v8049_v21  ;;  %v9974_v9 = vld [vmem:[#allocation66_spill] sm:$0xff] }
 0x27b   : > { %v3401_v20 = vadd.f32 %v3395_v47, %v8054_v30  ;;  %v3410_v34 = vmul.f32 %v3365_v24, %v9972_v49  ;;  %v3411_v51 = vmul.f32 %v3360_v44, %v9970_v22  ;;  %v3412_v11 = vmul.f32 %v3361_v53, %v9971_v61  ;;  %v9975_v47 = vld [vmem:[#allocation67_spill] sm:$0xff] }
 0x27c   : > { %v3413_v0 = vmul.f32 %v3362_v18, %v9972_v49  ;;  %v3414_v31 = vadd.f32 %v3408_v1, %v8061_v62  ;;  %v3415_v5 = vadd.f32 %v3409_v7, %v8064_v41  ;;  %v3426_v19 = vmul.f32 %v3363_v13, %v9973_v50 }
 0x27d   : > { %v3427_v32 = vmul.f32 %v3364_v63, %v9974_v9  ;;  %v3416_v21 = vadd.f32 %v3410_v34, %v8068_v35  ;;  %v3417_v30 = vadd.f32 %v3411_v51, %v8071_v56  ;;  %v3418_v52 = vadd.f32 %v3412_v11, %v8074_v57 }
 0x27e   : > { %v3419_v60 = vadd.f32 %v3413_v0, %v8078_v14  ;;  %v3428_v61 = vmul.f32 %v3365_v24, %v9975_v47  ;;  %v3429_v49 = vmul.f32 %v3360_v44, %v9973_v50  ;;  %v3430_v62 = vmul.f32 %v3361_v53, %v9974_v9 }
 0x27f   : > { %v3431_v41 = vmul.f32 %v3362_v18, %v9975_v47  ;;  %v3432_v13 = vadd.f32 %v3426_v19, %v8085_v16  ;;  %v3433_v63 = vadd.f32 %v3427_v32, %v8088_v45  ;;  %v3441_v35 = vrot.slane %v8113_v10, 7 }
 0x280   : > { %v3442_v51 = vrot.slane %v8115_v39, 7  ;;  %v3434_v56 = vadd.f32 %v3428_v61, %v8094_v6  ;;  %v3435_v14 = vadd.f32 %v3429_v49, %v8097_v33  ;;  %v3436_v57 = vadd.f32 %v3430_v62, %v8100_v40  ;;  %v9980_v61 = vld [vmem:[#allocation24_spill] sm:$0xff] }
 0x281   : > { %v3437_v34 = vadd.f32 %v3431_v41, %v8106_v25  ;;  %v3443_v44 = vrot.slane %v8120_v17, 7  ;;  %v9976_v53 = vrot.slane %v8091_v54, 7  ;;  %v9977_v45 = vrot.slane %v8103_v15, 7  ;;  %v9983_v41 = vld [vmem:[#allocation25_spill] sm:$0xff] }
 0x282   : > { %v9981_v49 = vrot.slane %v8111_v2, 7 }
 0x283   : > { %v3444_v16 = vsel %vm1068_vm1, %v9976_v53, %v3441_v35  ;;  %v3445_v18 = vsel %vm1068_vm1, %v9977_v45, %v3442_v51  ;;  %v9978_v6 = vmov %v9976_v53  ;;  %v9979_v40 = vmov %v9977_v45 }
 0x284   : > { %v3447_v33 = vsel %vm1068_vm1, %v3441_v35, %v9978_v6  ;;  %v3448_v25 = vsel %vm1068_vm1, %v3442_v51, %v9979_v40  ;;  %v3459_v1 = vmul.f32 %v3444_v16, %v9902_v26  ;;  %v3460_v7 = vmul.f32 %v3445_v18, %v9980_v61  ;;  %v9984_v40 = vld [vmem:[#allocation39_spill] sm:$0xff] }
 0x285   : > { %v3456_v24 = vmul.f32 %v3447_v33, %v9902_v26  ;;  %v3446_v11 = vsel %vm1068_vm1, %v9981_v49, %v3443_v44  ;;  %v9982_v0 = vmov %v9981_v49  ;;  %v3457_v32 = vmul.f32 %v3448_v25, %v9980_v61  ;;  %v9985_v49 = vld [vmem:[#allocation40_spill] sm:$0xff] }
 0x286   : > { %v3449_v19 = vsel %vm1068_vm1, %v3443_v44, %v9982_v0  ;;  %v3474_v62 = vmul.f32 %v3447_v33, %v9905_v37  ;;  %v3461_v26 = vmul.f32 %v3446_v11, %v9983_v41  ;;  %v3465_v53 = vadd.f32 %v3459_v1, %v3381_v29 }
 0x287   : > { %v3458_v35 = vmul.f32 %v3449_v19, %v9983_v41  ;;  %v3462_v51 = vadd.f32 %v3456_v24, %v3378_v55  ;;  %v3463_v45 = vadd.f32 %v3457_v32, %v3379_v23  ;;  %v3466_v6 = vadd.f32 %v3460_v7, %v3382_v48  ;;  %v9986_v24 = vld [vmem:[#allocation55_spill] sm:$0xff] }
 0x288   : > { %v3475_v47 = vmul.f32 %v3448_v25, %v9984_v40  ;;  %v3476_v9 = vmul.f32 %v3449_v19, %v9985_v49  ;;  %v3467_v22 = vadd.f32 %v3461_v26, %v3383_v59  ;;  %v3477_v44 = vmul.f32 %v3444_v16, %v9905_v37  ;;  %v9989_v26 = vld [vmem:[#allocation70_spill] sm:$0xff] }
 0x289   : > { %v3464_v50 = vadd.f32 %v3458_v35, %v3380_v38  ;;  %v3478_v61 = vmul.f32 %v3445_v18, %v9984_v40  ;;  %v3479_v0 = vmul.f32 %v3446_v11, %v9985_v49  ;;  %v3480_v8 = vadd.f32 %v3474_v62, %v3396_v42  ;;  %v9987_v42 = vld [vmem:[#allocation68_spill] sm:$0xff] }
 0x28a   : > { %v3481_v28 = vadd.f32 %v3475_v47, %v3397_v58  ;;  %v3482_v43 = vadd.f32 %v3476_v9, %v3398_v27  ;;  %v3483_v41 = vadd.f32 %v3477_v44, %v3399_v3  ;;  %v3492_v29 = vmul.f32 %v3447_v33, %v9812_v4  ;;  %v9988_v9 = vld [vmem:[#allocation69_spill] sm:$0xff] }
 0x28b   : > { %v3484_v55 = vadd.f32 %v3478_v61, %v3400_v46  ;;  %v3493_v48 = vmul.f32 %v3448_v25, %v9908_v36  ;;  %v3485_v23 = vadd.f32 %v3479_v0, %v3401_v20  ;;  %v3494_v1 = vmul.f32 %v3449_v19, %v9986_v24 }
 0x28c   : > { %v3495_v38 = vmul.f32 %v3444_v16, %v9812_v4  ;;  %v3496_v59 = vmul.f32 %v3445_v18, %v9908_v36  ;;  %v3497_v7 = vmul.f32 %v3446_v11, %v9986_v24  ;;  %v3498_v32 = vadd.f32 %v3492_v29, %v3414_v31  ;;  %v9990_v31 = vld [vmem:[#allocation26_spill] sm:$0xff]  ;;  %v9992_v29 = vld [vmem:[#allocation28_spill] sm:$0xff] }
 0x28d   : > { %v3499_v35 = vadd.f32 %v3493_v48, %v3415_v5  ;;  %v3510_v58 = vmul.f32 %v3447_v33, %v9987_v42  ;;  %v3500_v27 = vadd.f32 %v3494_v1, %v3416_v21  ;;  %v3511_v47 = vmul.f32 %v3448_v25, %v9988_v9  ;;  %v9994_v1 = vld [vmem:[#allocation42_spill] sm:$0xff] }
 0x28e   : > { %v3501_v3 = vadd.f32 %v3495_v38, %v3417_v30  ;;  %v3502_v46 = vadd.f32 %v3496_v59, %v3418_v52  ;;  %v3503_v62 = vadd.f32 %v3497_v7, %v3419_v60  ;;  %v3512_v20 = vmul.f32 %v3449_v19, %v9989_v26  ;;  %v9991_v52 = vld [vmem:[#allocation27_spill] sm:$0xff] }
 0x28f   : > { %v3513_v44 = vmul.f32 %v3444_v16, %v9987_v42  ;;  %v3514_v61 = vmul.f32 %v3445_v18, %v9988_v9  ;;  %v3515_v0 = vmul.f32 %v3446_v11, %v9989_v26  ;;  %v3516_v36 = vadd.f32 %v3510_v58, %v3432_v13  ;;  %v9995_v7 = vld [vmem:[#allocation43_spill] sm:$0xff] }
 0x290   : > { %v3517_v24 = vadd.f32 %v3511_v47, %v3433_v63  ;;  %v3528_v5 = vmul.f32 %v8091_v54, %v9990_v31  ;;  %v3518_v33 = vadd.f32 %v3512_v20, %v3434_v56  ;;  %v3529_v25 = vmul.f32 %v8103_v15, %v9991_v52  ;;  %v9996_v47 = vld [vmem:[#allocation56_spill] sm:$0xff] }
 0x291   : > { %v3519_v21 = vadd.f32 %v3513_v44, %v3435_v14  ;;  %v3520_v30 = vadd.f32 %v3514_v61, %v3436_v57  ;;  %v3521_v60 = vadd.f32 %v3515_v0, %v3437_v34  ;;  %v3530_v19 = vmul.f32 %v8111_v2, %v9992_v29  ;;  %v9993_v14 = vld [vmem:[#allocation41_spill] sm:$0xff] }
 0x292   : > { %v3531_v16 = vmul.f32 %v8113_v10, %v9990_v31  ;;  %v3532_v13 = vmul.f32 %v8115_v39, %v9991_v52  ;;  %v3533_v63 = vmul.f32 %v8120_v17, %v9992_v29  ;;  %v8264_v18 = vadd.f32 %v3528_v5, %v3462_v51  ;;  %v9997_v0 = vld [vmem:[#allocation57_spill] sm:$0xff]  ;;  %v9998_v52 = vld [vmem:[#allocation58_spill] sm:$0xff]  ;;  %v9999_v29 = vld [vmem:[#allocation71_spill] sm:$0xff] }
 0x293   : > { %v8266_v56 = vadd.f32 %v3529_v25, %v3463_v45  ;;  %v3546_v57 = vmul.f32 %v8091_v54, %v9993_v14  ;;  %v8270_v34 = vadd.f32 %v3530_v19, %v3464_v50  ;;  %v3547_v38 = vmul.f32 %v8103_v15, %v9994_v1 }
 0x294   : > { %v8272_v11 = vadd.f32 %v3531_v16, %v3465_v53  ;;  %v8274_v48 = vadd.f32 %v3532_v13, %v3466_v6  ;;  %v8278_v59 = vadd.f32 %v3533_v63, %v3467_v22  ;;  %v3548_v51 = vmul.f32 %v8111_v2, %v9995_v7  ;;  %v10000_v63 = vld [vmem:[#allocation72_spill] sm:$0xff] }
 0x295   : > { %v3549_v45 = vmul.f32 %v8113_v10, %v9993_v14  ;;  %v3550_v58 = vmul.f32 %v8115_v39, %v9994_v1  ;;  %v3551_v50 = vmul.f32 %v8120_v17, %v9995_v7  ;;  %v8288_v53 = vadd.f32 %v3546_v57, %v3480_v8  ;;  %v10007_v1 = vld [vmem:[#allocation46_spill] sm:$0xff]  ;;  %v10008_v14 = vld [vmem:[#allocation59_spill] sm:$0xff] }
 0x296   : > { %v8290_v6 = vadd.f32 %v3547_v38, %v3481_v28  ;;  %v3564_v22 = vmul.f32 %v8091_v54, %v9996_v47  ;;  %v8294_v20 = vadd.f32 %v3548_v51, %v3482_v43  ;;  %v3565_v31 = vmul.f32 %v8103_v15, %v9997_v0  ;;  %v10001_v51 = vld [vmem:[#allocation73_spill] sm:$0xff] }
 0x297   : > { %v8296_v44 = vadd.f32 %v3549_v45, %v3483_v41  ;;  %v8298_v61 = vadd.f32 %v3550_v58, %v3484_v55  ;;  %v8302_v5 = vadd.f32 %v3551_v50, %v3485_v23  ;;  %v3566_v8 = vmul.f32 %v8111_v2, %v9998_v52 }
 0x298   : > { %v3567_v28 = vmul.f32 %v8113_v10, %v9996_v47  ;;  %v3568_v25 = vmul.f32 %v8115_v39, %v9997_v0  ;;  %v3569_v43 = vmul.f32 %v8120_v17, %v9998_v52  ;;  %v8312_v41 = vadd.f32 %v3564_v22, %v3498_v32  ;;  %v10006_v0 = vld [vmem:[#allocation45_spill] sm:$0xff] }
 0x299   : > { %v8314_v55 = vadd.f32 %v3565_v31, %v3499_v35  ;;  %v3582_v23 = vmul.f32 %v8091_v54, %v9999_v29  ;;  %v8318_v19 = vadd.f32 %v3566_v8, %v3500_v27  ;;  %v3583_v57 = vmul.f32 %v8103_v15, %v10000_v63 }
 0x29a   : > { %v8320_v16 = vadd.f32 %v3567_v28, %v3501_v3  ;;  %v8322_v13 = vadd.f32 %v3568_v25, %v3502_v46  ;;  %v8326_v38 = vadd.f32 %v3569_v43, %v3503_v62  ;;  %v3584_v32 = vmul.f32 %v8111_v2, %v10001_v51  ;;  %v10004_v43 = vld [vmem:[#allocation31_spill] sm:$0xff] }
 0x29b   : > { %v3585_v35 = vmul.f32 %v8113_v10, %v9999_v29  ;;  %v3586_v45 = vmul.f32 %v8115_v39, %v10000_v63  ;;  %v3587_v27 = vmul.f32 %v8120_v17, %v10001_v51  ;;  %v8336_v3 = vadd.f32 %v3582_v23, %v3516_v36 }
 0x29c   : > { %v8338_v46 = vadd.f32 %v3583_v57, %v3517_v24  ;;  %v3594_v58 = vrot.slane %v8091_v54, 1  ;;  %v8341_v62 = vadd.f32 %v3584_v32, %v3518_v33  ;;  %v3595_v31 = vrot.slane %v8103_v15, 1 }
 0x29d   : > { %v8343_v50 = vadd.f32 %v3585_v35, %v3519_v21  ;;  %v8345_v22 = vadd.f32 %v3586_v45, %v3520_v30  ;;  %v8348_v8 = vadd.f32 %v3587_v27, %v3521_v60  ;;  %v3596_v28 = vrot.slane %v8111_v2, 1  ;;  %v10002_v45 = vld [vmem:[#allocation29_spill] sm:$0xff]  ;;  %v10003_v21 = vld [vmem:[#allocation30_spill] sm:$0xff] }
 0x29e   : > { %v3597_v25 = vrot.slane %v8113_v10, 1  ;;  %v3598_v36 = vrot.slane %v8115_v39, 1  ;;  %v3599_v24 = vrot.slane %v8120_v17, 1 }
 0x2a0   : > { %v3600_v30 = vsel %vm1117_vm2, %v3594_v58, %v3597_v25  ;;  %v3601_v60 = vsel %vm1117_vm2, %v3595_v31, %v3598_v36  ;;  %v3603_v23 = vsel %vm1117_vm2, %v3597_v25, %v3594_v58  ;;  %v3604_v57 = vsel %vm1117_vm2, %v3598_v36, %v3595_v31  ;;  %v10005_v36 = vld [vmem:[#allocation44_spill] sm:$0xff] }
 0x2a1   : > { %v3602_v32 = vsel %vm1117_vm2, %v3596_v28, %v3599_v24  ;;  %v3605_v35 = vsel %vm1117_vm2, %v3599_v24, %v3596_v28  ;;  %v3612_v27 = vmul.f32 %v3600_v30, %v10002_v45  ;;  %v3613_v33 = vmul.f32 %v3601_v60, %v10003_v21 }
 0x2a2   : > { %v3614_v51 = vmul.f32 %v3602_v32, %v10004_v43  ;;  %v3615_v63 = vmul.f32 %v3603_v23, %v10002_v45  ;;  %v3616_v29 = vmul.f32 %v3604_v57, %v10003_v21  ;;  %v3617_v58 = vmul.f32 %v3605_v35, %v10004_v43 }
 0x2a3   : > { %v3618_v31 = vadd.f32 %v3612_v27, %v8264_v18  ;;  %v3619_v25 = vadd.f32 %v3613_v33, %v8266_v56  ;;  %v3630_v52 = vmul.f32 %v3600_v30, %v10005_v36  ;;  %v3631_v28 = vmul.f32 %v3601_v60, %v10006_v0 }
 0x2a4   : > { %v3620_v24 = vadd.f32 %v3614_v51, %v8270_v34  ;;  %v3621_v47 = vadd.f32 %v3615_v63, %v8272_v11  ;;  %v3622_v7 = vadd.f32 %v3616_v29, %v8274_v48  ;;  %v3623_v45 = vadd.f32 %v3617_v58, %v8278_v59  ;;  %v10009_v51 = vld [vmem:[#allocation60_spill] sm:$0xff]  ;;  %v10010_v58 = vld [vmem:[#allocation61_spill] sm:$0xff] }
 0x2a5   : > { %v3632_v21 = vmul.f32 %v3602_v32, %v10007_v1  ;;  %v3633_v43 = vmul.f32 %v3603_v23, %v10005_v36  ;;  %v3634_v18 = vmul.f32 %v3604_v57, %v10006_v0  ;;  %v3635_v56 = vmul.f32 %v3605_v35, %v10007_v1  ;;  %v10011_v36 = vld [vmem:[#allocation74_spill] sm:$0xff] }
 0x2a6   : > { %v3636_v33 = vadd.f32 %v3630_v52, %v8288_v53  ;;  %v3637_v27 = vadd.f32 %v3631_v28, %v8290_v6  ;;  %v3648_v34 = vmul.f32 %v3600_v30, %v10008_v14  ;;  %v3649_v11 = vmul.f32 %v3601_v60, %v10009_v51 }
 0x2a7   : > { %v3638_v48 = vadd.f32 %v3632_v21, %v8294_v20  ;;  %v3639_v59 = vadd.f32 %v3633_v43, %v8296_v44  ;;  %v3640_v29 = vadd.f32 %v3634_v18, %v8298_v61  ;;  %v3641_v63 = vadd.f32 %v3635_v56, %v8302_v5  ;;  %v10012_v21 = vld [vmem:[#allocation75_spill] sm:$0xff]  ;;  %v10013_v56 = vld [vmem:[#allocation76_spill] sm:$0xff] }
 0x2a8   : > { %v3650_v0 = vmul.f32 %v3602_v32, %v10010_v58  ;;  %v3651_v1 = vmul.f32 %v3603_v23, %v10008_v14  ;;  %v3652_v53 = vmul.f32 %v3604_v57, %v10009_v51  ;;  %v3653_v6 = vmul.f32 %v3605_v35, %v10010_v58 }
 0x2a9   : > { %v3654_v52 = vadd.f32 %v3648_v34, %v8312_v41  ;;  %v3655_v28 = vadd.f32 %v3649_v11, %v8314_v55  ;;  %v3666_v20 = vmul.f32 %v3600_v30, %v10011_v36  ;;  %v3667_v44 = vmul.f32 %v3601_v60, %v10012_v21 }
 0x2aa   : > { %v3656_v61 = vadd.f32 %v3650_v0, %v8318_v19  ;;  %v3657_v5 = vadd.f32 %v3651_v1, %v8320_v16  ;;  %v3658_v43 = vadd.f32 %v3652_v53, %v8322_v13  ;;  %v3659_v18 = vadd.f32 %v3653_v6, %v8326_v38  ;;  %v10022_v53 = vld [vmem:[#allocation47_spill] sm:$0xff] }
 0x2ab   : > { %v3668_v51 = vmul.f32 %v3602_v32, %v10013_v56  ;;  %v3669_v58 = vmul.f32 %v3603_v23, %v10011_v36  ;;  %v3670_v41 = vmul.f32 %v3604_v57, %v10012_v21  ;;  %v3671_v55 = vmul.f32 %v3605_v35, %v10013_v56  ;;  %v10019_v32 = vld [vmem:[#allocation33_spill] sm:$0xff] }
 0x2ac   : > { %v3672_v30 = vadd.f32 %v3666_v20, %v8336_v3  ;;  %v3673_v60 = vadd.f32 %v3667_v44, %v8338_v46  ;;  %v3681_v0 = vrot.slane %v8113_v10, 2  ;;  %v3682_v1 = vrot.slane %v8115_v39, 2  ;;  %v10023_v20 = vld [vmem:[#allocation34_spill] sm:$0xff]  ;;  %v10038_v56 = vld [vmem:[#allocation65_spill] sm:$0xff] }
 0x2ad   : > { %v3674_v19 = vadd.f32 %v3668_v51, %v8341_v62  ;;  %v3675_v16 = vadd.f32 %v3669_v58, %v8343_v50  ;;  %v3676_v13 = vadd.f32 %v3670_v41, %v8345_v22  ;;  %v8419_v38 = vadd.f32 %v3671_v55, %v8348_v8  ;;  %v10018_v22 = vld [vmem:[#allocation32_spill] sm:$0xff] }
 0x2ae   : > { %v3683_v23 = vrot.slane %v8120_v17, 2  ;;  %v10014_v57 = vrot.slane %v8091_v54, 2  ;;  %v10015_v10 = vrot.slane %v8103_v15, 2  ;;  %v10020_v51 = vrot.slane %v8111_v2, 2  ;;  %v10024_v2 = vld [vmem:[#allocation48_spill] sm:$0xff] }
 0x2b0   : > { %v3684_v3 = vsel %vm1148_vm3, %v10014_v57, %v3681_v0  ;;  %v3685_v39 = vsel %vm1148_vm3, %v10015_v10, %v3682_v1  ;;  %v10016_v46 = vmov %v10014_v57  ;;  %v10017_v50 = vmov %v10015_v10 }
 0x2b1   : > { %v3687_v62 = vsel %vm1148_vm3, %v3681_v0, %v10016_v46  ;;  %v3688_v17 = vsel %vm1148_vm3, %v3682_v1, %v10017_v50  ;;  %v3696_v8 = vmul.f32 %v3684_v3, %v10018_v22  ;;  %v3697_v35 = vmul.f32 %v3685_v39, %v10019_v32  ;;  %v10025_v46 = vld [vmem:[#allocation49_spill] sm:$0xff] }
 0x2b2   : > { %v3699_v34 = vmul.f32 %v3687_v62, %v10018_v22  ;;  %v3686_v11 = vsel %vm1148_vm3, %v10020_v51, %v3683_v23  ;;  %v10021_v54 = vmov %v10020_v51  ;;  %v3700_v15 = vmul.f32 %v3688_v17, %v10019_v32 }
 0x2b3   : > { %v3689_v58 = vsel %vm1148_vm3, %v3683_v23, %v10021_v54  ;;  %v3714_v6 = vmul.f32 %v3684_v3, %v10022_v53  ;;  %v3698_v44 = vmul.f32 %v3686_v11, %v10023_v20  ;;  %v8453_v55 = vadd.f32 %v3696_v8, %v3618_v31 }
 0x2b4   : > { %v3701_v41 = vmul.f32 %v3689_v58, %v10023_v20  ;;  %v8455_v0 = vadd.f32 %v3697_v35, %v3619_v25  ;;  %v8457_v1 = vadd.f32 %v3699_v34, %v3621_v47  ;;  %v8459_v57 = vadd.f32 %v3700_v15, %v3622_v7  ;;  %v10028_v20 = vld [vmem:[#allocation64_spill] sm:$0xff] }
 0x2b5   : > { %v3715_v10 = vmul.f32 %v3685_v39, %v10024_v2  ;;  %v3716_v23 = vmul.f32 %v3686_v11, %v10025_v46  ;;  %v8463_v50 = vadd.f32 %v3698_v44, %v3620_v24  ;;  %v3717_v32 = vmul.f32 %v3687_v62, %v10022_v53  ;;  %v10026_v24 = vld [vmem:[#allocation62_spill] sm:$0xff]  ;;  %v10037_v53 = vld [vmem:[#allocation52_spill] sm:$0xff] }
 0x2b6   : > { %v8465_v22 = vadd.f32 %v3701_v41, %v3623_v45  ;;  %v3718_v51 = vmul.f32 %v3688_v17, %v10024_v2  ;;  %v3719_v31 = vmul.f32 %v3689_v58, %v10025_v46  ;;  %v8470_v25 = vadd.f32 %v3714_v6, %v3636_v33  ;;  %v10027_v45 = vld [vmem:[#allocation63_spill] sm:$0xff] }
 0x2b7   : > { %v8472_v47 = vadd.f32 %v3715_v10, %v3637_v27  ;;  %v8474_v7 = vadd.f32 %v3716_v23, %v3638_v48  ;;  %v8476_v8 = vadd.f32 %v3717_v32, %v3639_v59  ;;  %v3732_v34 = vmul.f32 %v3684_v3, %v10026_v24  ;;  %v8493_v10 = vld [vmem:[#allocation2 + $0x180] sm:$0xff]  ;;  %v8502_v46 = vld [vmem:[#allocation2 + $0x188] sm:$0xff] }
 0x2b8   : > { %v8478_v35 = vadd.f32 %v3718_v51, %v3640_v29  ;;  %v3733_v54 = vmul.f32 %v3685_v39, %v10027_v45  ;;  %v8482_v15 = vadd.f32 %v3719_v31, %v3641_v63  ;;  %v3734_v44 = vmul.f32 %v3686_v11, %v10028_v20  ;;  %v10029_v29 = vld [vmem:[#allocation77_spill] sm:$0xff]  ;;  %v10030_v51 = vld [vmem:[#allocation78_spill] sm:$0xff] }
 0x2b9   : > { %v3735_v41 = vmul.f32 %v3687_v62, %v10026_v24  ;;  %v3736_v33 = vmul.f32 %v3688_v17, %v10027_v45  ;;  %v3737_v27 = vmul.f32 %v3689_v58, %v10028_v20  ;;  %v8488_v48 = vadd.f32 %v3732_v34, %v3654_v52  ;;  %v10031_v52 = vld [vmem:[#allocation79_spill] sm:$0xff] }
 0x2ba   : > { %v8490_v59 = vadd.f32 %v3733_v54, %v3655_v28  ;;  %v3750_v6 = vmul.f32 %v3684_v3, %v10029_v29  ;;  %v8495_v23 = vadd.f32 %v3734_v44, %v3656_v61  ;;  %v3751_v31 = vmul.f32 %v3685_v39, %v10030_v51  ;;  %v8509_v61 = vld [vmem:[#allocation2 + $0x190] sm:$0xff]  ;;  %v10036_v20 = vld [vmem:[#allocation51_spill] sm:$0xff] }
 0x2bb   : > { %v8497_v63 = vadd.f32 %v3735_v41, %v3657_v5  ;;  %v8499_v32 = vadd.f32 %v3736_v33, %v3658_v43  ;;  %v8504_v45 = vadd.f32 %v3737_v27, %v3659_v18  ;;  %v3752_v34 = vmul.f32 %v3686_v11, %v10031_v52  ;;  %v8511_v5 = vld [vmem:[#allocation2 + $0x198] sm:$0xff]  ;;  %v8513_v43 = vld [vmem:[#allocation2 + $0x1a0] sm:$0xff]  ;;  %v8516_v11 = vld [vmem:[#allocation2 + $0x1a8] sm:$0xff] }
 0x2bc   : > { %v3753_v28 = vmul.f32 %v3687_v62, %v10029_v29  ;;  %v3754_v3 = vmul.f32 %v3688_v17, %v10030_v51  ;;  %v3755_v39 = vmul.f32 %v3689_v58, %v10031_v52  ;;  %v3756_v18 = vadd.f32 %v3750_v6, %v3672_v30 }
 0x2bd   : > { %v3757_v54 = vadd.f32 %v3751_v31, %v3673_v60  ;;  %v3776_v62 = vrot.slane %v8493_v10, 6  ;;  %v3758_v44 = vadd.f32 %v3752_v34, %v3674_v19  ;;  %v3777_v33 = vrot.slane %v8502_v46, 6 }
 0x2be   : > { %v3759_v41 = vadd.f32 %v3753_v28, %v3675_v16  ;;  %v3760_v17 = vadd.f32 %v3754_v3, %v3676_v13  ;;  %v3761_v27 = vadd.f32 %v3755_v39, %v8419_v38  ;;  %4614 = vst [vmem:[%s4690_s15 + $0x90] sm:$0xff] %v3756_v18  ;;  %v3778_v58 = vrot.slane %v8509_v61, 6  ;;  %v10032_v18 = vld [vmem:[#allocation35_spill] sm:$0xff] }
 0x2bf   : > { %4615 = vst [vmem:[%s4690_s15 + $0x98] sm:$0xff] %v3757_v54  ;;  %v3779_v30 = vrot.slane %v8511_v5, 6  ;;  %v3780_v60 = vrot.slane %v8513_v43, 6  ;;  %4616 = vst [vmem:[%s4690_s15 + $0xa0] sm:$0xff] %v3758_v44  ;;  %v3781_v19 = vrot.slane %v8516_v11, 6  ;;  %v3842_v16 = vrot.slane %v8493_v10, 7 }
 0x2c0   : > { %4617 = vst [vmem:[%s4690_s15 + $0xa8] sm:$0x3f] %v3759_v41  ;;  %4618 = vst [vmem:[%s4690_s15 + $0xb0] sm:$0x3f] %v3760_v17  ;;  %v3843_v13 = vrot.slane %v8502_v46, 7  ;;  %v3844_v6 = vrot.slane %v8509_v61, 7 }
 0x2c1   : > { %4619 = vst [vmem:[%s4690_s15 + $0xb8] sm:$0x3f] %v3761_v27  ;;  %v3782_v38 = vsel %vm1043_vm0, %v3776_v62, %v3779_v30  ;;  %v3783_v31 = vsel %vm1043_vm0, %v3777_v33, %v3780_v60  ;;  %v3785_v34 = vsel %vm1043_vm0, %v3779_v30, %v3776_v62  ;;  %v3786_v28 = vsel %vm1043_vm0, %v3780_v60, %v3777_v33  ;;  %v10033_v44 = vld [vmem:[#allocation36_spill] sm:$0xff]  ;;  %v10034_v17 = vld [vmem:[#allocation37_spill] sm:$0xff]  ;;  %v10035_v60 = vld [vmem:[#allocation50_spill] sm:$0xff] }
 0x2c2   : > { %v3784_v3 = vsel %vm1043_vm0, %v3778_v58, %v3781_v19  ;;  %v3787_v39 = vsel %vm1043_vm0, %v3781_v19, %v3778_v58  ;;  %v3794_v54 = vmul.f32 %v3785_v34, %v10032_v18  ;;  %v3795_v41 = vmul.f32 %v3786_v28, %v10033_v44 }
 0x2c3   : > { %v3796_v27 = vmul.f32 %v3787_v39, %v10034_v17  ;;  %v3797_v52 = vmul.f32 %v3782_v38, %v10032_v18  ;;  %v3798_v51 = vmul.f32 %v3783_v31, %v10033_v44  ;;  %v3799_v62 = vmul.f32 %v3784_v3, %v10034_v17 }
 0x2c4   : > { %v3800_v33 = vadd.f32 %v3794_v54, %v8453_v55  ;;  %v3801_v30 = vadd.f32 %v3795_v41, %v8455_v0  ;;  %v3812_v29 = vmul.f32 %v3785_v34, %v10035_v60  ;;  %v3813_v58 = vmul.f32 %v3786_v28, %v10036_v20 }
 0x2c5   : > { %v3802_v19 = vadd.f32 %v3796_v27, %v8463_v50  ;;  %v3803_v24 = vadd.f32 %v3797_v52, %v8457_v1  ;;  %v3804_v2 = vadd.f32 %v3798_v51, %v8459_v57  ;;  %v3805_v18 = vadd.f32 %v3799_v62, %v8465_v22  ;;  %v10039_v27 = vld [vmem:[#allocation66_spill] sm:$0xff]  ;;  %v10040_v62 = vld [vmem:[#allocation67_spill] sm:$0xff] }
 0x2c6   : > { %v3814_v44 = vmul.f32 %v3787_v39, %v10037_v53  ;;  %v3815_v17 = vmul.f32 %v3782_v38, %v10035_v60  ;;  %v3816_v55 = vmul.f32 %v3783_v31, %v10036_v20  ;;  %v3817_v0 = vmul.f32 %v3784_v3, %v10037_v53 }
 0x2c7   : > { %v3818_v54 = vadd.f32 %v3812_v29, %v8470_v25  ;;  %v3819_v41 = vadd.f32 %v3813_v58, %v8472_v47  ;;  %v3830_v50 = vmul.f32 %v3785_v34, %v10038_v56  ;;  %v3831_v1 = vmul.f32 %v3786_v28, %v10039_v27 }
 0x2c8   : > { %v3820_v57 = vadd.f32 %v3814_v44, %v8474_v7  ;;  %v3821_v22 = vadd.f32 %v3815_v17, %v8476_v8  ;;  %v3822_v51 = vadd.f32 %v3816_v55, %v8478_v35  ;;  %v3823_v52 = vadd.f32 %v3817_v0, %v8482_v15  ;;  %v10041_v0 = vld [vmem:[#allocation54_spill] sm:$0xff] }
 0x2c9   : > { %v3832_v20 = vmul.f32 %v3787_v39, %v10040_v62  ;;  %v3833_v53 = vmul.f32 %v3782_v38, %v10038_v56  ;;  %v3834_v25 = vmul.f32 %v3783_v31, %v10039_v27  ;;  %v3835_v47 = vmul.f32 %v3784_v3, %v10040_v62 }
 0x2ca   : > { %v3836_v29 = vadd.f32 %v3830_v50, %v8488_v48  ;;  %v3837_v34 = vadd.f32 %v3831_v1, %v8490_v59  ;;  %v3845_v7 = vrot.slane %v8511_v5, 7  ;;  %v3846_v8 = vrot.slane %v8513_v43, 7  ;;  %v10042_v1 = vld [vmem:[#allocation55_spill] sm:$0xff] }
 0x2cb   : > { %v3838_v35 = vadd.f32 %v3832_v20, %v8495_v23  ;;  %v3839_v15 = vadd.f32 %v3833_v53, %v8497_v63  ;;  %v3840_v28 = vadd.f32 %v3834_v25, %v8499_v32  ;;  %v3841_v38 = vadd.f32 %v3835_v47, %v8504_v45 }
 0x2cc   : > { %v3847_v31 = vrot.slane %v8516_v11, 7  ;;  %v3848_v3 = vsel %vm1068_vm1, %v3842_v16, %v3845_v7  ;;  %v3849_v48 = vsel %vm1068_vm1, %v3843_v13, %v3846_v8  ;;  %v3851_v59 = vsel %vm1068_vm1, %v3845_v7, %v3842_v16 }
 0x2cd   : > { %v3852_v20 = vsel %vm1068_vm1, %v3846_v8, %v3843_v13  ;;  %v3860_v53 = vmul.f32 %v3851_v59, %v9905_v37  ;;  %v3863_v23 = vmul.f32 %v3848_v3, %v9905_v37  ;;  %v3864_v45 = vmul.f32 %v3849_v48, %v9984_v40 }
 0x2ce   : > { %v3850_v63 = vsel %vm1068_vm1, %v3844_v6, %v3847_v31  ;;  %v3853_v32 = vsel %vm1068_vm1, %v3847_v31, %v3844_v6  ;;  %v3861_v39 = vmul.f32 %v3852_v20, %v9984_v40  ;;  %v3878_v58 = vmul.f32 %v3851_v59, %v9812_v4 }
 0x2cf   : > { %v3862_v16 = vmul.f32 %v3853_v32, %v9985_v49  ;;  %v3865_v13 = vmul.f32 %v3850_v63, %v9985_v49  ;;  %v3866_v44 = vadd.f32 %v3860_v53, %v3800_v33  ;;  %v3869_v17 = vadd.f32 %v3863_v23, %v3803_v24 }
 0x2d0   : > { %v3867_v55 = vadd.f32 %v3861_v39, %v3801_v30  ;;  %v3870_v37 = vadd.f32 %v3864_v45, %v3804_v2  ;;  %v3879_v50 = vmul.f32 %v3852_v20, %v10041_v0  ;;  %v3880_v25 = vmul.f32 %v3853_v32, %v10042_v1 }
 0x2d1   : > { %v3868_v47 = vadd.f32 %v3862_v16, %v3802_v19  ;;  %v3871_v7 = vadd.f32 %v3865_v13, %v3805_v18  ;;  %v3881_v6 = vmul.f32 %v3848_v3, %v9812_v4  ;;  %v3882_v40 = vmul.f32 %v3849_v48, %v10041_v0  ;;  %v10047_v13 = vld [vmem:[#allocation57_spill] sm:$0xff] }
 0x2d2   : > { %v3883_v8 = vmul.f32 %v3850_v63, %v10042_v1  ;;  %v3884_v31 = vadd.f32 %v3878_v58, %v3818_v54  ;;  %v3885_v62 = vadd.f32 %v3879_v50, %v3819_v41  ;;  %v3886_v27 = vadd.f32 %v3880_v25, %v3820_v57  ;;  %v10043_v54 = vld [vmem:[#allocation41_spill] sm:$0xff]  ;;  %v10045_v58 = vld [vmem:[#allocation43_spill] sm:$0xff] }
 0x2d3   : > { %v3887_v49 = vadd.f32 %v3881_v6, %v3821_v22  ;;  %v3888_v33 = vadd.f32 %v3882_v40, %v3822_v51  ;;  %v3896_v24 = vmul.f32 %v3851_v59, %v9987_v42  ;;  %v3897_v2 = vmul.f32 %v3852_v20, %v9988_v9  ;;  %v10044_v59 = vld [vmem:[#allocation42_spill] sm:$0xff] }
 0x2d4   : > { %v3889_v30 = vadd.f32 %v3883_v8, %v3823_v52  ;;  %v3898_v53 = vmul.f32 %v3853_v32, %v9989_v26  ;;  %v3899_v19 = vmul.f32 %v3848_v3, %v9987_v42  ;;  %v3900_v18 = vmul.f32 %v3849_v48, %v9988_v9  ;;  %v10048_v6 = vld [vmem:[#allocation58_spill] sm:$0xff] }
 0x2d5   : > { %v3901_v23 = vmul.f32 %v3850_v63, %v9989_v26  ;;  %v3902_v45 = vadd.f32 %v3896_v24, %v3836_v29  ;;  %v3903_v39 = vadd.f32 %v3897_v2, %v3837_v34  ;;  %v3914_v41 = vmul.f32 %v8493_v10, %v10043_v54 }
 0x2d6   : > { %v3904_v57 = vadd.f32 %v3898_v53, %v3838_v35  ;;  %v3905_v22 = vadd.f32 %v3899_v19, %v3839_v15  ;;  %v3906_v51 = vadd.f32 %v3900_v18, %v3840_v28  ;;  %v3915_v20 = vmul.f32 %v8502_v46, %v10044_v59  ;;  %v10046_v15 = vld [vmem:[#allocation56_spill] sm:$0xff] }
 0x2d7   : > { %v3907_v52 = vadd.f32 %v3901_v23, %v3841_v38  ;;  %v3916_v32 = vmul.f32 %v8509_v61, %v10045_v58  ;;  %v3917_v3 = vmul.f32 %v8511_v5, %v10043_v54  ;;  %v3918_v29 = vmul.f32 %v8513_v43, %v10044_v59  ;;  %v10050_v19 = vld [vmem:[#allocation72_spill] sm:$0xff]  ;;  %v10051_v54 = vld [vmem:[#allocation73_spill] sm:$0xff] }
 0x2d8   : > { %v3919_v34 = vmul.f32 %v8516_v11, %v10045_v58  ;;  %v3920_v48 = vadd.f32 %v3914_v41, %v3866_v44  ;;  %v3921_v35 = vadd.f32 %v3915_v20, %v3867_v55  ;;  %v3932_v28 = vmul.f32 %v8493_v10, %v10046_v15 }
 0x2d9   : > { %v3922_v63 = vadd.f32 %v3916_v32, %v3868_v47  ;;  %v3923_v16 = vadd.f32 %v3917_v3, %v3869_v17  ;;  %v3924_v38 = vadd.f32 %v3918_v29, %v3870_v37  ;;  %v3933_v50 = vmul.f32 %v8502_v46, %v10047_v13  ;;  %v10049_v17 = vld [vmem:[#allocation71_spill] sm:$0xff] }
 0x2da   : > { %v3925_v25 = vadd.f32 %v3919_v34, %v3871_v7  ;;  %v3934_v40 = vmul.f32 %v8509_v61, %v10048_v6  ;;  %v3935_v8 = vmul.f32 %v8511_v5, %v10046_v15  ;;  %v3936_v44 = vmul.f32 %v8513_v43, %v10047_v13 }
 0x2db   : > { %v3937_v55 = vmul.f32 %v8516_v11, %v10048_v6  ;;  %v3938_v24 = vadd.f32 %v3932_v28, %v3884_v31  ;;  %v3939_v47 = vadd.f32 %v3933_v50, %v3885_v62  ;;  %v3950_v37 = vmul.f32 %v8493_v10, %v10049_v17 }
 0x2dc   : > { %v3940_v2 = vadd.f32 %v3934_v40, %v3886_v27  ;;  %v3941_v53 = vadd.f32 %v3935_v8, %v3887_v49  ;;  %v3942_v7 = vadd.f32 %v3936_v44, %v3888_v33  ;;  %v3951_v18 = vmul.f32 %v8502_v46, %v10050_v19  ;;  %v10053_v44 = vld [vmem:[#allocation45_spill] sm:$0xff] }
 0x2dd   : > { %v3943_v23 = vadd.f32 %v3937_v55, %v3889_v30  ;;  %v3952_v41 = vmul.f32 %v8509_v61, %v10051_v54  ;;  %v3953_v59 = vmul.f32 %v8511_v5, %v10049_v17  ;;  %v3954_v31 = vmul.f32 %v8513_v43, %v10050_v19  ;;  %v10056_v17 = vld [vmem:[#allocation61_spill] sm:$0xff] }
 0x2de   : > { %v3955_v62 = vmul.f32 %v8516_v11, %v10051_v54  ;;  %v3956_v20 = vadd.f32 %v3950_v37, %v3902_v45  ;;  %v3957_v27 = vadd.f32 %v3951_v18, %v3903_v39  ;;  %v3962_v49 = vrot.slane %v8493_v10, 1  ;;  %v10054_v37 = vld [vmem:[#allocation46_spill] sm:$0xff] }
 0x2df   : > { %v3958_v33 = vadd.f32 %v3952_v41, %v3904_v57  ;;  %v3959_v58 = vadd.f32 %v3953_v59, %v3905_v22  ;;  %v3960_v32 = vadd.f32 %v3954_v31, %v3906_v51  ;;  %v3963_v30 = vrot.slane %v8502_v46, 1 }
 0x2e0   : > { %v3961_v3 = vadd.f32 %v3955_v62, %v3907_v52  ;;  %v3964_v29 = vrot.slane %v8509_v61, 1  ;;  %v3965_v34 = vrot.slane %v8511_v5, 1  ;;  %v3966_v28 = vrot.slane %v8513_v43, 1 }
 0x2e1   : > { %v3967_v50 = vrot.slane %v8516_v11, 1  ;;  %v4028_v40 = vrot.slane %v8493_v10, 2  ;;  %v4029_v45 = vrot.slane %v8502_v46, 2  ;;  %v4030_v39 = vrot.slane %v8509_v61, 2  ;;  %v10052_v10 = vld [vmem:[#allocation44_spill] sm:$0xff] }
 0x2e2   : > { %v3968_v57 = vsel %vm1117_vm2, %v3962_v49, %v3965_v34  ;;  %v3969_v22 = vsel %vm1117_vm2, %v3963_v30, %v3966_v28  ;;  %v3971_v51 = vsel %vm1117_vm2, %v3965_v34, %v3962_v49  ;;  %v3972_v52 = vsel %vm1117_vm2, %v3966_v28, %v3963_v30  ;;  %v10055_v34 = vld [vmem:[#allocation60_spill] sm:$0xff] }
 0x2e3   : > { %v3970_v8 = vsel %vm1117_vm2, %v3964_v29, %v3967_v50  ;;  %v3973_v46 = vsel %vm1117_vm2, %v3967_v50, %v3964_v29  ;;  %v3980_v61 = vmul.f32 %v3968_v57, %v10052_v10  ;;  %v3981_v55 = vmul.f32 %v3969_v22, %v10053_v44 }
 0x2e4   : > { %v3982_v18 = vmul.f32 %v3970_v8, %v10054_v37  ;;  %v3983_v41 = vmul.f32 %v3971_v51, %v10052_v10  ;;  %v3984_v59 = vmul.f32 %v3972_v52, %v10053_v44  ;;  %v3985_v31 = vmul.f32 %v3973_v46, %v10054_v37 }
 0x2e5   : > { %v3986_v62 = vadd.f32 %v3980_v61, %v3920_v48  ;;  %v3987_v49 = vadd.f32 %v3981_v55, %v3921_v35  ;;  %v3998_v30 = vmul.f32 %v3968_v57, %v10008_v14  ;;  %v3999_v28 = vmul.f32 %v3969_v22, %v10055_v34 }
 0x2e6   : > { %v3988_v54 = vadd.f32 %v3982_v18, %v3922_v63  ;;  %v3989_v29 = vadd.f32 %v3983_v41, %v3923_v16  ;;  %v3990_v50 = vadd.f32 %v3984_v59, %v3924_v38  ;;  %v3991_v19 = vadd.f32 %v3985_v31, %v3925_v25  ;;  %v10057_v38 = vld [vmem:[#allocation76_spill] sm:$0xff] }
 0x2e7   : > { %v4000_v6 = vmul.f32 %v3970_v8, %v10056_v17  ;;  %v4001_v13 = vmul.f32 %v3971_v51, %v10008_v14  ;;  %v4002_v10 = vmul.f32 %v3972_v52, %v10055_v34  ;;  %v4003_v44 = vmul.f32 %v3973_v46, %v10056_v17 }
 0x2e8   : > { %v4004_v15 = vadd.f32 %v3998_v30, %v3938_v24  ;;  %v4005_v37 = vadd.f32 %v3999_v28, %v3939_v47  ;;  %v4016_v48 = vmul.f32 %v3968_v57, %v10011_v36  ;;  %v4017_v35 = vmul.f32 %v3969_v22, %v10012_v21 }
 0x2e9   : > { %v4006_v61 = vadd.f32 %v4000_v6, %v3940_v2  ;;  %v4007_v55 = vadd.f32 %v4001_v13, %v3941_v53  ;;  %v4008_v63 = vadd.f32 %v4002_v10, %v3942_v7  ;;  %v4009_v16 = vadd.f32 %v4003_v44, %v3943_v23  ;;  %v10062_v44 = vld [vmem:[#allocation63_spill] sm:$0xff] }
 0x2ea   : > { %v4018_v25 = vmul.f32 %v3970_v8, %v10057_v38  ;;  %v4019_v18 = vmul.f32 %v3971_v51, %v10011_v36  ;;  %v4020_v41 = vmul.f32 %v3972_v52, %v10012_v21  ;;  %v4021_v59 = vmul.f32 %v3973_v46, %v10057_v38  ;;  %v10060_v51 = vld [vmem:[#allocation62_spill] sm:$0xff] }
 0x2eb   : > { %v4022_v31 = vadd.f32 %v4016_v48, %v3956_v20  ;;  %v4023_v17 = vadd.f32 %v4017_v35, %v3957_v27  ;;  %v4031_v24 = vrot.slane %v8511_v5, 2  ;;  %v4032_v47 = vrot.slane %v8513_v43, 2  ;;  %v10058_v20 = vld [vmem:[#allocation47_spill] sm:$0xff]  ;;  %v10059_v27 = vld [vmem:[#allocation48_spill] sm:$0xff] }
 0x2ec   : > { %v4024_v57 = vadd.f32 %v4018_v25, %v3958_v33  ;;  %v4025_v22 = vadd.f32 %v4019_v18, %v3959_v58  ;;  %v4026_v6 = vadd.f32 %v4020_v41, %v3960_v32  ;;  %v4027_v13 = vadd.f32 %v4021_v59, %v3961_v3  ;;  %v10063_v35 = vld [vmem:[#allocation64_spill] sm:$0xff] }
 0x2ed   : > { %v4033_v2 = vrot.slane %v8516_v11, 2  ;;  %v4034_v53 = vsel %vm1148_vm3, %v4028_v40, %v4031_v24  ;;  %v4035_v7 = vsel %vm1148_vm3, %v4029_v45, %v4032_v47  ;;  %v4037_v23 = vsel %vm1148_vm3, %v4031_v24, %v4028_v40  ;;  %v10061_v40 = vld [vmem:[#allocation49_spill] sm:$0xff] }
 0x2ee   : > { %v4038_v5 = vsel %vm1148_vm3, %v4032_v47, %v4029_v45  ;;  %v4046_v43 = vmul.f32 %v4034_v53, %v10058_v20  ;;  %v4047_v33 = vmul.f32 %v4035_v7, %v10059_v27  ;;  %v4049_v58 = vmul.f32 %v4037_v23, %v10058_v20  ;;  %v10065_v20 = vld [vmem:[#allocation78_spill] sm:$0xff] }
 0x2ef   : > { %v4036_v11 = vsel %vm1148_vm3, %v4030_v39, %v4033_v2  ;;  %v4039_v32 = vsel %vm1148_vm3, %v4033_v2, %v4030_v39  ;;  %v4050_v3 = vmul.f32 %v4038_v5, %v10059_v27  ;;  %v4064_v52 = vmul.f32 %v4034_v53, %v10060_v51  ;;  %v8735_v27 = vld [vmem:[#allocation2 + $0x1b8] sm:$0xff] }
 0x2f0   : > { %v4048_v8 = vmul.f32 %v4036_v11, %v10061_v40  ;;  %v4051_v45 = vmul.f32 %v4039_v32, %v10061_v40  ;;  %v4052_v46 = vadd.f32 %v4046_v43, %v3986_v62  ;;  %v4053_v30 = vadd.f32 %v4047_v33, %v3987_v49 }
 0x2f1   : > { %v8712_v28 = vadd.f32 %v4049_v58, %v3989_v29  ;;  %v8714_v10 = vadd.f32 %v4050_v3, %v3990_v50  ;;  %v4065_v48 = vmul.f32 %v4035_v7, %v10062_v44  ;;  %v4066_v25 = vmul.f32 %v4036_v11, %v10063_v35  ;;  %v8727_v29 = vld [vmem:[#allocation2 + $0x1b0] sm:$0xff]  ;;  %v10066_v58 = vld [vmem:[#allocation79_spill] sm:$0xff]  ;;  %v8740_v3 = vld [vmem:[#allocation2 + $0x1c0] sm:$0xff] }
 0x2f2   : > { %v4054_v18 = vadd.f32 %v4048_v8, %v3988_v54  ;;  %v4057_v39 = vadd.f32 %v4051_v45, %v3991_v19  ;;  %v4067_v41 = vmul.f32 %v4037_v23, %v10060_v51  ;;  %v4068_v59 = vmul.f32 %v4038_v5, %v10062_v44  ;;  %v10064_v54 = vld [vmem:[#allocation77_spill] sm:$0xff] }
 0x2f3   : > { %v4069_v24 = vmul.f32 %v4039_v32, %v10063_v35  ;;  %v8721_v47 = vadd.f32 %v4064_v52, %v4004_v15  ;;  %v8723_v62 = vadd.f32 %v4065_v48, %v4005_v37  ;;  %v8725_v49 = vadd.f32 %v4066_v25, %v4006_v61 }
 0x2f4   : > { %v8729_v50 = vadd.f32 %v4067_v41, %v4007_v55  ;;  %v8731_v2 = vadd.f32 %v4068_v59, %v4008_v63  ;;  %v4082_v19 = vmul.f32 %v4034_v53, %v10064_v54  ;;  %v4083_v43 = vmul.f32 %v4035_v7, %v10065_v20  ;;  %v8742_v55 = vld [vmem:[#allocation2 + $0x1c8] sm:$0xff]  ;;  %v8744_v63 = vld [vmem:[#allocation2 + $0x1d0] sm:$0xff] }
 0x2f5   : > { %v4075_v33 = vadd.f32 %v4069_v24, %v4009_v16  ;;  %v4084_v15 = vmul.f32 %v4036_v11, %v10066_v58  ;;  %v4085_v37 = vmul.f32 %v4037_v23, %v10064_v54  ;;  %v4086_v61 = vmul.f32 %v4038_v5, %v10065_v20  ;;  %v8747_v11 = vld [vmem:[#allocation2 + $0x1d8] sm:$0xff] }
 0x2f6   : > { %v4087_v53 = vmul.f32 %v4039_v32, %v10066_v58  ;;  %v4088_v7 = vadd.f32 %v4082_v19, %v4022_v31  ;;  %v4089_v16 = vadd.f32 %v4083_v43, %v4023_v17  ;;  %v4108_v23 = vrot.slane %v8727_v29, 6  ;;  %v10070_v58 = vld [vmem:[#allocation67_spill] sm:$0xff] }
 0x2f7   : > { %v4090_v52 = vadd.f32 %v4084_v15, %v4024_v57  ;;  %v4091_v40 = vadd.f32 %v4085_v37, %v4025_v22  ;;  %v4092_v5 = vadd.f32 %v4086_v61, %v4026_v6  ;;  %v4109_v8 = vrot.slane %v8735_v27, 6  ;;  %v10067_v15 = vld [vmem:[#allocation51_spill] sm:$0xff]  ;;  %v10068_v61 = vld [vmem:[#allocation52_spill] sm:$0xff] }
 0x2f8   : > { %v4093_v45 = vadd.f32 %v4087_v53, %v4027_v13  ;;  %4620 = vst [vmem:[%s4690_s15 + $0xc0] sm:$0xff] %v4088_v7  ;;  %4621 = vst [vmem:[%s4690_s15 + $0xc8] sm:$0xff] %v4089_v16  ;;  %v4110_v48 = vrot.slane %v8740_v3, 6  ;;  %v4111_v32 = vrot.slane %v8742_v55, 6  ;;  %v4112_v31 = vrot.slane %v8744_v63, 6 }
 0x2f9   : > { %4622 = vst [vmem:[%s4690_s15 + $0xd0] sm:$0xff] %v4090_v52  ;;  %4623 = vst [vmem:[%s4690_s15 + $0xd8] sm:$0x3f] %v4091_v40  ;;  %v4113_v17 = vrot.slane %v8747_v11, 6  ;;  %v4156_v57 = vrot.slane %v8727_v29, 7  ;;  %v4157_v22 = vrot.slane %v8735_v27, 7 }
 0x2fa   : > { %4624 = vst [vmem:[%s4690_s15 + $0xe0] sm:$0x3f] %v4092_v5  ;;  %v4158_v6 = vrot.slane %v8740_v3, 7  ;;  %4625 = vst [vmem:[%s4690_s15 + $0xe8] sm:$0x3f] %v4093_v45  ;;  %v4114_v13 = vsel %vm1043_vm0, %v4108_v23, %v4111_v32  ;;  %v4115_v25 = vsel %vm1043_vm0, %v4109_v8, %v4112_v31  ;;  %v4117_v41 = vsel %vm1043_vm0, %v4111_v32, %v4108_v23 }
 0x2fb   : > { %v4118_v59 = vsel %vm1043_vm0, %v4112_v31, %v4109_v8  ;;  %v4116_v24 = vsel %vm1043_vm0, %v4110_v48, %v4113_v17  ;;  %v4119_v19 = vsel %vm1043_vm0, %v4113_v17, %v4110_v48  ;;  %v4126_v43 = vmul.f32 %v4117_v41, %v10035_v60  ;;  %v10069_v8 = vld [vmem:[#allocation66_spill] sm:$0xff] }
 0x2fc   : > { %v4127_v37 = vmul.f32 %v4118_v59, %v10067_v15  ;;  %v4128_v53 = vmul.f32 %v4119_v19, %v10068_v61  ;;  %v4129_v7 = vmul.f32 %v4114_v13, %v10035_v60  ;;  %v4130_v16 = vmul.f32 %v4115_v25, %v10067_v15 }
 0x2fd   : > { %v4131_v23 = vmul.f32 %v4116_v24, %v10068_v61  ;;  %v4132_v52 = vadd.f32 %v4126_v43, %v4052_v46  ;;  %v4144_v5 = vmul.f32 %v4117_v41, %v10038_v56  ;;  %v4145_v45 = vmul.f32 %v4118_v59, %v10069_v8 }
 0x2fe   : > { %v4133_v40 = vadd.f32 %v4127_v37, %v4053_v30  ;;  %v4134_v32 = vadd.f32 %v4128_v53, %v4054_v18  ;;  %v4135_v48 = vadd.f32 %v4129_v7, %v8712_v28  ;;  %v4136_v31 = vadd.f32 %v4130_v16, %v8714_v10 }
 0x2ff   : > { %v4137_v17 = vadd.f32 %v4131_v23, %v4057_v39  ;;  %v4146_v20 = vmul.f32 %v4119_v19, %v10070_v58  ;;  %v4147_v60 = vmul.f32 %v4114_v13, %v10038_v56  ;;  %v4148_v15 = vmul.f32 %v4115_v25, %v10069_v8 }
 0x300   : > { %v4149_v61 = vmul.f32 %v4116_v24, %v10070_v58  ;;  %v4150_v46 = vadd.f32 %v4144_v5, %v8721_v47  ;;  %v4151_v30 = vadd.f32 %v4145_v45, %v8723_v62  ;;  %v4159_v41 = vrot.slane %v8742_v55, 7 }
 0x301   : > { %v4160_v18 = vrot.slane %v8744_v63, 7  ;;  %v4152_v28 = vadd.f32 %v4146_v20, %v8725_v49  ;;  %v4153_v10 = vadd.f32 %v4147_v60, %v8729_v50  ;;  %v4154_v39 = vadd.f32 %v4148_v15, %v8731_v2 }
 0x302   : > { %v4155_v59 = vadd.f32 %v4149_v61, %v4075_v33  ;;  %v4161_v13 = vrot.slane %v8747_v11, 7  ;;  %v4162_v25 = vsel %vm1068_vm1, %v4156_v57, %v4159_v41  ;;  %v4165_v62 = vsel %vm1068_vm1, %v4159_v41, %v4156_v57 }
 0x303   : > { %v4163_v47 = vsel %vm1068_vm1, %v4157_v22, %v4160_v18  ;;  %v4166_v24 = vsel %vm1068_vm1, %v4160_v18, %v4157_v22  ;;  %v4174_v49 = vmul.f32 %v4165_v62, %v9812_v4  ;;  %v4177_v50 = vmul.f32 %v4162_v25, %v9812_v4 }
 0x304   : > { %v4178_v2 = vmul.f32 %v4163_v47, %v10041_v0  ;;  %v4164_v20 = vsel %vm1068_vm1, %v4158_v6, %v4161_v13  ;;  %v4167_v33 = vsel %vm1068_vm1, %v4161_v13, %v4158_v6  ;;  %v4175_v19 = vmul.f32 %v4166_v24, %v10041_v0 }
 0x305   : > { %v4192_v43 = vmul.f32 %v4165_v62, %v9987_v42  ;;  %v4176_v57 = vmul.f32 %v4167_v33, %v10042_v1  ;;  %v4179_v22 = vmul.f32 %v4164_v20, %v10042_v1  ;;  %v4180_v37 = vadd.f32 %v4174_v49, %v4132_v52  ;;  %v10075_v49 = vld [vmem:[#allocation72_spill] sm:$0xff] }
 0x306   : > { %v4183_v53 = vadd.f32 %v4177_v50, %v4135_v48  ;;  %v4181_v7 = vadd.f32 %v4175_v19, %v4133_v40  ;;  %v4184_v4 = vadd.f32 %v4178_v2, %v4136_v31  ;;  %v4193_v16 = vmul.f32 %v4166_v24, %v9988_v9  ;;  %v10071_v48 = vld [vmem:[#allocation56_spill] sm:$0xff]  ;;  %v10072_v31 = vld [vmem:[#allocation57_spill] sm:$0xff] }
 0x307   : > { %v4194_v23 = vmul.f32 %v4167_v33, %v9989_v26  ;;  %v4182_v5 = vadd.f32 %v4176_v57, %v4134_v32  ;;  %v4185_v45 = vadd.f32 %v4179_v22, %v4137_v17  ;;  %v4195_v6 = vmul.f32 %v4162_v25, %v9987_v42  ;;  %v10073_v32 = vld [vmem:[#allocation58_spill] sm:$0xff] }
 0x308   : > { %v4196_v0 = vmul.f32 %v4163_v47, %v9988_v9  ;;  %v4197_v60 = vmul.f32 %v4164_v20, %v9989_v26  ;;  %v4198_v15 = vadd.f32 %v4192_v43, %v4150_v46  ;;  %v4199_v61 = vadd.f32 %v4193_v16, %v4151_v30  ;;  %v10076_v20 = vld [vmem:[#allocation73_spill] sm:$0xff] }
 0x309   : > { %v4200_v41 = vadd.f32 %v4194_v23, %v4152_v28  ;;  %v4201_v1 = vadd.f32 %v4195_v6, %v4153_v10  ;;  %v4210_v40 = vmul.f32 %v8727_v29, %v10071_v48  ;;  %v4211_v18 = vmul.f32 %v8735_v27, %v10072_v31 }
 0x30a   : > { %v4202_v52 = vadd.f32 %v4196_v0, %v4154_v39  ;;  %v4203_v13 = vadd.f32 %v4197_v60, %v4155_v59  ;;  %v4212_v17 = vmul.f32 %v8740_v3, %v10073_v32  ;;  %v4213_v25 = vmul.f32 %v8742_v55, %v10071_v48  ;;  %v10074_v39 = vld [vmem:[#allocation71_spill] sm:$0xff] }
 0x30b   : > { %v4214_v46 = vmul.f32 %v8744_v63, %v10072_v31  ;;  %v4215_v30 = vmul.f32 %v8747_v11, %v10073_v32  ;;  %v4216_v28 = vadd.f32 %v4210_v40, %v4180_v37  ;;  %v4217_v10 = vadd.f32 %v4211_v18, %v4181_v7  ;;  %v10077_v18 = vld [vmem:[#allocation61_spill] sm:$0xff] }
 0x30c   : > { %v4228_v47 = vmul.f32 %v8727_v29, %v10074_v39  ;;  %v4218_v62 = vadd.f32 %v4212_v17, %v4182_v5  ;;  %v4219_v24 = vadd.f32 %v4213_v25, %v4183_v53  ;;  %v4229_v50 = vmul.f32 %v8735_v27, %v10075_v49 }
 0x30d   : > { %v4220_v59 = vadd.f32 %v4214_v46, %v4184_v4  ;;  %v4221_v2 = vadd.f32 %v4215_v30, %v4185_v45  ;;  %v4230_v33 = vmul.f32 %v8740_v3, %v10076_v20  ;;  %v4231_v19 = vmul.f32 %v8742_v55, %v10074_v39 }
 0x30e   : > { %v4232_v43 = vmul.f32 %v8744_v63, %v10075_v49  ;;  %v4233_v57 = vmul.f32 %v8747_v11, %v10076_v20  ;;  %v4234_v22 = vadd.f32 %v4228_v47, %v4198_v15  ;;  %v4235_v37 = vadd.f32 %v4229_v50, %v4199_v61 }
 0x30f   : > { %v4240_v53 = vrot.slane %v8727_v29, 1  ;;  %v4236_v7 = vadd.f32 %v4230_v33, %v4200_v41  ;;  %v4237_v4 = vadd.f32 %v4231_v19, %v4201_v1  ;;  %v4241_v23 = vrot.slane %v8735_v27, 1 }
 0x310   : > { %v4238_v16 = vadd.f32 %v4232_v43, %v4202_v52  ;;  %v4239_v5 = vadd.f32 %v4233_v57, %v4203_v13  ;;  %v4242_v45 = vrot.slane %v8740_v3, 1  ;;  %v4243_v6 = vrot.slane %v8742_v55, 1 }
 0x311   : > { %v4244_v0 = vrot.slane %v8744_v63, 1  ;;  %v4245_v60 = vrot.slane %v8747_v11, 1  ;;  %v4288_v48 = vrot.slane %v8727_v29, 2  ;;  %v4289_v15 = vrot.slane %v8735_v27, 2 }
 0x312   : > { %v4290_v61 = vrot.slane %v8740_v3, 2  ;;  %v4246_v41 = vsel %vm1117_vm2, %v4240_v53, %v4243_v6  ;;  %v4249_v52 = vsel %vm1117_vm2, %v4243_v6, %v4240_v53 }
 0x313   : > { %v4247_v1 = vsel %vm1117_vm2, %v4241_v23, %v4244_v0  ;;  %v4250_v40 = vsel %vm1117_vm2, %v4244_v0, %v4241_v23  ;;  %v4248_v31 = vsel %vm1117_vm2, %v4242_v45, %v4245_v60  ;;  %v4251_v29 = vsel %vm1117_vm2, %v4245_v60, %v4242_v45 }
 0x314   : > { %v4258_v27 = vmul.f32 %v4246_v41, %v10008_v14  ;;  %v4259_v3 = vmul.f32 %v4247_v1, %v10055_v34  ;;  %v4260_v13 = vmul.f32 %v4248_v31, %v10077_v18  ;;  %v4261_v32 = vmul.f32 %v4249_v52, %v10008_v14 }
 0x315   : > { %v4262_v17 = vmul.f32 %v4250_v40, %v10055_v34  ;;  %v4263_v25 = vmul.f32 %v4251_v29, %v10077_v18  ;;  %v4276_v47 = vmul.f32 %v4246_v41, %v10011_v36  ;;  %v4277_v50 = vmul.f32 %v4247_v1, %v10012_v21  ;;  %v8903_v18 = vld [vmem:[#allocation2 + $0x1e0] sm:$0xff] }
 0x316   : > { %v4264_v46 = vadd.f32 %v4258_v27, %v4216_v28  ;;  %v4265_v30 = vadd.f32 %v4259_v3, %v4217_v10  ;;  %v4266_v33 = vadd.f32 %v4260_v13, %v4218_v62  ;;  %v4267_v19 = vadd.f32 %v4261_v32, %v4219_v24  ;;  %v10079_v27 = vld [vmem:[#allocation79_spill] sm:$0xff] }
 0x317   : > { %v4268_v43 = vadd.f32 %v4262_v17, %v4220_v59  ;;  %v4269_v57 = vadd.f32 %v4263_v25, %v4221_v2  ;;  %v4278_v53 = vmul.f32 %v4248_v31, %v10057_v38  ;;  %v4279_v23 = vmul.f32 %v4249_v52, %v10011_v36  ;;  %v8905_v13 = vld [vmem:[#allocation2 + $0x1e8] sm:$0xff]  ;;  %v8909_v17 = vld [vmem:[#allocation2 + $0x1f0] sm:$0xff]  ;;  %v8911_v25 = vld [vmem:[#allocation2 + $0x1f8] sm:$0xff] }
 0x318   : > { %v4280_v14 = vmul.f32 %v4250_v40, %v10012_v21  ;;  %v4281_v34 = vmul.f32 %v4251_v29, %v10057_v38  ;;  %v4282_v45 = vadd.f32 %v4276_v47, %v4234_v22  ;;  %v4283_v6 = vadd.f32 %v4277_v50, %v4235_v37  ;;  %v10078_v29 = vld [vmem:[#allocation78_spill] sm:$0xff] }
 0x319   : > { %v4291_v28 = vrot.slane %v8742_v55, 2  ;;  %v4292_v10 = vrot.slane %v8744_v63, 2  ;;  %v4284_v0 = vadd.f32 %v4278_v53, %v4236_v7  ;;  %v4285_v60 = vadd.f32 %v4279_v23, %v4237_v4 }
 0x31a   : > { %v4286_v62 = vadd.f32 %v4280_v14, %v4238_v16  ;;  %v4287_v24 = vadd.f32 %v4281_v34, %v4239_v5  ;;  %v4293_v59 = vrot.slane %v8747_v11, 2  ;;  %v4350_v53 = vrot.slane %v8903_v18, 6 }
 0x31b   : > { %v4294_v2 = vsel %vm1148_vm3, %v4288_v48, %v4291_v28  ;;  %v4295_v41 = vsel %vm1148_vm3, %v4289_v15, %v4292_v10  ;;  %v4297_v22 = vsel %vm1148_vm3, %v4291_v28, %v4288_v48  ;;  %v4298_v55 = vsel %vm1148_vm3, %v4292_v10, %v4289_v15 }
 0x31c   : > { %v4306_v63 = vmul.f32 %v4294_v2, %v10060_v51  ;;  %v4307_v37 = vmul.f32 %v4295_v41, %v10062_v44  ;;  %v4309_v7 = vmul.f32 %v4297_v22, %v10060_v51  ;;  %v4296_v11 = vsel %vm1148_vm3, %v4290_v61, %v4293_v59 }
 0x31d   : > { %v4299_v4 = vsel %vm1148_vm3, %v4293_v59, %v4290_v61  ;;  %v4310_v16 = vmul.f32 %v4298_v55, %v10062_v44  ;;  %v4324_v5 = vmul.f32 %v4294_v2, %v10064_v54  ;;  %v4308_v48 = vmul.f32 %v4296_v11, %v10063_v35 }
 0x31e   : > { %v4311_v15 = vmul.f32 %v4299_v4, %v10063_v35  ;;  %v4312_v1 = vadd.f32 %v4306_v63, %v4264_v46  ;;  %v4313_v52 = vadd.f32 %v4307_v37, %v4265_v30  ;;  %v4315_v40 = vadd.f32 %v4309_v7, %v4267_v19  ;;  %v8913_v46 = vld [vmem:[#allocation2 + $0x200] sm:$0xff]  ;;  %v8916_v19 = vld [vmem:[#allocation2 + $0x208] sm:$0xff] }
 0x31f   : > { %v4316_v31 = vadd.f32 %v4310_v16, %v4268_v43  ;;  %v4325_v51 = vmul.f32 %v4295_v41, %v10078_v29  ;;  %v4326_v3 = vmul.f32 %v4296_v11, %v10079_v27  ;;  %v4314_v61 = vadd.f32 %v4308_v48, %v4266_v33 }
 0x320   : > { %v4317_v44 = vadd.f32 %v4311_v15, %v4269_v57  ;;  %v4327_v32 = vmul.f32 %v4297_v22, %v10064_v54  ;;  %v4328_v35 = vmul.f32 %v4298_v55, %v10078_v29  ;;  %v4329_v30 = vmul.f32 %v4299_v4, %v10079_v27 }
 0x321   : > { %v4330_v47 = vadd.f32 %v4324_v5, %v4282_v45  ;;  %v4331_v50 = vadd.f32 %v4325_v51, %v4283_v6  ;;  %v4332_v33 = vadd.f32 %v4326_v3, %v4284_v0  ;;  %v4351_v23 = vrot.slane %v8905_v13, 6 }
 0x322   : > { %v4333_v43 = vadd.f32 %v4327_v32, %v4285_v60  ;;  %v4334_v57 = vadd.f32 %v4328_v35, %v4286_v62  ;;  %v4335_v14 = vadd.f32 %v4329_v30, %v4287_v24  ;;  %v4352_v34 = vrot.slane %v8909_v17, 6 }
 0x323   : > { %4626 = vst [vmem:[%s4690_s15 + $0xf0] sm:$0xff] %v4330_v47  ;;  %4627 = vst [vmem:[%s4690_s15 + $0xf8] sm:$0xff] %v4331_v50  ;;  %v4353_v45 = vrot.slane %v8911_v25, 6  ;;  %v4354_v6 = vrot.slane %v8913_v46, 6  ;;  %v4355_v28 = vrot.slane %v8916_v19, 6  ;;  %v4380_v10 = vrot.slane %v8903_v18, 7 }
 0x324   : > { %4628 = vst [vmem:[%s4690_s15 + $0x100] sm:$0xff] %v4332_v33  ;;  %4629 = vst [vmem:[%s4690_s15 + $0x108] sm:$0x3f] %v4333_v43  ;;  %v4381_v0 = vrot.slane %v8905_v13, 7  ;;  %v4382_v60 = vrot.slane %v8909_v17, 7  ;;  %v4383_v48 = vrot.slane %v8911_v25, 7  ;;  %v4416_v50 = vmul.f32 %v8903_v18, %v10074_v39 }
 0x325   : > { %4630 = vst [vmem:[%s4690_s15 + $0x110] sm:$0x3f] %v4334_v57  ;;  %4631 = vst [vmem:[%s4690_s15 + $0x118] sm:$0x3f] %v4335_v14  ;;  %v4356_v62 = vsel %vm1043_vm0, %v4350_v53, %v4353_v45  ;;  %v4357_v24 = vsel %vm1043_vm0, %v4351_v23, %v4354_v6  ;;  %v4359_v59 = vsel %vm1043_vm0, %v4353_v45, %v4350_v53  ;;  %v4384_v15 = vrot.slane %v8913_v46, 7 }
 0x326   : > { %v4360_v2 = vsel %vm1043_vm0, %v4354_v6, %v4351_v23  ;;  %v4358_v41 = vsel %vm1043_vm0, %v4352_v34, %v4355_v28  ;;  %v4361_v22 = vsel %vm1043_vm0, %v4355_v28, %v4352_v34  ;;  %v4368_v55 = vmul.f32 %v4359_v59, %v10038_v56 }
 0x327   : > { %v4369_v63 = vmul.f32 %v4360_v2, %v10069_v8  ;;  %v4370_v37 = vmul.f32 %v4361_v22, %v10070_v58  ;;  %v4371_v7 = vmul.f32 %v4356_v62, %v10038_v56  ;;  %v4372_v11 = vmul.f32 %v4357_v24, %v10069_v8 }
 0x328   : > { %v4373_v4 = vmul.f32 %v4358_v41, %v10070_v58  ;;  %v4374_v16 = vadd.f32 %v4368_v55, %v4312_v1  ;;  %v4385_v30 = vrot.slane %v8916_v19, 7  ;;  %v4386_v47 = vsel %vm1068_vm1, %v4380_v10, %v4383_v48 }
 0x329   : > { %v4375_v5 = vadd.f32 %v4369_v63, %v4313_v52  ;;  %v4376_v51 = vadd.f32 %v4370_v37, %v4314_v61  ;;  %v4377_v3 = vadd.f32 %v4371_v7, %v4315_v40  ;;  %v4378_v32 = vadd.f32 %v4372_v11, %v4316_v31 }
 0x32a   : > { %v4379_v35 = vadd.f32 %v4373_v4, %v4317_v44  ;;  %v4387_v56 = vsel %vm1068_vm1, %v4381_v0, %v4384_v15  ;;  %v4389_v58 = vsel %vm1068_vm1, %v4383_v48, %v4380_v10  ;;  %v4390_v8 = vsel %vm1068_vm1, %v4384_v15, %v4381_v0 }
 0x32b   : > { %v4398_v1 = vmul.f32 %v4389_v58, %v9987_v42  ;;  %v4401_v52 = vmul.f32 %v4386_v47, %v9987_v42  ;;  %v4402_v40 = vmul.f32 %v4387_v56, %v9988_v9  ;;  %v4388_v31 = vsel %vm1068_vm1, %v4382_v60, %v4385_v30 }
 0x32c   : > { %v4391_v61 = vsel %vm1068_vm1, %v4385_v30, %v4382_v60  ;;  %v4399_v44 = vmul.f32 %v4390_v8, %v9988_v9  ;;  %v4403_v43 = vmul.f32 %v4388_v31, %v9989_v26  ;;  %v4417_v14 = vmul.f32 %v8905_v13, %v10075_v49 }
 0x32d   : > { %v4400_v33 = vmul.f32 %v4391_v61, %v9989_v26  ;;  %v4404_v57 = vadd.f32 %v4398_v1, %v4374_v16  ;;  %v4407_v53 = vadd.f32 %v4401_v52, %v4377_v3  ;;  %v4408_v23 = vadd.f32 %v4402_v40, %v4378_v32 }
 0x32e   : > { %v4405_v42 = vadd.f32 %v4399_v44, %v4375_v5  ;;  %v4418_v34 = vmul.f32 %v8909_v17, %v10076_v20  ;;  %v4409_v6 = vadd.f32 %v4403_v43, %v4379_v35  ;;  %v4419_v9 = vmul.f32 %v8911_v25, %v10074_v39 }
 0x32f   : > { %v4406_v45 = vadd.f32 %v4400_v33, %v4376_v51  ;;  %v4420_v28 = vmul.f32 %v8913_v46, %v10075_v49  ;;  %v4421_v26 = vmul.f32 %v8916_v19, %v10076_v20  ;;  %v4422_v10 = vadd.f32 %v4416_v50, %v4404_v57 }
 0x330   : > { %v4423_v0 = vadd.f32 %v4417_v14, %v4405_v42  ;;  %v4428_v60 = vrot.slane %v8903_v18, 1  ;;  %v4425_v24 = vadd.f32 %v4419_v9, %v4407_v53  ;;  %v4429_v2 = vrot.slane %v8905_v13, 1 }
 0x331   : > { %v4424_v62 = vadd.f32 %v4418_v34, %v4406_v45  ;;  %v4426_v59 = vadd.f32 %v4420_v28, %v4408_v23  ;;  %v4427_v41 = vadd.f32 %v4421_v26, %v4409_v6  ;;  %v4430_v22 = vrot.slane %v8909_v17, 1 }
 0x332   : > { %v4431_v39 = vrot.slane %v8911_v25, 1  ;;  %v4432_v55 = vrot.slane %v8913_v46, 1  ;;  %v4433_v49 = vrot.slane %v8916_v19, 1  ;;  %v4458_v20 = vrot.slane %v8903_v18, 2 }
 0x333   : > { %v4459_v63 = vrot.slane %v8905_v13, 2  ;;  %v4460_v37 = vrot.slane %v8909_v17, 2  ;;  %v4461_v30 = vrot.slane %v8911_v25, 2  ;;  %v4462_v47 = vrot.slane %v8913_v46, 2 }
 0x334   : > { %v4434_v7 = vsel %vm1117_vm2, %v4428_v60, %v4431_v39  ;;  %v4435_v11 = vsel %vm1117_vm2, %v4429_v2, %v4432_v55  ;;  %v4437_v4 = vsel %vm1117_vm2, %v4431_v39, %v4428_v60  ;;  %v4438_v16 = vsel %vm1117_vm2, %v4432_v55, %v4429_v2 }
 0x335   : > { %v4436_v5 = vsel %vm1117_vm2, %v4430_v22, %v4433_v49  ;;  %v4439_v18 = vsel %vm1117_vm2, %v4433_v49, %v4430_v22  ;;  %v4446_v13 = vmul.f32 %v4434_v7, %v10011_v36  ;;  %v4447_v17 = vmul.f32 %v4435_v11, %v10012_v21 }
 0x336   : > { %v4448_v48 = vmul.f32 %v4436_v5, %v10057_v38  ;;  %v4449_v15 = vmul.f32 %v4437_v4, %v10011_v36  ;;  %v4450_v51 = vmul.f32 %v4438_v16, %v10012_v21  ;;  %v4451_v3 = vmul.f32 %v4439_v18, %v10057_v38 }
 0x337   : > { %v4452_v32 = vadd.f32 %v4446_v13, %v4422_v10  ;;  %v4453_v35 = vadd.f32 %v4447_v17, %v4423_v0  ;;  %v4463_v52 = vrot.slane %v8916_v19, 2  ;;  %v4464_v40 = vsel %vm1148_vm3, %v4458_v20, %v4461_v30 }
 0x338   : > { %v4454_v56 = vadd.f32 %v4448_v48, %v4424_v62  ;;  %v4455_v58 = vadd.f32 %v4449_v15, %v4425_v24  ;;  %v4456_v8 = vadd.f32 %v4450_v51, %v4426_v59  ;;  %v4457_v1 = vadd.f32 %v4451_v3, %v4427_v41 }
 0x339   : > { %v4465_v36 = vsel %vm1148_vm3, %v4459_v63, %v4462_v47  ;;  %v4467_v21 = vsel %vm1148_vm3, %v4461_v30, %v4458_v20  ;;  %v4468_v38 = vsel %vm1148_vm3, %v4462_v47, %v4459_v63  ;;  %v4476_v25 = vmul.f32 %v4464_v40, %v10064_v54 }
 0x33a   : > { %v4477_v46 = vmul.f32 %v4465_v36, %v10078_v29  ;;  %v4479_v19 = vmul.f32 %v4467_v21, %v10064_v54  ;;  %v4466_v31 = vsel %vm1148_vm3, %v4460_v37, %v4463_v52  ;;  %v4469_v61 = vsel %vm1148_vm3, %v4463_v52, %v4460_v37 }
 0x33b   : > { %v4480_v44 = vmul.f32 %v4468_v38, %v10078_v29  ;;  %v4478_v50 = vmul.f32 %v4466_v31, %v10079_v27  ;;  %v4481_v33 = vmul.f32 %v4469_v61, %v10079_v27  ;;  %v4482_v43 = vadd.f32 %v4476_v25, %v4452_v32 }
 0x33c   : > { %v4483_v57 = vadd.f32 %v4477_v46, %v4453_v35  ;;  %v4485_v53 = vadd.f32 %v4479_v19, %v4455_v58 }
 0x33d   : > { %v4486_v42 = vadd.f32 %v4480_v44, %v4456_v8  ;;  %v4484_v23 = vadd.f32 %v4478_v50, %v4454_v56  ;;  %v4487_v54 = vadd.f32 %v4481_v33, %v4457_v1  ;;  %4632 = vst [vmem:[%s4690_s15 + $0x120] sm:$0xff] %v4482_v43 }
 0x33e   : > { %4633 = vst [vmem:[%s4690_s15 + $0x128] sm:$0xff] %v4483_v57  ;;  %4635 = vst [vmem:[%s4690_s15 + $0x138] sm:$0x3f] %v4485_v53 }
 0x33f   : > { %4636 = vst [vmem:[%s4690_s15 + $0x140] sm:$0x3f] %v4486_v42  ;;  %4634 = vst [vmem:[%s4690_s15 + $0x130] sm:$0xff] %v4484_v23 }
 0x340   : > { %4637 = vst [vmem:[%s4690_s15 + $0x148] sm:$0x3f] %v4487_v54 }
 0x341 PF: > { %s12_s9 = sadd.s32 1, %s4657_s9  }
 0x342   : > { %p9_p6 = scmp.ge.s32.totalorder %s12_s9, 4  }
 0x344   :  { %11 = sbr.rel (!%p9_p6) target bundleno = 1 (0x1), region = 106 }

</bundles_post_ra>
